<compile_context>
chip_gen: v6e
topology: v6e:2x2x1
jax: 0.10.0
libtpu: 0.0.40
codegen_flags: <defaults>
</compile_context>

<pallas_src>
import math

import jax
import jax.numpy as jnp
import numpy as np
from jax.experimental import pallas as pl
from jax.experimental.pallas import tpu as pltpu

EPS = 1e-5


# ----------------------------------------------------------------------------
# Pallas kernel: one B_TILE-wide slab of batch columns per grid step.
# ----------------------------------------------------------------------------
def make_axial_kernel(groups, group_planes, H):
    GP = group_planes
    GPH = GP // 2

    def kernel(x_ref, w2_ref, qe_ref, keT_ref, ve_ref,
               qkvb_ref, qks_ref, outb_ref, o_ref):
        x2 = x_ref[...]                                        # (C*H, B) lane-dense
        # qkv projection: single MXU matmul.  bn_qkv scale/bias and
        # bn_output's "sv" scale are already folded into w2 / qkvb.
        qkv2 = jnp.dot(w2_ref[...], x2,
                       preferred_element_type=jnp.float32)     # (2*OP*H, B)
        B = x2.shape[-1]

        def chan(ch):
            # Aligned 8-sublane channel slice + folded bn_qkv bias.
            # TODO(synk): requires H % 8 == 0 to stay an aligned slice.
            return qkv2[ch * H:(ch + 1) * H, :] + qkvb_ref[0, ch]

        for g in range(groups):
            base = g * 2 * GP
            qk_s = qks_ref[0, g]                               # bn_similarity qk scale

            # logits[i,j,b] = sum_c q[c,i,b] * (s_qk*k[c,j,b] + s_qr*q_emb[c,i,j])
            #               + sum_c s_kr*k_emb[c,j,i] * k[c,j,b]
            # (bn_similarity bias is constant over j -> softmax-invariant, dropped)
            logits = None
            for c in range(GPH):
                q_c = chan(base + c)                           # (H, B)
                k_c = chan(base + GPH + c)                     # (H, B)
                k_s = qk_s * k_c                               # (H, B) cheap scale
                q_b = jnp.broadcast_to(q_c[:, None, :], (H, H, B))
                t = q_b * (k_s[None, :, :] + qe_ref[g, c])     # qk + qr contribution
                logits = t if logits is None else logits + t
                logits = logits + keT_ref[g, c] * k_c[None, :, :]   # kr contribution

            # Softmax over j (axis 1) with DEFERRED normalization.
            m = jnp.max(logits, axis=1, keepdims=True)         # (H, 1, B)
            e = jnp.exp(logits - m)                            # (H, H, B) unnormalized
            inv_den = pl.reciprocal(jnp.sum(e, axis=1), approx=True)   # (H, B)

            for c in range(GP):
                oc = g * GP + c
                v_c = chan(base + GP + c)                      # (H, B), sv-pre-scaled
                # fused sv + sve: one multiply + one j-reduction per channel
                acc = jnp.sum(e * (v_c[None, :, :] + ve_ref[oc]), axis=1)   # (H, B)
                row = acc * inv_den + outb_ref[0, oc]
                # per-channel aligned, lane-dense, unmasked store
                o_ref[oc * H:(oc + 1) * H, :] = row.astype(o_ref.dtype)

    return kernel


# ----------------------------------------------------------------------------
# Wrapper: parameter folding (glue) + pallas_call
# ----------------------------------------------------------------------------
def axial_attention_forward(x, params, *, groups, out_planes, kernel_size,
                            b_tile=128):
    # NOTE: b_tile=128 keeps >=2 grid steps at the demo size (good for v7x's
    # two TensorCores); on v6e with larger N*W consider b_tile=256.
    N, C, H, W = x.shape
    assert H == kernel_size, "attention axis length must equal kernel_size"
    OP = out_planes
    GP = OP // groups
    GPH = GP // 2
    assert GP % 2 == 0 and GPH >= 1
    NW = N * W
    NWp = ((NW + b_tile - 1) // b_tile) * b_tile      # pad batch lanes
    f32 = jnp.float32

    (w_qkv, relative,
     g1, b1, m1, v1,      # bn_qkv
     g2, b2, m2, v2,      # bn_similarity
     g3, b3, m3, v3) = params  # bn_output

    # ---- bn_output: even channels scale sv, odd channels scale sve ----
    s3 = g3 / jnp.sqrt(v3 + EPS)
    bb3 = b3 - m3 * s3
    sv_scale = s3[0::2]                              # (OP,)
    sve_scale = s3[1::2]                             # (OP,)
    out_bias = (bb3[0::2] + bb3[1::2])[None, :]      # (1, OP)  -> SMEM

    # ---- fold bn_qkv into the 1x1 conv; fold sv_scale into the v rows ----
    s1 = g1 / jnp.sqrt(v1 + EPS)
    w_folded = w_qkv * s1[:, None]                   # (2*OP, C)
    qkv_bias = b1 - m1 * s1                          # (2*OP,)
    mult = jnp.ones((groups, 2 * GP), f32)
    mult = mult.at[:, GP:].set(sv_scale.reshape(groups, GP)).reshape(2 * OP)
    w_folded = w_folded * mult[:, None]
    qkv_bias = (qkv_bias * mult)[None, :]            # (1, 2*OP) -> SMEM
    # block-diagonal expansion over H (TODO(synk): tile C*H at real sizes)
    w2 = jnp.kron(w_folded, jnp.eye(H, dtype=f32))   # (2*OP*H, C*H)

    # ---- bn_similarity: scales folded into constants, bias dropped ----
    s2 = (g2 / jnp.sqrt(v2 + EPS)).reshape(3, groups)   # rows: qk, qr, kr
    qk_scale = s2[0][None, :]                        # (1, groups) -> SMEM

    # ---- relative position embeddings, pre-scaled and lane-broadcast ----
    K = kernel_size
    rel_idx = jnp.arange(K)[:, None] - jnp.arange(K)[None, :] + K - 1
    all_emb = relative[:, rel_idx]                   # (2*GP, K, K)
    q_emb, k_emb, v_emb = all_emb[:GPH], all_emb[GPH:GP], all_emb[GP:]

    qe = s2[1][:, None, None, None] * q_emb[None]                          # (G,GPH,H,H)
    keT = s2[2][:, None, None, None] * jnp.transpose(k_emb, (0, 2, 1))[None]
    ve = (sve_scale.reshape(groups, GP)[:, :, None, None]
          * v_emb[None]).reshape(OP, H, H)                                 # (OP,H,H)
    # pre-broadcast to lane width (VMEM cost is identical to a size-1 lane dim)
    qe_b = jnp.broadcast_to(qe[..., None], (groups, GPH, H, H, b_tile)).astype(f32)
    keT_b = jnp.broadcast_to(keT[..., None], (groups, GPH, H, H, b_tile)).astype(f32)
    ve_b = jnp.broadcast_to(ve[..., None], (OP, H, H, b_tile)).astype(f32)

    # ---- lane-major activation layout: (C*H, N*W), batch on lanes ----
    x2 = jnp.transpose(x, (1, 2, 0, 3)).reshape(C * H, NW).astype(f32)
    if NWp != NW:
        x2 = jnp.pad(x2, ((0, 0), (0, NWp - NW)))

    kernel = make_axial_kernel(groups, GP, H)
    # TODO(synk): constants (w2, qe_b, keT_b, ve_b) could use
    # pipeline_mode=pl.Buffered(1) to drop double-buffering at large sizes.
    out2 = pl.pallas_call(
        kernel,
        out_shape=jax.ShapeDtypeStruct((OP * H, NWp), f32),
        grid=(NWp // b_tile,),
        in_specs=[
            pl.BlockSpec((C * H, b_tile), lambda i: (0, i)),              # x slab
            pl.BlockSpec((2 * OP * H, C * H), lambda i: (0, 0)),          # folded W
            pl.BlockSpec((groups, GPH, H, H, b_tile),
                         lambda i: (0, 0, 0, 0, 0)),                      # q_emb*s_qr
            pl.BlockSpec((groups, GPH, H, H, b_tile),
                         lambda i: (0, 0, 0, 0, 0)),                      # k_emb^T*s_kr
            pl.BlockSpec((OP, H, H, b_tile), lambda i: (0, 0, 0, 0)),     # v_emb*s_sve
            pl.BlockSpec(memory_space=pltpu.SMEM),                        # qkv bias
            pl.BlockSpec(memory_space=pltpu.SMEM),                        # qk scale
            pl.BlockSpec(memory_space=pltpu.SMEM),                        # out bias
        ],
        out_specs=pl.BlockSpec((OP * H, b_tile), lambda i: (0, i)),
        compiler_params=pltpu.CompilerParams(
            dimension_semantics=("parallel",),
            vmem_limit_bytes=32 * 1024 * 1024,
        ),
    )(x2, w2, qe_b, keT_b, ve_b, qkv_bias, qk_scale, out_bias)

    out2 = out2[:, :NW]
    # (OP*H, NW) -> (N, OP, H, W)
    out = jnp.transpose(out2.reshape(OP, H, N, W), (2, 0, 1, 3))
    return out


# ----------------------------------------------------------------------------
# Pure-JAX reference (mirrors the PyTorch einsum path) for validation
# ----------------------------------------------------------------------------
def reference_forward(x, params, *, groups, out_planes, kernel_size):
    N, C, H, W = x.shape
    GP = out_planes // groups
    GPH = GP // 2
    NW = N * W
    K = kernel_size

    (w_qkv, relative,
     g1, b1, m1, v1, g2, b2, m2, v2, g3, b3, m3, v3) = params

    xp = jnp.transpose(x, (0, 3, 1, 2)).reshape(NW, C, H)
    qkv = jnp.einsum('oc,bch->boh', w_qkv, xp)
    qkv = (qkv - m1[None, :, None]) / jnp.sqrt(v1 + EPS)[None, :, None] \
        * g1[None, :, None] + b1[None, :, None]
    qkv = qkv.reshape(NW, groups, 2 * GP, H)
    q, k, v = qkv[:, :, :GPH], qkv[:, :, GPH:GP], qkv[:, :, GP:]

    rel_idx = jnp.arange(K)[:, None] - jnp.arange(K)[None, :] + K - 1
    all_emb = relative[:, rel_idx]
    q_emb, k_emb, v_emb = all_emb[:GPH], all_emb[GPH:GP], all_emb[GP:]

    qr = jnp.einsum('bgci,cij->bgij', q, q_emb)
    kr = jnp.einsum('bgci,cij->bgij', k, k_emb).transpose(0, 1, 3, 2)
    qk = jnp.einsum('bgci,bgcj->bgij', q, k)
    stacked = jnp.concatenate([qk, qr, kr], axis=1)
    stacked = (stacked - m2[None, :, None, None]) / jnp.sqrt(v2 + EPS)[None, :, None, None] \
        * g2[None, :, None, None] + b2[None, :, None, None]
    sim_pre = stacked.reshape(NW, 3, groups, H, H).sum(axis=1)
    sim = jax.nn.softmax(sim_pre, axis=3)

    sv = jnp.einsum('bgij,bgcj->bgci', sim, v)
    sve = jnp.einsum('bgij,cij->bgci', sim, v_emb)
    so = jnp.concatenate([sv, sve], axis=-1).reshape(NW, 2 * out_planes, H)
    so = (so - m3[None, :, None]) / jnp.sqrt(v3 + EPS)[None, :, None] \
        * g3[None, :, None] + b3[None, :, None]
    out = so.reshape(N, W, out_planes, 2, H).sum(axis=3)
    return jnp.transpose(out, (0, 2, 3, 1))


# ----------------------------------------------------------------------------
def init_params(key, in_planes, out_planes, groups, kernel_size):
    GP = out_planes // groups
    ks = jax.random.split(key, 12)

    def bn(kk, c):
        k_a, k_b, k_c, k_d = jax.random.split(kk, 4)
        gamma = 1.0 + 0.1 * jax.random.normal(k_a, (c,), jnp.float32)
        beta = 0.1 * jax.random.normal(k_b, (c,), jnp.float32)
        mean = 0.1 * jax.random.normal(k_c, (c,), jnp.float32)
        var = jax.random.uniform(k_d, (c,), jnp.float32, 0.5, 1.5)
        return gamma, beta, mean, var

    w_qkv = jax.random.normal(ks[0], (2 * out_planes, in_planes), jnp.float32) \
        * math.sqrt(1.0 / in_planes)
    relative = jax.random.normal(ks[1], (2 * GP, 2 * kernel_size - 1), jnp.float32) \
        * math.sqrt(1.0 / GP)
    g1, b1, m1, v1 = bn(ks[2], 2 * out_planes)      # bn_qkv
    g2, b2, m2, v2 = bn(ks[3], 3 * groups)          # bn_similarity
    g3, b3, m3, v3 = bn(ks[4], 2 * out_planes)      # bn_output
    return (w_qkv, relative, g1, b1, m1, v1, g2, b2, m2, v2, g3, b3, m3, v3)


if __name__ == "__main__":
    # N*W = 256 -> two lane-dense (128-wide) grid steps.
    N, C, H, W = 2, 8, 16, 128
    out_planes, groups, kernel_size = 8, 2, 16

    key = jax.random.PRNGKey(0)
    k_x, k_p = jax.random.split(key)
    x = jax.random.normal(k_x, (N, C, H, W), jnp.float32)
    params = init_params(k_p, C, out_planes, groups, kernel_size)

    out = axial_attention_forward(x, params, groups=groups,
                                  out_planes=out_planes,
                                  kernel_size=kernel_size)
    out = jax.block_until_ready(out)

    ref = reference_forward(x, params, groups=groups,
                            out_planes=out_planes, kernel_size=kernel_size)
    ref = jax.block_until_ready(ref)

    np.testing.assert_allclose(np.asarray(out), np.asarray(ref),
                               rtol=2e-3, atol=2e-3)
    print("KERNEL_OK")
</pallas_src>

<mosaic_0001>
module attributes {stable_mosaic.version = 11 : i64} {
  func.func @kernel(%arg0: i32, %arg1: memref<128x128xf32, #tpu.memory_space<vmem>>, %arg2: memref<256x128xf32, #tpu.memory_space<vmem>>, %arg3: memref<2x2x16x16x128xf32, #tpu.memory_space<vmem>>, %arg4: memref<2x2x16x16x128xf32, #tpu.memory_space<vmem>>, %arg5: memref<8x16x16x128xf32, #tpu.memory_space<vmem>>, %arg6: memref<1x16xf32, #tpu.memory_space<smem>>, %arg7: memref<1x2xf32, #tpu.memory_space<smem>>, %arg8: memref<1x8xf32, #tpu.memory_space<smem>>, %arg9: memref<128x128xf32, #tpu.memory_space<vmem>>) attributes {dimension_semantics = [#tpu.dimension_semantics<parallel>], iteration_bounds = array<i64: 2>, scalar_prefetch = 0 : i64, scratch_operands = 0 : i64, tpu.core_type = #tpu.core_type<tc>, window_params = [{transform_indices = @transform_0, window_bounds = array<i64: 128, 128>}, {pipeline_mode = #tpu.pipeline_mode<synchronous>, transform_indices = @transform_1, window_bounds = array<i64: 256, 128>}, {pipeline_mode = #tpu.pipeline_mode<synchronous>, transform_indices = @transform_2, window_bounds = array<i64: 2, 2, 16, 16, 128>}, {pipeline_mode = #tpu.pipeline_mode<synchronous>, transform_indices = @transform_3, window_bounds = array<i64: 2, 2, 16, 16, 128>}, {pipeline_mode = #tpu.pipeline_mode<synchronous>, transform_indices = @transform_4, window_bounds = array<i64: 8, 16, 16, 128>}, {transform_indices = @transform_5, window_bounds = array<i64: 1, 16>}, {transform_indices = @transform_6, window_bounds = array<i64: 1, 2>}, {transform_indices = @transform_7, window_bounds = array<i64: 1, 8>}, {transform_indices = @transform_8, window_bounds = array<i64: 128, 128>}]} {
    %c0 = arith.constant 0 : index
    %c0_0 = arith.constant 0 : index
    %0 = vector.load %arg1[%c0, %c0_0] : memref<128x128xf32, #tpu.memory_space<vmem>>, vector<128x128xf32>
    %c0_1 = arith.constant 0 : index
    %c0_2 = arith.constant 0 : index
    %1 = vector.load %arg2[%c0_1, %c0_2] : memref<256x128xf32, #tpu.memory_space<vmem>>, vector<256x128xf32>
    %cst = arith.constant dense<0.000000e+00> : vector<256x128xf32>
    %2 = tpu.matmul %1, %0, %cst {dimension_numbers = #tpu.dot_dimension_numbers<[1], [0], [0], [1], [0, 0, 1, 1], [], []>} : vector<256x128xf32>, vector<128x128xf32>, vector<256x128xf32> -> vector<256x128xf32>
    %c0_3 = arith.constant 0 : index
    %c0_4 = arith.constant 0 : index
    %3 = memref.load %arg7[%c0_3, %c0_4] : memref<1x2xf32, #tpu.memory_space<smem>>
    %4 = vector.extract_strided_slice %2 {offsets = [0, 0], sizes = [16, 128], strides = [1, 1]} : vector<256x128xf32> to vector<16x128xf32>
    %c0_5 = arith.constant 0 : index
    %c0_6 = arith.constant 0 : index
    %5 = memref.load %arg6[%c0_5, %c0_6] : memref<1x16xf32, #tpu.memory_space<smem>>
    %6 = vector.broadcast %5 : f32 to vector<16x128xf32>
    %7 = arith.addf %4, %6 : vector<16x128xf32>
    %8 = vector.extract_strided_slice %2 {offsets = [32, 0], sizes = [16, 128], strides = [1, 1]} : vector<256x128xf32> to vector<16x128xf32>
    %c0_7 = arith.constant 0 : index
    %c2 = arith.constant 2 : index
    %9 = memref.load %arg6[%c0_7, %c2] : memref<1x16xf32, #tpu.memory_space<smem>>
    %10 = vector.broadcast %9 : f32 to vector<16x128xf32>
    %11 = arith.addf %8, %10 : vector<16x128xf32>
    %12 = vector.broadcast %3 : f32 to vector<16x128xf32>
    %13 = arith.mulf %12, %11 : vector<16x128xf32>
    %14 = vector.shape_cast %7 : vector<16x128xf32> to vector<16x1x128xf32>
    %15 = vector.shape_cast %14 : vector<16x1x128xf32> to vector<16x1x128xf32>
    %16 = vector.broadcast %15 : vector<16x1x128xf32> to vector<16x16x128xf32>
    %17 = vector.shape_cast %13 : vector<16x128xf32> to vector<1x16x128xf32>
    %c0_8 = arith.constant 0 : index
    %c0_9 = arith.constant 0 : index
    %c0_10 = arith.constant 0 : index
    %c0_11 = arith.constant 0 : index
    %c0_12 = arith.constant 0 : index
    %18 = vector.load %arg3[%c0_8, %c0_9, %c0_10, %c0_11, %c0_12] : memref<2x2x16x16x128xf32, #tpu.memory_space<vmem>>, vector<1x1x16x16x128xf32>
    %19 = vector.shape_cast %18 : vector<1x1x16x16x128xf32> to vector<16x16x128xf32>
    %20 = vector.broadcast %17 : vector<1x16x128xf32> to vector<16x16x128xf32>
    %21 = arith.addf %20, %19 : vector<16x16x128xf32>
    %22 = arith.mulf %16, %21 : vector<16x16x128xf32>
    %c0_13 = arith.constant 0 : index
    %c0_14 = arith.constant 0 : index
    %c0_15 = arith.constant 0 : index
    %c0_16 = arith.constant 0 : index
    %c0_17 = arith.constant 0 : index
    %23 = vector.load %arg4[%c0_13, %c0_14, %c0_15, %c0_16, %c0_17] : memref<2x2x16x16x128xf32, #tpu.memory_space<vmem>>, vector<1x1x16x16x128xf32>
    %24 = vector.shape_cast %23 : vector<1x1x16x16x128xf32> to vector<16x16x128xf32>
    %25 = vector.shape_cast %11 : vector<16x128xf32> to vector<1x16x128xf32>
    %26 = vector.broadcast %25 : vector<1x16x128xf32> to vector<16x16x128xf32>
    %27 = arith.mulf %24, %26 : vector<16x16x128xf32>
    %28 = arith.addf %22, %27 : vector<16x16x128xf32>
    %29 = vector.extract_strided_slice %2 {offsets = [16, 0], sizes = [16, 128], strides = [1, 1]} : vector<256x128xf32> to vector<16x128xf32>
    %c0_18 = arith.constant 0 : index
    %c1 = arith.constant 1 : index
    %30 = memref.load %arg6[%c0_18, %c1] : memref<1x16xf32, #tpu.memory_space<smem>>
    %31 = vector.broadcast %30 : f32 to vector<16x128xf32>
    %32 = arith.addf %29, %31 : vector<16x128xf32>
    %33 = vector.extract_strided_slice %2 {offsets = [48, 0], sizes = [16, 128], strides = [1, 1]} : vector<256x128xf32> to vector<16x128xf32>
    %c0_19 = arith.constant 0 : index
    %c3 = arith.constant 3 : index
    %34 = memref.load %arg6[%c0_19, %c3] : memref<1x16xf32, #tpu.memory_space<smem>>
    %35 = vector.broadcast %34 : f32 to vector<16x128xf32>
    %36 = arith.addf %33, %35 : vector<16x128xf32>
    %37 = vector.broadcast %3 : f32 to vector<16x128xf32>
    %38 = arith.mulf %37, %36 : vector<16x128xf32>
    %39 = vector.shape_cast %32 : vector<16x128xf32> to vector<16x1x128xf32>
    %40 = vector.shape_cast %39 : vector<16x1x128xf32> to vector<16x1x128xf32>
    %41 = vector.broadcast %40 : vector<16x1x128xf32> to vector<16x16x128xf32>
    %42 = vector.shape_cast %38 : vector<16x128xf32> to vector<1x16x128xf32>
    %c0_20 = arith.constant 0 : index
    %c1_21 = arith.constant 1 : index
    %c0_22 = arith.constant 0 : index
    %c0_23 = arith.constant 0 : index
    %c0_24 = arith.constant 0 : index
    %43 = vector.load %arg3[%c0_20, %c1_21, %c0_22, %c0_23, %c0_24] : memref<2x2x16x16x128xf32, #tpu.memory_space<vmem>>, vector<1x1x16x16x128xf32>
    %44 = vector.shape_cast %43 : vector<1x1x16x16x128xf32> to vector<16x16x128xf32>
    %45 = vector.broadcast %42 : vector<1x16x128xf32> to vector<16x16x128xf32>
    %46 = arith.addf %45, %44 : vector<16x16x128xf32>
    %47 = arith.mulf %41, %46 : vector<16x16x128xf32>
    %48 = arith.addf %28, %47 : vector<16x16x128xf32>
    %c0_25 = arith.constant 0 : index
    %c1_26 = arith.constant 1 : index
    %c0_27 = arith.constant 0 : index
    %c0_28 = arith.constant 0 : index
    %c0_29 = arith.constant 0 : index
    %49 = vector.load %arg4[%c0_25, %c1_26, %c0_27, %c0_28, %c0_29] : memref<2x2x16x16x128xf32, #tpu.memory_space<vmem>>, vector<1x1x16x16x128xf32>
    %50 = vector.shape_cast %49 : vector<1x1x16x16x128xf32> to vector<16x16x128xf32>
    %51 = vector.shape_cast %36 : vector<16x128xf32> to vector<1x16x128xf32>
    %52 = vector.broadcast %51 : vector<1x16x128xf32> to vector<16x16x128xf32>
    %53 = arith.mulf %50, %52 : vector<16x16x128xf32>
    %54 = arith.addf %48, %53 : vector<16x16x128xf32>
    %cst_30 = arith.constant dense<0xFF800000> : vector<16x128xf32>
    %55 = vector.multi_reduction <maximumf>, %54, %cst_30 [1] : vector<16x16x128xf32> to vector<16x128xf32>
    %56 = vector.shape_cast %55 : vector<16x128xf32> to vector<16x1x128xf32>
    %57 = vector.broadcast %56 : vector<16x1x128xf32> to vector<16x16x128xf32>
    %58 = arith.subf %54, %57 : vector<16x16x128xf32>
    %59 = math.exp %58 : vector<16x16x128xf32>
    %cst_31 = arith.constant dense<0.000000e+00> : vector<16x128xf32>
    %60 = vector.multi_reduction <add>, %59, %cst_31 [1] : vector<16x16x128xf32> to vector<16x128xf32>
    %61 = tpu.reciprocal %60 {approx = true} : vector<16x128xf32> -> vector<16x128xf32>
    %62 = vector.extract_strided_slice %2 {offsets = [64, 0], sizes = [16, 128], strides = [1, 1]} : vector<256x128xf32> to vector<16x128xf32>
    %c0_32 = arith.constant 0 : index
    %c4 = arith.constant 4 : index
    %63 = memref.load %arg6[%c0_32, %c4] : memref<1x16xf32, #tpu.memory_space<smem>>
    %64 = vector.broadcast %63 : f32 to vector<16x128xf32>
    %65 = arith.addf %62, %64 : vector<16x128xf32>
    %66 = vector.shape_cast %65 : vector<16x128xf32> to vector<1x16x128xf32>
    %c0_33 = arith.constant 0 : index
    %c0_34 = arith.constant 0 : index
    %c0_35 = arith.constant 0 : index
    %c0_36 = arith.constant 0 : index
    %67 = vector.load %arg5[%c0_33, %c0_34, %c0_35, %c0_36] : memref<8x16x16x128xf32, #tpu.memory_space<vmem>>, vector<1x16x16x128xf32>
    %68 = vector.shape_cast %67 : vector<1x16x16x128xf32> to vector<16x16x128xf32>
    %69 = vector.broadcast %66 : vector<1x16x128xf32> to vector<16x16x128xf32>
    %70 = arith.addf %69, %68 : vector<16x16x128xf32>
    %71 = arith.mulf %59, %70 : vector<16x16x128xf32>
    %cst_37 = arith.constant dense<0.000000e+00> : vector<16x128xf32>
    %72 = vector.multi_reduction <add>, %71, %cst_37 [1] : vector<16x16x128xf32> to vector<16x128xf32>
    %73 = arith.mulf %72, %61 : vector<16x128xf32>
    %c0_38 = arith.constant 0 : index
    %c0_39 = arith.constant 0 : index
    %74 = memref.load %arg8[%c0_38, %c0_39] : memref<1x8xf32, #tpu.memory_space<smem>>
    %75 = vector.broadcast %74 : f32 to vector<16x128xf32>
    %76 = arith.addf %73, %75 : vector<16x128xf32>
    %c0_40 = arith.constant 0 : index
    %c0_41 = arith.constant 0 : index
    %77 = vector.load %arg9[%c0_40, %c0_41] : memref<128x128xf32, #tpu.memory_space<vmem>>, vector<16x128xf32>
    tpu.vector_store %arg9[%c0_40, %c0_41], %76 {strides = array<i32>} : memref<128x128xf32, #tpu.memory_space<vmem>>, vector<16x128xf32>,
    %78 = vector.extract_strided_slice %2 {offsets = [80, 0], sizes = [16, 128], strides = [1, 1]} : vector<256x128xf32> to vector<16x128xf32>
    %c0_42 = arith.constant 0 : index
    %c5 = arith.constant 5 : index
    %79 = memref.load %arg6[%c0_42, %c5] : memref<1x16xf32, #tpu.memory_space<smem>>
    %80 = vector.broadcast %79 : f32 to vector<16x128xf32>
    %81 = arith.addf %78, %80 : vector<16x128xf32>
    %82 = vector.shape_cast %81 : vector<16x128xf32> to vector<1x16x128xf32>
    %c1_43 = arith.constant 1 : index
    %c0_44 = arith.constant 0 : index
    %c0_45 = arith.constant 0 : index
    %c0_46 = arith.constant 0 : index
    %83 = vector.load %arg5[%c1_43, %c0_44, %c0_45, %c0_46] : memref<8x16x16x128xf32, #tpu.memory_space<vmem>>, vector<1x16x16x128xf32>
    %84 = vector.shape_cast %83 : vector<1x16x16x128xf32> to vector<16x16x128xf32>
    %85 = vector.broadcast %82 : vector<1x16x128xf32> to vector<16x16x128xf32>
    %86 = arith.addf %85, %84 : vector<16x16x128xf32>
    %87 = arith.mulf %59, %86 : vector<16x16x128xf32>
    %cst_47 = arith.constant dense<0.000000e+00> : vector<16x128xf32>
    %88 = vector.multi_reduction <add>, %87, %cst_47 [1] : vector<16x16x128xf32> to vector<16x128xf32>
    %89 = arith.mulf %88, %61 : vector<16x128xf32>
    %c0_48 = arith.constant 0 : index
    %c1_49 = arith.constant 1 : index
    %90 = memref.load %arg8[%c0_48, %c1_49] : memref<1x8xf32, #tpu.memory_space<smem>>
    %91 = vector.broadcast %90 : f32 to vector<16x128xf32>
    %92 = arith.addf %89, %91 : vector<16x128xf32>
    %c16 = arith.constant 16 : index
    %c0_50 = arith.constant 0 : index
    %93 = vector.load %arg9[%c16, %c0_50] : memref<128x128xf32, #tpu.memory_space<vmem>>, vector<16x128xf32>
    tpu.vector_store %arg9[%c16, %c0_50], %92 {strides = array<i32>} : memref<128x128xf32, #tpu.memory_space<vmem>>, vector<16x128xf32>,
    %94 = vector.extract_strided_slice %2 {offsets = [96, 0], sizes = [16, 128], strides = [1, 1]} : vector<256x128xf32> to vector<16x128xf32>
    %c0_51 = arith.constant 0 : index
    %c6 = arith.constant 6 : index
    %95 = memref.load %arg6[%c0_51, %c6] : memref<1x16xf32, #tpu.memory_space<smem>>
    %96 = vector.broadcast %95 : f32 to vector<16x128xf32>
    %97 = arith.addf %94, %96 : vector<16x128xf32>
    %98 = vector.shape_cast %97 : vector<16x128xf32> to vector<1x16x128xf32>
    %c2_52 = arith.constant 2 : index
    %c0_53 = arith.constant 0 : index
    %c0_54 = arith.constant 0 : index
    %c0_55 = arith.constant 0 : index
    %99 = vector.load %arg5[%c2_52, %c0_53, %c0_54, %c0_55] : memref<8x16x16x128xf32, #tpu.memory_space<vmem>>, vector<1x16x16x128xf32>
    %100 = vector.shape_cast %99 : vector<1x16x16x128xf32> to vector<16x16x128xf32>
    %101 = vector.broadcast %98 : vector<1x16x128xf32> to vector<16x16x128xf32>
    %102 = arith.addf %101, %100 : vector<16x16x128xf32>
    %103 = arith.mulf %59, %102 : vector<16x16x128xf32>
    %cst_56 = arith.constant dense<0.000000e+00> : vector<16x128xf32>
    %104 = vector.multi_reduction <add>, %103, %cst_56 [1] : vector<16x16x128xf32> to vector<16x128xf32>
    %105 = arith.mulf %104, %61 : vector<16x128xf32>
    %c0_57 = arith.constant 0 : index
    %c2_58 = arith.constant 2 : index
    %106 = memref.load %arg8[%c0_57, %c2_58] : memref<1x8xf32, #tpu.memory_space<smem>>
    %107 = vector.broadcast %106 : f32 to vector<16x128xf32>
    %108 = arith.addf %105, %107 : vector<16x128xf32>
    %c32 = arith.constant 32 : index
    %c0_59 = arith.constant 0 : index
    %109 = vector.load %arg9[%c32, %c0_59] : memref<128x128xf32, #tpu.memory_space<vmem>>, vector<16x128xf32>
    tpu.vector_store %arg9[%c32, %c0_59], %108 {strides = array<i32>} : memref<128x128xf32, #tpu.memory_space<vmem>>, vector<16x128xf32>,
    %110 = vector.extract_strided_slice %2 {offsets = [112, 0], sizes = [16, 128], strides = [1, 1]} : vector<256x128xf32> to vector<16x128xf32>
    %c0_60 = arith.constant 0 : index
    %c7 = arith.constant 7 : index
    %111 = memref.load %arg6[%c0_60, %c7] : memref<1x16xf32, #tpu.memory_space<smem>>
    %112 = vector.broadcast %111 : f32 to vector<16x128xf32>
    %113 = arith.addf %110, %112 : vector<16x128xf32>
    %114 = vector.shape_cast %113 : vector<16x128xf32> to vector<1x16x128xf32>
    %c3_61 = arith.constant 3 : index
    %c0_62 = arith.constant 0 : index
    %c0_63 = arith.constant 0 : index
    %c0_64 = arith.constant 0 : index
    %115 = vector.load %arg5[%c3_61, %c0_62, %c0_63, %c0_64] : memref<8x16x16x128xf32, #tpu.memory_space<vmem>>, vector<1x16x16x128xf32>
    %116 = vector.shape_cast %115 : vector<1x16x16x128xf32> to vector<16x16x128xf32>
    %117 = vector.broadcast %114 : vector<1x16x128xf32> to vector<16x16x128xf32>
    %118 = arith.addf %117, %116 : vector<16x16x128xf32>
    %119 = arith.mulf %59, %118 : vector<16x16x128xf32>
    %cst_65 = arith.constant dense<0.000000e+00> : vector<16x128xf32>
    %120 = vector.multi_reduction <add>, %119, %cst_65 [1] : vector<16x16x128xf32> to vector<16x128xf32>
    %121 = arith.mulf %120, %61 : vector<16x128xf32>
    %c0_66 = arith.constant 0 : index
    %c3_67 = arith.constant 3 : index
    %122 = memref.load %arg8[%c0_66, %c3_67] : memref<1x8xf32, #tpu.memory_space<smem>>
    %123 = vector.broadcast %122 : f32 to vector<16x128xf32>
    %124 = arith.addf %121, %123 : vector<16x128xf32>
    %c48 = arith.constant 48 : index
    %c0_68 = arith.constant 0 : index
    %125 = vector.load %arg9[%c48, %c0_68] : memref<128x128xf32, #tpu.memory_space<vmem>>, vector<16x128xf32>
    tpu.vector_store %arg9[%c48, %c0_68], %124 {strides = array<i32>} : memref<128x128xf32, #tpu.memory_space<vmem>>, vector<16x128xf32>,
    %c0_69 = arith.constant 0 : index
    %c1_70 = arith.constant 1 : index
    %126 = memref.load %arg7[%c0_69, %c1_70] : memref<1x2xf32, #tpu.memory_space<smem>>
    %127 = vector.extract_strided_slice %2 {offsets = [128, 0], sizes = [16, 128], strides = [1, 1]} : vector<256x128xf32> to vector<16x128xf32>
    %c0_71 = arith.constant 0 : index
    %c8 = arith.constant 8 : index
    %128 = memref.load %arg6[%c0_71, %c8] : memref<1x16xf32, #tpu.memory_space<smem>>
    %129 = vector.broadcast %128 : f32 to vector<16x128xf32>
    %130 = arith.addf %127, %129 : vector<16x128xf32>
    %131 = vector.extract_strided_slice %2 {offsets = [160, 0], sizes = [16, 128], strides = [1, 1]} : vector<256x128xf32> to vector<16x128xf32>
    %c0_72 = arith.constant 0 : index
    %c10 = arith.constant 10 : index
    %132 = memref.load %arg6[%c0_72, %c10] : memref<1x16xf32, #tpu.memory_space<smem>>
    %133 = vector.broadcast %132 : f32 to vector<16x128xf32>
    %134 = arith.addf %131, %133 : vector<16x128xf32>
    %135 = vector.broadcast %126 : f32 to vector<16x128xf32>
    %136 = arith.mulf %135, %134 : vector<16x128xf32>
    %137 = vector.shape_cast %130 : vector<16x128xf32> to vector<16x1x128xf32>
    %138 = vector.shape_cast %137 : vector<16x1x128xf32> to vector<16x1x128xf32>
    %139 = vector.broadcast %138 : vector<16x1x128xf32> to vector<16x16x128xf32>
    %140 = vector.shape_cast %136 : vector<16x128xf32> to vector<1x16x128xf32>
    %c1_73 = arith.constant 1 : index
    %c0_74 = arith.constant 0 : index
    %c0_75 = arith.constant 0 : index
    %c0_76 = arith.constant 0 : index
    %c0_77 = arith.constant 0 : index
    %141 = vector.load %arg3[%c1_73, %c0_74, %c0_75, %c0_76, %c0_77] : memref<2x2x16x16x128xf32, #tpu.memory_space<vmem>>, vector<1x1x16x16x128xf32>
    %142 = vector.shape_cast %141 : vector<1x1x16x16x128xf32> to vector<16x16x128xf32>
    %143 = vector.broadcast %140 : vector<1x16x128xf32> to vector<16x16x128xf32>
    %144 = arith.addf %143, %142 : vector<16x16x128xf32>
    %145 = arith.mulf %139, %144 : vector<16x16x128xf32>
    %c1_78 = arith.constant 1 : index
    %c0_79 = arith.constant 0 : index
    %c0_80 = arith.constant 0 : index
    %c0_81 = arith.constant 0 : index
    %c0_82 = arith.constant 0 : index
    %146 = vector.load %arg4[%c1_78, %c0_79, %c0_80, %c0_81, %c0_82] : memref<2x2x16x16x128xf32, #tpu.memory_space<vmem>>, vector<1x1x16x16x128xf32>
    %147 = vector.shape_cast %146 : vector<1x1x16x16x128xf32> to vector<16x16x128xf32>
    %148 = vector.shape_cast %134 : vector<16x128xf32> to vector<1x16x128xf32>
    %149 = vector.broadcast %148 : vector<1x16x128xf32> to vector<16x16x128xf32>
    %150 = arith.mulf %147, %149 : vector<16x16x128xf32>
    %151 = arith.addf %145, %150 : vector<16x16x128xf32>
    %152 = vector.extract_strided_slice %2 {offsets = [144, 0], sizes = [16, 128], strides = [1, 1]} : vector<256x128xf32> to vector<16x128xf32>
    %c0_83 = arith.constant 0 : index
    %c9 = arith.constant 9 : index
    %153 = memref.load %arg6[%c0_83, %c9] : memref<1x16xf32, #tpu.memory_space<smem>>
    %154 = vector.broadcast %153 : f32 to vector<16x128xf32>
    %155 = arith.addf %152, %154 : vector<16x128xf32>
    %156 = vector.extract_strided_slice %2 {offsets = [176, 0], sizes = [16, 128], strides = [1, 1]} : vector<256x128xf32> to vector<16x128xf32>
    %c0_84 = arith.constant 0 : index
    %c11 = arith.constant 11 : index
    %157 = memref.load %arg6[%c0_84, %c11] : memref<1x16xf32, #tpu.memory_space<smem>>
    %158 = vector.broadcast %157 : f32 to vector<16x128xf32>
    %159 = arith.addf %156, %158 : vector<16x128xf32>
    %160 = vector.broadcast %126 : f32 to vector<16x128xf32>
    %161 = arith.mulf %160, %159 : vector<16x128xf32>
    %162 = vector.shape_cast %155 : vector<16x128xf32> to vector<16x1x128xf32>
    %163 = vector.shape_cast %162 : vector<16x1x128xf32> to vector<16x1x128xf32>
    %164 = vector.broadcast %163 : vector<16x1x128xf32> to vector<16x16x128xf32>
    %165 = vector.shape_cast %161 : vector<16x128xf32> to vector<1x16x128xf32>
    %c1_85 = arith.constant 1 : index
    %c1_86 = arith.constant 1 : index
    %c0_87 = arith.constant 0 : index
    %c0_88 = arith.constant 0 : index
    %c0_89 = arith.constant 0 : index
    %166 = vector.load %arg3[%c1_85, %c1_86, %c0_87, %c0_88, %c0_89] : memref<2x2x16x16x128xf32, #tpu.memory_space<vmem>>, vector<1x1x16x16x128xf32>
    %167 = vector.shape_cast %166 : vector<1x1x16x16x128xf32> to vector<16x16x128xf32>
    %168 = vector.broadcast %165 : vector<1x16x128xf32> to vector<16x16x128xf32>
    %169 = arith.addf %168, %167 : vector<16x16x128xf32>
    %170 = arith.mulf %164, %169 : vector<16x16x128xf32>
    %171 = arith.addf %151, %170 : vector<16x16x128xf32>
    %c1_90 = arith.constant 1 : index
    %c1_91 = arith.constant 1 : index
    %c0_92 = arith.constant 0 : index
    %c0_93 = arith.constant 0 : index
    %c0_94 = arith.constant 0 : index
    %172 = vector.load %arg4[%c1_90, %c1_91, %c0_92, %c0_93, %c0_94] : memref<2x2x16x16x128xf32, #tpu.memory_space<vmem>>, vector<1x1x16x16x128xf32>
    %173 = vector.shape_cast %172 : vector<1x1x16x16x128xf32> to vector<16x16x128xf32>
    %174 = vector.shape_cast %159 : vector<16x128xf32> to vector<1x16x128xf32>
    %175 = vector.broadcast %174 : vector<1x16x128xf32> to vector<16x16x128xf32>
    %176 = arith.mulf %173, %175 : vector<16x16x128xf32>
    %177 = arith.addf %171, %176 : vector<16x16x128xf32>
    %cst_95 = arith.constant dense<0xFF800000> : vector<16x128xf32>
    %178 = vector.multi_reduction <maximumf>, %177, %cst_95 [1] : vector<16x16x128xf32> to vector<16x128xf32>
    %179 = vector.shape_cast %178 : vector<16x128xf32> to vector<16x1x128xf32>
    %180 = vector.broadcast %179 : vector<16x1x128xf32> to vector<16x16x128xf32>
    %181 = arith.subf %177, %180 : vector<16x16x128xf32>
    %182 = math.exp %181 : vector<16x16x128xf32>
    %cst_96 = arith.constant dense<0.000000e+00> : vector<16x128xf32>
    %183 = vector.multi_reduction <add>, %182, %cst_96 [1] : vector<16x16x128xf32> to vector<16x128xf32>
    %184 = tpu.reciprocal %183 {approx = true} : vector<16x128xf32> -> vector<16x128xf32>
    %185 = vector.extract_strided_slice %2 {offsets = [192, 0], sizes = [16, 128], strides = [1, 1]} : vector<256x128xf32> to vector<16x128xf32>
    %c0_97 = arith.constant 0 : index
    %c12 = arith.constant 12 : index
    %186 = memref.load %arg6[%c0_97, %c12] : memref<1x16xf32, #tpu.memory_space<smem>>
    %187 = vector.broadcast %186 : f32 to vector<16x128xf32>
    %188 = arith.addf %185, %187 : vector<16x128xf32>
    %189 = vector.shape_cast %188 : vector<16x128xf32> to vector<1x16x128xf32>
    %c4_98 = arith.constant 4 : index
    %c0_99 = arith.constant 0 : index
    %c0_100 = arith.constant 0 : index
    %c0_101 = arith.constant 0 : index
    %190 = vector.load %arg5[%c4_98, %c0_99, %c0_100, %c0_101] : memref<8x16x16x128xf32, #tpu.memory_space<vmem>>, vector<1x16x16x128xf32>
    %191 = vector.shape_cast %190 : vector<1x16x16x128xf32> to vector<16x16x128xf32>
    %192 = vector.broadcast %189 : vector<1x16x128xf32> to vector<16x16x128xf32>
    %193 = arith.addf %192, %191 : vector<16x16x128xf32>
    %194 = arith.mulf %182, %193 : vector<16x16x128xf32>
    %cst_102 = arith.constant dense<0.000000e+00> : vector<16x128xf32>
    %195 = vector.multi_reduction <add>, %194, %cst_102 [1] : vector<16x16x128xf32> to vector<16x128xf32>
    %196 = arith.mulf %195, %184 : vector<16x128xf32>
    %c0_103 = arith.constant 0 : index
    %c4_104 = arith.constant 4 : index
    %197 = memref.load %arg8[%c0_103, %c4_104] : memref<1x8xf32, #tpu.memory_space<smem>>
    %198 = vector.broadcast %197 : f32 to vector<16x128xf32>
    %199 = arith.addf %196, %198 : vector<16x128xf32>
    %c64 = arith.constant 64 : index
    %c0_105 = arith.constant 0 : index
    %200 = vector.load %arg9[%c64, %c0_105] : memref<128x128xf32, #tpu.memory_space<vmem>>, vector<16x128xf32>
    tpu.vector_store %arg9[%c64, %c0_105], %199 {strides = array<i32>} : memref<128x128xf32, #tpu.memory_space<vmem>>, vector<16x128xf32>,
    %201 = vector.extract_strided_slice %2 {offsets = [208, 0], sizes = [16, 128], strides = [1, 1]} : vector<256x128xf32> to vector<16x128xf32>
    %c0_106 = arith.constant 0 : index
    %c13 = arith.constant 13 : index
    %202 = memref.load %arg6[%c0_106, %c13] : memref<1x16xf32, #tpu.memory_space<smem>>
    %203 = vector.broadcast %202 : f32 to vector<16x128xf32>
    %204 = arith.addf %201, %203 : vector<16x128xf32>
    %205 = vector.shape_cast %204 : vector<16x128xf32> to vector<1x16x128xf32>
    %c5_107 = arith.constant 5 : index
    %c0_108 = arith.constant 0 : index
    %c0_109 = arith.constant 0 : index
    %c0_110 = arith.constant 0 : index
    %206 = vector.load %arg5[%c5_107, %c0_108, %c0_109, %c0_110] : memref<8x16x16x128xf32, #tpu.memory_space<vmem>>, vector<1x16x16x128xf32>
    %207 = vector.shape_cast %206 : vector<1x16x16x128xf32> to vector<16x16x128xf32>
    %208 = vector.broadcast %205 : vector<1x16x128xf32> to vector<16x16x128xf32>
    %209 = arith.addf %208, %207 : vector<16x16x128xf32>
    %210 = arith.mulf %182, %209 : vector<16x16x128xf32>
    %cst_111 = arith.constant dense<0.000000e+00> : vector<16x128xf32>
    %211 = vector.multi_reduction <add>, %210, %cst_111 [1] : vector<16x16x128xf32> to vector<16x128xf32>
    %212 = arith.mulf %211, %184 : vector<16x128xf32>
    %c0_112 = arith.constant 0 : index
    %c5_113 = arith.constant 5 : index
    %213 = memref.load %arg8[%c0_112, %c5_113] : memref<1x8xf32, #tpu.memory_space<smem>>
    %214 = vector.broadcast %213 : f32 to vector<16x128xf32>
    %215 = arith.addf %212, %214 : vector<16x128xf32>
    %c80 = arith.constant 80 : index
    %c0_114 = arith.constant 0 : index
    %216 = vector.load %arg9[%c80, %c0_114] : memref<128x128xf32, #tpu.memory_space<vmem>>, vector<16x128xf32>
    tpu.vector_store %arg9[%c80, %c0_114], %215 {strides = array<i32>} : memref<128x128xf32, #tpu.memory_space<vmem>>, vector<16x128xf32>,
    %217 = vector.extract_strided_slice %2 {offsets = [224, 0], sizes = [16, 128], strides = [1, 1]} : vector<256x128xf32> to vector<16x128xf32>
    %c0_115 = arith.constant 0 : index
    %c14 = arith.constant 14 : index
    %218 = memref.load %arg6[%c0_115, %c14] : memref<1x16xf32, #tpu.memory_space<smem>>
    %219 = vector.broadcast %218 : f32 to vector<16x128xf32>
    %220 = arith.addf %217, %219 : vector<16x128xf32>
    %221 = vector.shape_cast %220 : vector<16x128xf32> to vector<1x16x128xf32>
    %c6_116 = arith.constant 6 : index
    %c0_117 = arith.constant 0 : index
    %c0_118 = arith.constant 0 : index
    %c0_119 = arith.constant 0 : index
    %222 = vector.load %arg5[%c6_116, %c0_117, %c0_118, %c0_119] : memref<8x16x16x128xf32, #tpu.memory_space<vmem>>, vector<1x16x16x128xf32>
    %223 = vector.shape_cast %222 : vector<1x16x16x128xf32> to vector<16x16x128xf32>
    %224 = vector.broadcast %221 : vector<1x16x128xf32> to vector<16x16x128xf32>
    %225 = arith.addf %224, %223 : vector<16x16x128xf32>
    %226 = arith.mulf %182, %225 : vector<16x16x128xf32>
    %cst_120 = arith.constant dense<0.000000e+00> : vector<16x128xf32>
    %227 = vector.multi_reduction <add>, %226, %cst_120 [1] : vector<16x16x128xf32> to vector<16x128xf32>
    %228 = arith.mulf %227, %184 : vector<16x128xf32>
    %c0_121 = arith.constant 0 : index
    %c6_122 = arith.constant 6 : index
    %229 = memref.load %arg8[%c0_121, %c6_122] : memref<1x8xf32, #tpu.memory_space<smem>>
    %230 = vector.broadcast %229 : f32 to vector<16x128xf32>
    %231 = arith.addf %228, %230 : vector<16x128xf32>
    %c96 = arith.constant 96 : index
    %c0_123 = arith.constant 0 : index
    %232 = vector.load %arg9[%c96, %c0_123] : memref<128x128xf32, #tpu.memory_space<vmem>>, vector<16x128xf32>
    tpu.vector_store %arg9[%c96, %c0_123], %231 {strides = array<i32>} : memref<128x128xf32, #tpu.memory_space<vmem>>, vector<16x128xf32>,
    %233 = vector.extract_strided_slice %2 {offsets = [240, 0], sizes = [16, 128], strides = [1, 1]} : vector<256x128xf32> to vector<16x128xf32>
    %c0_124 = arith.constant 0 : index
    %c15 = arith.constant 15 : index
    %234 = memref.load %arg6[%c0_124, %c15] : memref<1x16xf32, #tpu.memory_space<smem>>
    %235 = vector.broadcast %234 : f32 to vector<16x128xf32>
    %236 = arith.addf %233, %235 : vector<16x128xf32>
    %237 = vector.shape_cast %236 : vector<16x128xf32> to vector<1x16x128xf32>
    %c7_125 = arith.constant 7 : index
    %c0_126 = arith.constant 0 : index
    %c0_127 = arith.constant 0 : index
    %c0_128 = arith.constant 0 : index
    %238 = vector.load %arg5[%c7_125, %c0_126, %c0_127, %c0_128] : memref<8x16x16x128xf32, #tpu.memory_space<vmem>>, vector<1x16x16x128xf32>
    %239 = vector.shape_cast %238 : vector<1x16x16x128xf32> to vector<16x16x128xf32>
    %240 = vector.broadcast %237 : vector<1x16x128xf32> to vector<16x16x128xf32>
    %241 = arith.addf %240, %239 : vector<16x16x128xf32>
    %242 = arith.mulf %182, %241 : vector<16x16x128xf32>
    %cst_129 = arith.constant dense<0.000000e+00> : vector<16x128xf32>
    %243 = vector.multi_reduction <add>, %242, %cst_129 [1] : vector<16x16x128xf32> to vector<16x128xf32>
    %244 = arith.mulf %243, %184 : vector<16x128xf32>
    %c0_130 = arith.constant 0 : index
    %c7_131 = arith.constant 7 : index
    %245 = memref.load %arg8[%c0_130, %c7_131] : memref<1x8xf32, #tpu.memory_space<smem>>
    %246 = vector.broadcast %245 : f32 to vector<16x128xf32>
    %247 = arith.addf %244, %246 : vector<16x128xf32>
    %c112 = arith.constant 112 : index
    %c0_132 = arith.constant 0 : index
    %248 = vector.load %arg9[%c112, %c0_132] : memref<128x128xf32, #tpu.memory_space<vmem>>, vector<16x128xf32>
    tpu.vector_store %arg9[%c112, %c0_132], %247 {strides = array<i32>} : memref<128x128xf32, #tpu.memory_space<vmem>>, vector<16x128xf32>,
    return
  }
  func.func @transform_0(%arg0: i32) -> (i32, i32) {
    %c0_i32 = arith.constant 0 : i32
    %c0_i32_0 = arith.constant 0 : i32
    return %c0_i32, %arg0 : i32, i32
  }
  func.func @transform_1(%arg0: i32) -> (i32, i32) {
    %c0_i32 = arith.constant 0 : i32
    %c0_i32_0 = arith.constant 0 : i32
    %c0_i32_1 = arith.constant 0 : i32
    return %c0_i32, %c0_i32_0 : i32, i32
  }
  func.func @transform_2(%arg0: i32) -> (i32, i32, i32, i32, i32) {
    %c0_i32 = arith.constant 0 : i32
    %c0_i32_0 = arith.constant 0 : i32
    %c0_i32_1 = arith.constant 0 : i32
    %c0_i32_2 = arith.constant 0 : i32
    %c0_i32_3 = arith.constant 0 : i32
    %c0_i32_4 = arith.constant 0 : i32
    return %c0_i32, %c0_i32_0, %c0_i32_1, %c0_i32_2, %c0_i32_3 : i32, i32, i32, i32, i32
  }
  func.func @transform_3(%arg0: i32) -> (i32, i32, i32, i32, i32) {
    %c0_i32 = arith.constant 0 : i32
    %c0_i32_0 = arith.constant 0 : i32
    %c0_i32_1 = arith.constant 0 : i32
    %c0_i32_2 = arith.constant 0 : i32
    %c0_i32_3 = arith.constant 0 : i32
    %c0_i32_4 = arith.constant 0 : i32
    return %c0_i32, %c0_i32_0, %c0_i32_1, %c0_i32_2, %c0_i32_3 : i32, i32, i32, i32, i32
  }
  func.func @transform_4(%arg0: i32) -> (i32, i32, i32, i32) {
    %c0_i32 = arith.constant 0 : i32
    %c0_i32_0 = arith.constant 0 : i32
    %c0_i32_1 = arith.constant 0 : i32
    %c0_i32_2 = arith.constant 0 : i32
    %c0_i32_3 = arith.constant 0 : i32
    return %c0_i32, %c0_i32_0, %c0_i32_1, %c0_i32_2 : i32, i32, i32, i32
  }
  func.func @transform_5(%arg0: i32) -> (i32, i32) {
    %c0_i32 = arith.constant 0 : i32
    %c0_i32_0 = arith.constant 0 : i32
    %c0_i32_1 = arith.constant 0 : i32
    return %c0_i32, %c0_i32_0 : i32, i32
  }
  func.func @transform_6(%arg0: i32) -> (i32, i32) {
    %c0_i32 = arith.constant 0 : i32
    %c0_i32_0 = arith.constant 0 : i32
    %c0_i32_1 = arith.constant 0 : i32
    return %c0_i32, %c0_i32_0 : i32, i32
  }
  func.func @transform_7(%arg0: i32) -> (i32, i32) {
    %c0_i32 = arith.constant 0 : i32
    %c0_i32_0 = arith.constant 0 : i32
    %c0_i32_1 = arith.constant 0 : i32
    return %c0_i32, %c0_i32_0 : i32, i32
  }
  func.func @transform_8(%arg0: i32) -> (i32, i32) {
    %c0_i32 = arith.constant 0 : i32
    %c0_i32_0 = arith.constant 0 : i32
    return %c0_i32, %arg0 : i32, i32
  }
}

</mosaic_0001>

<bundles_post_ra>
// kernel: tpu_custom_call.1
= control target key start
LH: loop header
LB: loop body
LE: loop exit
PB: predicated region body
PF: predicated region fallthrough
CT: control target
= control target key end

     0   :  { %s9903_s0 = inlined_call_operand.hbm [shape: f32[128,256], index: 0, kind: input, shape index: {}]   ;;  %s9904_s1 = inlined_call_operand.hbm [shape: f32[256,128], index: 1, kind: input, shape index: {}]   ;;  %s9905_s2 = inlined_call_operand.hbm [shape: f32[2,2,16,16,128], index: 2, kind: input, shape index: {}]   ;;  %s9906_s3 = inlined_call_operand.hbm [shape: f32[2,2,16,16,128], index: 3, kind: input, shape index: {}]   ;;  %s9907_s4 = inlined_call_operand.hbm [shape: f32[8,16,16,128], index: 4, kind: input, shape index: {}]   ;;  %s9908_s5 = inlined_call_operand.vmem [shape: f32[1,16], index: 5, kind: input, shape index: {}]   ;;  %s9909_s6 = inlined_call_operand.vmem [shape: f32[1,2], index: 6, kind: input, shape index: {}]   ;;  %s9910_s7 = inlined_call_operand.vmem [shape: f32[1,8], index: 7, kind: input, shape index: {}]   ;;  %s9911_s8 = inlined_call_operand.hbm [shape: f32[128,256], index: 8, kind: output, shape index: {}]  }
   0x1   :  { %10242 = sst [smem:[#allocation187_spill]] %s9904_s1 }
   0x2   :  { %10243 = sst [smem:[#allocation188_spill]] %s9905_s2 }
   0x3   :  { %13 = vsyncpa [#allocation3], 0 }
   0x4   :  { %15 = vsyncpa [#allocation3 + $0x1], 0 }
   0x5   :  { %16 = vsyncpa [#allocation7], 0 }
   0x6   :  { %17 = vsyncpa [#allocation10], 0 }
   0x7   :  { %18 = vsyncpa [#allocation5], 0 }
   0x8   :  { %19 = vsyncpa [#allocation14], 0 }
   0x9   :  { %20 = vsyncpa [#allocation4], 0 }
   0xa   :  { %22 = vsyncpa [#allocation4 + $0x1], 0  ;;  %s6221_s27 = smov 0   ;;  %s6223_s28 = smov 0  }
   0xb   :  { %s6225_s29 = smov 0   ;;  %s6227_s30 = smov 0  }
   0xc LB: > { %s6160_s9 = smov [#allocation6]   ;;  %s6242_s11 = sadd.s32 4294967295, %s6158_s30   ;;  %s6158_s30 = sphi %s6227_s30, %s11341_s30   ;;  %s6154_s29 = sphi %s6225_s29, %s11340_s29   ;;  %s6150_s28 = sphi %s6223_s28, %s11339_s28   ;;  %s6146_s27 = sphi %s6221_s27, %s11338_s27  }
   0xd   : > { %s244_s10 = sshll.u32 %s6160_s9, 4  ;;  %p5377_p0 = scmp.ge.s32.totalorder %s6158_s30, 1  ;;  %s245_s10 = int_to_ptr.vmem [resolvable:$true] %s244_s10 }
   0xe   : > { %p9914_p1 = scmp.eq.s32.totalorder %s6242_s11, 0  ;;  %p232_p2 = scmp.lt.s32.totalorder %s6158_s30, 3 }
   0xf   : > { %s6161_s13 = smov [#allocation9]   ;;  %s308_s17 = sshll.u32 %s9909_s6, 4  ;;  %s6263_s17 = int_to_ptr.vmem [resolvable:$true] %s308_s17 }
  0x10   : > { %p6247_p3 = pnand %p5377_p0, %p232_p2  ;;  %s270_s14 = sshll.u32 %s6161_s13, 4  ;;  %s271_s14 = int_to_ptr.vmem [resolvable:$true] %s270_s14 }
  0x11   : > { %s5912_s20 = scalar_lea.vmem %s245_s10, 4096  ;;  %p5920_p11 = scmp.lt.s32.totalorder %s245_s10, %s245_s10 }
  0x12   : > { %s10244_s12 = scalar_select %p6247_p3, 1, 0 }
  0x13   : > { %p5617_p5 = pneg %p6247_p3  ;;  %p5913_p8 = scmp.ne.s32.totalorder %s245_s10, %s5912_s20 }
  0x14   : > { %p5921_p12 = scmp.lt.s32.totalorder %s5912_s20, %s5912_s20 }
  0x15   : > { %p6259_p6 = pnand %p5617_p5, %p9914_p1 }
  0x16   : > { %p5922_p13 = por %p5921_p12, %p5920_p11 }
  0x17   : > { %p6267_p7 = pneg %p6259_p6 }
  0x19   : > { %p5915_p9 = pnand %p5913_p8, %p6267_p7 }
  0x1b   : > { %p5916_p10 = pneg %p5915_p9 }
  0x1d   : > { %p5923_p0 = pnand %p5922_p13, %p5916_p10 }
  0x1f   : > { %5926 = shalt.err (!%p5923_p0)
}
  0x20   : > { %s9912_s21 = smov 128   ;;  %s9913_s22 = smov 8  }
  0x21   : > { %s10247_s1 = sld [smem:[#allocation187_spill]]  ;;  %s5938_s25 = scalar_lea.vmem %s271_s14, 16384 }
  0x22   : > { %p5939_p2 = scmp.ne.s32.totalorder %s271_s14, %s5938_s25  ;;  %p5946_p9 = scmp.lt.s32.totalorder %s271_s14, %s271_s14 }
  0x23   : > { %p5947_p10 = scmp.lt.s32.totalorder %s5938_s25, %s5938_s25 }
  0x24   : > { %p5941_p5 = pnand %p5939_p2, %p6267_p7 }
  0x25   : > { %p5948_p11 = por %p5947_p10, %p5946_p9 }
  0x26   : > { %p5942_p8 = pneg %p5941_p5 }
  0x27   : > { %5620 = dma.hbm_to_vmem [thread:$0]  (!%p6259_p6), %s10247_s1, 4096, %s245_s10, [#allocation7], %s9912_s21, %s9912_s21, %s9913_s22  }
  0x28   : > { %p5949_p12 = pnand %p5948_p11, %p5942_p8 }
  0x2a   : > { %5952 = shalt.err (!%p5949_p12)
}
  0x2b   : > { %5626 = dma.hbm_to_vmem [thread:$0]  (!%p6259_p6), %s9906_s3, 16384, %s271_s14, [#allocation10], %s9912_s21, %s9912_s21, %s9913_s22  }
  0x2c   : > { %s5953_s10 = scalar_lea.vmem %s6263_s17, 16  ;;  %p5961_p5 = scmp.lt.s32.totalorder %s6263_s17, %s6263_s17 }
  0x2d   : > { %p5954_p13 = scmp.ne.s32.totalorder %s6263_s17, %s5953_s10  ;;  %p5962_p8 = scmp.lt.s32.totalorder %s5953_s10, %s5953_s10 }
  0x2f   : > { %p5956_p0 = pnand %p5954_p13, %p6267_p7  ;;  %p5963_p9 = por %p5962_p8, %p5961_p5 }
  0x31   : > { %p5957_p2 = pneg %p5956_p0 }
  0x33   : > { %p5964_p10 = pnand %p5963_p9, %p5957_p2 }
  0x35   : > { %5967 = shalt.err (!%p5964_p10)
}
  0x36   : > { %s6164_s13 = smov [#allocation13]   ;;  %s6165_s15 = smov [#allocation8]  }
  0x37   : > { %5635 = dma.vmem_to_smem (!%p6259_p6), %s6263_s17, 16, %s6164_s13, [#allocation14]  }
  0x38   : > { %s257_s16 = sshll.u32 %s6165_s15, 4  ;;  %s6166_s14 = smov [#allocation11]   ;;  %s258_s16 = int_to_ptr.vmem [resolvable:$true] %s257_s16 }
  0x39   : > { %s283_s20 = sshll.u32 %s6166_s14, 4  ;;  %s5979_s23 = scalar_lea.vmem %s258_s16, 16384  ;;  %s284_s20 = int_to_ptr.vmem [resolvable:$true] %s283_s20 }
  0x3a   : > { %p5980_p11 = scmp.ne.s32.totalorder %s258_s16, %s5979_s23  ;;  %p5987_p0 = scmp.lt.s32.totalorder %s258_s16, %s258_s16 }
  0x3b   : > { %p5988_p5 = scmp.lt.s32.totalorder %s5979_s23, %s5979_s23 }
  0x3c   : > { %p5982_p12 = pnand %p5980_p11, %p6267_p7 }
  0x3d   : > { %p5989_p2 = por %p5988_p5, %p5987_p0 }
  0x3e   : > { %p5983_p13 = pneg %p5982_p12 }
  0x40   : > { %p5990_p8 = pnand %p5989_p2, %p5983_p13 }
  0x42   : > { %5993 = shalt.err (!%p5990_p8)
}
  0x43   : > { %s10248_s2 = sld [smem:[#allocation188_spill]]  ;;  %s297_s9 = sshll.u32 %s9908_s5, 4  ;;  %s298_s9 = int_to_ptr.vmem [resolvable:$true] %s297_s9 }
  0x44   : > { %s6005_s10 = scalar_lea.vmem %s284_s20, 32768  ;;  %p6013_p12 = scmp.lt.s32.totalorder %s284_s20, %s284_s20 }
  0x45   : > { %p6006_p9 = scmp.ne.s32.totalorder %s284_s20, %s6005_s10  ;;  %p6014_p13 = scmp.lt.s32.totalorder %s6005_s10, %s6005_s10 }
  0x47   : > { %p6008_p10 = pnand %p6006_p9, %p6267_p7  ;;  %p6015_p0 = por %p6014_p13, %p6013_p12 }
  0x49   : > { %5623 = dma.hbm_to_vmem [thread:$0]  (!%p6259_p6), %s10248_s2, 16384, %s258_s16, [#allocation7], %s9912_s21, %s9912_s21, %s9913_s22  }
  0x4a   : > { %p6009_p11 = pneg %p6008_p10 }
  0x4c   : > { %p6016_p5 = pnand %p6015_p0, %p6009_p11 }
  0x4e   : > { %6019 = shalt.err (!%p6016_p5)
}
  0x4f   : > { %5629 = dma.hbm_to_vmem [thread:$0]  (!%p6259_p6), %s9907_s4, 32768, %s284_s20, [#allocation10], %s9912_s21, %s9912_s21, %s9913_s22  }
  0x50   : > { %s6020_s16 = scalar_lea.vmem %s298_s9, 16  ;;  %p6028_p10 = scmp.lt.s32.totalorder %s298_s9, %s298_s9 }
  0x51   : > { %p6021_p2 = scmp.ne.s32.totalorder %s298_s9, %s6020_s16  ;;  %p6029_p12 = scmp.lt.s32.totalorder %s6020_s16, %s6020_s16 }
  0x53   : > { %p6023_p8 = pnand %p6021_p2, %p6267_p7  ;;  %p6030_p11 = por %p6029_p12, %p6028_p10 }
  0x55   : > { %p6024_p9 = pneg %p6023_p8 }
  0x57   : > { %p6031_p13 = pnand %p6030_p11, %p6024_p9 }
  0x59   : > { %6034 = shalt.err (!%p6031_p13)
}
  0x5a   : > { %s6167_s14 = smov [#allocation12]   ;;  %s319_s20 = sshll.u32 %s9910_s7, 4  ;;  %s320_s20 = int_to_ptr.vmem [resolvable:$true] %s319_s20 }
  0x5b   : > { %5632 = dma.vmem_to_smem (!%p6259_p6), %s298_s9, 16, %s6167_s14, [#allocation5]  }
  0x5c   : > { %s6035_s24 = scalar_lea.vmem %s320_s20, 16  ;;  %p6043_p8 = scmp.lt.s32.totalorder %s320_s20, %s320_s20 }
  0x5d   : > { %p6036_p0 = scmp.ne.s32.totalorder %s320_s20, %s6035_s24  ;;  %p6044_p4 = scmp.lt.s32.totalorder %s6035_s24, %s6035_s24 }
  0x5f   : > { %p6038_p5 = pnand %p6036_p0, %p6267_p7  ;;  %p6045_p10 = por %p6044_p4, %p6043_p8 }
  0x61   : > { %p6039_p2 = pneg %p6038_p5 }
  0x63   : > { %p6046_p9 = pnand %p6045_p10, %p6039_p2 }
  0x65   : > { %6049 = shalt.err (!%p6046_p9)
}
  0x66   : > { %s6168_s25 = smov [#allocation15]   ;;  %s5376_s19 = sadd.s32 4294967294, %s6158_s30  }
  0x67   : > { %5638 = dma.vmem_to_smem (!%p6259_p6), %s320_s20, 16, %s6168_s25, [#allocation14]  }
  0x68   : > { %s6336_s26 = sadd.s32 1, %s6158_s30   ;;  %s35_s18 = sadd.s32 1, %s6154_s29 }
  0x69   : > { %s32_s9 = ssub.s32 %s6158_s30, %s6336_s26  ;;  %p42_p4 = scmp.ne.s32.totalorder %s6154_s29, %s6150_s28 }
  0x6a   : > { %p33_p7 = scmp.eq.s32.totalorder %s32_s9, 0  ;;  %p43_p12 = scmp.eq.s32.totalorder %s6158_s30, 0 }
  0x6b   : > { %p48_p11 = scmp.ne.s32.totalorder %s6150_s28, %s6146_s27  ;;  %p219_p13 = scmp.eq.s32.totalorder %s6242_s11, 1 }
  0x6c   : > { %s6348_s10 = scalar_select %p33_p7, %s6154_s29, %s35_s18  }
  0x6d   : > { %p44_p0 = por %p43_p12, %p42_p4  ;;  %p6352_p5 = por %p9914_p1, %p48_p11 }
  0x6e   : > { %p6356_p6 = por %p219_p13, %p42_p4  ;;  %p225_p2 = scmp.eq.s32.totalorder %s5376_s19, 1 }
  0x6f   : > { %s10249_s13 = scalar_select %p6352_p5, 1, 0 }
  0x70   : > { %s10250_s15 = scalar_select %p6356_p6, 1, 0 }
  0x71   : > { %p5654_p8 = scmp.lt.s32.totalorder %s6158_s30, 2  ;;  %s330_s16 = sand.u32 1, %s6154_s29  }
  0x72   : > { %p6362_p10 = por %p225_p2, %p48_p11  ;;  %s5386_s23 = sshll.u32 %s330_s16, 7 }
  0x73   : > { %s5387_s17 = sshll.u32 %s6158_s30, 7  ;;  %s334_s18 = scalar_lea.vmem [#allocation2], %s5386_s23 }
  0x74   : > { %s10251_s14 = scalar_select %p6362_p10, 1, 0 }
  0x75   : > { %s6370_s25 = scalar_lea.hbm %s9903_s0, %s5387_s17  ;;  %s340_s9 = sshll.u32 %s334_s18, 4  ;;  %s6376_s9 = int_to_ptr.vmem [resolvable:$true] %s340_s9 }
  0x76   : > { %p6372_p9 = pnand %p5654_p8, %p44_p0  ;;  %s6378_s21 = scalar_lea.sflag [#allocation3], %s330_s16 }
  0x77   : > { %s6050_s22 = scalar_lea.hbm %s6370_s25, 2048  ;;  %s6055_s23 = scalar_lea.hbm %s9903_s0, 4096 }
  0x78   : > { %p6051_p4 = scmp.ne.s32.totalorder %s6370_s25, %s6050_s22  ;;  %p6052_p7 = pneg %p6372_p9 }
  0x79   : > { %p6056_p13 = scmp.lt.s32.totalorder %s6370_s25, %s9903_s0  ;;  %p6057_p0 = scmp.lt.s32.totalorder %s6055_s23, %s6050_s22 }
  0x7a   : > { %p6053_p12 = pnand %p6052_p7, %p6051_p4 }
  0x7b   : > { %p6058_p2 = por %p6057_p0, %p6056_p13 }
  0x7c   : > { %p6054_p11 = pneg %p6053_p12 }
  0x7e   : > { %p6059_p8 = pnand %p6058_p2, %p6054_p11 }
  0x80   : > { %6062 = shalt.err (!%p6059_p8)
}
  0x81   : > { %s6063_s16 = scalar_lea.vmem %s6376_s9, 2048  ;;  %s6169_s1 = smov [#allocation2]  }
  0x82   : > { %p6064_p1 = scmp.ne.s32.totalorder %s6376_s9, %s6063_s16  ;;  %s6068_s2 = sshll.u32 %s6169_s1, 4  ;;  %s6069_s2 = int_to_ptr.vmem [resolvable:$false] %s6068_s2 }
  0x83   : > { %s6070_s17 = scalar_lea.vmem %s6069_s2, 4096  ;;  %p6071_p12 = scmp.lt.s32.totalorder %s6376_s9, %s6069_s2 }
  0x84   : > { %p6066_p10 = pnand %p6064_p1, %p6052_p7  ;;  %p6072_p6 = scmp.lt.s32.totalorder %s6070_s17, %s6063_s16 }
  0x86   : > { %p6067_p4 = pneg %p6066_p10  ;;  %p6073_p5 = por %p6072_p6, %p6071_p12 }
  0x88   : > { %p6074_p3 = pnand %p6073_p5, %p6067_p4 }
  0x8a   : > { %6077 = shalt.err (!%p6074_p3)
}
  0x8b   : > { %s6170_s22 = smov 256   ;;  %s10253_s20 = smov 8  }
  0x8c   : > { %s10254_s23 = smov 128   ;;  %p10255_p1 = scmp.ne.s32.totalorder %s10244_s12, 0 }
  0x8d   : > { %5642 = dma.hbm_to_vmem [thread:$0]  (!%p6372_p9), %s6370_s25, 2048, %s6376_s9, %s6378_s21, %s6170_s22, %s10254_s23, %s10253_s20  }
  0x8e   : > { %352 = sbr.rel (%p10255_p1) target bundleno = 1254 (0x4e6), region = 52 }
  0x93   : > { %s6404_s1 = sand.u32 1, %s6150_s28   ;;  %p10256_p3 = scmp.ne.s32.totalorder %s10249_s13, 0 }
  0x94   : > { %s5389_s2 = sshll.u32 %s6404_s1, 7  ;;  %s355_s24 = scalar_lea.sflag [#allocation3], %s6404_s1 }
  0x95   : > { %s6410_s19 = scalar_lea.vmem [#allocation2], %s5389_s2 }
  0x96   : > { %6121 = dma.done.wait (%p10256_p3), %s355_s24, 2048  }
  0x97   : > { %6123 = vsyncadd (%p10256_p3), %s355_s24, 4294965248  ;;  %p10257_p5 = scmp.eq.s32.totalorder %s6242_s11, 0 }
  0x99   : > { %6125 = dma.done.wait (%p10257_p5), [#allocation7], 20480   ;;  %p10258_p6 = pmov %p10257_p5 }
  0x9a   : > { %p10259_p10 = pmov %p10257_p5 }
  0x9b   : > { %6127 = vsyncadd (%p10258_p6), [#allocation7], 4294946816 }
  0x9c   : > { %6129 = dma.done.wait (%p10259_p10), [#allocation10], 49152   ;;  %p10260_p9 = pmov %p10257_p5 }
  0x9d   : > { %p10261_p7 = pmov %p10257_p5 }
  0x9e   : > { %6131 = vsyncadd (%p10260_p9), [#allocation10], 4294918144 }
  0x9f   : > { %6133 = dma.done.wait (%p10261_p7), [#allocation5], 16   ;;  %p10262_p11 = pmov %p10257_p5 }
  0xa0   : > { %p10263_p13 = pmov %p10257_p5 }
  0xa1   : > { %6135 = vsyncadd (%p10262_p11), [#allocation5], 4294967280 }
  0xa2   : > { %6137 = dma.done.wait (%p10263_p13), [#allocation14], 32   ;;  %p10264_p0 = pmov %p10257_p5 }
  0xa4   : > { %6139 = vsyncadd (%p10264_p0), [#allocation14], 4294967264 }
  0xa5   : > { %391 = sfence }
  0xa6   : > { %v435_v0 = vld [vmem:[%s6410_s19 + $0x78] sm:$0xff]  ;;  %v434_v1 = vld [vmem:[%s6410_s19 + $0x70] sm:$0xff]  ;;  %v433_v2 = vld [vmem:[%s6410_s19 + $0x68] sm:$0xff]  ;;  %s694_s12 = sld [smem:[#allocation12]]  ;;  %v6171_v48 = vmov 1966171168   ;;  %v711_v50 = vlaneseq }
  0xa7   : > { %5473 = vmatprep.subr.mxu0 %v435_v0  ;;  %5553 = vmatprep.subr.mxu1 %v435_v0  ;;  %v432_v3 = vld [vmem:[%s6410_s19 + $0x60] sm:$0xff]  ;;  %v431_v4 = vld [vmem:[%s6410_s19 + $0x58] sm:$0xff]  ;;  %v430_v5 = vld [vmem:[%s6410_s19 + $0x50] sm:$0xff]  ;;  %s6448_s21 = sld [smem:[#allocation12 + $0x8]]  ;;  %v709_v49 = vunpack.c.l.s4 %v6171_v48  ;;  %vm2091_vm0 = vcmask 1041409   ;;  %vm2093_vm1 = vcmask 1042434  }
  0xa8   : > { %5474 = vmatpush3.msra.mxu0 %v435_v0  ;;  %5569 = vmatpush3.msra.mxu1 %v435_v0  ;;  %v429_v6 = vld [vmem:[%s6410_s19 + $0x48] sm:$0xff]  ;;  %v428_v7 = vld [vmem:[%s6410_s19 + $0x40] sm:$0xff]  ;;  %v427_v8 = vld [vmem:[%s6410_s19 + $0x38] sm:$0xff]  ;;  %s6450_s13 = sld [smem:[#allocation12 + $0x1]]  ;;  %v712_v52 = vshrl.u32 %v711_v50, 7  ;;  %vm2095_vm2 = vcmask 1043459  }
  0xa9   : > { %5475 = vmatprep.subr.mxu0 %v434_v1  ;;  %5554 = vmatprep.subr.mxu1 %v434_v1  ;;  %v426_v9 = vld [vmem:[%s6410_s19 + $0x30] sm:$0xff]  ;;  %v425_v10 = vld [vmem:[%s6410_s19 + $0x28] sm:$0xff]  ;;  %v424_v11 = vld [vmem:[%s6410_s19 + $0x20] sm:$0xff]  ;;  %s6452_s25 = sld [smem:[#allocation12 + $0x9]]  ;;  %v710_v51 = vunpack.c.0.s8 %v709_v49  ;;  %vm2097_vm3 = vcmask 1044484   ;;  %vm2099_vm4 = vcmask 1045509  }
  0xaa   : > { %5476 = vmatpush3.msra.mxu0 %v434_v1  ;;  %5570 = vmatpush3.msra.mxu1 %v434_v1  ;;  %v423_v12 = vld [vmem:[%s6410_s19 + $0x18] sm:$0xff]  ;;  %v422_v13 = vld [vmem:[%s6410_s19 + $0x10] sm:$0xff]  ;;  %v421_v14 = vld [vmem:[%s6410_s19 + $0x8] sm:$0xff]  ;;  %s6454_s9 = sld [smem:[#allocation12 + $0x2]]  ;;  %v6465_v60 = vsub.s32 0, %v712_v52  ;;  %vm2101_vm5 = vcmask 1046534  }
  0xab   : > { %5477 = vmatprep.subr.mxu0 %v433_v2  ;;  %5555 = vmatprep.subr.mxu1 %v433_v2  ;;  %v420_v15 = vld [vmem:[%s6410_s19] sm:$0xff]  ;;  %v437_v18 = vld [vmem:[#allocation6 + $0x8] sm:$0xff]  ;;  %v438_v20 = vld [vmem:[#allocation6 + $0x10] sm:$0xff]  ;;  %s693_s18 = sld [smem:[#allocation13]]  ;;  %v6461_v55 = vsub.s32 %v710_v51, %v712_v52  ;;  %vm2103_vm6 = vcmask 1047559   ;;  %p11335_p8 = scmp.ne.s32.totalorder %s10250_s15, 0 }
  0xac   : > { %5478 = vmatpush3.msra.mxu0 %v433_v2  ;;  %5571 = vmatpush3.msra.mxu1 %v433_v2  ;;  %v436_v16 = vld [vmem:[#allocation6] sm:$0xff]  ;;  %v453_v19 = vld [vmem:[#allocation6 + $0x88] sm:$0xff]  ;;  %v454_v21 = vld [vmem:[#allocation6 + $0x90] sm:$0xff]  ;;  %s6456_s16 = sld [smem:[#allocation12 + $0xa]]  ;;  %v695_v53 = vstv %s694_s12 }
  0xad   : > { %5479 = vmatprep.subr.mxu0 %v432_v3  ;;  %5556 = vmatprep.subr.mxu1 %v432_v3  ;;  %v452_v17 = vld [vmem:[#allocation6 + $0x80] sm:$0xff]  ;;  %v439_v22 = vld [vmem:[#allocation6 + $0x18] sm:$0xff]  ;;  %v441_v26 = vld [vmem:[#allocation6 + $0x28] sm:$0xff]  ;;  %s5408_s17 = sld [smem:[#allocation13 + $0x1]]  ;;  %v2961_v54 = vstv %s6448_s21 }
  0xae   : > { %5480 = vmatpush3.msra.mxu0 %v432_v3  ;;  %5572 = vmatpush3.msra.mxu1 %v432_v3  ;;  %v455_v23 = vld [vmem:[#allocation6 + $0x98] sm:$0xff]  ;;  %v440_v24 = vld [vmem:[#allocation6 + $0x20] sm:$0xff]  ;;  %v457_v27 = vld [vmem:[#allocation6 + $0xa8] sm:$0xff]  ;;  %s6459_s22 = sld [smem:[#allocation12 + $0x3]]  ;;  %v1078_v62 = vstv %s6450_s13 }
  0xaf   : > { %5481 = vmatprep.subr.mxu0 %v431_v4  ;;  %5557 = vmatprep.subr.mxu1 %v431_v4  ;;  %v456_v25 = vld [vmem:[#allocation6 + $0xa0] sm:$0xff]  ;;  %v442_v28 = vld [vmem:[#allocation6 + $0x30] sm:$0xff]  ;;  %v443_v30 = vld [vmem:[#allocation6 + $0x38] sm:$0xff]  ;;  %s6463_s20 = sld [smem:[#allocation12 + $0xb]]  ;;  %v3346_v63 = vstv %s6452_s25 }
  0xb0   : > { %5482 = vmatpush3.msra.mxu0 %v431_v4  ;;  %5573 = vmatpush3.msra.mxu1 %v431_v4  ;;  %v458_v29 = vld [vmem:[#allocation6 + $0xb0] sm:$0xff]  ;;  %v459_v31 = vld [vmem:[#allocation6 + $0xb8] sm:$0xff]  ;;  %v444_v32 = vld [vmem:[#allocation6 + $0x40] sm:$0xff]  ;;  %s7841_s23 = sld [smem:[#allocation12 + $0x4]] }
  0xb1   : > { %5483 = vmatprep.subr.mxu0 %v430_v5  ;;  %5558 = vmatprep.subr.mxu1 %v430_v5  ;;  %v460_v33 = vld [vmem:[#allocation6 + $0xc0] sm:$0xff]  ;;  %v445_v34 = vld [vmem:[#allocation6 + $0x48] sm:$0xff]  ;;  %v446_v36 = vld [vmem:[#allocation6 + $0x50] sm:$0xff]  ;;  %s7873_s24 = sld [smem:[#allocation12 + $0xc]] }
  0xb2   : > { %5484 = vmatpush3.msra.mxu0 %v430_v5  ;;  %5574 = vmatpush3.msra.mxu1 %v430_v5  ;;  %v461_v35 = vld [vmem:[#allocation6 + $0xc8] sm:$0xff]  ;;  %v462_v37 = vld [vmem:[#allocation6 + $0xd0] sm:$0xff]  ;;  %v447_v38 = vld [vmem:[#allocation6 + $0x58] sm:$0xff]  ;;  %s8209_s19 = sld [smem:[#allocation12 + $0x5]] }
  0xb3   : > { %5485 = vmatprep.subr.mxu0 %v429_v6  ;;  %5559 = vmatprep.subr.mxu1 %v429_v6  ;;  %v463_v39 = vld [vmem:[#allocation6 + $0xd8] sm:$0xff]  ;;  %v448_v40 = vld [vmem:[#allocation6 + $0x60] sm:$0xff]  ;;  %v449_v42 = vld [vmem:[#allocation6 + $0x68] sm:$0xff]  ;;  %s8315_s12 = sld [smem:[#allocation12 + $0xd]] }
  0xb4   : > { %5486 = vmatpush3.msra.mxu0 %v429_v6  ;;  %5575 = vmatpush3.msra.mxu1 %v429_v6  ;;  %v464_v41 = vld [vmem:[#allocation6 + $0xe0] sm:$0xff]  ;;  %v465_v43 = vld [vmem:[#allocation6 + $0xe8] sm:$0xff]  ;;  %v450_v44 = vld [vmem:[#allocation6 + $0x70] sm:$0xff]  ;;  %v6472_v6 = vstv %s693_s18  ;;  %s8515_s21 = sld [smem:[#allocation12 + $0x6]] }
  0xb5   : > { %5487 = vmatprep.subr.mxu0 %v428_v7  ;;  %5560 = vmatprep.subr.mxu1 %v428_v7  ;;  %v466_v45 = vld [vmem:[#allocation6 + $0xf0] sm:$0xff]  ;;  %v451_v46 = vld [vmem:[#allocation6 + $0x78] sm:$0xff]  ;;  %10265 = vst [vmem:[#allocation23_spill] sm:$0xff] %v6472_v6  ;;  %s8593_s13 = sld [smem:[#allocation12 + $0xe]] }
  0xb6   : > { %5488 = vmatpush3.msra.mxu0 %v428_v7  ;;  %5576 = vmatpush3.msra.mxu1 %v428_v7  ;;  %v467_v47 = vld [vmem:[#allocation6 + $0xf8] sm:$0xff]  ;;  %s8622_s25 = sld [smem:[#allocation12 + $0x7]] }
  0xb7   : > { %5489 = vmatprep.subr.mxu0 %v427_v8  ;;  %5561 = vmatprep.subr.mxu1 %v427_v8  ;;  %s9244_s18 = sld [smem:[#allocation15]] }
  0xb8   : > { %5490 = vmatpush3.msra.mxu0 %v427_v8  ;;  %5577 = vmatpush3.msra.mxu1 %v427_v8 }
  0xb9   : > { %5491 = vmatprep.subr.mxu0 %v426_v9  ;;  %5562 = vmatprep.subr.mxu1 %v426_v9 }
  0xba   : > { %5492 = vmatpush3.msra.mxu0 %v426_v9  ;;  %5578 = vmatpush3.msra.mxu1 %v426_v9 }
  0xbb   : > { %5493 = vmatprep.subr.mxu0 %v425_v10  ;;  %5563 = vmatprep.subr.mxu1 %v425_v10 }
  0xbc   : > { %5494 = vmatpush3.msra.mxu0 %v425_v10  ;;  %5579 = vmatpush3.msra.mxu1 %v425_v10 }
  0xbd   : > { %5495 = vmatprep.subr.mxu0 %v424_v11  ;;  %5564 = vmatprep.subr.mxu1 %v424_v11 }
  0xbe   : > { %5496 = vmatpush3.msra.mxu0 %v424_v11  ;;  %5580 = vmatpush3.msra.mxu1 %v424_v11 }
  0xbf   : > { %5497 = vmatprep.subr.mxu0 %v423_v12  ;;  %5565 = vmatprep.subr.mxu1 %v423_v12 }
  0xc0   : > { %5498 = vmatpush3.msra.mxu0 %v423_v12  ;;  %5581 = vmatpush3.msra.mxu1 %v423_v12 }
  0xc1   : > { %5499 = vmatprep.subr.mxu0 %v422_v13  ;;  %5566 = vmatprep.subr.mxu1 %v422_v13 }
  0xc2   : > { %5500 = vmatpush3.msra.mxu0 %v422_v13  ;;  %5582 = vmatpush3.msra.mxu1 %v422_v13 }
  0xc3   : > { %5501 = vmatprep.subr.mxu0 %v421_v14  ;;  %5567 = vmatprep.subr.mxu1 %v421_v14 }
  0xc4   : > { %5502 = vmatpush3.msra.mxu0 %v421_v14  ;;  %5583 = vmatpush3.msra.mxu1 %v421_v14 }
  0xc5   : > { %5503 = vmatprep.subr.mxu0 %v420_v15  ;;  %5568 = vmatprep.subr.mxu1 %v420_v15 }
  0xc6   : > { %5504 = vmatpush3.msra.mxu0 %v420_v15  ;;  %5584 = vmatpush3.msra.mxu1 %v420_v15  ;;  %v6479_v15 = vstv %s5408_s17  ;;  %s9415_s17 = sld [smem:[#allocation15 + $0x2]] }
  0xc7   : > { %5505 = vmatprep.mubr.f32.mxu0 %v436_v16  ;;  %5529 = vmatprep.mubr.f32.mxu1 %v452_v17  ;;  %10266 = vst [vmem:[#allocation24_spill] sm:$0xff] %v6479_v15 }
  0xc8   : > { %5506 = vmatmul.mubr.f32.vlgmr.msra.gmra.mxu0 %v437_v18  ;;  %5530 = vmatmul.mubr.f32.vlgmr.msra.gmra.mxu1 %v453_v19 }
  0xc9   : > { %5508 = vmatprep.mubr.f32.mxu0 %v438_v20  ;;  %5532 = vmatprep.mubr.f32.mxu1 %v454_v21 }
  0xcc   : > { %5509 = vmatmul.mubr.f32.gmra.mxu0 %v439_v22  ;;  %5533 = vmatmul.mubr.f32.gmra.mxu1 %v455_v23 }
  0xcd   : > { %5511 = vmatprep.mubr.f32.mxu0 %v440_v24  ;;  %5535 = vmatprep.mubr.f32.mxu1 %v456_v25 }
  0xd0   : > { %5512 = vmatmul.mubr.f32.gmra.mxu0 %v441_v26  ;;  %5536 = vmatmul.mubr.f32.gmra.mxu1 %v457_v27 }
  0xd1   : > { %5514 = vmatprep.mubr.f32.mxu0 %v442_v28  ;;  %5538 = vmatprep.mubr.f32.mxu1 %v458_v29 }
  0xd4   : > { %5515 = vmatmul.mubr.f32.gmra.mxu0 %v443_v30  ;;  %5539 = vmatmul.mubr.f32.gmra.mxu1 %v459_v31 }
  0xd5   : > { %5517 = vmatprep.mubr.f32.mxu0 %v444_v32  ;;  %5541 = vmatprep.mubr.f32.mxu1 %v460_v33 }
  0xd8   : > { %5518 = vmatmul.mubr.f32.gmra.mxu0 %v445_v34  ;;  %5542 = vmatmul.mubr.f32.gmra.mxu1 %v461_v35 }
  0xd9   : > { %5520 = vmatprep.mubr.f32.mxu0 %v446_v36  ;;  %5544 = vmatprep.mubr.f32.mxu1 %v462_v37 }
  0xdc   : > { %5521 = vmatmul.mubr.f32.gmra.mxu0 %v447_v38  ;;  %5545 = vmatmul.mubr.f32.gmra.mxu1 %v463_v39 }
  0xdd   : > { %5523 = vmatprep.mubr.f32.mxu0 %v448_v40  ;;  %5547 = vmatprep.mubr.f32.mxu1 %v464_v41 }
  0xe0   : > { %5524 = vmatmul.mubr.f32.gmra.mxu0 %v449_v42  ;;  %5548 = vmatmul.mubr.f32.gmra.mxu1 %v465_v43 }
  0xe1   : > { %5526 = vmatprep.mubr.f32.mxu0 %v450_v44  ;;  %5550 = vmatprep.mubr.f32.mxu1 %v466_v45 }
  0xe4   : > { %5527 = vmatmul.mubr.f32.gmra.mxu0 %v451_v46  ;;  %5551 = vmatmul.mubr.f32.gmra.mxu1 %v467_v47 }
 0x188   : > { %v5507_v56 = vpop.f32.mrf.mxu0  ;;  %v5531_v57 = vpop.f32.mrf.mxu1 }
 0x189   : > { %v697_v58 = vadd.f32 %v5507_v56, %v695_v53  ;;  %v2963_v59 = vadd.f32 %v5531_v57, %v2961_v54 }
 0x18a   : > { %v534_v61 = vpop.f32.mrf.mxu0  ;;  %v614_v14 = vpop.f32.mrf.mxu1 }
 0x18b   : > { %v756_v0 = vcombine.high %v697_v58, %v697_v58  ;;  %v763_v1 = vrot.slane %v697_v58, %v6461_v55  ;;  %v3022_v2 = vcombine.high %v2963_v59, %v2963_v59  ;;  %v3029_v3 = vrot.slane %v2963_v59, %v6461_v55 }
 0x18c   : > { %v696_v4 = vadd.f32 %v695_v53, %v534_v61  ;;  %v2962_v28 = vadd.f32 %v2961_v54, %v614_v14  ;;  %v5510_v41 = vpop.f32.mrf.mxu0  ;;  %v5534_v59 = vpop.f32.mrf.mxu1 }
 0x18d   : > { %v770_v8 = vrot.slane %v756_v0, %v6461_v55  ;;  %v771_v9 = vcombine.high %v763_v1, %v763_v1  ;;  %v779_v10 = vrot.slane %v763_v1, %v6461_v55  ;;  %v3036_v11 = vrot.slane %v3022_v2, %v6461_v55 }
 0x18e   : > { %v3037_v12 = vcombine.high %v3029_v3, %v3029_v3  ;;  %v3045_v13 = vrot.slane %v3029_v3, %v6461_v55  ;;  %v707_v26 = vcombine.high %v696_v4, %v696_v4  ;;  %v714_v27 = vrot.slane %v696_v4, %v6461_v55  ;;  %v544_v61 = vpop.f32.mrf.mxu0 }
 0x18f   : > { %v772_v17 = vcombine.high %v770_v8, %v770_v8  ;;  %v786_v18 = vrot.slane %v770_v8, %v6461_v55  ;;  %v793_v19 = vrot.slane %v771_v9, %v6461_v55  ;;  %v801_v20 = vcombine.high %v779_v10, %v779_v10 }
 0x190   : > { %v3038_v21 = vcombine.high %v3036_v11, %v3036_v11  ;;  %v3052_v22 = vrot.slane %v3036_v11, %v6461_v55  ;;  %v3059_v23 = vrot.slane %v3037_v12, %v6461_v55  ;;  %v6490_v30 = vrot.slane %v779_v10, %v6465_v60 }
 0x191   : > { %v800_v25 = vrot.slane %v772_v17, %v6461_v55  ;;  %v802_v29 = vcombine.high %v786_v18, %v786_v18  ;;  %v3067_v32 = vcombine.high %v3045_v13, %v3045_v13  ;;  %v803_v33 = vcombine.high %v793_v19, %v793_v19 }
 0x192   : > { %10267 = vst [vmem:[#allocation25_spill] sm:$0xff] %v6490_v30  ;;  %v3066_v31 = vrot.slane %v3038_v21, %v6461_v55  ;;  %v6494_v34 = vrot.slane %v793_v19, %v6465_v60  ;;  %v6497_v35 = vrot.slane %v801_v20, %v6465_v60  ;;  %v6500_v36 = vrot.slane %v786_v18, %v6465_v60 }
 0x193   : > { %v3068_v37 = vcombine.high %v3052_v22, %v3052_v22  ;;  %v3069_v38 = vcombine.high %v3059_v23, %v3059_v23  ;;  %v6503_v40 = vrot.slane %v3045_v13, %v6465_v60  ;;  %v804_v42 = vcombine.high %v800_v25, %v800_v25 }
 0x194   : > { %10268 = vst [vmem:[#allocation26_spill] sm:$0xff] %v6494_v34  ;;  %10269 = vst [vmem:[#allocation27_spill] sm:$0xff] %v6497_v35  ;;  %v3070_v39 = vcombine.high %v3066_v31, %v3066_v31  ;;  %v6506_v43 = vrot.slane %v3059_v23, %v6465_v60  ;;  %v6509_v44 = vrot.slane %v3067_v32, %v6465_v60 }
 0x195   : > { %10270 = vst [vmem:[#allocation28_spill] sm:$0xff] %v6500_v36  ;;  %v6512_v45 = vrot.slane %v3052_v22, %v6465_v60  ;;  %v6515_v46 = vrot.slane %v3069_v38, %v6465_v60  ;;  %v6518_v47 = vrot.slane %v3066_v31, %v6465_v60  ;;  %v6521_v48 = vrot.slane %v3068_v37, %v6465_v60 }
 0x196   : > { %10271 = vst [vmem:[#allocation29_spill] sm:$0xff] %v6509_v44  ;;  %v6524_v49 = vrot.slane %v3070_v39, %v6465_v60  ;;  %v721_v50 = vrot.slane %v707_v26, %v6461_v55  ;;  %v722_v51 = vcombine.high %v714_v27, %v714_v27  ;;  %v730_v52 = vrot.slane %v714_v27, %v6461_v55 }
 0x197   : > { %10272 = vst [vmem:[#allocation30_spill] sm:$0xff] %v6512_v45  ;;  %10273 = vst [vmem:[#allocation31_spill] sm:$0xff] %v6515_v46  ;;  %v2973_v53 = vcombine.high %v2962_v28, %v2962_v28  ;;  %v6529_v54 = vrot.slane %v803_v33, %v6465_v60  ;;  %v6532_v56 = vrot.slane %v800_v25, %v6465_v60 }
 0x198   : > { %10274 = vst [vmem:[#allocation32_spill] sm:$0xff] %v6518_v47  ;;  %10275 = vst [vmem:[#allocation33_spill] sm:$0xff] %v6521_v48  ;;  %v6535_v57 = vrot.slane %v802_v29, %v6465_v60  ;;  %v2980_v58 = vrot.slane %v2962_v28, %v6461_v55  ;;  %v723_v0 = vcombine.high %v721_v50, %v721_v50 }
 0x199   : > { %10276 = vst [vmem:[#allocation34_spill] sm:$0xff] %v6524_v49  ;;  %10277 = vst [vmem:[#allocation35_spill] sm:$0xff] %v6532_v56  ;;  %v737_v1 = vrot.slane %v721_v50, %v6461_v55  ;;  %v744_v2 = vrot.slane %v722_v51, %v6461_v55  ;;  %v752_v3 = vcombine.high %v730_v52, %v730_v52 }
 0x19a   : > { %10278 = vst [vmem:[#allocation36_spill] sm:$0xff] %v6535_v57  ;;  %v6541_v4 = vrot.slane %v804_v42, %v6465_v60  ;;  %v2987_v8 = vrot.slane %v2973_v53, %v6461_v55  ;;  %v2988_v9 = vcombine.high %v2980_v58, %v2980_v58  ;;  %v2996_v10 = vrot.slane %v2980_v58, %v6461_v55 }
 0x19b   : > { %v751_v11 = vrot.slane %v723_v0, %v6461_v55  ;;  %v1080_v12 = vadd.f32 %v5510_v41, %v1078_v62  ;;  %v3348_v13 = vadd.f32 %v5534_v59, %v3346_v63  ;;  %v6552_v14 = vadd.f32 %v1078_v62, %v544_v61 }
 0x19c   : > { %10279 = vst [vmem:[#allocation37_spill] sm:$0xff] %v6541_v4  ;;  %v753_v17 = vcombine.high %v737_v1, %v737_v1  ;;  %v6555_v18 = vrot.slane %v730_v52, %v6465_v60  ;;  %v2989_v19 = vcombine.high %v2987_v8, %v2987_v8  ;;  %v3003_v20 = vrot.slane %v2987_v8, %v6461_v55 }
 0x19d   : > { %v754_v21 = vcombine.high %v744_v2, %v744_v2  ;;  %v6559_v22 = vrot.slane %v744_v2, %v6465_v60  ;;  %v6562_v23 = vrot.slane %v752_v3, %v6465_v60  ;;  %v6565_v25 = vrot.slane %v737_v1, %v6465_v60 }
 0x19e   : > { %v3010_v62 = vrot.slane %v2988_v9, %v6461_v55  ;;  %v3017_v26 = vrot.slane %v2989_v19, %v6461_v55  ;;  %v3018_v27 = vcombine.high %v2996_v10, %v2996_v10  ;;  %v3019_v28 = vcombine.high %v3003_v20, %v3003_v20 }
 0x19f   : > { %v755_v29 = vcombine.high %v751_v11, %v751_v11  ;;  %v6570_v31 = vrot.slane %v2996_v10, %v6465_v60  ;;  %v6573_v32 = vrot.slane %v3003_v20, %v6465_v60  ;;  %v1138_v33 = vcombine.high %v1080_v12, %v1080_v12 }
 0x1a0   : > { %v3020_v37 = vcombine.high %v3010_v62, %v3010_v62  ;;  %v3021_v38 = vcombine.high %v3017_v26, %v3017_v26  ;;  %v6576_v39 = vrot.slane %v3010_v62, %v6465_v60  ;;  %v6579_v41 = vrot.slane %v3018_v27, %v6465_v60 }
 0x1a1   : > { %v6582_v42 = vrot.slane %v3017_v26, %v6465_v60  ;;  %v6585_v50 = vrot.slane %v3019_v28, %v6465_v60  ;;  %v1145_v51 = vrot.slane %v1080_v12, %v6461_v55  ;;  %v1152_v52 = vrot.slane %v1138_v33, %v6461_v55 }
 0x1a2   : > { %v6590_v53 = vrot.slane %v3020_v37, %v6465_v60  ;;  %v6593_v58 = vrot.slane %v3021_v38, %v6465_v60  ;;  %v3406_v59 = vcombine.high %v3348_v13, %v3348_v13  ;;  %v3413_v61 = vrot.slane %v3348_v13, %v6461_v55 }
 0x1a3   : > { %10280 = vst [vmem:[#allocation38_spill] sm:$0xff] %v6585_v50  ;;  %v1153_v0 = vcombine.high %v1145_v51, %v1145_v51  ;;  %v1154_v1 = vcombine.high %v1152_v52, %v1152_v52  ;;  %v1161_v2 = vrot.slane %v1145_v51, %v6461_v55  ;;  %v1168_v3 = vrot.slane %v1152_v52, %v6461_v55 }
 0x1a4   : > { %10281 = vst [vmem:[#allocation39_spill] sm:$0xff] %v6593_v58  ;;  %v6599_v8 = vrot.slane %v754_v21, %v6465_v60  ;;  %v6602_v9 = vrot.slane %v751_v11, %v6465_v60  ;;  %v3420_v10 = vrot.slane %v3406_v59, %v6461_v55  ;;  %v3421_v12 = vcombine.high %v3413_v61, %v3413_v61 }
 0x1a5   : > { %v1175_v19 = vrot.slane %v1153_v0, %v6461_v55  ;;  %v1182_v20 = vrot.slane %v1154_v1, %v6461_v55  ;;  %v1183_v13 = vcombine.high %v1161_v2, %v1161_v2  ;;  %v3429_v62 = vrot.slane %v3413_v61, %v6461_v55 }
 0x1a6   : > { %v6609_v26 = vrot.slane %v753_v17, %v6465_v60  ;;  %v6612_v27 = vrot.slane %v755_v29, %v6465_v60  ;;  %v3422_v21 = vcombine.high %v3420_v10, %v3420_v10  ;;  %v3436_v11 = vrot.slane %v3420_v10, %v6461_v55 }
 0x1a7   : > { %v1184_v28 = vcombine.high %v1168_v3, %v1168_v3  ;;  %v6616_v33 = vrot.slane %v1161_v2, %v6465_v60  ;;  %v6619_v37 = vrot.slane %v1168_v3, %v6465_v60  ;;  %v1089_v38 = vcombine.high %v6552_v14, %v6552_v14  ;;  %v624_v2 = vpop.f32.mrf.mxu1 }
 0x1a8   : > { %10282 = vst [vmem:[#allocation40_spill] sm:$0xff] %v6609_v26  ;;  %v1185_v51 = vcombine.high %v1175_v19, %v1175_v19  ;;  %v1186_v52 = vcombine.high %v1182_v20, %v1182_v20  ;;  %v3443_v17 = vrot.slane %v3421_v12, %v6461_v55  ;;  %v3450_v29 = vrot.slane %v3422_v21, %v6461_v55  ;;  %v5513_v21 = vpop.f32.mrf.mxu0 }
 0x1a9   : > { %10283 = vst [vmem:[#allocation41_spill] sm:$0xff] %v6616_v33  ;;  %10284 = vst [vmem:[#allocation42_spill] sm:$0xff] %v6619_v37  ;;  %v6626_v59 = vrot.slane %v1175_v19, %v6465_v60  ;;  %v6629_v61 = vrot.slane %v1183_v13, %v6465_v60  ;;  %v3451_v0 = vcombine.high %v3429_v62, %v3429_v62 }
 0x1aa   : > { %v3452_v1 = vcombine.high %v3436_v11, %v3436_v11  ;;  %v3453_v3 = vcombine.high %v3443_v17, %v3443_v17  ;;  %v3454_v10 = vcombine.high %v3450_v29, %v3450_v29  ;;  %v6632_v24 = vrot.slane %v3429_v62, %v6465_v60 }
 0x1ab   : > { %10285 = vst [vmem:[#allocation43_spill] sm:$0xff] %v6626_v59  ;;  %10286 = vst [vmem:[#allocation44_spill] sm:$0xff] %v6629_v61  ;;  %v6635_v12 = vrot.slane %v3443_v17, %v6465_v60  ;;  %v6638_v19 = vrot.slane %v3451_v0, %v6465_v60  ;;  %v6641_v13 = vrot.slane %v3436_v11, %v6465_v60  ;;  %v888_v59 = vld [vmem:[#allocation8 + $0x18] sm:$0xff] }
 0x1ac   : > { %10287 = vst [vmem:[#allocation45_spill] sm:$0xff] %v6632_v24  ;;  %v6644_v16 = vrot.slane %v3450_v29, %v6465_v60  ;;  %v6647_v7 = vrot.slane %v3452_v1, %v6465_v60  ;;  %v6650_v5 = vrot.slane %v3453_v3, %v6465_v60  ;;  %v6653_v62 = vrot.slane %v3454_v10, %v6465_v60 }
 0x1ad   : > { %10288 = vst [vmem:[#allocation46_spill] sm:$0xff] %v6635_v12  ;;  %10289 = vst [vmem:[#allocation47_spill] sm:$0xff] %v6638_v19  ;;  %v1096_v17 = vrot.slane %v6552_v14, %v6461_v55  ;;  %v1103_v0 = vrot.slane %v1089_v38, %v6461_v55  ;;  %v6659_v11 = vrot.slane %v1182_v20, %v6465_v60  ;;  %v10300_v12 = vstv %s6456_s16 }
 0x1ae   : > { %10290 = vst [vmem:[#allocation48_spill] sm:$0xff] %v6641_v13  ;;  %10291 = vst [vmem:[#allocation49_spill] sm:$0xff] %v6644_v16  ;;  %v6662_v29 = vrot.slane %v1184_v28, %v6465_v60  ;;  %v3347_v1 = vadd.f32 %v3346_v63, %v624_v2  ;;  %v5537_v16 = vpop.f32.mrf.mxu1  ;;  %v554_v13 = vpop.f32.mrf.mxu0  ;;  %v6673_v20 = vrot.slane %v1185_v51, %v6465_v60 }
 0x1af   : > { %10292 = vst [vmem:[#allocation50_spill] sm:$0xff] %v6647_v7  ;;  %10293 = vst [vmem:[#allocation51_spill] sm:$0xff] %v6650_v5  ;;  %v10297_v7 = vstv %s6454_s9  ;;  %v1104_v10 = vcombine.high %v1096_v17, %v1096_v17  ;;  %v1112_v14 = vrot.slane %v1096_v17, %v6461_v55  ;;  %v1119_v38 = vrot.slane %v1103_v0, %v6461_v55 }
 0x1b0   : > { %10294 = vst [vmem:[#allocation52_spill] sm:$0xff] %v6653_v62  ;;  %10295 = vst [vmem:[#allocation53_spill] sm:$0xff] %v6659_v11  ;;  %v6668_v3 = vadd.f32 %v5513_v21, %v10297_v7  ;;  %v1105_v62 = vcombine.high %v1103_v0, %v1103_v0  ;;  %v6676_v28 = vrot.slane %v1186_v52, %v6465_v60  ;;  %v982_v7 = vld [vmem:[#allocation9 + $0x8] sm:$0xff]  ;;  %v10301_v52 = vstv %s6454_s9  ;;  %s8628_s9 = sld [smem:[#allocation12 + $0xf]] }
 0x1b1   : > { %10296 = vst [vmem:[#allocation54_spill] sm:$0xff] %v6662_v29  ;;  %10298 = vst [vmem:[#allocation55_spill] sm:$0xff] %v6673_v20  ;;  %v3357_v63 = vcombine.high %v3347_v1, %v3347_v1  ;;  %v3364_v2 = vrot.slane %v3347_v1, %v6461_v55  ;;  %v1126_v21 = vrot.slane %v1104_v10, %v6461_v55 }
 0x1b2   : > { %10299 = vst [vmem:[#allocation56_spill] sm:$0xff] %v6676_v28  ;;  %v1133_v5 = vrot.slane %v1105_v62, %v6461_v55  ;;  %v1134_v19 = vcombine.high %v1112_v14, %v1112_v14  ;;  %v6683_v17 = vadd.f32 %v5537_v16, %v10300_v12  ;;  %v704_v51 = vmul.f32 %v6472_v6, %v6668_v3  ;;  %v914_v6 = vld [vmem:[#allocation8 + $0xe8] sm:$0xff] }
 0x1b3   : > { %v3371_v0 = vrot.slane %v3357_v63, %v6461_v55  ;;  %v3372_v24 = vcombine.high %v3364_v2, %v3364_v2  ;;  %v6690_v28 = vadd.f32 %v10301_v52, %v554_v13  ;;  %v1135_v29 = vcombine.high %v1119_v38, %v1119_v38 }
 0x1b4   : > { %v6693_v1 = vrot.slane %v1112_v14, %v6465_v60  ;;  %v6696_v10 = vrot.slane %v1119_v38, %v6465_v60  ;;  %v6699_v62 = vmul.f32 %v982_v7, %v6668_v3  ;;  %v1136_v16 = vcombine.high %v1126_v21, %v1126_v21 }
 0x1b5   : > { %10302 = vst [vmem:[#allocation57_spill] sm:$0xff] %v6690_v28  ;;  %v1137_v12 = vcombine.high %v1133_v5, %v1133_v5  ;;  %v3373_v63 = vcombine.high %v3371_v0, %v3371_v0  ;;  %v3380_v11 = vrot.slane %v3364_v2, %v6461_v55  ;;  %v6703_v37 = vrot.slane %v1126_v21, %v6465_v60  ;;  %v886_v2 = vld [vmem:[#allocation8 + $0x8] sm:$0xff] }
 0x1b6   : > { %10303 = vst [vmem:[#allocation58_spill] sm:$0xff] %v6693_v1  ;;  %10304 = vst [vmem:[#allocation59_spill] sm:$0xff] %v6696_v10  ;;  %v6706_v13 = vrot.slane %v1134_v19, %v6465_v60  ;;  %v3387_v14 = vrot.slane %v3371_v0, %v6461_v55  ;;  %v3394_v52 = vrot.slane %v3372_v24, %v6461_v55  ;;  %v890_v21 = vld [vmem:[#allocation8 + $0x28] sm:$0xff]  ;;  %v892_v24 = vld [vmem:[#allocation8 + $0x38] sm:$0xff] }
 0x1b7   : > { %10305 = vst [vmem:[#allocation60_spill] sm:$0xff] %v6703_v37  ;;  %v6711_v38 = vrot.slane %v1133_v5, %v6465_v60  ;;  %v3401_v7 = vrot.slane %v3373_v63, %v6461_v55  ;;  %v3402_v20 = vcombine.high %v3380_v11, %v3380_v11  ;;  %v6715_v61 = vrot.slane %v3380_v11, %v6465_v60  ;;  %v894_v5 = vld [vmem:[#allocation8 + $0x48] sm:$0xff]  ;;  %v900_v37 = vld [vmem:[#allocation8 + $0x78] sm:$0xff] }
 0x1b8   : > { %10306 = vst [vmem:[#allocation61_spill] sm:$0xff] %v6706_v13  ;;  %v3403_v33 = vcombine.high %v3387_v14, %v3387_v14  ;;  %v3404_v10 = vcombine.high %v3394_v52, %v3394_v52  ;;  %v6718_v19 = vrot.slane %v3394_v52, %v6465_v60  ;;  %v6721_v0 = vrot.slane %v3387_v14, %v6465_v60  ;;  %v898_v13 = vld [vmem:[#allocation8 + $0x68] sm:$0xff]  ;;  %v912_v1 = vld [vmem:[#allocation8 + $0xd8] sm:$0xff] }
 0x1b9   : > { %10307 = vst [vmem:[#allocation62_spill] sm:$0xff] %v6711_v38  ;;  %10308 = vst [vmem:[#allocation63_spill] sm:$0xff] %v6715_v61  ;;  %v896_v38 = vld [vmem:[#allocation8 + $0x58] sm:$0xff]  ;;  %v6724_v55 = vrot.slane %v1135_v29, %v6465_v60  ;;  %v3405_v63 = vcombine.high %v3401_v7, %v3401_v7  ;;  %v6727_v11 = vrot.slane %v3402_v20, %v6465_v60  ;;  %v902_v52 = vld [vmem:[#allocation8 + $0x88] sm:$0xff] }
 0x1ba   : > { %10309 = vst [vmem:[#allocation64_spill] sm:$0xff] %v6718_v19  ;;  %10310 = vst [vmem:[#allocation65_spill] sm:$0xff] %v6721_v0  ;;  %v6730_v61 = vrot.slane %v3401_v7, %v6465_v60  ;;  %v6733_v19 = vrot.slane %v1136_v16, %v6465_v60  ;;  %v6736_v14 = vrot.slane %v1137_v12, %v6465_v60  ;;  %v904_v20 = vld [vmem:[#allocation8 + $0x98] sm:$0xff] }
 0x1bb   : > { %10311 = vst [vmem:[#allocation66_spill] sm:$0xff] %v6724_v55  ;;  %10312 = vst [vmem:[#allocation67_spill] sm:$0xff] %v6727_v11  ;;  %v6739_v0 = vrot.slane %v3404_v10, %v6465_v60  ;;  %v6742_v29 = vrot.slane %v3403_v33, %v6465_v60  ;;  %v906_v11 = vld [vmem:[#allocation8 + $0xa8] sm:$0xff]  ;;  %v908_v55 = vld [vmem:[#allocation8 + $0xb8] sm:$0xff]  ;;  %v6745_v7 = vrot.slane %v3405_v63, %v6465_v60 }
 0x1bc   : > { %10313 = vst [vmem:[#allocation68_spill] sm:$0xff] %v6730_v61  ;;  %10314 = vst [vmem:[#allocation69_spill] sm:$0xff] %v6733_v19  ;;  %v910_v61 = vld [vmem:[#allocation8 + $0xc8] sm:$0xff]  ;;  %v918_v16 = vadd.f32 %v886_v2, %v704_v51  ;;  %v920_v19 = vadd.f32 %v888_v59, %v704_v51  ;;  %v922_v28 = vadd.f32 %v890_v21, %v704_v51  ;;  %v916_v12 = vld [vmem:[#allocation8 + $0xf8] sm:$0xff] }
 0x1bd   : > { %10315 = vst [vmem:[#allocation70_spill] sm:$0xff] %v6736_v14  ;;  %10316 = vst [vmem:[#allocation71_spill] sm:$0xff] %v6739_v0  ;;  %v924_v14 = vadd.f32 %v892_v24, %v704_v51  ;;  %v926_v49 = vadd.f32 %v894_v5, %v704_v51  ;;  %v928_v10 = vadd.f32 %v896_v38, %v704_v51  ;;  %v984_v21 = vld [vmem:[#allocation9 + $0x18] sm:$0xff]  ;;  %v986_v24 = vld [vmem:[#allocation9 + $0x28] sm:$0xff] }
 0x1be   : > { %10317 = vst [vmem:[#allocation72_spill] sm:$0xff] %v6742_v29  ;;  %10318 = vst [vmem:[#allocation73_spill] sm:$0xff] %v6745_v7  ;;  %v930_v0 = vadd.f32 %v898_v13, %v704_v51  ;;  %v932_v48 = vadd.f32 %v900_v37, %v704_v51  ;;  %v934_v33 = vadd.f32 %v902_v52, %v704_v51  ;;  %v988_v5 = vld [vmem:[#allocation9 + $0x38] sm:$0xff] }
 0x1bf   : > { %v936_v29 = vadd.f32 %v904_v20, %v704_v51  ;;  %v938_v47 = vadd.f32 %v906_v11, %v704_v51  ;;  %v940_v45 = vadd.f32 %v908_v55, %v704_v51  ;;  %v942_v46 = vadd.f32 %v910_v61, %v704_v51  ;;  %v996_v52 = vld [vmem:[#allocation9 + $0x78] sm:$0xff]  ;;  %v998_v20 = vld [vmem:[#allocation9 + $0x88] sm:$0xff] }
 0x1c0   : > { %v944_v44 = vadd.f32 %v912_v1, %v704_v51  ;;  %v946_v60 = vadd.f32 %v914_v6, %v704_v51  ;;  %v948_v63 = vadd.f32 %v916_v12, %v704_v51  ;;  %v950_v7 = vmul.f32 %v918_v16, %v6555_v18  ;;  %v990_v1 = vld [vmem:[#allocation9 + $0x48] sm:$0xff]  ;;  %v992_v6 = vld [vmem:[#allocation9 + $0x58] sm:$0xff] }
 0x1c1   : > { %v952_v2 = vmul.f32 %v920_v19, %v6559_v22  ;;  %v954_v59 = vmul.f32 %v922_v28, %v6562_v23  ;;  %v956_v13 = vmul.f32 %v924_v14, %v6599_v8  ;;  %v958_v37 = vmul.f32 %v926_v49, %v6565_v25  ;;  %v994_v51 = vld [vmem:[#allocation9 + $0x68] sm:$0xff]  ;;  %v1000_v14 = vld [vmem:[#allocation9 + $0x98] sm:$0xff] }
 0x1c2   : > { %v960_v38 = vmul.f32 %v928_v10, %v6602_v9  ;;  %v962_v61 = vmul.f32 %v930_v0, %v6609_v26  ;;  %v964_v55 = vmul.f32 %v932_v48, %v6612_v27  ;;  %v966_v19 = vmul.f32 %v934_v33, %v6490_v30  ;;  %v1002_v10 = vld [vmem:[#allocation9 + $0xa8] sm:$0xff]  ;;  %v1004_v26 = vld [vmem:[#allocation9 + $0xb8] sm:$0xff] }
 0x1c3   : > { %v968_v28 = vmul.f32 %v936_v29, %v6494_v34  ;;  %v970_v11 = vmul.f32 %v938_v47, %v6497_v35  ;;  %v972_v49 = vmul.f32 %v940_v45, %v6529_v54  ;;  %v974_v16 = vmul.f32 %v942_v46, %v6500_v36  ;;  %v1006_v48 = vld [vmem:[#allocation9 + $0xc8] sm:$0xff]  ;;  %v1008_v30 = vld [vmem:[#allocation9 + $0xd8] sm:$0xff] }
 0x1c4   : > { %v976_v0 = vmul.f32 %v944_v44, %v6532_v56  ;;  %v978_v12 = vmul.f32 %v946_v60, %v6535_v57  ;;  %v980_v33 = vmul.f32 %v948_v63, %v6541_v4  ;;  %v1010_v29 = vld [vmem:[#allocation9 + $0xe8] sm:$0xff]  ;;  %v1012_v34 = vld [vmem:[#allocation9 + $0xf8] sm:$0xff]  ;;  %v1016_v47 = vmul.f32 %v984_v21, %v6668_v3 }
 0x1c5   : > { %v1018_v35 = vmul.f32 %v986_v24, %v6668_v3  ;;  %v1020_v45 = vmul.f32 %v988_v5, %v6668_v3  ;;  %v1022_v46 = vmul.f32 %v990_v1, %v6668_v3  ;;  %v1024_v44 = vmul.f32 %v992_v6, %v6668_v3 }
 0x1c6   : > { %v1026_v60 = vmul.f32 %v994_v51, %v6668_v3  ;;  %v1028_v57 = vmul.f32 %v996_v52, %v6668_v3  ;;  %v1030_v56 = vmul.f32 %v998_v20, %v6668_v3  ;;  %v1032_v63 = vmul.f32 %v1000_v14, %v6668_v3 }
 0x1c7   : > { %v1034_v4 = vmul.f32 %v1002_v10, %v6668_v3  ;;  %v1036_v21 = vmul.f32 %v1004_v26, %v6668_v3  ;;  %v1038_v24 = vmul.f32 %v1006_v48, %v6668_v3  ;;  %v1040_v5 = vmul.f32 %v1008_v30, %v6668_v3  ;;  %v3250_v10 = vld [vmem:[#allocation9 + $0x208] sm:$0xff] }
 0x1c8   : > { %v1042_v1 = vmul.f32 %v1010_v29, %v6668_v3  ;;  %v1044_v6 = vmul.f32 %v1012_v34, %v6668_v3  ;;  %v6779_v51 = vadd.f32 %v6699_v62, %v950_v7  ;;  %v6781_v52 = vadd.f32 %v1016_v47, %v952_v2  ;;  %v3153_v29 = vld [vmem:[#allocation8 + $0x208] sm:$0xff]  ;;  %v3155_v34 = vld [vmem:[#allocation8 + $0x218] sm:$0xff] }
 0x1c9   : > { %v6783_v20 = vadd.f32 %v1018_v35, %v954_v59  ;;  %v6785_v14 = vadd.f32 %v1020_v45, %v956_v13  ;;  %v6787_v36 = vadd.f32 %v1022_v46, %v958_v37  ;;  %v6789_v26 = vadd.f32 %v1024_v44, %v960_v38  ;;  %v3157_v3 = vld [vmem:[#allocation8 + $0x228] sm:$0xff]  ;;  %v3159_v62 = vld [vmem:[#allocation8 + $0x238] sm:$0xff] }
 0x1ca   : > { %10319 = vst [vmem:[#allocation74_spill] sm:$0xff] %v6779_v51  ;;  %10320 = vst [vmem:[#allocation75_spill] sm:$0xff] %v6781_v52  ;;  %v6791_v48 = vadd.f32 %v1026_v60, %v962_v61  ;;  %v6793_v30 = vadd.f32 %v1028_v57, %v964_v55  ;;  %v3252_v7 = vld [vmem:[#allocation9 + $0x218] sm:$0xff]  ;;  %v3254_v2 = vld [vmem:[#allocation9 + $0x228] sm:$0xff]  ;;  %v6795_v35 = vadd.f32 %v1030_v56, %v966_v19 }
 0x1cb   : > { %10321 = vst [vmem:[#allocation76_spill] sm:$0xff] %v6783_v20  ;;  %10322 = vst [vmem:[#allocation77_spill] sm:$0xff] %v6785_v14  ;;  %v3256_v47 = vld [vmem:[#allocation9 + $0x238] sm:$0xff]  ;;  %v6797_v59 = vadd.f32 %v1032_v63, %v968_v28  ;;  %v6799_v13 = vadd.f32 %v1034_v4, %v970_v11  ;;  %v6801_v37 = vadd.f32 %v1036_v21, %v972_v49  ;;  %v3258_v38 = vld [vmem:[#allocation9 + $0x248] sm:$0xff] }
 0x1cc   : > { %10323 = vst [vmem:[#allocation78_spill] sm:$0xff] %v6787_v36  ;;  %10324 = vst [vmem:[#allocation79_spill] sm:$0xff] %v6789_v26  ;;  %v3260_v61 = vld [vmem:[#allocation9 + $0x258] sm:$0xff]  ;;  %v3262_v45 = vld [vmem:[#allocation9 + $0x268] sm:$0xff]  ;;  %v6803_v57 = vadd.f32 %v1038_v24, %v974_v16  ;;  %v6805_v55 = vadd.f32 %v1040_v5, %v976_v0  ;;  %v6807_v46 = vadd.f32 %v1042_v1, %v978_v12 }
 0x1cd   : > { %10325 = vst [vmem:[#allocation80_spill] sm:$0xff] %v6791_v48  ;;  %10326 = vst [vmem:[#allocation81_spill] sm:$0xff] %v6793_v30  ;;  %v2970_v44 = vmul.f32 %v6479_v15, %v6683_v17  ;;  %v3161_v56 = vld [vmem:[#allocation8 + $0x248] sm:$0xff]  ;;  %v3163_v19 = vld [vmem:[#allocation8 + $0x258] sm:$0xff]  ;;  %v6811_v60 = vadd.f32 %v1044_v6, %v980_v33  ;;  %v6814_v63 = vmul.f32 %v3250_v10, %v6683_v17 }
 0x1ce   : > { %10327 = vst [vmem:[#allocation82_spill] sm:$0xff] %v6795_v35  ;;  %10328 = vst [vmem:[#allocation83_spill] sm:$0xff] %v6797_v59  ;;  %v3165_v28 = vld [vmem:[#allocation8 + $0x268] sm:$0xff]  ;;  %v3167_v4 = vld [vmem:[#allocation8 + $0x278] sm:$0xff]  ;;  %v6817_v16 = vmul.f32 %v3252_v7, %v6683_v17  ;;  %v6820_v0 = vmul.f32 %v3254_v2, %v6683_v17  ;;  %v3288_v5 = vmul.f32 %v3256_v47, %v6683_v17 }
 0x1cf   : > { %10329 = vst [vmem:[#allocation84_spill] sm:$0xff] %v6799_v13  ;;  %10330 = vst [vmem:[#allocation85_spill] sm:$0xff] %v6801_v37  ;;  %v3169_v11 = vld [vmem:[#allocation8 + $0x288] sm:$0xff]  ;;  %v3171_v49 = vld [vmem:[#allocation8 + $0x298] sm:$0xff]  ;;  %v3290_v33 = vmul.f32 %v3258_v38, %v6683_v17  ;;  %v3292_v1 = vmul.f32 %v3260_v61, %v6683_v17  ;;  %v3294_v6 = vmul.f32 %v3262_v45, %v6683_v17 }
 0x1d0   : > { %10331 = vst [vmem:[#allocation86_spill] sm:$0xff] %v6803_v57  ;;  %10332 = vst [vmem:[#allocation87_spill] sm:$0xff] %v6805_v55  ;;  %v3173_v12 = vld [vmem:[#allocation8 + $0x2a8] sm:$0xff]  ;;  %v3175_v21 = vld [vmem:[#allocation8 + $0x2b8] sm:$0xff]  ;;  %v3185_v55 = vadd.f32 %v3153_v29, %v2970_v44  ;;  %v3187_v7 = vadd.f32 %v3155_v34, %v2970_v44  ;;  %v3189_v57 = vadd.f32 %v3157_v3, %v2970_v44 }
 0x1d1   : > { %10333 = vst [vmem:[#allocation88_spill] sm:$0xff] %v6807_v46  ;;  %10334 = vst [vmem:[#allocation89_spill] sm:$0xff] %v6811_v60  ;;  %v3177_v24 = vld [vmem:[#allocation8 + $0x2c8] sm:$0xff]  ;;  %v3179_v60 = vld [vmem:[#allocation8 + $0x2d8] sm:$0xff]  ;;  %v3191_v37 = vadd.f32 %v3159_v62, %v2970_v44  ;;  %v3193_v2 = vadd.f32 %v3161_v56, %v2970_v44  ;;  %v3195_v13 = vadd.f32 %v3163_v19, %v2970_v44 }
 0x1d2   : > { %v3181_v10 = vld [vmem:[#allocation8 + $0x2e8] sm:$0xff]  ;;  %v3183_v46 = vld [vmem:[#allocation8 + $0x2f8] sm:$0xff]  ;;  %v3197_v59 = vadd.f32 %v3165_v28, %v2970_v44  ;;  %v3199_v35 = vadd.f32 %v3167_v4, %v2970_v44  ;;  %v3201_v30 = vadd.f32 %v3169_v11, %v2970_v44  ;;  %v3203_v48 = vadd.f32 %v3171_v49, %v2970_v44  ;;  %v10339_v52 = vld [vmem:[#allocation33_spill] sm:$0xff] }
 0x1d3   : > { %v3205_v47 = vadd.f32 %v3173_v12, %v2970_v44  ;;  %v3207_v26 = vadd.f32 %v3175_v21, %v2970_v44  ;;  %v3209_v38 = vadd.f32 %v3177_v24, %v2970_v44  ;;  %v3211_v36 = vadd.f32 %v3179_v60, %v2970_v44  ;;  %v3264_v3 = vld [vmem:[#allocation9 + $0x278] sm:$0xff]  ;;  %v3266_v62 = vld [vmem:[#allocation9 + $0x288] sm:$0xff] }
 0x1d4   : > { %v3213_v61 = vadd.f32 %v3181_v10, %v2970_v44  ;;  %v3215_v14 = vadd.f32 %v3183_v46, %v2970_v44  ;;  %v3217_v45 = vmul.f32 %v3185_v55, %v6570_v31  ;;  %v3219_v20 = vmul.f32 %v3187_v7, %v6576_v39  ;;  %v3268_v4 = vld [vmem:[#allocation9 + $0x298] sm:$0xff]  ;;  %v3270_v46 = vld [vmem:[#allocation9 + $0x2a8] sm:$0xff] }
 0x1d5   : > { %v3221_v29 = vmul.f32 %v3189_v57, %v6579_v41  ;;  %v3223_v34 = vmul.f32 %v3191_v37, %v6590_v53  ;;  %v3225_v56 = vmul.f32 %v3193_v2, %v6573_v32  ;;  %v3227_v19 = vmul.f32 %v3195_v13, %v6582_v42  ;;  %v3272_v44 = vld [vmem:[#allocation9 + $0x2b8] sm:$0xff]  ;;  %v10335_v57 = vld [vmem:[#allocation29_spill] sm:$0xff]  ;;  %v10336_v37 = vld [vmem:[#allocation31_spill] sm:$0xff] }
 0x1d6   : > { %v3229_v28 = vmul.f32 %v3197_v59, %v6585_v50  ;;  %v3231_v60 = vmul.f32 %v3199_v35, %v6593_v58  ;;  %v3233_v55 = vmul.f32 %v3201_v30, %v6503_v40  ;;  %v3235_v11 = vmul.f32 %v3203_v48, %v6506_v43  ;;  %v3274_v21 = vld [vmem:[#allocation9 + $0x2c8] sm:$0xff]  ;;  %v3276_v24 = vld [vmem:[#allocation9 + $0x2d8] sm:$0xff] }
 0x1d7   : > { %v3237_v49 = vmul.f32 %v3205_v47, %v10335_v57  ;;  %v3239_v12 = vmul.f32 %v3207_v26, %v10336_v37  ;;  %v3278_v10 = vld [vmem:[#allocation9 + $0x2e8] sm:$0xff]  ;;  %v10337_v7 = vld [vmem:[#allocation30_spill] sm:$0xff]  ;;  %v3245_v35 = vmul.f32 %v3213_v61, %v10339_v52  ;;  %v3296_v30 = vmul.f32 %v3264_v3, %v6683_v17 }
 0x1d8   : > { %v3241_v13 = vmul.f32 %v3209_v38, %v10337_v7  ;;  %v10338_v2 = vld [vmem:[#allocation32_spill] sm:$0xff]  ;;  %v10340_v51 = vld [vmem:[#allocation34_spill] sm:$0xff]  ;;  %v3298_v48 = vmul.f32 %v3266_v62, %v6683_v17  ;;  %v3300_v47 = vmul.f32 %v3268_v4, %v6683_v17  ;;  %v3302_v26 = vmul.f32 %v3270_v46, %v6683_v17 }
 0x1d9   : > { %v3243_v59 = vmul.f32 %v3211_v36, %v10338_v2  ;;  %v3247_v58 = vmul.f32 %v3215_v14, %v10340_v51  ;;  %v3280_v50 = vld [vmem:[#allocation9 + $0x2f8] sm:$0xff]  ;;  %v3304_v37 = vmul.f32 %v3272_v44, %v6683_v17  ;;  %v3306_v57 = vmul.f32 %v3274_v21, %v6683_v17 }
 0x1da   : > { %v3308_v38 = vmul.f32 %v3276_v24, %v6683_v17  ;;  %v3310_v36 = vmul.f32 %v3278_v10, %v6683_v17  ;;  %v3312_v61 = vmul.f32 %v3280_v50, %v6683_v17  ;;  %v6852_v14 = vadd.f32 %v6814_v63, %v3217_v45  ;;  %v885_v24 = vld [vmem:[#allocation8] sm:$0xff]  ;;  %v887_v10 = vld [vmem:[#allocation8 + $0x10] sm:$0xff] }
 0x1db   : > { %v6855_v3 = vadd.f32 %v6817_v16, %v3219_v20  ;;  %v6858_v62 = vadd.f32 %v6820_v0, %v3221_v29  ;;  %v6860_v4 = vadd.f32 %v3288_v5, %v3223_v34  ;;  %v6862_v46 = vadd.f32 %v3290_v33, %v3225_v56  ;;  %v889_v50 = vld [vmem:[#allocation8 + $0x20] sm:$0xff]  ;;  %v891_v17 = vld [vmem:[#allocation8 + $0x30] sm:$0xff] }
 0x1dc   : > { %10341 = vst [vmem:[#allocation30_spill] sm:$0xff] %v6852_v14  ;;  %v6864_v44 = vadd.f32 %v3292_v1, %v3227_v19  ;;  %v6866_v21 = vadd.f32 %v3294_v6, %v3229_v28  ;;  %v981_v63 = vld [vmem:[#allocation9] sm:$0xff]  ;;  %v983_v45 = vld [vmem:[#allocation9 + $0x10] sm:$0xff]  ;;  %v6868_v20 = vadd.f32 %v3296_v30, %v3231_v60  ;;  %v6870_v16 = vadd.f32 %v3298_v48, %v3233_v55 }
 0x1dd   : > { %10342 = vst [vmem:[#allocation32_spill] sm:$0xff] %v6855_v3  ;;  %10343 = vst [vmem:[#allocation33_spill] sm:$0xff] %v6858_v62  ;;  %v985_v14 = vld [vmem:[#allocation9 + $0x20] sm:$0xff]  ;;  %v6872_v0 = vadd.f32 %v3300_v47, %v3235_v11  ;;  %v6874_v5 = vadd.f32 %v3302_v26, %v3237_v49  ;;  %v987_v33 = vld [vmem:[#allocation9 + $0x30] sm:$0xff]  ;;  %v6876_v6 = vadd.f32 %v3304_v37, %v3239_v12 }
 0x1de   : > { %10344 = vst [vmem:[#allocation34_spill] sm:$0xff] %v6860_v4  ;;  %10345 = vst [vmem:[#allocation90_spill] sm:$0xff] %v6862_v46  ;;  %v989_v1 = vld [vmem:[#allocation9 + $0x40] sm:$0xff]  ;;  %v991_v29 = vld [vmem:[#allocation9 + $0x50] sm:$0xff]  ;;  %v6878_v34 = vadd.f32 %v3306_v57, %v3241_v13  ;;  %v6880_v56 = vadd.f32 %v3308_v38, %v3243_v59  ;;  %v6884_v48 = vadd.f32 %v3310_v36, %v3245_v35 }
 0x1df   : > { %10346 = vst [vmem:[#allocation91_spill] sm:$0xff] %v6864_v44  ;;  %10347 = vst [vmem:[#allocation92_spill] sm:$0xff] %v6866_v21  ;;  %v10355_v19 = vld [vmem:[#allocation57_spill] sm:$0xff]  ;;  %v10356_v28 = vld [vmem:[#allocation23_spill] sm:$0xff]  ;;  %v6886_v11 = vadd.f32 %v3312_v61, %v3247_v58 }
 0x1e0   : > { %10348 = vst [vmem:[#allocation93_spill] sm:$0xff] %v6868_v20  ;;  %10349 = vst [vmem:[#allocation94_spill] sm:$0xff] %v6870_v16  ;;  %v703_v21 = vmul.f32 %v10356_v28, %v10355_v19  ;;  %v893_v60 = vld [vmem:[#allocation8 + $0x40] sm:$0xff]  ;;  %v895_v30 = vld [vmem:[#allocation8 + $0x50] sm:$0xff]  ;;  %v6889_v37 = vmul.f32 %v981_v63, %v10355_v19  ;;  %v6892_v57 = vmul.f32 %v983_v45, %v10355_v19 }
 0x1e1   : > { %10350 = vst [vmem:[#allocation95_spill] sm:$0xff] %v6872_v0  ;;  %10351 = vst [vmem:[#allocation96_spill] sm:$0xff] %v6874_v5  ;;  %v897_v55 = vld [vmem:[#allocation8 + $0x60] sm:$0xff]  ;;  %v899_v49 = vld [vmem:[#allocation8 + $0x70] sm:$0xff]  ;;  %v6895_v38 = vmul.f32 %v985_v14, %v10355_v19  ;;  %v6898_v35 = vmul.f32 %v987_v33, %v10355_v19  ;;  %v6901_v58 = vmul.f32 %v989_v1, %v10355_v19 }
 0x1e2   : > { %10352 = vst [vmem:[#allocation97_spill] sm:$0xff] %v6876_v6  ;;  %10353 = vst [vmem:[#allocation98_spill] sm:$0xff] %v6878_v34  ;;  %v901_v47 = vld [vmem:[#allocation8 + $0x80] sm:$0xff]  ;;  %v903_v26 = vld [vmem:[#allocation8 + $0x90] sm:$0xff]  ;;  %v6904_v36 = vmul.f32 %v991_v29, %v10355_v19  ;;  %v917_v45 = vadd.f32 %v885_v24, %v703_v21  ;;  %v923_v34 = vadd.f32 %v891_v17, %v703_v21 }
 0x1e3   : > { %10354 = vst [vmem:[#allocation99_spill] sm:$0xff] %v6880_v56  ;;  %10357 = vst [vmem:[#allocation57_spill] sm:$0xff] %v6884_v48  ;;  %v905_v12 = vld [vmem:[#allocation8 + $0xa0] sm:$0xff]  ;;  %v907_v13 = vld [vmem:[#allocation8 + $0xb0] sm:$0xff]  ;;  %v919_v48 = vadd.f32 %v887_v10, %v703_v21  ;;  %v921_v56 = vadd.f32 %v889_v50, %v703_v21  ;;  %v925_v6 = vadd.f32 %v893_v60, %v703_v21  ;;  %v634_v60 = vpop.f32.mrf.mxu1 }
 0x1e4   : > { %10358 = vst [vmem:[#allocation23_spill] sm:$0xff] %v6886_v11  ;;  %v909_v59 = vld [vmem:[#allocation8 + $0xc0] sm:$0xff]  ;;  %v911_v61 = vld [vmem:[#allocation8 + $0xd0] sm:$0xff]  ;;  %v927_v5 = vadd.f32 %v895_v30, %v703_v21  ;;  %v929_v14 = vadd.f32 %v897_v55, %v703_v21  ;;  %v931_v0 = vadd.f32 %v899_v49, %v703_v21  ;;  %v933_v16 = vadd.f32 %v901_v47, %v703_v21  ;;  %v10359_v49 = vld [vmem:[#allocation40_spill] sm:$0xff] }
 0x1e5   : > { %v913_v63 = vld [vmem:[#allocation8 + $0xe0] sm:$0xff]  ;;  %v915_v11 = vld [vmem:[#allocation8 + $0xf0] sm:$0xff]  ;;  %v935_v33 = vadd.f32 %v903_v26, %v703_v21  ;;  %v937_v20 = vadd.f32 %v905_v12, %v703_v21  ;;  %v939_v44 = vadd.f32 %v907_v13, %v703_v21  ;;  %v941_v1 = vadd.f32 %v909_v59, %v703_v21 }
 0x1e6   : > { %v943_v46 = vadd.f32 %v911_v61, %v703_v21  ;;  %v945_v4 = vadd.f32 %v913_v63, %v703_v21  ;;  %v947_v29 = vadd.f32 %v915_v11, %v703_v21  ;;  %v949_v62 = vmul.f32 %v917_v45, %v6555_v18  ;;  %v993_v50 = vld [vmem:[#allocation9 + $0x60] sm:$0xff]  ;;  %v995_v17 = vld [vmem:[#allocation9 + $0x70] sm:$0xff]  ;;  %v10365_v63 = vld [vmem:[#allocation36_spill] sm:$0xff] }
 0x1e7   : > { %v951_v3 = vmul.f32 %v919_v48, %v6559_v22  ;;  %v953_v24 = vmul.f32 %v921_v56, %v6562_v23  ;;  %v955_v10 = vmul.f32 %v923_v34, %v6599_v8  ;;  %v957_v30 = vmul.f32 %v925_v6, %v6565_v25  ;;  %v997_v21 = vld [vmem:[#allocation9 + $0x80] sm:$0xff]  ;;  %v999_v11 = vld [vmem:[#allocation9 + $0x90] sm:$0xff]  ;;  %v10361_v48 = vld [vmem:[#allocation26_spill] sm:$0xff] }
 0x1e8   : > { %v959_v55 = vmul.f32 %v927_v5, %v6602_v9  ;;  %v961_v47 = vmul.f32 %v929_v14, %v10359_v49  ;;  %v963_v26 = vmul.f32 %v931_v0, %v6612_v27  ;;  %v1001_v18 = vld [vmem:[#allocation9 + $0xa0] sm:$0xff]  ;;  %v10360_v12 = vld [vmem:[#allocation25_spill] sm:$0xff]  ;;  %v967_v23 = vmul.f32 %v935_v33, %v10361_v48  ;;  %v10363_v6 = vld [vmem:[#allocation28_spill] sm:$0xff] }
 0x1e9   : > { %v965_v22 = vmul.f32 %v933_v16, %v10360_v12  ;;  %v10362_v56 = vld [vmem:[#allocation27_spill] sm:$0xff]  ;;  %v971_v34 = vmul.f32 %v939_v44, %v6529_v54  ;;  %v1003_v13 = vld [vmem:[#allocation9 + $0xb0] sm:$0xff]  ;;  %v973_v9 = vmul.f32 %v941_v1, %v10363_v6  ;;  %v977_v27 = vmul.f32 %v945_v4, %v10365_v63  ;;  %v5516_v44 = vpop.f32.mrf.mxu0  ;;  %v5540_v12 = vpop.f32.mrf.mxu1 }
 0x1ea   : > { %v969_v8 = vmul.f32 %v937_v20, %v10362_v56  ;;  %v1005_v59 = vld [vmem:[#allocation9 + $0xc0] sm:$0xff]  ;;  %v1007_v25 = vld [vmem:[#allocation9 + $0xd0] sm:$0xff]  ;;  %v1025_v16 = vmul.f32 %v993_v50, %v10355_v19  ;;  %v1027_v33 = vmul.f32 %v995_v17, %v10355_v19  ;;  %v1029_v20 = vmul.f32 %v997_v21, %v10355_v19 }
 0x1eb   : > { %v10364_v5 = vld [vmem:[#allocation35_spill] sm:$0xff]  ;;  %v10366_v0 = vld [vmem:[#allocation37_spill] sm:$0xff]  ;;  %v1031_v54 = vmul.f32 %v999_v11, %v10355_v19  ;;  %v1033_v1 = vmul.f32 %v1001_v18, %v10355_v19  ;;  %v1037_v4 = vmul.f32 %v1005_v59, %v10355_v19  ;;  %v6933_v17 = vadd.f32 %v6889_v37, %v949_v62  ;;  %v644_v59 = vpop.f32.mrf.mxu1 }
 0x1ec   : > { %v975_v61 = vmul.f32 %v943_v46, %v10364_v5  ;;  %v979_v45 = vmul.f32 %v947_v29, %v10366_v0  ;;  %v1009_v14 = vld [vmem:[#allocation9 + $0xe0] sm:$0xff]  ;;  %v1011_v49 = vld [vmem:[#allocation9 + $0xf0] sm:$0xff]  ;;  %v1035_v46 = vmul.f32 %v1003_v13, %v10355_v19  ;;  %v1039_v29 = vmul.f32 %v1007_v25, %v10355_v19 }
 0x1ed   : > { %v1041_v48 = vmul.f32 %v1009_v14, %v10355_v19  ;;  %v1043_v50 = vmul.f32 %v1011_v49, %v10355_v19  ;;  %10367 = vst [vmem:[#allocation40_spill] sm:$0xff] %v6933_v17  ;;  %v6936_v21 = vadd.f32 %v6892_v57, %v951_v3  ;;  %v6939_v11 = vadd.f32 %v6895_v38, %v953_v24  ;;  %v3152_v57 = vld [vmem:[#allocation8 + $0x200] sm:$0xff]  ;;  %v564_v24 = vpop.f32.mrf.mxu0  ;;  %v3255_v25 = vld [vmem:[#allocation9 + $0x230] sm:$0xff] }
 0x1ee   : > { %v6942_v18 = vadd.f32 %v6898_v35, %v955_v10  ;;  %v6945_v56 = vadd.f32 %v6901_v58, %v957_v30  ;;  %v6948_v13 = vadd.f32 %v6904_v36, %v959_v55  ;;  %v6950_v19 = vadd.f32 %v1025_v16, %v961_v47  ;;  %v3249_v38 = vld [vmem:[#allocation9 + $0x200] sm:$0xff]  ;;  %v3154_v55 = vld [vmem:[#allocation8 + $0x210] sm:$0xff] }
 0x1ef   : > { %10368 = vst [vmem:[#allocation25_spill] sm:$0xff] %v6936_v21  ;;  %10369 = vst [vmem:[#allocation26_spill] sm:$0xff] %v6939_v11  ;;  %v6952_v62 = vadd.f32 %v1027_v33, %v963_v26  ;;  %v6954_v37 = vadd.f32 %v1029_v20, %v965_v22  ;;  %v6956_v3 = vadd.f32 %v1031_v54, %v967_v23  ;;  %v10380_v36 = vstv %s6456_s16  ;;  %v3156_v47 = vld [vmem:[#allocation8 + $0x220] sm:$0xff]  ;;  %v3158_v26 = vld [vmem:[#allocation8 + $0x230] sm:$0xff]  ;;  %s9339_s16 = scalar_lea.vmem [#allocation16], %s5389_s2  ;;  %s9354_s2 = sld [smem:[#allocation15 + $0x1]] }
 0x1f0   : > { %10370 = vst [vmem:[#allocation27_spill] sm:$0xff] %v6942_v18  ;;  %10371 = vst [vmem:[#allocation28_spill] sm:$0xff] %v6945_v56  ;;  %v6958_v35 = vadd.f32 %v1033_v1, %v969_v8  ;;  %v6960_v58 = vadd.f32 %v1035_v46, %v971_v34  ;;  %v6962_v10 = vadd.f32 %v1037_v4, %v973_v9  ;;  %v3251_v22 = vld [vmem:[#allocation9 + $0x210] sm:$0xff]  ;;  %v3253_v23 = vld [vmem:[#allocation9 + $0x220] sm:$0xff]  ;;  %v10385_v20 = vstv %s6463_s20  ;;  %s9560_s20 = sld [smem:[#allocation15 + $0x4]] }
 0x1f1   : > { %10372 = vst [vmem:[#allocation35_spill] sm:$0xff] %v6948_v13  ;;  %10373 = vst [vmem:[#allocation36_spill] sm:$0xff] %v6950_v19  ;;  %v6966_v30 = vadd.f32 %v10380_v36, %v634_v60  ;;  %v6968_v6 = vadd.f32 %v1039_v29, %v975_v61  ;;  %v6970_v8 = vadd.f32 %v1041_v48, %v977_v27  ;;  %v3257_v9 = vld [vmem:[#allocation9 + $0x240] sm:$0xff]  ;;  %v3259_v5 = vld [vmem:[#allocation9 + $0x250] sm:$0xff]  ;;  %v10384_v60 = vstv %s6459_s22  ;;  %s9473_s22 = sld [smem:[#allocation15 + $0x3]] }
 0x1f2   : > { %10374 = vst [vmem:[#allocation37_spill] sm:$0xff] %v6952_v62  ;;  %10375 = vst [vmem:[#allocation100_spill] sm:$0xff] %v6954_v37  ;;  %v6972_v34 = vadd.f32 %v1043_v50, %v979_v45  ;;  %v3261_v63 = vld [vmem:[#allocation9 + $0x260] sm:$0xff]  ;;  %v6976_v0 = vadd.f32 %v5516_v44, %v10384_v60  ;;  %v3162_v16 = vld [vmem:[#allocation8 + $0x250] sm:$0xff]  ;;  %v6982_v54 = vadd.f32 %v5540_v12, %v10385_v20  ;;  %v10386_v61 = vmov %v10384_v60 }
 0x1f3   : > { %10376 = vst [vmem:[#allocation101_spill] sm:$0xff] %v6956_v3  ;;  %10377 = vst [vmem:[#allocation102_spill] sm:$0xff] %v6958_v35  ;;  %v2969_v14 = vmul.f32 %v6479_v15, %v6966_v30  ;;  %v3160_v49 = vld [vmem:[#allocation8 + $0x240] sm:$0xff]  ;;  %v6986_v27 = vadd.f32 %v10386_v61, %v564_v24  ;;  %v10387_v45 = vmov %v10385_v20  ;;  %v3166_v46 = vld [vmem:[#allocation8 + $0x270] sm:$0xff]  ;;  %v6993_v44 = vmul.f32 %v3249_v38, %v6966_v30 }
 0x1f4   : > { %10378 = vst [vmem:[#allocation103_spill] sm:$0xff] %v6960_v58  ;;  %10379 = vst [vmem:[#allocation104_spill] sm:$0xff] %v6962_v10  ;;  %v3164_v33 = vld [vmem:[#allocation8 + $0x260] sm:$0xff]  ;;  %v6990_v1 = vadd.f32 %v10387_v45, %v644_v59  ;;  %v3170_v29 = vld [vmem:[#allocation8 + $0x290] sm:$0xff]  ;;  %v6996_v48 = vmul.f32 %v3251_v22, %v6966_v30  ;;  %v6999_v50 = vmul.f32 %v3253_v23, %v6966_v30 }
 0x1f5   : > { %10381 = vst [vmem:[#allocation105_spill] sm:$0xff] %v6968_v6  ;;  %10382 = vst [vmem:[#allocation106_spill] sm:$0xff] %v6970_v8  ;;  %v3168_v4 = vld [vmem:[#allocation8 + $0x280] sm:$0xff]  ;;  %v7002_v12 = vmul.f32 %v3255_v25, %v6966_v30  ;;  %v3174_v36 = vld [vmem:[#allocation8 + $0x2b0] sm:$0xff]  ;;  %v3184_v59 = vadd.f32 %v3152_v57, %v2969_v14  ;;  %v3289_v20 = vmul.f32 %v3257_v9, %v6966_v30 }
 0x1f6   : > { %10383 = vst [vmem:[#allocation107_spill] sm:$0xff] %v6972_v34  ;;  %10388 = vst [vmem:[#allocation108_spill] sm:$0xff] %v6990_v1  ;;  %v3172_v24 = vld [vmem:[#allocation8 + $0x2a0] sm:$0xff]  ;;  %v3291_v61 = vmul.f32 %v3259_v5, %v6966_v30  ;;  %v3293_v38 = vmul.f32 %v3261_v63, %v6966_v30  ;;  %v3178_v45 = vld [vmem:[#allocation8 + $0x2d0] sm:$0xff]  ;;  %v3186_v34 = vadd.f32 %v3154_v55, %v2969_v14 }
 0x1f7   : > { %v3176_v60 = vld [vmem:[#allocation8 + $0x2c0] sm:$0xff]  ;;  %v3182_v22 = vld [vmem:[#allocation8 + $0x2f0] sm:$0xff]  ;;  %v3188_v8 = vadd.f32 %v3156_v47, %v2969_v14  ;;  %v3190_v23 = vadd.f32 %v3158_v26, %v2969_v14  ;;  %v3192_v6 = vadd.f32 %v3160_v49, %v2969_v14  ;;  %v3194_v10 = vadd.f32 %v3162_v16, %v2969_v14  ;;  %v1414_v56 = vld [vmem:[#allocation9 + $0x188] sm:$0xff] }
 0x1f8   : > { %v3180_v1 = vld [vmem:[#allocation8 + $0x2e0] sm:$0xff]  ;;  %v3196_v25 = vadd.f32 %v3164_v33, %v2969_v14  ;;  %v3198_v58 = vadd.f32 %v3166_v46, %v2969_v14  ;;  %v3200_v35 = vadd.f32 %v3168_v4, %v2969_v14  ;;  %v3202_v3 = vadd.f32 %v3170_v29, %v2969_v14  ;;  %v3263_v49 = vld [vmem:[#allocation9 + $0x270] sm:$0xff]  ;;  %v10389_v4 = vld [vmem:[#allocation38_spill] sm:$0xff] }
 0x1f9   : > { %v3204_v37 = vadd.f32 %v3172_v24, %v2969_v14  ;;  %v3206_v57 = vadd.f32 %v3174_v36, %v2969_v14  ;;  %v3208_v62 = vadd.f32 %v3176_v60, %v2969_v14  ;;  %v3210_v9 = vadd.f32 %v3178_v45, %v2969_v14  ;;  %v3265_v16 = vld [vmem:[#allocation9 + $0x280] sm:$0xff]  ;;  %v3267_v33 = vld [vmem:[#allocation9 + $0x290] sm:$0xff] }
 0x1fa   : > { %v3212_v19 = vadd.f32 %v3180_v1, %v2969_v14  ;;  %v3214_v5 = vadd.f32 %v3182_v22, %v2969_v14  ;;  %v3216_v63 = vmul.f32 %v3184_v59, %v6570_v31  ;;  %v3218_v13 = vmul.f32 %v3186_v34, %v6576_v39  ;;  %v10390_v24 = vld [vmem:[#allocation39_spill] sm:$0xff]  ;;  %v3271_v36 = vld [vmem:[#allocation9 + $0x2b0] sm:$0xff] }
 0x1fb   : > { %v3220_v55 = vmul.f32 %v3188_v8, %v6579_v41  ;;  %v3222_v47 = vmul.f32 %v3190_v23, %v6590_v53  ;;  %v3224_v26 = vmul.f32 %v3192_v6, %v6573_v32  ;;  %v3226_v46 = vmul.f32 %v3194_v10, %v6582_v42  ;;  %v3269_v31 = vld [vmem:[#allocation9 + $0x2a0] sm:$0xff]  ;;  %v10391_v8 = vld [vmem:[#allocation29_spill] sm:$0xff] }
 0x1fc   : > { %v3228_v29 = vmul.f32 %v3196_v25, %v10389_v4  ;;  %v3230_v1 = vmul.f32 %v3198_v58, %v10390_v24  ;;  %v3232_v14 = vmul.f32 %v3200_v35, %v6503_v40  ;;  %v3273_v39 = vld [vmem:[#allocation9 + $0x2c0] sm:$0xff]  ;;  %v3234_v41 = vmul.f32 %v3202_v3, %v6506_v43  ;;  %v3275_v60 = vld [vmem:[#allocation9 + $0x2d0] sm:$0xff]  ;;  %v1269_v25 = vld [vmem:[#allocation8 + $0x108] sm:$0xff] }
 0x1fd   : > { %v3236_v53 = vmul.f32 %v3204_v37, %v10391_v8  ;;  %v10392_v34 = vld [vmem:[#allocation31_spill] sm:$0xff]  ;;  %v3240_v6 = vmul.f32 %v3208_v62, %v10337_v7  ;;  %v3279_v42 = vld [vmem:[#allocation9 + $0x2f0] sm:$0xff]  ;;  %v3242_v10 = vmul.f32 %v3210_v9, %v10338_v2  ;;  %v3244_v58 = vmul.f32 %v3212_v19, %v10339_v52  ;;  %v1279_v24 = vld [vmem:[#allocation8 + $0x158] sm:$0xff] }
 0x1fe   : > { %v3238_v32 = vmul.f32 %v3206_v57, %v10392_v34  ;;  %v3277_v59 = vld [vmem:[#allocation9 + $0x2e0] sm:$0xff]  ;;  %v3246_v40 = vmul.f32 %v3214_v5, %v10340_v51  ;;  %v3295_v35 = vmul.f32 %v3263_v49, %v6966_v30  ;;  %v3297_v45 = vmul.f32 %v3265_v16, %v6966_v30  ;;  %v1275_v49 = vld [vmem:[#allocation8 + $0x138] sm:$0xff]  ;;  %v1402_v16 = vld [vmem:[#allocation9 + $0x128] sm:$0xff] }
 0x1ff   : > { %v3299_v43 = vmul.f32 %v3267_v33, %v6966_v30  ;;  %v3301_v37 = vmul.f32 %v3269_v31, %v6966_v30  ;;  %v3303_v3 = vmul.f32 %v3271_v36, %v6966_v30  ;;  %v3305_v7 = vmul.f32 %v3273_v39, %v6966_v30  ;;  %v1283_v31 = vld [vmem:[#allocation8 + $0x178] sm:$0xff]  ;;  %v1285_v36 = vld [vmem:[#allocation8 + $0x188] sm:$0xff] }
 0x200   : > { %v3307_v62 = vmul.f32 %v3275_v60, %v6966_v30  ;;  %v3309_v2 = vmul.f32 %v3277_v59, %v6966_v30  ;;  %v3311_v52 = vmul.f32 %v3279_v42, %v6966_v30  ;;  %v7033_v51 = vadd.f32 %v6993_v44, %v3216_v63  ;;  %v1271_v44 = vld [vmem:[#allocation8 + $0x118] sm:$0xff]  ;;  %v1273_v63 = vld [vmem:[#allocation8 + $0x128] sm:$0xff] }
 0x201   : > { %v7036_v19 = vadd.f32 %v6996_v48, %v3218_v13  ;;  %v7039_v22 = vadd.f32 %v6999_v50, %v3220_v55  ;;  %v7042_v23 = vadd.f32 %v7002_v12, %v3222_v47  ;;  %v7044_v57 = vadd.f32 %v3289_v20, %v3224_v26  ;;  %v1398_v13 = vld [vmem:[#allocation9 + $0x108] sm:$0xff]  ;;  %v1400_v48 = vld [vmem:[#allocation9 + $0x118] sm:$0xff] }
 0x202   : > { %10393 = vst [vmem:[#allocation38_spill] sm:$0xff] %v7033_v51  ;;  %v7046_v9 = vadd.f32 %v3291_v61, %v3226_v46  ;;  %v7048_v5 = vadd.f32 %v3293_v38, %v3228_v29  ;;  %v7050_v30 = vadd.f32 %v3295_v35, %v3230_v1  ;;  %v7052_v50 = vadd.f32 %v3297_v45, %v3232_v14  ;;  %v1404_v61 = vld [vmem:[#allocation9 + $0x138] sm:$0xff]  ;;  %v1406_v47 = vld [vmem:[#allocation9 + $0x148] sm:$0xff] }
 0x203   : > { %10394 = vst [vmem:[#allocation39_spill] sm:$0xff] %v7036_v19  ;;  %10395 = vst [vmem:[#allocation29_spill] sm:$0xff] %v7039_v22  ;;  %v7054_v55 = vadd.f32 %v3299_v43, %v3234_v41  ;;  %v7056_v12 = vadd.f32 %v3301_v37, %v3236_v53  ;;  %v7058_v20 = vadd.f32 %v3303_v3, %v3238_v32  ;;  %v1408_v38 = vld [vmem:[#allocation9 + $0x158] sm:$0xff]  ;;  %v1277_v29 = vld [vmem:[#allocation8 + $0x148] sm:$0xff] }
 0x204   : > { %10396 = vst [vmem:[#allocation31_spill] sm:$0xff] %v7042_v23  ;;  %10397 = vst [vmem:[#allocation109_spill] sm:$0xff] %v7044_v57  ;;  %v7060_v26 = vadd.f32 %v3305_v7, %v3240_v6  ;;  %v7062_v33 = vadd.f32 %v3307_v62, %v3242_v10  ;;  %v7064_v46 = vadd.f32 %v3309_v2, %v3244_v58  ;;  %v1281_v1 = vld [vmem:[#allocation8 + $0x168] sm:$0xff]  ;;  %v1287_v39 = vld [vmem:[#allocation8 + $0x198] sm:$0xff] }
 0x205   : > { %10398 = vst [vmem:[#allocation110_spill] sm:$0xff] %v7046_v9  ;;  %10399 = vst [vmem:[#allocation111_spill] sm:$0xff] %v7048_v5  ;;  %v1086_v4 = vmul.f32 %v6976_v0, %v10356_v28  ;;  %v7068_v14 = vadd.f32 %v3311_v52, %v3246_v40  ;;  %v7071_v41 = vmul.f32 %v1398_v13, %v6976_v0  ;;  %v1289_v34 = vld [vmem:[#allocation8 + $0x1a8] sm:$0xff]  ;;  %v1291_v32 = vld [vmem:[#allocation8 + $0x1b8] sm:$0xff] }
 0x206   : > { %10400 = vst [vmem:[#allocation112_spill] sm:$0xff] %v7050_v30  ;;  %10401 = vst [vmem:[#allocation113_spill] sm:$0xff] %v7052_v50  ;;  %v7074_v8 = vmul.f32 %v1400_v48, %v6976_v0  ;;  %v7077_v53 = vmul.f32 %v1402_v16, %v6976_v0  ;;  %v1293_v6 = vld [vmem:[#allocation8 + $0x1c8] sm:$0xff]  ;;  %v7080_v59 = vmul.f32 %v1404_v61, %v6976_v0  ;;  %v1295_v58 = vld [vmem:[#allocation8 + $0x1d8] sm:$0xff] }
 0x207   : > { %10402 = vst [vmem:[#allocation114_spill] sm:$0xff] %v7054_v55  ;;  %10403 = vst [vmem:[#allocation115_spill] sm:$0xff] %v7056_v12  ;;  %v1301_v60 = vadd.f32 %v1269_v25, %v1086_v4  ;;  %v7083_v42 = vmul.f32 %v1406_v47, %v6976_v0  ;;  %v7086_v10 = vmul.f32 %v1408_v38, %v6976_v0  ;;  %v1297_v40 = vld [vmem:[#allocation8 + $0x1e8] sm:$0xff]  ;;  %v1299_v35 = vld [vmem:[#allocation8 + $0x1f8] sm:$0xff] }
 0x208   : > { %10404 = vst [vmem:[#allocation116_spill] sm:$0xff] %v7058_v20  ;;  %10405 = vst [vmem:[#allocation117_spill] sm:$0xff] %v7060_v26  ;;  %v1303_v45 = vadd.f32 %v1271_v44, %v1086_v4  ;;  %v1305_v43 = vadd.f32 %v1273_v63, %v1086_v4  ;;  %v1307_v37 = vadd.f32 %v1275_v49, %v1086_v4  ;;  %v10409_v38 = vld [vmem:[#allocation58_spill] sm:$0xff]  ;;  %v10411_v20 = vld [vmem:[#allocation61_spill] sm:$0xff] }
 0x209   : > { %10406 = vst [vmem:[#allocation118_spill] sm:$0xff] %v7062_v33  ;;  %10407 = vst [vmem:[#allocation119_spill] sm:$0xff] %v7064_v46  ;;  %v1309_v3 = vadd.f32 %v1277_v29, %v1086_v4  ;;  %v1311_v7 = vadd.f32 %v1279_v24, %v1086_v4  ;;  %v1313_v62 = vadd.f32 %v1281_v1, %v1086_v4  ;;  %v10410_v33 = vld [vmem:[#allocation60_spill] sm:$0xff]  ;;  %v10412_v63 = vld [vmem:[#allocation69_spill] sm:$0xff] }
 0x20a   : > { %10408 = vst [vmem:[#allocation120_spill] sm:$0xff] %v7068_v14  ;;  %v1315_v2 = vadd.f32 %v1283_v31, %v1086_v4  ;;  %v1317_v52 = vadd.f32 %v1285_v36, %v1086_v4  ;;  %v1319_v25 = vadd.f32 %v1287_v39, %v1086_v4  ;;  %v1321_v13 = vadd.f32 %v1289_v34, %v1086_v4  ;;  %v10413_v29 = vld [vmem:[#allocation59_spill] sm:$0xff]  ;;  %v10414_v1 = vld [vmem:[#allocation62_spill] sm:$0xff]  ;;  %v10422_v50 = vld [vmem:[#allocation53_spill] sm:$0xff] }
 0x20b   : > { %v1323_v48 = vadd.f32 %v1291_v32, %v1086_v4  ;;  %v1325_v16 = vadd.f32 %v1293_v6, %v1086_v4  ;;  %v1327_v61 = vadd.f32 %v1295_v58, %v1086_v4  ;;  %v1329_v47 = vadd.f32 %v1297_v40, %v1086_v4  ;;  %v10415_v36 = vld [vmem:[#allocation66_spill] sm:$0xff]  ;;  %v10417_v6 = vld [vmem:[#allocation41_spill] sm:$0xff]  ;;  %v10418_v40 = vld [vmem:[#allocation43_spill] sm:$0xff] }
 0x20c   : > { %v1331_v14 = vadd.f32 %v1299_v35, %v1086_v4  ;;  %v1333_v46 = vmul.f32 %v1301_v60, %v10409_v38  ;;  %v1335_v26 = vmul.f32 %v1303_v45, %v10410_v33  ;;  %v1337_v44 = vmul.f32 %v1305_v43, %v10411_v20  ;;  %v10416_v34 = vld [vmem:[#allocation70_spill] sm:$0xff]  ;;  %v10419_v35 = vld [vmem:[#allocation44_spill] sm:$0xff]  ;;  %v10420_v12 = vld [vmem:[#allocation55_spill] sm:$0xff] }
 0x20d   : > { %v1339_v49 = vmul.f32 %v1307_v37, %v10412_v63  ;;  %v1341_v24 = vmul.f32 %v1309_v3, %v10413_v29  ;;  %v1343_v31 = vmul.f32 %v1311_v7, %v10414_v1  ;;  %v1345_v39 = vmul.f32 %v1313_v62, %v10415_v36  ;;  %v10421_v55 = vld [vmem:[#allocation42_spill] sm:$0xff]  ;;  %v10424_v5 = vld [vmem:[#allocation56_spill] sm:$0xff]  ;;  %v10426_v57 = vld [vmem:[#allocation75_spill] sm:$0xff] }
 0x20e   : > { %v1347_v32 = vmul.f32 %v1315_v2, %v10416_v34  ;;  %v1349_v58 = vmul.f32 %v1317_v52, %v10417_v6  ;;  %v1351_v4 = vmul.f32 %v1319_v25, %v10418_v40  ;;  %v1353_v60 = vmul.f32 %v1321_v13, %v10419_v35  ;;  %v10423_v30 = vld [vmem:[#allocation54_spill] sm:$0xff]  ;;  %v10427_v23 = vld [vmem:[#allocation76_spill] sm:$0xff]  ;;  %v10428_v22 = vld [vmem:[#allocation77_spill] sm:$0xff] }
 0x20f   : > { %v1355_v45 = vmul.f32 %v1323_v48, %v10420_v12  ;;  %v1357_v43 = vmul.f32 %v1325_v16, %v10421_v55  ;;  %v1359_v37 = vmul.f32 %v1327_v61, %v10422_v50  ;;  %v1361_v3 = vmul.f32 %v1329_v47, %v10423_v30  ;;  %v10425_v9 = vld [vmem:[#allocation74_spill] sm:$0xff]  ;;  %v1410_v51 = vld [vmem:[#allocation9 + $0x168] sm:$0xff]  ;;  %v10430_v16 = vld [vmem:[#allocation79_spill] sm:$0xff] }
 0x210   : > { %v1363_v7 = vmul.f32 %v1331_v14, %v10424_v5  ;;  %v1365_v62 = vadd.f32 %v1333_v46, %v10425_v9  ;;  %v1367_v2 = vadd.f32 %v1335_v26, %v10426_v57  ;;  %v1369_v52 = vadd.f32 %v1337_v44, %v10427_v23  ;;  %v10429_v19 = vld [vmem:[#allocation78_spill] sm:$0xff]  ;;  %v10431_v61 = vld [vmem:[#allocation80_spill] sm:$0xff]  ;;  %v10432_v47 = vld [vmem:[#allocation81_spill] sm:$0xff] }
 0x211   : > { %v1371_v25 = vadd.f32 %v1339_v49, %v10428_v22  ;;  %v1373_v13 = vadd.f32 %v1341_v24, %v10429_v19  ;;  %v1412_v48 = vld [vmem:[#allocation9 + $0x178] sm:$0xff]  ;;  %v1375_v18 = vadd.f32 %v1343_v31, %v10430_v16  ;;  %v1377_v11 = vadd.f32 %v1345_v39, %v10431_v61  ;;  %v1418_v46 = vld [vmem:[#allocation9 + $0x1a8] sm:$0xff]  ;;  %v10434_v26 = vld [vmem:[#allocation83_spill] sm:$0xff] }
 0x212   : > { %v1379_v21 = vadd.f32 %v1347_v32, %v10432_v47  ;;  %v10433_v14 = vld [vmem:[#allocation82_spill] sm:$0xff]  ;;  %v1383_v23 = vadd.f32 %v1351_v4, %v10434_v26  ;;  %v10435_v44 = vld [vmem:[#allocation84_spill] sm:$0xff]  ;;  %v10436_v49 = vld [vmem:[#allocation85_spill] sm:$0xff]  ;;  %v1442_v55 = vmul.f32 %v1410_v51, %v6976_v0  ;;  %v1444_v4 = vmul.f32 %v1412_v48, %v6976_v0 }
 0x213   : > { %v1381_v17 = vadd.f32 %v1349_v58, %v10433_v14  ;;  %v1416_v9 = vld [vmem:[#allocation9 + $0x198] sm:$0xff]  ;;  %v1385_v22 = vadd.f32 %v1353_v60, %v10435_v44  ;;  %v1387_v19 = vadd.f32 %v1355_v45, %v10436_v49  ;;  %v1422_v30 = vld [vmem:[#allocation9 + $0x1c8] sm:$0xff]  ;;  %v10438_v16 = vld [vmem:[#allocation87_spill] sm:$0xff]  ;;  %v1446_v60 = vmul.f32 %v1414_v56, %v6976_v0 }
 0x214   : > { %v1420_v57 = vld [vmem:[#allocation9 + $0x1b8] sm:$0xff]  ;;  %v1426_v31 = vld [vmem:[#allocation9 + $0x1e8] sm:$0xff]  ;;  %v1391_v39 = vadd.f32 %v1359_v37, %v10438_v16  ;;  %v10440_v47 = vld [vmem:[#allocation89_spill] sm:$0xff]  ;;  %v1448_v45 = vmul.f32 %v1416_v9, %v6976_v0  ;;  %v1454_v44 = vmul.f32 %v1422_v30, %v6976_v0  ;;  %v7131_v51 = vadd.f32 %v7071_v41, %v1365_v62 }
 0x215   : > { %v10437_v24 = vld [vmem:[#allocation86_spill] sm:$0xff]  ;;  %v10439_v61 = vld [vmem:[#allocation88_spill] sm:$0xff]  ;;  %v1395_v58 = vadd.f32 %v1363_v7, %v10440_v47  ;;  %v1452_v26 = vmul.f32 %v1420_v57, %v6976_v0  ;;  %v7134_v48 = vadd.f32 %v7074_v8, %v1367_v2  ;;  %v7137_v56 = vadd.f32 %v7077_v53, %v1369_v52 }
 0x216   : > { %v1389_v5 = vadd.f32 %v1357_v43, %v10437_v24  ;;  %v1424_v50 = vld [vmem:[#allocation9 + $0x1d8] sm:$0xff]  ;;  %v1393_v32 = vadd.f32 %v1361_v3, %v10439_v61  ;;  %v1450_v43 = vmul.f32 %v1418_v46, %v6976_v0  ;;  %v1458_v3 = vmul.f32 %v1426_v31, %v6976_v0  ;;  %v3537_v9 = vld [vmem:[#allocation8 + $0x308] sm:$0xff] }
 0x217   : > { %v1428_v14 = vld [vmem:[#allocation9 + $0x1f8] sm:$0xff]  ;;  %v1456_v37 = vmul.f32 %v1424_v50, %v6976_v0  ;;  %v3541_v57 = vld [vmem:[#allocation8 + $0x328] sm:$0xff]  ;;  %v7140_v30 = vadd.f32 %v7080_v59, %v1371_v25  ;;  %v7143_v50 = vadd.f32 %v7083_v42, %v1373_v13  ;;  %v7148_v41 = vadd.f32 %v1442_v55, %v1377_v11 }
 0x218   : > { %v1460_v7 = vmul.f32 %v1428_v14, %v6976_v0  ;;  %v3539_v46 = vld [vmem:[#allocation8 + $0x318] sm:$0xff]  ;;  %v7146_v0 = vadd.f32 %v7086_v10, %v1375_v18  ;;  %v3666_v8 = vld [vmem:[#allocation9 + $0x308] sm:$0xff]  ;;  %v7150_v49 = vadd.f32 %v1444_v4, %v1379_v21  ;;  %v7152_v53 = vadd.f32 %v1446_v60, %v1381_v17 }
 0x219   : > { %10441 = vst [vmem:[#allocation58_spill] sm:$0xff] %v7143_v50  ;;  %10443 = vst [vmem:[#allocation61_spill] sm:$0xff] %v7148_v41  ;;  %v3543_v62 = vld [vmem:[#allocation8 + $0x338] sm:$0xff]  ;;  %v7154_v52 = vadd.f32 %v1448_v45, %v1383_v23  ;;  %v7156_v24 = vadd.f32 %v1450_v43, %v1385_v22  ;;  %v3545_v59 = vld [vmem:[#allocation8 + $0x348] sm:$0xff]  ;;  %v7158_v13 = vadd.f32 %v1452_v26, %v1387_v19 }
 0x21a   : > { %10442 = vst [vmem:[#allocation60_spill] sm:$0xff] %v7146_v0  ;;  %v3668_v2 = vld [vmem:[#allocation9 + $0x318] sm:$0xff]  ;;  %10444 = vst [vmem:[#allocation69_spill] sm:$0xff] %v7150_v49  ;;  %v3549_v42 = vld [vmem:[#allocation8 + $0x368] sm:$0xff]  ;;  %v7160_v18 = vadd.f32 %v1454_v44, %v1389_v5  ;;  %v7162_v11 = vadd.f32 %v1456_v37, %v1391_v39  ;;  %v3354_v55 = vmul.f32 %v6982_v54, %v6479_v15 }
 0x21b   : > { %10445 = vst [vmem:[#allocation59_spill] sm:$0xff] %v7152_v53  ;;  %10446 = vst [vmem:[#allocation62_spill] sm:$0xff] %v7154_v52  ;;  %v3547_v25 = vld [vmem:[#allocation8 + $0x358] sm:$0xff]  ;;  %v3553_v10 = vld [vmem:[#allocation8 + $0x388] sm:$0xff]  ;;  %v7166_v31 = vadd.f32 %v1458_v3, %v1393_v32  ;;  %v7168_v23 = vadd.f32 %v1460_v7, %v1395_v58  ;;  %v7171_v19 = vmul.f32 %v3666_v8, %v6982_v54 }
 0x21c   : > { %10447 = vst [vmem:[#allocation66_spill] sm:$0xff] %v7156_v24  ;;  %10448 = vst [vmem:[#allocation70_spill] sm:$0xff] %v7158_v13  ;;  %v3551_v21 = vld [vmem:[#allocation8 + $0x378] sm:$0xff]  ;;  %v3557_v22 = vld [vmem:[#allocation8 + $0x3a8] sm:$0xff]  ;;  %v7174_v5 = vmul.f32 %v3668_v2, %v6982_v54  ;;  %v3569_v4 = vadd.f32 %v3537_v9, %v3354_v55  ;;  %v3571_v60 = vadd.f32 %v3539_v46, %v3354_v55 }
 0x21d   : > { %10449 = vst [vmem:[#allocation41_spill] sm:$0xff] %v7160_v18  ;;  %10450 = vst [vmem:[#allocation43_spill] sm:$0xff] %v7162_v11  ;;  %v3555_v17 = vld [vmem:[#allocation8 + $0x398] sm:$0xff]  ;;  %v3561_v61 = vld [vmem:[#allocation8 + $0x3c8] sm:$0xff]  ;;  %v3573_v45 = vadd.f32 %v3541_v57, %v3354_v55  ;;  %v3575_v43 = vadd.f32 %v3543_v62, %v3354_v55  ;;  %v3577_v32 = vadd.f32 %v3545_v59, %v3354_v55 }
 0x21e   : > { %10451 = vst [vmem:[#allocation44_spill] sm:$0xff] %v7166_v31  ;;  %10452 = vst [vmem:[#allocation55_spill] sm:$0xff] %v7168_v23  ;;  %v3559_v16 = vld [vmem:[#allocation8 + $0x3b8] sm:$0xff]  ;;  %v3565_v47 = vld [vmem:[#allocation8 + $0x3e8] sm:$0xff]  ;;  %v3579_v26 = vadd.f32 %v3547_v25, %v3354_v55  ;;  %v3581_v58 = vadd.f32 %v3549_v42, %v3354_v55  ;;  %v3583_v44 = vadd.f32 %v3551_v21, %v3354_v55 }
 0x21f   : > { %v3563_v39 = vld [vmem:[#allocation8 + $0x3d8] sm:$0xff]  ;;  %v3585_v37 = vadd.f32 %v3553_v10, %v3354_v55  ;;  %v3587_v3 = vadd.f32 %v3555_v17, %v3354_v55  ;;  %v3589_v7 = vadd.f32 %v3557_v22, %v3354_v55  ;;  %v3591_v15 = vadd.f32 %v3559_v16, %v3354_v55  ;;  %v10453_v11 = vld [vmem:[#allocation63_spill] sm:$0xff]  ;;  %v10454_v13 = vld [vmem:[#allocation64_spill] sm:$0xff] }
 0x220   : > { %v3567_v14 = vld [vmem:[#allocation8 + $0x3f8] sm:$0xff]  ;;  %v3593_v8 = vadd.f32 %v3561_v61, %v3354_v55  ;;  %v3595_v23 = vadd.f32 %v3563_v39, %v3354_v55  ;;  %v3597_v31 = vadd.f32 %v3565_v47, %v3354_v55  ;;  %v3601_v18 = vmul.f32 %v3569_v4, %v10453_v11  ;;  %v10455_v9 = vld [vmem:[#allocation67_spill] sm:$0xff]  ;;  %v10457_v59 = vld [vmem:[#allocation65_spill] sm:$0xff] }
 0x221   : > { %v3599_v2 = vadd.f32 %v3567_v14, %v3354_v55  ;;  %v3603_v24 = vmul.f32 %v3571_v60, %v10454_v13  ;;  %v3605_v46 = vmul.f32 %v3573_v45, %v10455_v9  ;;  %v10456_v57 = vld [vmem:[#allocation71_spill] sm:$0xff]  ;;  %v3609_v25 = vmul.f32 %v3577_v32, %v10457_v59  ;;  %v10458_v42 = vld [vmem:[#allocation68_spill] sm:$0xff]  ;;  %v10460_v22 = vld [vmem:[#allocation73_spill] sm:$0xff] }
 0x222   : > { %v3607_v62 = vmul.f32 %v3575_v43, %v10456_v57  ;;  %v3611_v21 = vmul.f32 %v3579_v26, %v10458_v42  ;;  %v10459_v10 = vld [vmem:[#allocation72_spill] sm:$0xff]  ;;  %v3615_v16 = vmul.f32 %v3583_v44, %v10460_v22  ;;  %v10461_v61 = vld [vmem:[#allocation45_spill] sm:$0xff]  ;;  %v10462_v47 = vld [vmem:[#allocation46_spill] sm:$0xff] }
 0x223   : > { %v3613_v17 = vmul.f32 %v3581_v58, %v10459_v10  ;;  %v3617_v39 = vmul.f32 %v3585_v37, %v10461_v61  ;;  %v3619_v55 = vmul.f32 %v3587_v3, %v10462_v47  ;;  %v10463_v14 = vld [vmem:[#allocation47_spill] sm:$0xff]  ;;  %v10465_v13 = vld [vmem:[#allocation48_spill] sm:$0xff]  ;;  %v10466_v9 = vld [vmem:[#allocation49_spill] sm:$0xff] }
 0x224   : > { %v3621_v4 = vmul.f32 %v3589_v7, %v10463_v14  ;;  %v10464_v11 = vld [vmem:[#allocation51_spill] sm:$0xff]  ;;  %v3625_v45 = vmul.f32 %v3593_v8, %v10465_v13  ;;  %v3627_v43 = vmul.f32 %v3595_v23, %v10466_v9  ;;  %v10467_v57 = vld [vmem:[#allocation50_spill] sm:$0xff]  ;;  %v10468_v59 = vld [vmem:[#allocation52_spill] sm:$0xff] }
 0x225   : > { %v3623_v60 = vmul.f32 %v3591_v15, %v10464_v11  ;;  %v3629_v32 = vmul.f32 %v3597_v31, %v10467_v57  ;;  %v3631_v26 = vmul.f32 %v3599_v2, %v10468_v59  ;;  %v10469_v42 = vld [vmem:[#allocation30_spill] sm:$0xff]  ;;  %v10470_v10 = vld [vmem:[#allocation32_spill] sm:$0xff]  ;;  %v10471_v22 = vld [vmem:[#allocation33_spill] sm:$0xff] }
 0x226   : > { %v3633_v58 = vadd.f32 %v3601_v18, %v10469_v42  ;;  %v3635_v44 = vadd.f32 %v3603_v24, %v10470_v10  ;;  %v3637_v37 = vadd.f32 %v3605_v46, %v10471_v22  ;;  %v10472_v61 = vld [vmem:[#allocation34_spill] sm:$0xff]  ;;  %v3670_v47 = vld [vmem:[#allocation9 + $0x328] sm:$0xff]  ;;  %v10474_v8 = vld [vmem:[#allocation91_spill] sm:$0xff] }
 0x227   : > { %v3639_v3 = vadd.f32 %v3607_v62, %v10472_v61  ;;  %v3672_v7 = vld [vmem:[#allocation9 + $0x338] sm:$0xff]  ;;  %v3674_v14 = vld [vmem:[#allocation9 + $0x348] sm:$0xff]  ;;  %v3643_v13 = vadd.f32 %v3611_v21, %v10474_v8  ;;  %v10476_v31 = vld [vmem:[#allocation93_spill] sm:$0xff] }
 0x228   : > { %v10473_v15 = vld [vmem:[#allocation90_spill] sm:$0xff]  ;;  %v10475_v23 = vld [vmem:[#allocation92_spill] sm:$0xff]  ;;  %v3647_v57 = vadd.f32 %v3615_v16, %v10476_v31  ;;  %v10478_v10 = vld [vmem:[#allocation95_spill] sm:$0xff] }
 0x229   : > { %v3641_v11 = vadd.f32 %v3609_v25, %v10473_v15  ;;  %v3645_v9 = vadd.f32 %v3613_v17, %v10475_v23  ;;  %v3676_v2 = vld [vmem:[#allocation9 + $0x358] sm:$0xff]  ;;  %v3678_v59 = vld [vmem:[#allocation9 + $0x368] sm:$0xff]  ;;  %v3651_v46 = vadd.f32 %v3619_v55, %v10478_v10  ;;  %v10480_v61 = vld [vmem:[#allocation97_spill] sm:$0xff]  ;;  %v3706_v10 = vmul.f32 %v3674_v14, %v6982_v54 }
 0x22a   : > { %v3680_v18 = vld [vmem:[#allocation9 + $0x378] sm:$0xff]  ;;  %v10479_v22 = vld [vmem:[#allocation96_spill] sm:$0xff]  ;;  %v3655_v52 = vadd.f32 %v3623_v60, %v10480_v61  ;;  %v10482_v8 = vld [vmem:[#allocation99_spill] sm:$0xff]  ;;  %v3704_v60 = vmul.f32 %v3672_v7, %v6982_v54 }
 0x22b   : > { %v10477_v42 = vld [vmem:[#allocation94_spill] sm:$0xff]  ;;  %v3653_v62 = vadd.f32 %v3621_v4, %v10479_v22  ;;  %v3682_v53 = vld [vmem:[#allocation9 + $0x388] sm:$0xff]  ;;  %v3659_v17 = vadd.f32 %v3627_v43, %v10482_v8  ;;  %v10483_v23 = vld [vmem:[#allocation57_spill] sm:$0xff]  ;;  %v3702_v4 = vmul.f32 %v3670_v47, %v6982_v54  ;;  %v3708_v22 = vmul.f32 %v3676_v2, %v6982_v54 }
 0x22c   : > { %v3649_v24 = vadd.f32 %v3617_v39, %v10477_v42  ;;  %v3684_v49 = vld [vmem:[#allocation9 + $0x398] sm:$0xff]  ;;  %v3686_v25 = vld [vmem:[#allocation9 + $0x3a8] sm:$0xff]  ;;  %v3661_v16 = vadd.f32 %v3629_v32, %v10483_v23  ;;  %v10484_v31 = vld [vmem:[#allocation23_spill] sm:$0xff]  ;;  %v3712_v43 = vmul.f32 %v3680_v18, %v6982_v54  ;;  %v3714_v32 = vmul.f32 %v3682_v53, %v6982_v54 }
 0x22d   : > { %v10481_v15 = vld [vmem:[#allocation98_spill] sm:$0xff]  ;;  %v3663_v41 = vadd.f32 %v3631_v26, %v10484_v31  ;;  %v3690_v50 = vld [vmem:[#allocation9 + $0x3c8] sm:$0xff]  ;;  %v3716_v26 = vmul.f32 %v3684_v49, %v6982_v54  ;;  %v3718_v61 = vmul.f32 %v3686_v25, %v6982_v54  ;;  %v7226_v18 = vadd.f32 %v7174_v5, %v3635_v44  ;;  %v1268_v53 = vld [vmem:[#allocation8 + $0x100] sm:$0xff] }
 0x22e   : > { %v3657_v21 = vadd.f32 %v3625_v45, %v10481_v15  ;;  %v3688_v0 = vld [vmem:[#allocation9 + $0x3b8] sm:$0xff]  ;;  %v3694_v42 = vld [vmem:[#allocation9 + $0x3e8] sm:$0xff]  ;;  %v3710_v45 = vmul.f32 %v3678_v59, %v6982_v54  ;;  %v3722_v47 = vmul.f32 %v3690_v50, %v6982_v54  ;;  %v7223_v59 = vadd.f32 %v7171_v19, %v3633_v58  ;;  %v1270_v8 = vld [vmem:[#allocation8 + $0x110] sm:$0xff] }
 0x22f   : > { %v3692_v39 = vld [vmem:[#allocation9 + $0x3d8] sm:$0xff]  ;;  %v3720_v15 = vmul.f32 %v3688_v0, %v6982_v54  ;;  %v3726_v14 = vmul.f32 %v3694_v42, %v6982_v54  ;;  %10486 = vst [vmem:[#allocation75_spill] sm:$0xff] %v7226_v18  ;;  %v7228_v49 = vadd.f32 %v3702_v4, %v3637_v37  ;;  %v7230_v25 = vadd.f32 %v3704_v60, %v3639_v3  ;;  %v1272_v23 = vld [vmem:[#allocation8 + $0x120] sm:$0xff]  ;;  %v1274_v31 = vld [vmem:[#allocation8 + $0x130] sm:$0xff] }
 0x230   : > { %v3696_v55 = vld [vmem:[#allocation9 + $0x3f8] sm:$0xff]  ;;  %v3724_v7 = vmul.f32 %v3692_v39, %v6982_v54  ;;  %10485 = vst [vmem:[#allocation74_spill] sm:$0xff] %v7223_v59  ;;  %v7232_v0 = vadd.f32 %v3706_v10, %v3641_v11  ;;  %v7234_v50 = vadd.f32 %v3708_v22, %v3643_v13  ;;  %v1397_v39 = vld [vmem:[#allocation9 + $0x100] sm:$0xff]  ;;  %v7238_v19 = vadd.f32 %v3712_v43, %v3647_v57  ;;  %v1399_v44 = vld [vmem:[#allocation9 + $0x110] sm:$0xff] }
 0x231   : > { %v3728_v2 = vmul.f32 %v3696_v55, %v6982_v54  ;;  %10487 = vst [vmem:[#allocation76_spill] sm:$0xff] %v7228_v49  ;;  %10488 = vst [vmem:[#allocation77_spill] sm:$0xff] %v7230_v25  ;;  %v7236_v54 = vadd.f32 %v3710_v45, %v3645_v9  ;;  %v7240_v58 = vadd.f32 %v3714_v32, %v3649_v24  ;;  %v1401_v37 = vld [vmem:[#allocation9 + $0x120] sm:$0xff]  ;;  %v1403_v3 = vld [vmem:[#allocation9 + $0x130] sm:$0xff] }
 0x232   : > { %10489 = vst [vmem:[#allocation78_spill] sm:$0xff] %v7232_v0  ;;  %10490 = vst [vmem:[#allocation79_spill] sm:$0xff] %v7234_v50  ;;  %v7242_v5 = vadd.f32 %v3716_v26, %v3651_v46  ;;  %v7244_v42 = vadd.f32 %v3718_v61, %v3653_v62  ;;  %v7246_v11 = vadd.f32 %v3720_v15, %v3655_v52  ;;  %v1276_v9 = vld [vmem:[#allocation8 + $0x140] sm:$0xff]  ;;  %v1278_v4 = vld [vmem:[#allocation8 + $0x150] sm:$0xff] }
 0x233   : > { %10491 = vst [vmem:[#allocation80_spill] sm:$0xff] %v7236_v54  ;;  %10492 = vst [vmem:[#allocation81_spill] sm:$0xff] %v7238_v19  ;;  %v7248_v13 = vadd.f32 %v3722_v47, %v3657_v21  ;;  %v1085_v55 = vmul.f32 %v6986_v27, %v10356_v28  ;;  %v1280_v57 = vld [vmem:[#allocation8 + $0x160] sm:$0xff]  ;;  %v7252_v60 = vadd.f32 %v3724_v7, %v3659_v17  ;;  %v1282_v10 = vld [vmem:[#allocation8 + $0x170] sm:$0xff] }
 0x234   : > { %10493 = vst [vmem:[#allocation82_spill] sm:$0xff] %v7240_v58  ;;  %10494 = vst [vmem:[#allocation83_spill] sm:$0xff] %v7242_v5  ;;  %v7254_v24 = vadd.f32 %v3726_v14, %v3661_v16  ;;  %v7256_v46 = vadd.f32 %v3728_v2, %v3663_v41  ;;  %v1284_v22 = vld [vmem:[#allocation8 + $0x180] sm:$0xff]  ;;  %v1286_v62 = vld [vmem:[#allocation8 + $0x190] sm:$0xff]  ;;  %v7259_v52 = vmul.f32 %v1397_v39, %v6986_v27 }
 0x235   : > { %10495 = vst [vmem:[#allocation84_spill] sm:$0xff] %v7244_v42  ;;  %10496 = vst [vmem:[#allocation85_spill] sm:$0xff] %v7246_v11  ;;  %v1288_v21 = vld [vmem:[#allocation8 + $0x1a0] sm:$0xff]  ;;  %v1290_v45 = vld [vmem:[#allocation8 + $0x1b0] sm:$0xff]  ;;  %v1300_v32 = vadd.f32 %v1268_v53, %v1085_v55  ;;  %v7262_v28 = vmul.f32 %v1399_v44, %v6986_v27  ;;  %v7265_v17 = vmul.f32 %v1401_v37, %v6986_v27 }
 0x236   : > { %10497 = vst [vmem:[#allocation86_spill] sm:$0xff] %v7248_v13  ;;  %10498 = vst [vmem:[#allocation87_spill] sm:$0xff] %v7252_v60  ;;  %v1292_v43 = vld [vmem:[#allocation8 + $0x1c0] sm:$0xff]  ;;  %v7268_v16 = vmul.f32 %v1403_v3, %v6986_v27  ;;  %v1294_v41 = vld [vmem:[#allocation8 + $0x1d0] sm:$0xff]  ;;  %v1302_v15 = vadd.f32 %v1270_v8, %v1085_v55  ;;  %v1304_v47 = vadd.f32 %v1272_v23, %v1085_v55 }
 0x237   : > { %10499 = vst [vmem:[#allocation88_spill] sm:$0xff] %v7254_v24  ;;  %10500 = vst [vmem:[#allocation89_spill] sm:$0xff] %v7256_v46  ;;  %v1296_v26 = vld [vmem:[#allocation8 + $0x1e0] sm:$0xff]  ;;  %v1298_v61 = vld [vmem:[#allocation8 + $0x1f0] sm:$0xff]  ;;  %v1306_v7 = vadd.f32 %v1274_v31, %v1085_v55  ;;  %v1308_v14 = vadd.f32 %v1276_v9, %v1085_v55  ;;  %v1310_v2 = vadd.f32 %v1278_v4, %v1085_v55 }
 0x238   : > { %v1312_v39 = vadd.f32 %v1280_v57, %v1085_v55  ;;  %v1314_v46 = vadd.f32 %v1282_v10, %v1085_v55  ;;  %v1316_v53 = vadd.f32 %v1284_v22, %v1085_v55  ;;  %v1318_v24 = vadd.f32 %v1286_v62, %v1085_v55  ;;  %v10501_v22 = vld [vmem:[#allocation42_spill] sm:$0xff]  ;;  %v10502_v62 = vld [vmem:[#allocation53_spill] sm:$0xff] }
 0x239   : > { %v1320_v44 = vadd.f32 %v1288_v21, %v1085_v55  ;;  %v1322_v60 = vadd.f32 %v1290_v45, %v1085_v55  ;;  %v1324_v13 = vadd.f32 %v1292_v43, %v1085_v55  ;;  %v1326_v37 = vadd.f32 %v1294_v41, %v1085_v55  ;;  %v10503_v21 = vld [vmem:[#allocation54_spill] sm:$0xff]  ;;  %v10504_v45 = vld [vmem:[#allocation56_spill] sm:$0xff]  ;;  %v10508_v41 = vld [vmem:[#allocation27_spill] sm:$0xff] }
 0x23a   : > { %v1328_v11 = vadd.f32 %v1296_v26, %v1085_v55  ;;  %v1330_v42 = vadd.f32 %v1298_v61, %v1085_v55  ;;  %v1332_v3 = vmul.f32 %v1300_v32, %v10409_v38  ;;  %v1334_v5 = vmul.f32 %v1302_v15, %v10410_v33  ;;  %v10505_v43 = vld [vmem:[#allocation40_spill] sm:$0xff]  ;;  %v10506_v32 = vld [vmem:[#allocation25_spill] sm:$0xff]  ;;  %v1405_v26 = vld [vmem:[#allocation9 + $0x140] sm:$0xff] }
 0x23b   : > { %v1336_v8 = vmul.f32 %v1304_v47, %v10411_v20  ;;  %v1338_v23 = vmul.f32 %v1306_v7, %v10412_v63  ;;  %v1340_v31 = vmul.f32 %v1308_v14, %v10413_v29  ;;  %v1342_v9 = vmul.f32 %v1310_v2, %v10414_v1  ;;  %v10511_v15 = vld [vmem:[#allocation36_spill] sm:$0xff]  ;;  %v1411_v2 = vld [vmem:[#allocation9 + $0x170] sm:$0xff] }
 0x23c   : > { %v1344_v4 = vmul.f32 %v1312_v39, %v10415_v36  ;;  %v1346_v57 = vmul.f32 %v1314_v46, %v10416_v34  ;;  %v1348_v10 = vmul.f32 %v1316_v53, %v10417_v6  ;;  %v1350_v55 = vmul.f32 %v1318_v24, %v10418_v40  ;;  %v10507_v46 = vld [vmem:[#allocation26_spill] sm:$0xff]  ;;  %v10509_v24 = vld [vmem:[#allocation28_spill] sm:$0xff]  ;;  %v1413_v39 = vld [vmem:[#allocation9 + $0x180] sm:$0xff] }
 0x23d   : > { %v1352_v38 = vmul.f32 %v1320_v44, %v10419_v35  ;;  %v1354_v33 = vmul.f32 %v1322_v60, %v10420_v12  ;;  %v1356_v20 = vmul.f32 %v1324_v13, %v10501_v22  ;;  %v1358_v63 = vmul.f32 %v1326_v37, %v10502_v62  ;;  %v1407_v12 = vld [vmem:[#allocation9 + $0x150] sm:$0xff]  ;;  %v1409_v60 = vld [vmem:[#allocation9 + $0x160] sm:$0xff]  ;;  %v10515_v37 = vld [vmem:[#allocation102_spill] sm:$0xff] }
 0x23e   : > { %v1360_v29 = vmul.f32 %v1328_v11, %v10503_v21  ;;  %v1362_v1 = vmul.f32 %v1330_v42, %v10504_v45  ;;  %v1364_v36 = vadd.f32 %v1332_v3, %v10505_v43  ;;  %v1366_v34 = vadd.f32 %v1334_v5, %v10506_v32  ;;  %v10510_v13 = vld [vmem:[#allocation35_spill] sm:$0xff]  ;;  %v10512_v11 = vld [vmem:[#allocation37_spill] sm:$0xff]  ;;  %v10513_v42 = vld [vmem:[#allocation100_spill] sm:$0xff] }
 0x23f   : > { %v1368_v6 = vadd.f32 %v1336_v8, %v10507_v46  ;;  %v1370_v40 = vadd.f32 %v1338_v23, %v10508_v41  ;;  %v1372_v35 = vadd.f32 %v1340_v31, %v10509_v24  ;;  %v1374_v61 = vadd.f32 %v1342_v9, %v10510_v13  ;;  %v1415_v5 = vld [vmem:[#allocation9 + $0x190] sm:$0xff]  ;;  %v10516_v8 = vld [vmem:[#allocation103_spill] sm:$0xff]  ;;  %v10517_v31 = vld [vmem:[#allocation104_spill] sm:$0xff] }
 0x240   : > { %v1376_v47 = vadd.f32 %v1344_v4, %v10511_v15  ;;  %v1378_v7 = vadd.f32 %v1346_v57, %v10512_v11  ;;  %v1380_v14 = vadd.f32 %v1348_v10, %v10513_v42  ;;  %v10514_v53 = vld [vmem:[#allocation101_spill] sm:$0xff]  ;;  %v1384_v3 = vadd.f32 %v1352_v38, %v10515_v37  ;;  %v1417_v62 = vld [vmem:[#allocation9 + $0x1a0] sm:$0xff]  ;;  %v10519_v57 = vld [vmem:[#allocation106_spill] sm:$0xff] }
 0x241   : > { %v1382_v44 = vadd.f32 %v1350_v55, %v10514_v53  ;;  %v1386_v23 = vadd.f32 %v1354_v33, %v10516_v8  ;;  %v1388_v22 = vadd.f32 %v1356_v20, %v10517_v31  ;;  %v1419_v21 = vld [vmem:[#allocation9 + $0x1b0] sm:$0xff]  ;;  %v1421_v9 = vld [vmem:[#allocation9 + $0x1c0] sm:$0xff]  ;;  %v7303_v43 = vadd.f32 %v1360_v29, %v10519_v57  ;;  %v10526_v53 = vld [vmem:[#allocation60_spill] sm:$0xff] }
 0x242   : > { %v10518_v45 = vld [vmem:[#allocation105_spill] sm:$0xff]  ;;  %v10520_v10 = vld [vmem:[#allocation107_spill] sm:$0xff]  ;;  %v1437_v55 = vmul.f32 %v1405_v26, %v6986_v27  ;;  %v1439_v38 = vmul.f32 %v1407_v12, %v6986_v27  ;;  %v1441_v33 = vmul.f32 %v1409_v60, %v6986_v27  ;;  %v1443_v20 = vmul.f32 %v1411_v2, %v6986_v27 }
 0x243   : > { %v7300_v4 = vadd.f32 %v1358_v63, %v10518_v45  ;;  %v7306_v32 = vadd.f32 %v1362_v1, %v10520_v10  ;;  %v1445_v46 = vmul.f32 %v1413_v39, %v6986_v27  ;;  %v1423_v41 = vld [vmem:[#allocation9 + $0x1d0] sm:$0xff]  ;;  %v1425_v24 = vld [vmem:[#allocation9 + $0x1e0] sm:$0xff]  ;;  %v1447_v13 = vmul.f32 %v1415_v5, %v6986_v27 }
 0x244   : > { %v1427_v63 = vld [vmem:[#allocation9 + $0x1f0] sm:$0xff]  ;;  %v1449_v29 = vmul.f32 %v1417_v62, %v6986_v27  ;;  %v1451_v1 = vmul.f32 %v1419_v21, %v6986_v27  ;;  %v1453_v15 = vmul.f32 %v1421_v9, %v6986_v27  ;;  %v7318_v26 = vadd.f32 %v7259_v52, %v1364_v36 }
 0x245   : > { %v7321_v12 = vadd.f32 %v7262_v28, %v1366_v34  ;;  %v7324_v60 = vadd.f32 %v7265_v17, %v1368_v6  ;;  %v7327_v11 = vadd.f32 %v7268_v16, %v1370_v40  ;;  %v7329_v42 = vadd.f32 %v1437_v55, %v1372_v35  ;;  %v10527_v37 = vld [vmem:[#allocation61_spill] sm:$0xff] }
 0x246   : > { %v7331_v2 = vadd.f32 %v1439_v38, %v1374_v61  ;;  %v7333_v39 = vadd.f32 %v1441_v33, %v1376_v47  ;;  %v7335_v5 = vadd.f32 %v1443_v20, %v1378_v7  ;;  %v1455_v52 = vmul.f32 %v1423_v41, %v6986_v27  ;;  %v10525_v7 = vld [vmem:[#allocation58_spill] sm:$0xff]  ;;  %v10528_v8 = vld [vmem:[#allocation69_spill] sm:$0xff] }
 0x247   : > { %v1457_v36 = vmul.f32 %v1425_v24, %v6986_v27  ;;  %v1459_v28 = vmul.f32 %v1427_v63, %v6986_v27  ;;  %v7340_v34 = vadd.f32 %v1445_v46, %v1380_v14  ;;  %v7342_v17 = vadd.f32 %v1447_v13, %v1382_v44 }
 0x248   : > { %v7344_v16 = vadd.f32 %v1449_v29, %v1384_v3  ;;  %v7346_v6 = vadd.f32 %v1451_v1, %v1386_v23  ;;  %v7348_v40 = vadd.f32 %v1453_v15, %v1388_v22  ;;  %v1493_v35 = vmax.f32 %v7318_v26, %v7131_v51 }
 0x249   : > { %10521 = vst [vmem:[#allocation30_spill] sm:$0xff] %v7342_v17  ;;  %v1500_v61 = vmax.f32 %v7321_v12, %v7134_v48  ;;  %v1507_v47 = vmax.f32 %v7324_v60, %v7137_v56  ;;  %v1514_v27 = vmax.f32 %v7327_v11, %v7140_v30  ;;  %v1521_v14 = vmax.f32 %v7329_v42, %v10525_v7 }
 0x24a   : > { %10522 = vst [vmem:[#allocation32_spill] sm:$0xff] %v7344_v16  ;;  %10523 = vst [vmem:[#allocation33_spill] sm:$0xff] %v7346_v6  ;;  %v1528_v44 = vmax.f32 %v7331_v2, %v10526_v53  ;;  %v1535_v3 = vmax.f32 %v7333_v39, %v10527_v37  ;;  %v1542_v23 = vmax.f32 %v7335_v5, %v10528_v8  ;;  %v1494_v31 = vrot.slane %v1493_v35, 4 }
 0x24b   : > { %10524 = vst [vmem:[#allocation34_spill] sm:$0xff] %v7348_v40  ;;  %v1501_v22 = vrot.slane %v1500_v61, 4  ;;  %v1508_v62 = vrot.slane %v1507_v47, 4  ;;  %v1515_v21 = vrot.slane %v1514_v27, 4  ;;  %v1522_v9 = vrot.slane %v1521_v14, 4 }
 0x24c   : > { %v1529_v45 = vrot.slane %v1528_v44, 4  ;;  %v1536_v57 = vrot.slane %v1535_v3, 4  ;;  %v1543_v10 = vrot.slane %v1542_v23, 4  ;;  %v1495_v55 = vmax.f32 %v1493_v35, %v1494_v31 }
 0x24d   : > { %v1502_v38 = vmax.f32 %v1500_v61, %v1501_v22  ;;  %v1509_v33 = vmax.f32 %v1507_v47, %v1508_v62  ;;  %v1516_v20 = vmax.f32 %v1514_v27, %v1515_v21  ;;  %v1523_v46 = vmax.f32 %v1521_v14, %v1522_v9 }
 0x24e   : > { %v1530_v41 = vmax.f32 %v1528_v44, %v1529_v45  ;;  %v1537_v24 = vmax.f32 %v1535_v3, %v1536_v57  ;;  %v1544_v63 = vmax.f32 %v1542_v23, %v1543_v10  ;;  %v1496_v13 = vrot.slane %v1495_v55, 2  ;;  %v10535_v10 = vld [vmem:[#allocation70_spill] sm:$0xff] }
 0x24f   : > { %v1503_v29 = vrot.slane %v1502_v38, 2  ;;  %v1510_v1 = vrot.slane %v1509_v33, 2  ;;  %v1517_v15 = vrot.slane %v1516_v20, 2  ;;  %v1524_v58 = vrot.slane %v1523_v46, 2 }
 0x250   : > { %v1531_v19 = vrot.slane %v1530_v41, 2  ;;  %v1538_v54 = vrot.slane %v1537_v24, 2  ;;  %v1545_v50 = vrot.slane %v1544_v63, 2  ;;  %v1497_v0 = vmax.f32 %v1495_v55, %v1496_v13 }
 0x251   : > { %v1504_v25 = vmax.f32 %v1502_v38, %v1503_v29  ;;  %v1511_v49 = vmax.f32 %v1509_v33, %v1510_v1  ;;  %v1518_v18 = vmax.f32 %v1516_v20, %v1517_v15  ;;  %v1525_v35 = vmax.f32 %v1523_v46, %v1524_v58  ;;  %v10537_v38 = vld [vmem:[#allocation43_spill] sm:$0xff]  ;;  %v10538_v33 = vld [vmem:[#allocation44_spill] sm:$0xff] }
 0x252   : > { %v7366_v61 = vmax.f32 %v1530_v41, %v1531_v19  ;;  %v7368_v47 = vmax.f32 %v1537_v24, %v1538_v54  ;;  %v7370_v27 = vmax.f32 %v1544_v63, %v1545_v50  ;;  %v1498_v14 = vrot.slane %v1497_v0, 1  ;;  %v10539_v46 = vld [vmem:[#allocation55_spill] sm:$0xff] }
 0x253   : > { %v1505_v44 = vrot.slane %v1504_v25, 1  ;;  %v1512_v3 = vrot.slane %v1511_v49, 1  ;;  %v1519_v23 = vrot.slane %v1518_v18, 1  ;;  %v7373_v31 = vadd.f32 %v1455_v52, %v7300_v4  ;;  %v10532_v52 = vld [vmem:[#allocation59_spill] sm:$0xff] }
 0x254   : > { %v7376_v22 = vadd.f32 %v1457_v36, %v7303_v43  ;;  %v7379_v62 = vadd.f32 %v1459_v28, %v7306_v32  ;;  %v1526_v58 = vrot.slane %v1525_v35, 1  ;;  %v7381_v19 = vmax.f32 %v1497_v0, %v1498_v14  ;;  %v10533_v36 = vld [vmem:[#allocation62_spill] sm:$0xff] }
 0x255   : > { %10529 = vst [vmem:[#allocation90_spill] sm:$0xff] %v7373_v31  ;;  %v1533_v54 = vrot.slane %v7366_v61, 1  ;;  %v1540_v50 = vrot.slane %v7368_v47, 1  ;;  %v1547_v21 = vrot.slane %v7370_v27, 1  ;;  %v7386_v9 = vmax.f32 %v1504_v25, %v1505_v44  ;;  %v10534_v28 = vld [vmem:[#allocation66_spill] sm:$0xff]  ;;  %v10536_v25 = vld [vmem:[#allocation41_spill] sm:$0xff] }
 0x256   : > { %10530 = vst [vmem:[#allocation91_spill] sm:$0xff] %v7376_v22  ;;  %10531 = vst [vmem:[#allocation92_spill] sm:$0xff] %v7379_v62  ;;  %v7388_v45 = vmax.f32 %v1511_v49, %v1512_v3  ;;  %v7390_v4 = vmax.f32 %v1518_v18, %v1519_v23  ;;  %v7392_v43 = vmax.f32 %v1525_v35, %v1526_v58 }
 0x257   : > { %v1549_v32 = vmax.f32 %v7340_v34, %v10532_v52  ;;  %v1556_v0 = vmax.f32 %v7342_v17, %v10533_v36  ;;  %v1563_v57 = vmax.f32 %v7344_v16, %v10534_v28  ;;  %v1570_v55 = vmax.f32 %v7346_v6, %v10535_v10 }
 0x258   : > { %v1577_v49 = vmax.f32 %v7348_v40, %v10536_v25  ;;  %v1584_v18 = vmax.f32 %v7373_v31, %v10537_v38  ;;  %v1591_v20 = vmax.f32 %v7376_v22, %v10538_v33  ;;  %v1598_v41 = vmax.f32 %v7379_v62, %v10539_v46 }
 0x259   : > { %v1550_v24 = vrot.slane %v1549_v32, 4  ;;  %v1557_v63 = vrot.slane %v1556_v0, 4  ;;  %v1564_v13 = vrot.slane %v1563_v57, 4  ;;  %v1571_v29 = vrot.slane %v1570_v55, 4 }
 0x25a   : > { %v1578_v1 = vrot.slane %v1577_v49, 4  ;;  %v1585_v15 = vrot.slane %v1584_v18, 4  ;;  %v1592_v35 = vrot.slane %v1591_v20, 4  ;;  %v1599_v14 = vrot.slane %v1598_v41, 4 }
 0x25b   : > { %v1551_v44 = vmax.f32 %v1549_v32, %v1550_v24  ;;  %v1558_v3 = vmax.f32 %v1556_v0, %v1557_v63  ;;  %v1565_v23 = vmax.f32 %v1563_v57, %v1564_v13  ;;  %v1572_v58 = vmax.f32 %v1570_v55, %v1571_v29 }
 0x25c   : > { %v1579_v59 = vmax.f32 %v1577_v49, %v1578_v1  ;;  %v1586_v38 = vmax.f32 %v1584_v18, %v1585_v15  ;;  %v1593_v31 = vmax.f32 %v1591_v20, %v1592_v35  ;;  %v1600_v25 = vmax.f32 %v1598_v41, %v1599_v14  ;;  %v10549_v35 = vld [vmem:[#allocation90_spill] sm:$0xff] }
 0x25d   : > { %v1552_v33 = vrot.slane %v1551_v44, 2  ;;  %v1559_v22 = vrot.slane %v1558_v3, 2  ;;  %v1566_v40 = vrot.slane %v1565_v23, 2  ;;  %v1573_v46 = vrot.slane %v1572_v58, 2 }
 0x25e   : > { %v1580_v62 = vrot.slane %v1579_v59, 2  ;;  %v1587_v10 = vrot.slane %v1586_v38, 2  ;;  %v1594_v6 = vrot.slane %v1593_v31, 2  ;;  %v1601_v28 = vrot.slane %v1600_v25, 2 }
 0x25f   : > { %v1553_v16 = vmax.f32 %v1551_v44, %v1552_v33  ;;  %v1560_v36 = vmax.f32 %v1558_v3, %v1559_v22  ;;  %v1567_v17 = vmax.f32 %v1565_v23, %v1566_v40  ;;  %v1574_v52 = vmax.f32 %v1572_v58, %v1573_v46  ;;  %v10548_v33 = vld [vmem:[#allocation41_spill] sm:$0xff]  ;;  %v10550_v44 = vld [vmem:[#allocation43_spill] sm:$0xff] }
 0x260   : > { %v1581_v32 = vmax.f32 %v1579_v59, %v1580_v62  ;;  %v1588_v0 = vmax.f32 %v1586_v38, %v1587_v10  ;;  %v1595_v57 = vmax.f32 %v1593_v31, %v1594_v6  ;;  %v1602_v55 = vmax.f32 %v1600_v25, %v1601_v28  ;;  %v10547_v25 = vld [vmem:[#allocation34_spill] sm:$0xff]  ;;  %v10551_v23 = vld [vmem:[#allocation91_spill] sm:$0xff] }
 0x261   : > { %v1554_v49 = vrot.slane %v1553_v16, 1  ;;  %v1561_v18 = vrot.slane %v1560_v36, 1  ;;  %v1568_v20 = vrot.slane %v1567_v17, 1  ;;  %v1575_v41 = vrot.slane %v1574_v52, 1 }
 0x262   : > { %v1582_v24 = vrot.slane %v1581_v32, 1  ;;  %v1589_v63 = vrot.slane %v1588_v0, 1  ;;  %v1596_v13 = vrot.slane %v1595_v57, 1  ;;  %v1603_v29 = vrot.slane %v1602_v55, 1 }
 0x263   : > { %v1534_v1 = vmax.f32 %v7366_v61, %v1533_v54  ;;  %v1541_v15 = vmax.f32 %v7368_v47, %v1540_v50  ;;  %v7413_v22 = vmax.f32 %v7370_v27, %v1547_v21  ;;  %v7415_v40 = vmax.f32 %v1553_v16, %v1554_v49 }
 0x264   : > { %v7417_v59 = vmax.f32 %v1560_v36, %v1561_v18  ;;  %v7419_v6 = vmax.f32 %v1567_v17, %v1568_v20  ;;  %v7421_v31 = vmax.f32 %v1574_v52, %v1575_v41  ;;  %v7423_v62 = vmax.f32 %v1581_v32, %v1582_v24  ;;  %v3665_v32 = vld [vmem:[#allocation9 + $0x300] sm:$0xff]  ;;  %v10553_v20 = vld [vmem:[#allocation92_spill] sm:$0xff] }
 0x265   : > { %v7425_v28 = vmax.f32 %v1588_v0, %v1589_v63  ;;  %v7427_v10 = vmax.f32 %v1595_v57, %v1596_v13  ;;  %v7429_v61 = vmax.f32 %v1602_v55, %v1603_v29  ;;  %v1605_v47 = vsub.f32 %v7318_v26, %v7381_v19  ;;  %v10552_v0 = vld [vmem:[#allocation44_spill] sm:$0xff]  ;;  %v10554_v24 = vld [vmem:[#allocation55_spill] sm:$0xff] }
 0x266   : > { %v1606_v16 = vsub.f32 %v7131_v51, %v7381_v19  ;;  %v1607_v17 = vsub.f32 %v7321_v12, %v7386_v9  ;;  %v1608_v27 = vsub.f32 %v7134_v48, %v7386_v9  ;;  %v1609_v54 = vsub.f32 %v7324_v60, %v7388_v45  ;;  %v10540_v9 = vld [vmem:[#allocation59_spill] sm:$0xff]  ;;  %v10555_v29 = vld [vmem:[#allocation24_spill] sm:$0xff] }
 0x267   : > { %v1610_v50 = vsub.f32 %v7137_v56, %v7388_v45  ;;  %v1611_v21 = vsub.f32 %v7327_v11, %v7390_v4  ;;  %v1612_v26 = vsub.f32 %v7140_v30, %v7390_v4  ;;  %v1613_v51 = vsub.f32 %v7329_v42, %v7392_v43 }
 0x268   : > { %v1614_v12 = vsub.f32 %v10525_v7, %v7392_v43  ;;  %v1615_v48 = vsub.f32 %v7331_v2, %v1534_v1  ;;  %v1616_v19 = vsub.f32 %v10526_v53, %v1534_v1  ;;  %v1617_v60 = vsub.f32 %v7333_v39, %v1541_v15  ;;  %v10541_v2 = vld [vmem:[#allocation30_spill] sm:$0xff]  ;;  %v10556_v1 = vld [vmem:[#allocation108_spill] sm:$0xff] }
 0x269   : > { %v1618_v56 = vsub.f32 %v10527_v37, %v1541_v15  ;;  %v1619_v11 = vsub.f32 %v7335_v5, %v7413_v22  ;;  %v1620_v30 = vsub.f32 %v10528_v8, %v7413_v22  ;;  %v1621_v42 = vsub.f32 %v7340_v34, %v7415_v40  ;;  %v10542_v53 = vld [vmem:[#allocation62_spill] sm:$0xff]  ;;  %v10543_v37 = vld [vmem:[#allocation32_spill] sm:$0xff]  ;;  %v10545_v8 = vld [vmem:[#allocation33_spill] sm:$0xff] }
 0x26a   : > { %v1622_v7 = vsub.f32 %v10540_v9, %v7415_v40  ;;  %v1623_v45 = vsub.f32 %v10541_v2, %v7417_v59  ;;  %v1624_v39 = vsub.f32 %v10542_v53, %v7417_v59  ;;  %v1625_v4 = vsub.f32 %v10543_v37, %v7419_v6  ;;  %v10544_v5 = vld [vmem:[#allocation66_spill] sm:$0xff]  ;;  %v3536_v2 = vld [vmem:[#allocation8 + $0x300] sm:$0xff]  ;;  %v3538_v37 = vld [vmem:[#allocation8 + $0x310] sm:$0xff] }
 0x26b   : > { %v1626_v43 = vsub.f32 %v10544_v5, %v7419_v6  ;;  %v1627_v52 = vsub.f32 %v10545_v8, %v7421_v31  ;;  %v10546_v34 = vld [vmem:[#allocation70_spill] sm:$0xff]  ;;  %v1629_v38 = vsub.f32 %v10547_v25, %v7423_v62  ;;  %v1630_v46 = vsub.f32 %v10548_v33, %v7423_v62  ;;  %v3540_v5 = vld [vmem:[#allocation8 + $0x320] sm:$0xff]  ;;  %v3558_v25 = vld [vmem:[#allocation8 + $0x3b0] sm:$0xff] }
 0x26c   : > { %v1628_v36 = vsub.f32 %v10546_v34, %v7421_v31  ;;  %v1631_v14 = vsub.f32 %v10549_v35, %v7425_v28  ;;  %v1632_v3 = vsub.f32 %v10550_v44, %v7425_v28  ;;  %v1633_v58 = vsub.f32 %v10551_v23, %v7427_v10  ;;  %v3552_v34 = vld [vmem:[#allocation8 + $0x380] sm:$0xff] }
 0x26d   : > { %v1634_v57 = vsub.f32 %v10552_v0, %v7427_v10  ;;  %v1637_v55 = vmul.f32 1.442695, %v1605_v47  ;;  %v1639_v49 = vmul.f32 1.442695, %v1606_v16  ;;  %v1641_v18 = vmul.f32 1.442695, %v1607_v17 }
 0x26e   : > { %v1635_v41 = vsub.f32 %v10553_v20, %v7429_v61  ;;  %v1636_v63 = vsub.f32 %v10554_v24, %v7429_v61  ;;  %v1643_v13 = vmul.f32 1.442695, %v1608_v27  ;;  %v7493_v15 = vmul.f32 %v10556_v1, %v10555_v29  ;;  %v3560_v33 = vld [vmem:[#allocation8 + $0x3c0] sm:$0xff]  ;;  %v3695_v24 = vld [vmem:[#allocation9 + $0x3f0] sm:$0xff] }
 0x26f   : > { %5709 = vpow2.f32 %v1637_v55  ;;  %v1645_v22 = vmul.f32 1.442695, %v1609_v54  ;;  %v1647_v40 = vmul.f32 1.442695, %v1610_v50  ;;  %v7496_v59 = vmul.f32 %v3665_v32, %v10556_v1  ;;  %v3564_v44 = vld [vmem:[#allocation8 + $0x3e0] sm:$0xff] }
 0x270   : > { %5711 = vpow2.f32 %v1639_v49  ;;  %v1649_v6 = vmul.f32 1.442695, %v1611_v21  ;;  %v1651_v31 = vmul.f32 1.442695, %v1612_v26  ;;  %v1653_v62 = vmul.f32 1.442695, %v1613_v51 }
 0x271   : > { %5713 = vpow2.f32 %v1641_v18  ;;  %v1655_v28 = vmul.f32 1.442695, %v1614_v12  ;;  %v1657_v47 = vmul.f32 1.442695, %v1615_v48  ;;  %v1659_v16 = vmul.f32 1.442695, %v1616_v19 }
 0x272   : > { %5715 = vpow2.f32 %v1643_v13  ;;  %v1661_v17 = vmul.f32 1.442695, %v1617_v60  ;;  %v1663_v27 = vmul.f32 1.442695, %v1618_v56  ;;  %v1665_v9 = vmul.f32 1.442695, %v1619_v11 }
 0x273   : > { %5717 = vpow2.f32 %v1645_v22  ;;  %v1667_v53 = vmul.f32 1.442695, %v1620_v30  ;;  %v7498_v54 = vmul.f32 1.442695, %v1621_v42  ;;  %v7500_v50 = vmul.f32 1.442695, %v1622_v7 }
 0x274   : > { %v3542_v21 = vld [vmem:[#allocation8 + $0x330] sm:$0xff]  ;;  %5719 = vpow2.f32 %v1647_v40  ;;  %v7502_v26 = vmul.f32 1.442695, %v1623_v45  ;;  %v7504_v51 = vmul.f32 1.442695, %v1624_v39  ;;  %v3544_v48 = vld [vmem:[#allocation8 + $0x340] sm:$0xff]  ;;  %v3584_v49 = vadd.f32 %v3552_v34, %v7493_v15 }
 0x275   : > { %v7506_v12 = vmul.f32 1.442695, %v1625_v4  ;;  %v3546_v19 = vld [vmem:[#allocation8 + $0x350] sm:$0xff]  ;;  %v3548_v60 = vld [vmem:[#allocation8 + $0x360] sm:$0xff]  ;;  %5721 = vpow2.f32 %v1649_v6  ;;  %v7508_v56 = vmul.f32 1.442695, %v1626_v43  ;;  %v3574_v35 = vadd.f32 %v3542_v21, %v7493_v15 }
 0x276   : > { %v7510_v11 = vmul.f32 1.442695, %v1627_v52  ;;  %v7512_v30 = vmul.f32 1.442695, %v1628_v36  ;;  %v3550_v42 = vld [vmem:[#allocation8 + $0x370] sm:$0xff]  ;;  %5723 = vpow2.f32 %v1651_v31  ;;  %v3568_v52 = vadd.f32 %v3536_v2, %v7493_v15  ;;  %v3556_v36 = vld [vmem:[#allocation8 + $0x3a0] sm:$0xff] }
 0x277   : > { %v7514_v7 = vmul.f32 1.442695, %v1629_v38  ;;  %v7516_v45 = vmul.f32 1.442695, %v1630_v46  ;;  %v7518_v39 = vmul.f32 1.442695, %v1631_v14  ;;  %5725 = vpow2.f32 %v1653_v62 }
 0x278   : > { %v7520_v4 = vmul.f32 1.442695, %v1632_v3  ;;  %v7522_v8 = vmul.f32 1.442695, %v1633_v58  ;;  %v3554_v43 = vld [vmem:[#allocation8 + $0x390] sm:$0xff]  ;;  %5727 = vpow2.f32 %v1655_v28  ;;  %v3570_v38 = vadd.f32 %v3538_v37, %v7493_v15  ;;  %v10561_v37 = vld [vmem:[#allocation67_spill] sm:$0xff] }
 0x279   : > { %v3572_v46 = vadd.f32 %v3540_v5, %v7493_v15  ;;  %5729 = vpow2.f32 %v1657_v47  ;;  %v3562_v14 = vld [vmem:[#allocation8 + $0x3d0] sm:$0xff]  ;;  %v3576_v23 = vadd.f32 %v3544_v48, %v7493_v15  ;;  %v3578_v58 = vadd.f32 %v3546_v19, %v7493_v15  ;;  %v10559_v47 = vld [vmem:[#allocation63_spill] sm:$0xff] }
 0x27a   : > { %v3566_v3 = vld [vmem:[#allocation8 + $0x3f0] sm:$0xff]  ;;  %v3580_v32 = vadd.f32 %v3548_v60, %v7493_v15  ;;  %5731 = vpow2.f32 %v1659_v16  ;;  %v3582_v55 = vadd.f32 %v3550_v42, %v7493_v15  ;;  %v3586_v18 = vadd.f32 %v3554_v43, %v7493_v15  ;;  %v10563_v48 = vld [vmem:[#allocation71_spill] sm:$0xff]  ;;  %v10565_v42 = vld [vmem:[#allocation68_spill] sm:$0xff] }
 0x27b   : > { %5733 = vpow2.f32 %v1661_v17  ;;  %v3588_v13 = vadd.f32 %v3556_v36, %v7493_v15  ;;  %v3590_v29 = vadd.f32 %v3558_v25, %v7493_v15  ;;  %v3592_v22 = vadd.f32 %v3560_v33, %v7493_v15  ;;  %v10560_v17 = vld [vmem:[#allocation64_spill] sm:$0xff]  ;;  %v10564_v19 = vld [vmem:[#allocation65_spill] sm:$0xff]  ;;  %v3685_v0 = vld [vmem:[#allocation9 + $0x3a0] sm:$0xff] }
 0x27c   : > { %v7537_v40 = vpop.eup %5709  ;;  %5735 = vpow2.f32 %v1663_v27  ;;  %v3594_v6 = vadd.f32 %v3562_v14, %v7493_v15  ;;  %v3596_v31 = vadd.f32 %v3564_v44, %v7493_v15  ;;  %v3598_v62 = vadd.f32 %v3566_v3, %v7493_v15  ;;  %v10567_v15 = vld [vmem:[#allocation72_spill] sm:$0xff]  ;;  %v10569_v25 = vld [vmem:[#allocation45_spill] sm:$0xff]  ;;  %v10573_v44 = vld [vmem:[#allocation51_spill] sm:$0xff] }
 0x27d   : > { %10557 = vst [vmem:[#allocation93_spill] sm:$0xff] %v7537_v40  ;;  %v7542_v28 = vpop.eup %5711  ;;  %5737 = vpow2.f32 %v1665_v9  ;;  %v3600_v16 = vmul.f32 %v3568_v52, %v10559_v47  ;;  %v3602_v2 = vmul.f32 %v3570_v38, %v10560_v17  ;;  %v3604_v5 = vmul.f32 %v3572_v46, %v10561_v37  ;;  %v10568_v52 = vld [vmem:[#allocation73_spill] sm:$0xff]  ;;  %v10577_v47 = vld [vmem:[#allocation50_spill] sm:$0xff] }
 0x27e   : > { %10558 = vst [vmem:[#allocation94_spill] sm:$0xff] %v7542_v28  ;;  %v7547_v21 = vpop.eup %5713  ;;  %5739 = vpow2.f32 %v1667_v53  ;;  %v3606_v27 = vmul.f32 %v3574_v35, %v10563_v48  ;;  %v3608_v60 = vmul.f32 %v3576_v23, %v10564_v19  ;;  %v3610_v34 = vmul.f32 %v3578_v58, %v10565_v42  ;;  %v10571_v53 = vld [vmem:[#allocation46_spill] sm:$0xff]  ;;  %v10572_v35 = vld [vmem:[#allocation47_spill] sm:$0xff]  ;;  %v10585_v42 = vld [vmem:[#allocation109_spill] sm:$0xff] }
 0x27f   : > { %10562 = vst [vmem:[#allocation95_spill] sm:$0xff] %v7547_v21  ;;  %v7552_v43 = vpop.eup %5715  ;;  %5741 = vpow2.f32 %v7498_v54  ;;  %v3612_v9 = vmul.f32 %v3580_v32, %v10567_v15  ;;  %v3614_v36 = vmul.f32 %v3582_v55, %v10568_v52  ;;  %v3616_v33 = vmul.f32 %v3584_v49, %v10569_v25  ;;  %v10575_v54 = vld [vmem:[#allocation48_spill] sm:$0xff]  ;;  %v10576_v32 = vld [vmem:[#allocation49_spill] sm:$0xff]  ;;  %v10580_v37 = vld [vmem:[#allocation38_spill] sm:$0xff] }
 0x280   : > { %10566 = vst [vmem:[#allocation96_spill] sm:$0xff] %v7552_v43  ;;  %v7558_v38 = vpop.eup %5717  ;;  %5743 = vpow2.f32 %v7500_v50  ;;  %v3618_v46 = vmul.f32 %v3586_v18, %v10571_v53  ;;  %v3620_v14 = vmul.f32 %v3588_v13, %v10572_v35  ;;  %v3622_v3 = vmul.f32 %v3590_v29, %v10573_v44  ;;  %v10579_v50 = vld [vmem:[#allocation52_spill] sm:$0xff]  ;;  %v10581_v29 = vld [vmem:[#allocation39_spill] sm:$0xff]  ;;  %v10592_v53 = vld [vmem:[#allocation114_spill] sm:$0xff] }
 0x281   : > { %10570 = vst [vmem:[#allocation97_spill] sm:$0xff] %v7558_v38  ;;  %v7564_v23 = vpop.eup %5719  ;;  %5745 = vpow2.f32 %v7502_v26  ;;  %v3624_v58 = vmul.f32 %v3592_v22, %v10575_v54  ;;  %v3626_v55 = vmul.f32 %v3594_v6, %v10576_v32  ;;  %v3628_v49 = vmul.f32 %v3596_v31, %v10577_v47  ;;  %v10583_v26 = vld [vmem:[#allocation29_spill] sm:$0xff]  ;;  %v10584_v6 = vld [vmem:[#allocation31_spill] sm:$0xff] }
 0x282   : > { %10574 = vst [vmem:[#allocation98_spill] sm:$0xff] %v7564_v23  ;;  %v7570_v17 = vpop.eup %5721  ;;  %5747 = vpow2.f32 %v7504_v51  ;;  %v3630_v18 = vmul.f32 %v3598_v62, %v10579_v50  ;;  %v7575_v13 = vadd.f32 %v3600_v16, %v10580_v37  ;;  %v7578_v48 = vadd.f32 %v3602_v2, %v10581_v29  ;;  %v10587_v16 = vld [vmem:[#allocation110_spill] sm:$0xff]  ;;  %v10588_v15 = vld [vmem:[#allocation111_spill] sm:$0xff]  ;;  %v10596_v50 = vld [vmem:[#allocation117_spill] sm:$0xff] }
 0x283   : > { %10578 = vst [vmem:[#allocation99_spill] sm:$0xff] %v7570_v17  ;;  %v7580_v19 = vpop.eup %5723  ;;  %5749 = vpow2.f32 %v7506_v12  ;;  %v7584_v22 = vadd.f32 %v3604_v5, %v10583_v26  ;;  %v7587_v31 = vadd.f32 %v3606_v27, %v10584_v6  ;;  %v7590_v51 = vadd.f32 %v3608_v60, %v10585_v42  ;;  %v10589_v12 = vld [vmem:[#allocation112_spill] sm:$0xff]  ;;  %v10591_v27 = vld [vmem:[#allocation113_spill] sm:$0xff]  ;;  %v3669_v54 = vld [vmem:[#allocation9 + $0x320] sm:$0xff] }
 0x284   : > { %10582 = vst [vmem:[#allocation57_spill] sm:$0xff] %v7580_v19  ;;  %v7592_v62 = vpop.eup %5725  ;;  %5751 = vpow2.f32 %v7508_v56  ;;  %v7596_v2 = vadd.f32 %v3610_v34, %v10587_v16  ;;  %v7599_v52 = vadd.f32 %v3612_v9, %v10588_v15  ;;  %v7602_v25 = vadd.f32 %v3614_v36, %v10589_v12  ;;  %v10593_v56 = vld [vmem:[#allocation115_spill] sm:$0xff]  ;;  %v3667_v34 = vld [vmem:[#allocation9 + $0x310] sm:$0xff]  ;;  %v10595_v36 = vld [vmem:[#allocation116_spill] sm:$0xff] }
 0x285   : > { %10586 = vst [vmem:[#allocation23_spill] sm:$0xff] %v7592_v62  ;;  %v7604_v5 = vpop.eup %5727  ;;  %5753 = vpow2.f32 %v7510_v11  ;;  %v7608_v60 = vadd.f32 %v3616_v33, %v10591_v27  ;;  %v7611_v35 = vadd.f32 %v3618_v46, %v10592_v53  ;;  %v7614_v44 = vadd.f32 %v3620_v14, %v10593_v56  ;;  %v3671_v9 = vld [vmem:[#allocation9 + $0x330] sm:$0xff]  ;;  %v10597_v37 = vld [vmem:[#allocation118_spill] sm:$0xff]  ;;  %v3673_v29 = vld [vmem:[#allocation9 + $0x340] sm:$0xff] }
 0x286   : > { %10590 = vst [vmem:[#allocation42_spill] sm:$0xff] %v7604_v5  ;;  %v7616_v32 = vpop.eup %5729  ;;  %5755 = vpow2.f32 %v7512_v30  ;;  %v3654_v47 = vadd.f32 %v3622_v3, %v10595_v36  ;;  %v3656_v11 = vadd.f32 %v3624_v58, %v10596_v50  ;;  %v3658_v33 = vadd.f32 %v3626_v55, %v10597_v37  ;;  %v3675_v26 = vld [vmem:[#allocation9 + $0x350] sm:$0xff]  ;;  %v3677_v46 = vld [vmem:[#allocation9 + $0x360] sm:$0xff]  ;;  %v10601_v16 = vld [vmem:[#allocation120_spill] sm:$0xff] }
 0x287   : > { %10594 = vst [vmem:[#allocation53_spill] sm:$0xff] %v7616_v32  ;;  %v7622_v6 = vpop.eup %5731  ;;  %5757 = vpow2.f32 %v7514_v7  ;;  %v7628_v14 = vmul.f32 1.442695, %v1634_v57  ;;  %v10600_v42 = vld [vmem:[#allocation119_spill] sm:$0xff]  ;;  %v3662_v3 = vadd.f32 %v3630_v18, %v10601_v16  ;;  %v3679_v15 = vld [vmem:[#allocation9 + $0x370] sm:$0xff]  ;;  %v3701_v20 = vmul.f32 %v3669_v54, %v10556_v1 }
 0x288   : > { %10598 = vst [vmem:[#allocation54_spill] sm:$0xff] %v7622_v6  ;;  %v3660_v30 = vadd.f32 %v3628_v49, %v10600_v42  ;;  %v3681_v58 = vld [vmem:[#allocation9 + $0x380] sm:$0xff]  ;;  %v3683_v12 = vld [vmem:[#allocation9 + $0x390] sm:$0xff]  ;;  %v7632_v55 = vpop.eup %5733  ;;  %5759 = vpow2.f32 %v7516_v45  ;;  %v7638_v7 = vmul.f32 1.442695, %v1635_v41  ;;  %v3699_v49 = vmul.f32 %v3667_v34, %v10556_v1 }
 0x289   : > { %10599 = vst [vmem:[#allocation56_spill] sm:$0xff] %v7628_v14  ;;  %10602 = vst [vmem:[#allocation40_spill] sm:$0xff] %v7632_v55  ;;  %v7643_v10 = vmul.f32 1.442695, %v1636_v63  ;;  %v3687_v57 = vld [vmem:[#allocation9 + $0x3b0] sm:$0xff]  ;;  %v7646_v18 = vpop.eup %5735  ;;  %5761 = vpow2.f32 %v7518_v39  ;;  %v3689_v27 = vld [vmem:[#allocation9 + $0x3c0] sm:$0xff]  ;;  %v3703_v41 = vmul.f32 %v3671_v9, %v10556_v1  ;;  %v3705_v56 = vmul.f32 %v3673_v29, %v10556_v1 }
 0x28a   : > { %10603 = vst [vmem:[#allocation25_spill] sm:$0xff] %v7638_v7  ;;  %10605 = vst [vmem:[#allocation27_spill] sm:$0xff] %v7646_v18  ;;  %v3691_v45 = vld [vmem:[#allocation9 + $0x3d0] sm:$0xff]  ;;  %v3693_v53 = vld [vmem:[#allocation9 + $0x3e0] sm:$0xff]  ;;  %v7652_v61 = vpop.eup %5737  ;;  %5763 = vpow2.f32 %v7520_v4  ;;  %v3707_v63 = vmul.f32 %v3675_v26, %v10556_v1  ;;  %v3709_v34 = vmul.f32 %v3677_v46, %v10556_v1  ;;  %v3711_v39 = vmul.f32 %v3679_v15, %v10556_v1 }
 0x28b   : > { %10604 = vst [vmem:[#allocation26_spill] sm:$0xff] %v7643_v10  ;;  %10606 = vst [vmem:[#allocation28_spill] sm:$0xff] %v7652_v61  ;;  %v7658_v36 = vpop.eup %5739  ;;  %5765 = vpow2.f32 %v7522_v8  ;;  %v3713_v54 = vmul.f32 %v3681_v58, %v10556_v1  ;;  %v3715_v9 = vmul.f32 %v3683_v12, %v10556_v1  ;;  %v3717_v50 = vmul.f32 %v3685_v0, %v10556_v1 }
 0x28c   : > { %10607 = vst [vmem:[#allocation35_spill] sm:$0xff] %v7658_v36  ;;  %v7664_v37 = vpop.eup %5741  ;;  %v3719_v4 = vmul.f32 %v3687_v57, %v10556_v1  ;;  %v3721_v29 = vmul.f32 %v3689_v27, %v10556_v1  ;;  %v3723_v26 = vmul.f32 %v3691_v45, %v10556_v1  ;;  %v3725_v46 = vmul.f32 %v3693_v53, %v10556_v1  ;;  %v10619_v53 = vld [vmem:[#allocation74_spill] sm:$0xff] }
 0x28d   : > { %10608 = vst [vmem:[#allocation36_spill] sm:$0xff] %v7664_v37  ;;  %v7670_v42 = vpop.eup %5743  ;;  %v3727_v8 = vmul.f32 %v3695_v24, %v10556_v1  ;;  %v7675_v16 = vadd.f32 %v7496_v59, %v7575_v13  ;;  %v7678_v15 = vadd.f32 %v3699_v49, %v7578_v48  ;;  %v7681_v58 = vadd.f32 %v3701_v20, %v7584_v22  ;;  %v10620_v20 = vld [vmem:[#allocation75_spill] sm:$0xff] }
 0x28e   : > { %10609 = vst [vmem:[#allocation37_spill] sm:$0xff] %v7670_v42  ;;  %v7683_v12 = vpop.eup %5745  ;;  %v7686_v0 = vadd.f32 %v3703_v41, %v7587_v31  ;;  %v7689_v57 = vadd.f32 %v3705_v56, %v7590_v51  ;;  %v7692_v1 = vadd.f32 %v3707_v63, %v7596_v2  ;;  %v7695_v59 = vadd.f32 %v3709_v34, %v7599_v52  ;;  %v10621_v41 = vld [vmem:[#allocation76_spill] sm:$0xff]  ;;  %v10625_v63 = vld [vmem:[#allocation79_spill] sm:$0xff] }
 0x28f   : > { %10610 = vst [vmem:[#allocation100_spill] sm:$0xff] %v7683_v12  ;;  %v7697_v13 = vpop.eup %5747  ;;  %v7700_v48 = vadd.f32 %v3711_v39, %v7602_v25  ;;  %v7703_v22 = vadd.f32 %v3713_v54, %v7608_v60  ;;  %v7706_v31 = vadd.f32 %v3715_v9, %v7611_v35  ;;  %v7709_v51 = vadd.f32 %v3717_v50, %v7614_v44  ;;  %v10626_v34 = vld [vmem:[#allocation80_spill] sm:$0xff] }
 0x290   : > { %10611 = vst [vmem:[#allocation101_spill] sm:$0xff] %v7697_v13  ;;  %v7711_v49 = vpop.eup %5749  ;;  %v7713_v2 = vadd.f32 %v3719_v4, %v3654_v47  ;;  %v7715_v52 = vadd.f32 %v3721_v29, %v3656_v11  ;;  %v7717_v27 = vadd.f32 %v3723_v26, %v3658_v33  ;;  %v7719_v45 = vadd.f32 %v3725_v46, %v3660_v30  ;;  %v10623_v11 = vld [vmem:[#allocation77_spill] sm:$0xff]  ;;  %v10624_v30 = vld [vmem:[#allocation78_spill] sm:$0xff] }
 0x291   : > { %10612 = vst [vmem:[#allocation102_spill] sm:$0xff] %v7711_v49  ;;  %v7721_v25 = vpop.eup %5751  ;;  %v7723_v60 = vadd.f32 %v3727_v8, %v3662_v3  ;;  %v3761_v35 = vmax.f32 %v7675_v16, %v10619_v53  ;;  %v3768_v44 = vmax.f32 %v7678_v15, %v10620_v20  ;;  %v3775_v47 = vmax.f32 %v7681_v58, %v10621_v41  ;;  %v10628_v29 = vld [vmem:[#allocation81_spill] sm:$0xff] }
 0x292   : > { %10613 = vst [vmem:[#allocation103_spill] sm:$0xff] %v7713_v2  ;;  %10614 = vst [vmem:[#allocation104_spill] sm:$0xff] %v7715_v52  ;;  %v7731_v56 = vpop.eup %5753  ;;  %v3782_v33 = vmax.f32 %v7686_v0, %v10623_v11  ;;  %v3789_v24 = vmax.f32 %v7689_v57, %v10624_v30  ;;  %v3796_v3 = vmax.f32 %v7692_v1, %v10625_v63 }
 0x293   : > { %10615 = vst [vmem:[#allocation105_spill] sm:$0xff] %v7717_v27  ;;  %10616 = vst [vmem:[#allocation106_spill] sm:$0xff] %v7719_v45  ;;  %v3803_v39 = vmax.f32 %v7695_v59, %v10626_v34  ;;  %v7741_v54 = vpop.eup %5755  ;;  %v3762_v9 = vrot.slane %v3761_v35, 4  ;;  %v3769_v50 = vrot.slane %v3768_v44, 4  ;;  %v3776_v4 = vrot.slane %v3775_v47, 4 }
 0x294   : > { %10617 = vst [vmem:[#allocation107_spill] sm:$0xff] %v7721_v25  ;;  %10618 = vst [vmem:[#allocation58_spill] sm:$0xff] %v7723_v60  ;;  %v3810_v26 = vmax.f32 %v7700_v48, %v10628_v29  ;;  %v7745_v46 = vpop.eup %5757  ;;  %v3783_v8 = vrot.slane %v3782_v33, 4  ;;  %v3797_v49 = vrot.slane %v3796_v3, 4 }
 0x295   : > { %10622 = vst [vmem:[#allocation60_spill] sm:$0xff] %v7731_v56  ;;  %10627 = vst [vmem:[#allocation61_spill] sm:$0xff] %v7741_v54  ;;  %v3790_v56 = vrot.slane %v3789_v24, 4  ;;  %v3804_v61 = vrot.slane %v3803_v39, 4  ;;  %v7747_v55 = vpop.eup %5759  ;;  %v3763_v32 = vmax.f32 %v3761_v35, %v3762_v9  ;;  %v3770_v62 = vmax.f32 %v3768_v44, %v3769_v50 }
 0x296   : > { %10629 = vst [vmem:[#allocation69_spill] sm:$0xff] %v7745_v46  ;;  %10630 = vst [vmem:[#allocation59_spill] sm:$0xff] %v7747_v55  ;;  %v3777_v17 = vmax.f32 %v3775_v47, %v3776_v4  ;;  %v3811_v38 = vrot.slane %v3810_v26, 4  ;;  %v7749_v12 = vpop.eup %5761  ;;  %v3784_v37 = vmax.f32 %v3782_v33, %v3783_v8  ;;  %v3798_v25 = vmax.f32 %v3796_v3, %v3797_v49 }
 0x297   : > { %10631 = vst [vmem:[#allocation30_spill] sm:$0xff] %v7749_v12  ;;  %v3791_v54 = vmax.f32 %v3789_v24, %v3790_v56  ;;  %v3805_v13 = vmax.f32 %v3803_v39, %v3804_v61  ;;  %v7751_v42 = vpop.eup %5763  ;;  %v3764_v36 = vrot.slane %v3763_v32, 2  ;;  %v3771_v46 = vrot.slane %v3770_v62, 2 }
 0x298   : > { %10632 = vst [vmem:[#allocation62_spill] sm:$0xff] %v7751_v42  ;;  %v3778_v18 = vrot.slane %v3777_v17, 2  ;;  %v3812_v6 = vmax.f32 %v3810_v26, %v3811_v38  ;;  %v7753_v5 = vpop.eup %5765  ;;  %v3785_v19 = vrot.slane %v3784_v37, 2  ;;  %v3799_v35 = vrot.slane %v3798_v25, 2 }
 0x299   : > { %10633 = vst [vmem:[#allocation32_spill] sm:$0xff] %v7753_v5  ;;  %v3792_v55 = vrot.slane %v3791_v54, 2  ;;  %v3806_v44 = vrot.slane %v3805_v13, 2  ;;  %v3765_v47 = vmax.f32 %v3763_v32, %v3764_v36  ;;  %v3772_v9 = vmax.f32 %v3770_v62, %v3771_v46  ;;  %v10634_v36 = vld [vmem:[#allocation82_spill] sm:$0xff] }
 0x29a   : > { %v3779_v50 = vmax.f32 %v3777_v17, %v3778_v18  ;;  %v3813_v4 = vrot.slane %v3812_v6, 2  ;;  %v3786_v33 = vmax.f32 %v3784_v37, %v3785_v19  ;;  %v3800_v49 = vmax.f32 %v3798_v25, %v3799_v35  ;;  %v10637_v35 = vld [vmem:[#allocation85_spill] sm:$0xff] }
 0x29b   : > { %v3793_v56 = vmax.f32 %v3791_v54, %v3792_v55  ;;  %v3807_v61 = vmax.f32 %v3805_v13, %v3806_v44  ;;  %v3766_v24 = vrot.slane %v3765_v47, 1  ;;  %v3773_v3 = vrot.slane %v3772_v9, 1  ;;  %v10635_v13 = vld [vmem:[#allocation83_spill] sm:$0xff]  ;;  %v10636_v54 = vld [vmem:[#allocation84_spill] sm:$0xff]  ;;  %v10638_v44 = vld [vmem:[#allocation86_spill] sm:$0xff] }
 0x29c   : > { %v3780_v39 = vrot.slane %v3779_v50, 1  ;;  %v3814_v8 = vmax.f32 %v3812_v6, %v3813_v4  ;;  %v3787_v12 = vrot.slane %v3786_v33, 1  ;;  %v3801_v26 = vrot.slane %v3800_v49, 1 }
 0x29d   : > { %v3794_v38 = vrot.slane %v3793_v56, 1  ;;  %v3808_v5 = vrot.slane %v3807_v61, 1  ;;  %v7755_v42 = vmax.f32 %v3765_v47, %v3766_v24  ;;  %v7757_v23 = vmax.f32 %v3772_v9, %v3773_v3  ;;  %v10639_v9 = vld [vmem:[#allocation87_spill] sm:$0xff] }
 0x29e   : > { %v7759_v32 = vmax.f32 %v3779_v50, %v3780_v39  ;;  %v3815_v17 = vrot.slane %v3814_v8, 1  ;;  %v7761_v62 = vmax.f32 %v3786_v33, %v3787_v12  ;;  %v7765_v55 = vmax.f32 %v3800_v49, %v3801_v26  ;;  %v10640_v50 = vld [vmem:[#allocation88_spill] sm:$0xff] }
 0x29f   : > { %v7763_v19 = vmax.f32 %v3793_v56, %v3794_v38  ;;  %v7767_v18 = vmax.f32 %v3807_v61, %v3808_v5  ;;  %v3817_v37 = vmax.f32 %v7703_v22, %v10634_v36  ;;  %v3824_v25 = vmax.f32 %v7706_v31, %v10635_v13  ;;  %v10641_v61 = vld [vmem:[#allocation89_spill] sm:$0xff] }
 0x2a0   : > { %v7769_v6 = vmax.f32 %v3814_v8, %v3815_v17  ;;  %v3831_v46 = vmax.f32 %v7709_v51, %v10636_v54  ;;  %v3838_v12 = vmax.f32 %v7713_v2, %v10637_v35  ;;  %v3845_v47 = vmax.f32 %v7715_v52, %v10638_v44 }
 0x2a1   : > { %v3852_v5 = vmax.f32 %v7717_v27, %v10639_v9  ;;  %v3859_v4 = vmax.f32 %v7719_v45, %v10640_v50  ;;  %v3818_v33 = vrot.slane %v3817_v37, 4  ;;  %v3825_v56 = vrot.slane %v3824_v25, 4 }
 0x2a2   : > { %v3832_v49 = vrot.slane %v3831_v46, 4  ;;  %v3866_v24 = vmax.f32 %v7723_v60, %v10641_v61  ;;  %v3839_v3 = vrot.slane %v3838_v12, 4  ;;  %v3846_v39 = vrot.slane %v3845_v47, 4 }
 0x2a3   : > { %v3853_v8 = vrot.slane %v3852_v5, 4  ;;  %v3860_v38 = vrot.slane %v3859_v4, 4  ;;  %v3819_v26 = vmax.f32 %v3817_v37, %v3818_v33  ;;  %v3826_v17 = vmax.f32 %v3824_v25, %v3825_v56 }
 0x2a4   : > { %v3833_v43 = vmax.f32 %v3831_v46, %v3832_v49  ;;  %v3867_v21 = vrot.slane %v3866_v24, 4  ;;  %v3840_v28 = vmax.f32 %v3838_v12, %v3839_v3  ;;  %v3847_v40 = vmax.f32 %v3845_v47, %v3846_v39 }
 0x2a5   : > { %v3854_v10 = vmax.f32 %v3852_v5, %v3853_v8  ;;  %v3861_v7 = vmax.f32 %v3859_v4, %v3860_v38  ;;  %v3820_v14 = vrot.slane %v3819_v26, 2  ;;  %v3827_v50 = vrot.slane %v3826_v17, 2  ;;  %v10651_v8 = vld [vmem:[#allocation58_spill] sm:$0xff] }
 0x2a6   : > { %v3834_v45 = vrot.slane %v3833_v43, 2  ;;  %v3868_v9 = vmax.f32 %v3866_v24, %v3867_v21  ;;  %v3841_v27 = vrot.slane %v3840_v28, 2  ;;  %v3848_v44 = vrot.slane %v3847_v40, 2 }
 0x2a7   : > { %v3855_v52 = vrot.slane %v3854_v10, 2  ;;  %v3862_v61 = vrot.slane %v3861_v7, 2  ;;  %v3821_v60 = vmax.f32 %v3819_v26, %v3820_v14  ;;  %v3828_v35 = vmax.f32 %v3826_v17, %v3827_v50  ;;  %v10650_v50 = vld [vmem:[#allocation88_spill] sm:$0xff]  ;;  %v10653_v17 = vld [vmem:[#allocation89_spill] sm:$0xff] }
 0x2a8   : > { %v3835_v2 = vmax.f32 %v3833_v43, %v3834_v45  ;;  %v3869_v54 = vrot.slane %v3868_v9, 2  ;;  %v3842_v37 = vmax.f32 %v3840_v28, %v3841_v27  ;;  %v3849_v25 = vmax.f32 %v3847_v40, %v3848_v44  ;;  %v10652_v26 = vld [vmem:[#allocation56_spill] sm:$0xff] }
 0x2a9   : > { %v3856_v46 = vmax.f32 %v3854_v10, %v3855_v52  ;;  %v3863_v33 = vmax.f32 %v3861_v7, %v3862_v61  ;;  %v3822_v12 = vrot.slane %v3821_v60, 1  ;;  %v3829_v47 = vrot.slane %v3828_v35, 1 }
 0x2aa   : > { %v3836_v5 = vrot.slane %v3835_v2, 1  ;;  %v3870_v4 = vmax.f32 %v3868_v9, %v3869_v54  ;;  %v3843_v56 = vrot.slane %v3842_v37, 1  ;;  %v3850_v49 = vrot.slane %v3849_v25, 1 }
 0x2ab   : > { %v3857_v3 = vrot.slane %v3856_v46, 1  ;;  %v3864_v21 = vrot.slane %v3863_v33, 1  ;;  %v7787_v24 = vmax.f32 %v3821_v60, %v3822_v12  ;;  %v7789_v39 = vmax.f32 %v3828_v35, %v3829_v47  ;;  %v10655_v47 = vld [vmem:[#allocation26_spill] sm:$0xff] }
 0x2ac   : > { %v7791_v14 = vmax.f32 %v3835_v2, %v3836_v5  ;;  %v3871_v43 = vrot.slane %v3870_v4, 1  ;;  %v7793_v45 = vmax.f32 %v3842_v37, %v3843_v56  ;;  %v7795_v40 = vmax.f32 %v3849_v25, %v3850_v49 }
 0x2ad   : > { %v7797_v28 = vmax.f32 %v3856_v46, %v3857_v3  ;;  %v7799_v7 = vmax.f32 %v3863_v33, %v3864_v21  ;;  %v3873_v52 = vsub.f32 %v7675_v16, %v7755_v42  ;;  %v3874_v27 = vsub.f32 %v10619_v53, %v7755_v42  ;;  %v10654_v33 = vld [vmem:[#allocation25_spill] sm:$0xff] }
 0x2ae   : > { %v7801_v10 = vmax.f32 %v3870_v4, %v3871_v43  ;;  %v3875_v2 = vsub.f32 %v7678_v15, %v7757_v23  ;;  %v3876_v60 = vsub.f32 %v10620_v20, %v7757_v23  ;;  %v3877_v54 = vsub.f32 %v7681_v58, %v7759_v32 }
 0x2af   : > { %v3878_v35 = vsub.f32 %v10621_v41, %v7759_v32  ;;  %v3879_v44 = vsub.f32 %v7686_v0, %v7761_v62  ;;  %v3880_v16 = vsub.f32 %v10623_v11, %v7761_v62  ;;  %v3881_v42 = vsub.f32 %v7689_v57, %v7763_v19  ;;  %v10645_v62 = vld [vmem:[#allocation104_spill] sm:$0xff] }
 0x2b0   : > { %v3882_v15 = vsub.f32 %v10624_v30, %v7763_v19  ;;  %v3883_v23 = vsub.f32 %v7692_v1, %v7765_v55  ;;  %v3884_v58 = vsub.f32 %v10625_v63, %v7765_v55  ;;  %v3885_v53 = vsub.f32 %v7695_v59, %v7767_v18  ;;  %v10642_v30 = vld [vmem:[#allocation84_spill] sm:$0xff]  ;;  %v10646_v19 = vld [vmem:[#allocation86_spill] sm:$0xff] }
 0x2b1   : > { %v3886_v0 = vsub.f32 %v10626_v34, %v7767_v18  ;;  %v3887_v20 = vsub.f32 %v7700_v48, %v7769_v6  ;;  %v3888_v57 = vsub.f32 %v10628_v29, %v7769_v6  ;;  %v3889_v41 = vsub.f32 %v7703_v22, %v7787_v24  ;;  %v10643_v34 = vld [vmem:[#allocation103_spill] sm:$0xff]  ;;  %v10644_v29 = vld [vmem:[#allocation85_spill] sm:$0xff] }
 0x2b2   : > { %v3890_v1 = vsub.f32 %v10634_v36, %v7787_v24  ;;  %v3891_v11 = vsub.f32 %v7706_v31, %v7789_v39  ;;  %v3892_v59 = vsub.f32 %v10635_v13, %v7789_v39  ;;  %v3893_v48 = vsub.f32 %v7709_v51, %v7791_v14  ;;  %v10647_v18 = vld [vmem:[#allocation105_spill] sm:$0xff]  ;;  %v10648_v51 = vld [vmem:[#allocation87_spill] sm:$0xff]  ;;  %v10649_v13 = vld [vmem:[#allocation106_spill] sm:$0xff] }
 0x2b3   : > { %v3894_v63 = vsub.f32 %v10642_v30, %v7791_v14  ;;  %v3895_v22 = vsub.f32 %v10643_v34, %v7793_v45  ;;  %v3896_v32 = vsub.f32 %v10644_v29, %v7793_v45  ;;  %v3897_v31 = vsub.f32 %v10645_v62, %v7795_v40  ;;  %v1844_v34 = vld [vmem:[#allocation11 + $0x58] sm:$0xff]  ;;  %v10657_v62 = vld [vmem:[#allocation93_spill] sm:$0xff] }
 0x2b4   : > { %v3898_v55 = vsub.f32 %v10646_v19, %v7795_v40  ;;  %v3899_v6 = vsub.f32 %v10647_v18, %v7797_v28  ;;  %v3900_v36 = vsub.f32 %v10648_v51, %v7797_v28  ;;  %v3901_v9 = vsub.f32 %v10649_v13, %v7799_v7  ;;  %v1848_v29 = vld [vmem:[#allocation11 + $0x78] sm:$0xff]  ;;  %v1850_v18 = vld [vmem:[#allocation11 + $0x88] sm:$0xff] }
 0x2b5   : > { %v3902_v61 = vsub.f32 %v10650_v50, %v7799_v7  ;;  %v3903_v38 = vsub.f32 %v10651_v8, %v7801_v10  ;;  %5767 = vpow2.f32 %v10652_v26  ;;  %v3904_v37 = vsub.f32 %v10653_v17, %v7801_v10  ;;  %v1854_v51 = vld [vmem:[#allocation11 + $0xa8] sm:$0xff]  ;;  %v1860_v17 = vld [vmem:[#allocation11 + $0xd8] sm:$0xff] }
 0x2b6   : > { %v3905_v25 = vmul.f32 1.442695, %v3873_v52  ;;  %v3907_v46 = vmul.f32 1.442695, %v3874_v27  ;;  %5769 = vpow2.f32 %v10654_v33  ;;  %v3909_v12 = vmul.f32 1.442695, %v3875_v2 }
 0x2b7   : > { %5771 = vpow2.f32 %v10655_v47  ;;  %v3911_v5 = vmul.f32 1.442695, %v3876_v60  ;;  %v3913_v4 = vmul.f32 1.442695, %v3877_v54  ;;  %v3915_v56 = vmul.f32 1.442695, %v3878_v35 }
 0x2b8   : > { %5773 = vpow2.f32 %v3905_v25  ;;  %v3917_v49 = vmul.f32 1.442695, %v3879_v44  ;;  %v3919_v3 = vmul.f32 1.442695, %v3880_v16  ;;  %v10041_v21 = vstv %s7841_s23  ;;  %v5519_v44 = vpop.f32.mrf.mxu0  ;;  %v1834_v16 = vld [vmem:[#allocation11 + $0x8] sm:$0xff]  ;;  %v1864_v47 = vld [vmem:[#allocation11 + $0xf8] sm:$0xff] }
 0x2b9   : > { %5775 = vpow2.f32 %v3907_v46  ;;  %v3921_v24 = vmul.f32 1.442695, %v3881_v42  ;;  %v3923_v39 = vmul.f32 1.442695, %v3882_v15  ;;  %v3925_v14 = vmul.f32 1.442695, %v3883_v23 }
 0x2ba   : > { %5777 = vpow2.f32 %v3909_v12  ;;  %v3927_v43 = vmul.f32 1.442695, %v3884_v58  ;;  %v3929_v45 = vmul.f32 1.442695, %v3885_v53  ;;  %v3931_v40 = vmul.f32 1.442695, %v3886_v0 }
 0x2bb   : > { %5779 = vpow2.f32 %v3911_v5  ;;  %v3933_v28 = vmul.f32 1.442695, %v3887_v20  ;;  %v7875_v7 = vmul.f32 1.442695, %v3888_v57  ;;  %v7877_v10 = vmul.f32 1.442695, %v3889_v41 }
 0x2bc   : > { %5781 = vpow2.f32 %v3913_v4  ;;  %v7879_v52 = vmul.f32 1.442695, %v3890_v1  ;;  %v7881_v27 = vmul.f32 1.442695, %v3891_v11  ;;  %v7883_v2 = vmul.f32 1.442695, %v3892_v59 }
 0x2bd   : > { %5783 = vpow2.f32 %v3915_v56  ;;  %v7885_v60 = vmul.f32 1.442695, %v3893_v48  ;;  %v7887_v54 = vmul.f32 1.442695, %v3894_v63  ;;  %v7889_v35 = vmul.f32 1.442695, %v3895_v22 }
 0x2be   : > { %5785 = vpow2.f32 %v3917_v49  ;;  %v1836_v42 = vld [vmem:[#allocation11 + $0x18] sm:$0xff]  ;;  %v7891_v15 = vmul.f32 1.442695, %v3896_v32  ;;  %v7893_v23 = vmul.f32 1.442695, %v3897_v31  ;;  %v1832_v58 = vadd.f32 %v5519_v44, %v10041_v21  ;;  %v1838_v53 = vld [vmem:[#allocation11 + $0x28] sm:$0xff] }
 0x2bf   : > { %5787 = vpow2.f32 %v3919_v3  ;;  %v1840_v0 = vld [vmem:[#allocation11 + $0x38] sm:$0xff]  ;;  %v1842_v20 = vld [vmem:[#allocation11 + $0x48] sm:$0xff]  ;;  %v7897_v57 = vmul.f32 1.442695, %v3898_v55  ;;  %v7899_v41 = vmul.f32 1.442695, %v3899_v6  ;;  %v10042_v32 = vstv %s7873_s24 }
 0x2c0   : > { %5789 = vpow2.f32 %v3921_v24  ;;  %v7901_v1 = vmul.f32 1.442695, %v3900_v36  ;;  %v7903_v11 = vmul.f32 1.442695, %v3901_v9  ;;  %v7905_v59 = vmul.f32 1.442695, %v3902_v61 }
 0x2c1   : > { %5791 = vpow2.f32 %v3923_v39  ;;  %v7907_v48 = vmul.f32 1.442695, %v3903_v38  ;;  %v7911_v63 = vmul.f32 1.442695, %v3904_v37  ;;  %v1846_v22 = vld [vmem:[#allocation11 + $0x68] sm:$0xff]  ;;  %v10658_v31 = vld [vmem:[#allocation94_spill] sm:$0xff]  ;;  %v1866_v36 = vadd.f32 %v1834_v16, %v1832_v58 }
 0x2c2   : > { %v7909_v30 = vpop.eup %5767  ;;  %5793 = vpow2.f32 %v3925_v14  ;;  %v7916_v19 = vadd.f32 %v10658_v31, %v10657_v62  ;;  %v1852_v6 = vld [vmem:[#allocation11 + $0x98] sm:$0xff]  ;;  %v1868_v13 = vadd.f32 %v1836_v42, %v1832_v58  ;;  %v10660_v9 = vld [vmem:[#allocation95_spill] sm:$0xff]  ;;  %v10661_v50 = vld [vmem:[#allocation96_spill] sm:$0xff]  ;;  %v1870_v37 = vadd.f32 %v1838_v53, %v1832_v58 }
 0x2c3   : > { %10656 = vst [vmem:[#allocation66_spill] sm:$0xff] %v7909_v30  ;;  %v7918_v55 = vpop.eup %5769  ;;  %5795 = vpow2.f32 %v3927_v43  ;;  %v7922_v61 = vadd.f32 %v10661_v50, %v10660_v9  ;;  %v1856_v38 = vld [vmem:[#allocation11 + $0xb8] sm:$0xff]  ;;  %v1858_v26 = vld [vmem:[#allocation11 + $0xc8] sm:$0xff]  ;;  %v1872_v25 = vadd.f32 %v1840_v0, %v1832_v58  ;;  %v1874_v46 = vadd.f32 %v1842_v20, %v1832_v58 }
 0x2c4   : > { %10659 = vst [vmem:[#allocation33_spill] sm:$0xff] %v7918_v55  ;;  %v7924_v8 = vpop.eup %5771  ;;  %5797 = vpow2.f32 %v3929_v45  ;;  %v1862_v12 = vld [vmem:[#allocation11 + $0xe8] sm:$0xff]  ;;  %v1876_v5 = vadd.f32 %v1844_v34, %v1832_v58  ;;  %v1878_v4 = vadd.f32 %v1846_v22, %v1832_v58  ;;  %v1880_v56 = vadd.f32 %v1848_v29, %v1832_v58  ;;  %v10669_v34 = vld [vmem:[#allocation57_spill] sm:$0xff]  ;;  %v4105_v21 = vld [vmem:[#allocation11 + $0x418] sm:$0xff] }
 0x2c5   : > { %10662 = vst [vmem:[#allocation70_spill] sm:$0xff] %v7924_v8  ;;  %v7926_v33 = vpop.eup %5773  ;;  %5799 = vpow2.f32 %v3931_v40  ;;  %v1882_v3 = vadd.f32 %v1850_v18, %v1832_v58  ;;  %v1884_v24 = vadd.f32 %v1852_v6, %v1832_v58  ;;  %v1886_v39 = vadd.f32 %v1854_v51, %v1832_v58  ;;  %v10672_v18 = vld [vmem:[#allocation54_spill] sm:$0xff] }
 0x2c6   : > { %10663 = vst [vmem:[#allocation34_spill] sm:$0xff] %v7926_v33  ;;  %v7928_v49 = vpop.eup %5775  ;;  %5801 = vpow2.f32 %v3933_v28  ;;  %v1888_v43 = vadd.f32 %v1856_v38, %v1832_v58  ;;  %v1890_v45 = vadd.f32 %v1858_v26, %v1832_v58  ;;  %v1892_v44 = vadd.f32 %v1860_v17, %v1832_v58  ;;  %v10675_v38 = vld [vmem:[#allocation35_spill] sm:$0xff]  ;;  %v10676_v17 = vld [vmem:[#allocation37_spill] sm:$0xff] }
 0x2c7   : > { %10664 = vst [vmem:[#allocation41_spill] sm:$0xff] %v7928_v49  ;;  %v7930_v14 = vpop.eup %5777  ;;  %5803 = vpow2.f32 %v7875_v7  ;;  %v1894_v40 = vadd.f32 %v1862_v12, %v1832_v58  ;;  %v1896_v42 = vadd.f32 %v1864_v47, %v1832_v58  ;;  %v7937_v53 = vmul.f32 %v10658_v31, %v1866_v36  ;;  %v10668_v7 = vld [vmem:[#allocation98_spill] sm:$0xff]  ;;  %v5543_v36 = vpop.f32.mrf.mxu1  ;;  %v10679_v47 = vld [vmem:[#allocation107_spill] sm:$0xff]  ;;  %v4127_v31 = vld [vmem:[#allocation11 + $0x4c8] sm:$0xff] }
 0x2c8   : > { %10665 = vst [vmem:[#allocation90_spill] sm:$0xff] %v7930_v14  ;;  %v7933_v16 = vpop.eup %5779  ;;  %5805 = vpow2.f32 %v7877_v10  ;;  %v7943_v0 = vmul.f32 %v10661_v50, %v1868_v13  ;;  %v7946_v20 = vmul.f32 %v10668_v7, %v1870_v37  ;;  %v7949_v22 = vmul.f32 %v10669_v34, %v1872_v25  ;;  %v10671_v58 = vld [vmem:[#allocation42_spill] sm:$0xff] }
 0x2c9   : > { %10666 = vst [vmem:[#allocation43_spill] sm:$0xff] %v7933_v16  ;;  %v7939_v28 = vpop.eup %5781  ;;  %5807 = vpow2.f32 %v7879_v52  ;;  %v7955_v29 = vmul.f32 %v10671_v58, %v1874_v46  ;;  %v7958_v6 = vmul.f32 %v10672_v18, %v1876_v5  ;;  %v10673_v52 = vld [vmem:[#allocation27_spill] sm:$0xff]  ;;  %v7967_v26 = vmul.f32 %v10675_v38, %v1880_v56  ;;  %v10678_v46 = vld [vmem:[#allocation101_spill] sm:$0xff]  ;;  %v4103_v56 = vld [vmem:[#allocation11 + $0x408] sm:$0xff] }
 0x2ca   : > { %10667 = vst [vmem:[#allocation91_spill] sm:$0xff] %v7939_v28  ;;  %v7951_v10 = vpop.eup %5783  ;;  %5809 = vpow2.f32 %v7881_v27  ;;  %v7961_v51 = vmul.f32 %v10673_v52, %v1878_v4  ;;  %v7970_v37 = vmul.f32 %v10676_v17, %v1882_v3  ;;  %v4100_v27 = vadd.f32 %v5543_v36, %v10042_v32  ;;  %v10680_v4 = vld [vmem:[#allocation61_spill] sm:$0xff]  ;;  %v10683_v3 = vld [vmem:[#allocation59_spill] sm:$0xff]  ;;  %v10685_v32 = vld [vmem:[#allocation62_spill] sm:$0xff] }
 0x2cb   : > { %10670 = vst [vmem:[#allocation44_spill] sm:$0xff] %v7951_v10  ;;  %v7963_v13 = vpop.eup %5785  ;;  %5811 = vpow2.f32 %v7883_v2  ;;  %v7978_v12 = vmul.f32 %v10678_v46, %v1884_v24  ;;  %v7981_v5 = vmul.f32 %v10679_v47, %v1886_v39  ;;  %v7984_v2 = vmul.f32 %v10680_v4, %v1888_v43  ;;  %v4107_v39 = vld [vmem:[#allocation11 + $0x428] sm:$0xff]  ;;  %v4109_v47 = vld [vmem:[#allocation11 + $0x438] sm:$0xff] }
 0x2cc   : > { %10674 = vst [vmem:[#allocation92_spill] sm:$0xff] %v7963_v13  ;;  %v7974_v25 = vpop.eup %5787  ;;  %5813 = vpow2.f32 %v7885_v60  ;;  %v7990_v36 = vmul.f32 %v10683_v3, %v1890_v45  ;;  %v7993_v60 = vmul.f32 %v10685_v32, %v1892_v44  ;;  %v7996_v24 = vmul.f32 %v7909_v30, %v1894_v40  ;;  %v4111_v52 = vld [vmem:[#allocation11 + $0x448] sm:$0xff]  ;;  %v4117_v45 = vld [vmem:[#allocation11 + $0x478] sm:$0xff] }
 0x2cd   : > { %10677 = vst [vmem:[#allocation55_spill] sm:$0xff] %v7974_v25  ;;  %10681 = vst [vmem:[#allocation24_spill] sm:$0xff] %v7984_v2  ;;  %v7986_v38 = vpop.eup %5789  ;;  %5815 = vpow2.f32 %v7887_v54  ;;  %v8002_v4 = vmul.f32 %v7924_v8, %v1896_v42  ;;  %v4113_v54 = vld [vmem:[#allocation11 + $0x458] sm:$0xff]  ;;  %v4115_v18 = vld [vmem:[#allocation11 + $0x468] sm:$0xff]  ;;  %v1702_v3 = vrot.slane %v7916_v19, 4  ;;  %v1709_v44 = vrot.slane %v7922_v61, 4 }
 0x2ce   : > { %10682 = vst [vmem:[#allocation108_spill] sm:$0xff] %v7986_v38  ;;  %10684 = vst [vmem:[#allocation63_spill] sm:$0xff] %v7990_v36  ;;  %v7998_v43 = vpop.eup %5791  ;;  %5817 = vpow2.f32 %v7889_v35  ;;  %v4119_v40 = vld [vmem:[#allocation11 + $0x488] sm:$0xff]  ;;  %v4121_v30 = vld [vmem:[#allocation11 + $0x498] sm:$0xff]  ;;  %v4135_v34 = vadd.f32 %v4103_v56, %v4100_v27  ;;  %v4137_v7 = vadd.f32 %v4105_v21, %v4100_v27  ;;  %v4139_v13 = vadd.f32 %v4107_v39, %v4100_v27 }
 0x2cf   : > { %10686 = vst [vmem:[#allocation64_spill] sm:$0xff] %v7993_v60  ;;  %10687 = vst [vmem:[#allocation67_spill] sm:$0xff] %v7996_v24  ;;  %v8006_v32 = vpop.eup %5793  ;;  %5819 = vpow2.f32 %v7891_v15  ;;  %v4123_v58 = vld [vmem:[#allocation11 + $0x4a8] sm:$0xff]  ;;  %v4125_v50 = vld [vmem:[#allocation11 + $0x4b8] sm:$0xff]  ;;  %v4141_v28 = vadd.f32 %v4109_v47, %v4100_v27  ;;  %v4145_v21 = vadd.f32 %v4113_v54, %v4100_v27  ;;  %v4149_v24 = vadd.f32 %v4117_v45, %v4100_v27 }
 0x2d0   : > { %10688 = vst [vmem:[#allocation71_spill] sm:$0xff] %v7998_v43  ;;  %10689 = vst [vmem:[#allocation65_spill] sm:$0xff] %v8002_v4  ;;  %v10691_v35 = vld [vmem:[#allocation36_spill] sm:$0xff]  ;;  %v8011_v8 = vpop.eup %5795  ;;  %5821 = vpow2.f32 %v7897_v57  ;;  %v4129_v38 = vld [vmem:[#allocation11 + $0x4d8] sm:$0xff]  ;;  %v4147_v4 = vadd.f32 %v4115_v18, %v4100_v27  ;;  %v4151_v57 = vadd.f32 %v4119_v40, %v4100_v27  ;;  %v4153_v60 = vadd.f32 %v4121_v30, %v4100_v27 }
 0x2d1   : > { %10690 = vst [vmem:[#allocation68_spill] sm:$0xff] %v8006_v32  ;;  %v1757_v42 = vadd.f32 %v10676_v17, %v10691_v35  ;;  %10692 = vst [vmem:[#allocation72_spill] sm:$0xff] %v8011_v8  ;;  %v4143_v32 = vadd.f32 %v4111_v52, %v4100_v27  ;;  %v8014_v14 = vpop.eup %5797  ;;  %5823 = vpow2.f32 %v7893_v23  ;;  %v4131_v15 = vld [vmem:[#allocation11 + $0x4e8] sm:$0xff]  ;;  %v4133_v56 = vld [vmem:[#allocation11 + $0x4f8] sm:$0xff]  ;;  %v4155_v36 = vadd.f32 %v4123_v58, %v4100_v27 }
 0x2d2   : > { %10693 = vst [vmem:[#allocation73_spill] sm:$0xff] %v8014_v14  ;;  %v8017_v17 = vpop.eup %5799  ;;  %5825 = vpow2.f32 %v7901_v1  ;;  %v8023_v52 = vadd.f32 %v4125_v50, %v4100_v27  ;;  %v8025_v47 = vadd.f32 %v4127_v31, %v4100_v27  ;;  %v8027_v23 = vadd.f32 %v4129_v38, %v4100_v27 }
 0x2d3   : > { %10694 = vst [vmem:[#allocation45_spill] sm:$0xff] %v8017_v17  ;;  %v8020_v2 = vpop.eup %5801  ;;  %5827 = vpow2.f32 %v7899_v41  ;;  %v8032_v18 = vadd.f32 %v4131_v15, %v4100_v27  ;;  %v8034_v1 = vadd.f32 %v4133_v56, %v4100_v27  ;;  %v8037_v30 = vmul.f32 %v7928_v49, %v4135_v34  ;;  %v10702_v27 = vld [vmem:[#allocation100_spill] sm:$0xff] }
 0x2d4   : > { %10695 = vst [vmem:[#allocation46_spill] sm:$0xff] %v8020_v2  ;;  %v8029_v39 = vpop.eup %5803  ;;  %5829 = vpow2.f32 %v7903_v11  ;;  %v1703_v41 = vadd.f32 %v1702_v3, %v7916_v19  ;;  %v1710_v31 = vadd.f32 %v1709_v44, %v7922_v61  ;;  %v1758_v50 = vrot.slane %v1757_v42, 4  ;;  %v574_v61 = vpop.f32.mrf.mxu0 }
 0x2d5   : > { %10696 = vst [vmem:[#allocation47_spill] sm:$0xff] %v8029_v39  ;;  %10697 = vst [vmem:[#allocation51_spill] sm:$0xff] %v8037_v30  ;;  %v8039_v58 = vpop.eup %5805  ;;  %5831 = vpow2.f32 %v7905_v59  ;;  %v8048_v11 = vmul.f32 %v7933_v16, %v4137_v7  ;;  %v8051_v34 = vmul.f32 %v7951_v10, %v4139_v13  ;;  %v1764_v54 = vadd.f32 %v10678_v46, %v10702_v27 }
 0x2d6   : > { %10698 = vst [vmem:[#allocation48_spill] sm:$0xff] %v8039_v58  ;;  %v8044_v38 = vpop.eup %5807  ;;  %5833 = vpow2.f32 %v7911_v63  ;;  %v8058_v19 = vmul.f32 %v7974_v25, %v4141_v28  ;;  %v1704_v3 = vrot.slane %v1703_v41, 2  ;;  %v1711_v45 = vrot.slane %v1710_v31, 2 }
 0x2d7   : > { %10699 = vst [vmem:[#allocation49_spill] sm:$0xff] %v8044_v38  ;;  %10700 = vst [vmem:[#allocation50_spill] sm:$0xff] %v8048_v11  ;;  %v8055_v59 = vpop.eup %5809  ;;  %v1759_v44 = vadd.f32 %v1758_v50, %v1757_v42  ;;  %v8063_v63 = vmul.f32 %v7998_v43, %v4143_v32  ;;  %v8066_v7 = vmul.f32 %v8011_v8, %v4145_v21  ;;  %v1765_v13 = vrot.slane %v1764_v54, 4  ;;  %v1833_v50 = vld [vmem:[#allocation11] sm:$0xff] }
 0x2d8   : > { %10701 = vst [vmem:[#allocation52_spill] sm:$0xff] %v8051_v34  ;;  %10703 = vst [vmem:[#allocation38_spill] sm:$0xff] %v8055_v59  ;;  %v8060_v40 = vpop.eup %5811  ;;  %v10708_v15 = vstv %s7841_s23  ;;  %v8075_v28 = vmul.f32 %v8017_v17, %v4147_v4  ;;  %v1705_v25 = vadd.f32 %v1704_v3, %v1703_v41  ;;  %v1712_v46 = vadd.f32 %v1711_v45, %v1710_v31  ;;  %v1839_v3 = vld [vmem:[#allocation11 + $0x30] sm:$0xff]  ;;  %v1841_v45 = vld [vmem:[#allocation11 + $0x40] sm:$0xff]  ;;  %s9662_s23 = sld [smem:[#allocation15 + $0x5]] }
 0x2d9   : > { %10704 = vst [vmem:[#allocation39_spill] sm:$0xff] %v8058_v19  ;;  %10705 = vst [vmem:[#allocation29_spill] sm:$0xff] %v8060_v40  ;;  %v8070_v56 = vadd.f32 %v10708_v15, %v574_v61  ;;  %v8072_v10 = vpop.eup %5813  ;;  %v1760_v42 = vrot.slane %v1759_v44, 2  ;;  %v1835_v19 = vld [vmem:[#allocation11 + $0x10] sm:$0xff]  ;;  %5835 = vpow2.f32 %v7907_v48  ;;  %v8081_v32 = vmul.f32 %v8029_v39, %v4149_v24  ;;  %v1837_v15 = vld [vmem:[#allocation11 + $0x20] sm:$0xff] }
 0x2da   : > { %10706 = vst [vmem:[#allocation31_spill] sm:$0xff] %v8063_v63  ;;  %10707 = vst [vmem:[#allocation109_spill] sm:$0xff] %v8066_v7  ;;  %v8077_v34 = vpop.eup %5815  ;;  %v8084_v21 = vmul.f32 %v8044_v38, %v4151_v57  ;;  %v1766_v61 = vadd.f32 %v1765_v13, %v1764_v54  ;;  %v1706_v4 = vrot.slane %v1705_v25, 1  ;;  %v1713_v41 = vrot.slane %v1712_v46, 1  ;;  %v1843_v17 = vld [vmem:[#allocation11 + $0x50] sm:$0xff]  ;;  %v1845_v54 = vld [vmem:[#allocation11 + $0x60] sm:$0xff] }
 0x2db   : > { %10709 = vst [vmem:[#allocation110_spill] sm:$0xff] %v8072_v10  ;;  %10710 = vst [vmem:[#allocation111_spill] sm:$0xff] %v8075_v28  ;;  %v8086_v8 = vpop.eup %5817  ;;  %v1761_v31 = vadd.f32 %v1760_v42, %v1759_v44  ;;  %v8090_v43 = vadd.f32 %v7928_v49, %v7926_v33  ;;  %v8095_v24 = vmul.f32 %v8060_v40, %v4153_v60  ;;  %v1847_v13 = vld [vmem:[#allocation11 + $0x70] sm:$0xff]  ;;  %v1853_v7 = vld [vmem:[#allocation11 + $0xa0] sm:$0xff] }
 0x2dc   : > { %10711 = vst [vmem:[#allocation112_spill] sm:$0xff] %v8077_v34  ;;  %10712 = vst [vmem:[#allocation113_spill] sm:$0xff] %v8081_v32  ;;  %v8092_v48 = vpop.eup %5819  ;;  %v1767_v57 = vrot.slane %v1766_v61, 2  ;;  %v1865_v39 = vadd.f32 %v1833_v50, %v8070_v56  ;;  %v8102_v42 = vmul.f32 %v8077_v34, %v4155_v36  ;;  %v1707_v32 = vadd.f32 %v1706_v4, %v1705_v25  ;;  %v1851_v10 = vld [vmem:[#allocation11 + $0x90] sm:$0xff]  ;;  %v1857_v4 = vld [vmem:[#allocation11 + $0xc0] sm:$0xff] }
 0x2dd   : > { %10713 = vst [vmem:[#allocation114_spill] sm:$0xff] %v8084_v21  ;;  %10714 = vst [vmem:[#allocation115_spill] sm:$0xff] %v8086_v8  ;;  %v1867_v21 = vadd.f32 %v1835_v19, %v8070_v56  ;;  %v8099_v44 = vpop.eup %5821  ;;  %v1762_v49 = vrot.slane %v1761_v31, 1  ;;  %v1849_v8 = vld [vmem:[#allocation11 + $0x80] sm:$0xff]  ;;  %v1869_v28 = vadd.f32 %v1837_v15, %v8070_v56  ;;  %v1855_v63 = vld [vmem:[#allocation11 + $0xb0] sm:$0xff]  ;;  %v1871_v50 = vadd.f32 %v1839_v3, %v8070_v56 }
 0x2de   : > { %10715 = vst [vmem:[#allocation116_spill] sm:$0xff] %v8092_v48  ;;  %10716 = vst [vmem:[#allocation117_spill] sm:$0xff] %v8095_v24  ;;  %v8105_v60 = vpop.eup %5823  ;;  %v1768_v24 = vadd.f32 %v1767_v57, %v1766_v61  ;;  %v1873_v19 = vadd.f32 %v1841_v45, %v8070_v56  ;;  %v1875_v11 = vadd.f32 %v1843_v17, %v8070_v56  ;;  %5837 = vrcp.f32 %v1707_v32 }
 0x2df   : > { %10717 = vst [vmem:[#allocation118_spill] sm:$0xff] %v8099_v44  ;;  %10718 = vst [vmem:[#allocation119_spill] sm:$0xff] %v8102_v42  ;;  %v8110_v30 = vpop.eup %5825  ;;  %v8114_v25 = vmul.f32 %v8092_v48, %v8023_v52  ;;  %v1714_v36 = vadd.f32 %v1713_v41, %v1712_v46  ;;  %v1877_v15 = vadd.f32 %v1845_v54, %v8070_v56  ;;  %v1859_v46 = vld [vmem:[#allocation11 + $0xd0] sm:$0xff]  ;;  %v1861_v48 = vld [vmem:[#allocation11 + $0xe0] sm:$0xff] }
 0x2e0   : > { %10719 = vst [vmem:[#allocation120_spill] sm:$0xff] %v8105_v60  ;;  %10720 = vst [vmem:[#allocation74_spill] sm:$0xff] %v8110_v30  ;;  %v1879_v61 = vadd.f32 %v1847_v13, %v8070_v56  ;;  %v8118_v57 = vpop.eup %5827  ;;  %v8122_v3 = vmul.f32 %v8099_v44, %v8025_v47  ;;  %v1769_v45 = vrot.slane %v1768_v24, 1  ;;  %v1881_v17 = vadd.f32 %v1849_v8, %v8070_v56  ;;  %v1863_v8 = vld [vmem:[#allocation11 + $0xf0] sm:$0xff] }
 0x2e1   : > { %10721 = vst [vmem:[#allocation75_spill] sm:$0xff] %v8114_v25  ;;  %10722 = vst [vmem:[#allocation76_spill] sm:$0xff] %v8118_v57  ;;  %v1883_v34 = vadd.f32 %v1851_v10, %v8070_v56  ;;  %v8126_v42 = vpop.eup %5829  ;;  %v1763_v52 = vadd.f32 %v1762_v49, %v1761_v31  ;;  %v1885_v41 = vadd.f32 %v1853_v7, %v8070_v56  ;;  %v10728_v7 = vld [vmem:[#allocation97_spill] sm:$0xff]  ;;  %5839 = vrcp.f32 %v1714_v36 }
 0x2e2   : > { %10723 = vst [vmem:[#allocation77_spill] sm:$0xff] %v8122_v3  ;;  %10724 = vst [vmem:[#allocation78_spill] sm:$0xff] %v8126_v42  ;;  %v1887_v54 = vadd.f32 %v1855_v63, %v8070_v56  ;;  %v8130_v13 = vpop.eup %5831  ;;  %v8134_v47 = vmul.f32 %v8110_v30, %v8027_v23  ;;  %v1770_v44 = vadd.f32 %v1769_v45, %v1768_v24  ;;  %v10729_v63 = vld [vmem:[#allocation99_spill] sm:$0xff]  ;;  %v10731_v24 = vld [vmem:[#allocation53_spill] sm:$0xff] }
 0x2e3   : > { %10725 = vst [vmem:[#allocation79_spill] sm:$0xff] %v8130_v13  ;;  %v1889_v10 = vadd.f32 %v1857_v4, %v8070_v56  ;;  %v1897_v3 = vmul.f32 %v10657_v62, %v1865_v39  ;;  %v8138_v49 = vpop.eup %5833  ;;  %v1899_v32 = vmul.f32 %v10660_v9, %v1867_v21  ;;  %v1901_v31 = vmul.f32 %v10728_v7, %v1869_v28  ;;  %v10730_v42 = vld [vmem:[#allocation23_spill] sm:$0xff]  ;;  %v10732_v30 = vld [vmem:[#allocation40_spill] sm:$0xff] }
 0x2e4   : > { %10726 = vst [vmem:[#allocation80_spill] sm:$0xff] %v8134_v47  ;;  %10727 = vst [vmem:[#allocation81_spill] sm:$0xff] %v8138_v49  ;;  %v1903_v25 = vmul.f32 %v10729_v63, %v1871_v50  ;;  %v1905_v57 = vmul.f32 %v10730_v42, %v1873_v19  ;;  %v1891_v23 = vadd.f32 %v1859_v46, %v8070_v56  ;;  %5841 = vrcp.f32 %v1763_v52  ;;  %v10733_v19 = vld [vmem:[#allocation28_spill] sm:$0xff] }
 0x2e5   : > { %v1907_v45 = vmul.f32 %v10731_v24, %v1875_v11  ;;  %v1909_v47 = vmul.f32 %v10732_v30, %v1877_v15  ;;  %v8149_v39 = vmul.f32 %v8130_v13, %v8032_v18  ;;  %v1893_v21 = vadd.f32 %v1861_v48, %v8070_v56 }
 0x2e6   : > { %v1895_v28 = vadd.f32 %v1863_v8, %v8070_v56  ;;  %v8155_v50 = vmul.f32 %v8138_v49, %v8034_v1  ;;  %5843 = vrcp.f32 %v1770_v44  ;;  %v1911_v36 = vmul.f32 %v10733_v19, %v1879_v61  ;;  %v8159_v4 = vpop.eup %5835 }
 0x2e7   : > { %v1929_v11 = vadd.f32 %v7937_v53, %v1897_v3  ;;  %10734 = vst [vmem:[#allocation82_spill] sm:$0xff] %v8159_v4  ;;  %v1936_v15 = vadd.f32 %v7943_v0, %v1899_v32  ;;  %v1943_v18 = vadd.f32 %v7946_v20, %v1901_v31  ;;  %v1950_v52 = vadd.f32 %v7949_v22, %v1903_v25  ;;  %v10735_v0 = vld [vmem:[#allocation102_spill] sm:$0xff]  ;;  %v10736_v20 = vld [vmem:[#allocation60_spill] sm:$0xff] }
 0x2e8   : > { %v1957_v48 = vadd.f32 %v7955_v29, %v1905_v57  ;;  %v1913_v56 = vmul.f32 %v10691_v35, %v1881_v17  ;;  %v1964_v1 = vadd.f32 %v7958_v6, %v1907_v45  ;;  %v1971_v44 = vadd.f32 %v7961_v51, %v1909_v47  ;;  %v10737_v35 = vld [vmem:[#allocation69_spill] sm:$0xff] }
 0x2e9   : > { %v1930_v46 = vrot.slane %v1929_v11, 4  ;;  %v1937_v61 = vrot.slane %v1936_v15, 4  ;;  %v1944_v8 = vrot.slane %v1943_v18, 4  ;;  %v1951_v53 = vrot.slane %v1950_v52, 4 }
 0x2ea   : > { %v1958_v3 = vrot.slane %v1957_v48, 4  ;;  %v1915_v19 = vmul.f32 %v10702_v27, %v1883_v34  ;;  %v1917_v32 = vmul.f32 %v10735_v0, %v1885_v41  ;;  %v1919_v31 = vmul.f32 %v10736_v20, %v1887_v54  ;;  %v10740_v54 = vld [vmem:[#allocation30_spill] sm:$0xff] }
 0x2eb   : > { %v1931_v22 = vadd.f32 %v1930_v46, %v1929_v11  ;;  %v1938_v25 = vadd.f32 %v1937_v61, %v1936_v15  ;;  %v1945_v29 = vadd.f32 %v1944_v8, %v1943_v18  ;;  %v1952_v57 = vadd.f32 %v1951_v53, %v1950_v52  ;;  %v8176_v41 = vpop.eup %5837 }
 0x2ec   : > { %v1959_v17 = vadd.f32 %v1958_v3, %v1957_v48  ;;  %v1921_v30 = vmul.f32 %v10737_v35, %v1889_v10  ;;  %v8173_v51 = vadd.f32 %v7967_v26, %v1911_v36  ;;  %v1985_v47 = vadd.f32 %v7970_v37, %v1913_v56  ;;  %10739 = vst [vmem:[#allocation84_spill] sm:$0xff] %v8176_v41  ;;  %v10741_v48 = vld [vmem:[#allocation32_spill] sm:$0xff] }
 0x2ed   : > { %v1932_v6 = vrot.slane %v1931_v22, 2  ;;  %v1939_v45 = vrot.slane %v1938_v25, 2  ;;  %v1946_v24 = vrot.slane %v1945_v29, 2  ;;  %v1965_v34 = vrot.slane %v1964_v1, 4 }
 0x2ee   : > { %10738 = vst [vmem:[#allocation83_spill] sm:$0xff] %v8173_v51  ;;  %v1972_v27 = vrot.slane %v1971_v44, 4  ;;  %v1923_v11 = vmul.f32 %v10740_v54, %v1891_v23  ;;  %v1953_v15 = vrot.slane %v1952_v57, 2  ;;  %v1986_v18 = vrot.slane %v1985_v47, 4  ;;  %v8183_v53 = vpop.eup %5839  ;;  %v10750_v51 = vld [vmem:[#allocation64_spill] sm:$0xff] }
 0x2ef   : > { %v1992_v52 = vadd.f32 %v7978_v12, %v1915_v19  ;;  %v1925_v10 = vmul.f32 %v10741_v48, %v1893_v21  ;;  %v1933_v46 = vadd.f32 %v1932_v6, %v1931_v22  ;;  %v1940_v61 = vadd.f32 %v1939_v45, %v1938_v25  ;;  %10742 = vst [vmem:[#allocation103_spill] sm:$0xff] %v8183_v53 }
 0x2f0   : > { %v1960_v26 = vrot.slane %v1959_v17, 2  ;;  %v1927_v36 = vmul.f32 %v7918_v55, %v1895_v28  ;;  %v1987_v37 = vadd.f32 %v1986_v18, %v1985_v47  ;;  %v1999_v8 = vadd.f32 %v7981_v5, %v1917_v32  ;;  %v10748_v32 = vld [vmem:[#allocation24_spill] sm:$0xff] }
 0x2f1   : > { %v1993_v56 = vrot.slane %v1992_v52, 4  ;;  %v1947_v3 = vadd.f32 %v1946_v24, %v1945_v29  ;;  %v8185_v35 = vadd.f32 %v1965_v34, %v1964_v1  ;;  %v8187_v23 = vadd.f32 %v1972_v27, %v1971_v44  ;;  %v8190_v19 = vpop.eup %5841  ;;  %v10749_v44 = vld [vmem:[#allocation63_spill] sm:$0xff] }
 0x2f2   : > { %10745 = vst [vmem:[#allocation86_spill] sm:$0xff] %v8190_v19  ;;  %v1954_v21 = vadd.f32 %v1953_v15, %v1952_v57  ;;  %v1988_v22 = vrot.slane %v1987_v37, 2  ;;  %v2000_v6 = vrot.slane %v1999_v8, 4  ;;  %v1934_v47 = vrot.slane %v1933_v46, 1  ;;  %v10751_v15 = vld [vmem:[#allocation67_spill] sm:$0xff] }
 0x2f3   : > { %10743 = vst [vmem:[#allocation85_spill] sm:$0xff] %v8185_v35  ;;  %10744 = vst [vmem:[#allocation104_spill] sm:$0xff] %v8187_v23  ;;  %v1994_v25 = vadd.f32 %v1993_v56, %v1992_v52  ;;  %v8192_v28 = vpop.eup %5843  ;;  %v1941_v45 = vrot.slane %v1940_v61, 1  ;;  %v8194_v5 = vadd.f32 %v1960_v26, %v1959_v17  ;;  %v2006_v24 = vadd.f32 %v10748_v32, %v1919_v31  ;;  %v10752_v31 = vld [vmem:[#allocation65_spill] sm:$0xff]  ;;  %v4106_v17 = vld [vmem:[#allocation11 + $0x420] sm:$0xff] }
 0x2f4   : > { %10746 = vst [vmem:[#allocation105_spill] sm:$0xff] %v8192_v28  ;;  %v1989_v1 = vadd.f32 %v1988_v22, %v1987_v37  ;;  %v2001_v27 = vadd.f32 %v2000_v6, %v1999_v8  ;;  %v2013_v34 = vadd.f32 %v10749_v44, %v1921_v30  ;;  %v1948_v18 = vrot.slane %v1947_v3, 1 }
 0x2f5   : > { %10747 = vst [vmem:[#allocation87_spill] sm:$0xff] %v8194_v5  ;;  %v1995_v29 = vrot.slane %v1994_v25, 2  ;;  %v2007_v12 = vrot.slane %v2006_v24, 4  ;;  %v2020_v57 = vadd.f32 %v10750_v51, %v1923_v11  ;;  %v2027_v52 = vadd.f32 %v10751_v15, %v1925_v10 }
 0x2f6   : > { %v1955_v56 = vrot.slane %v1954_v21, 1  ;;  %v2002_v55 = vrot.slane %v2001_v27, 2  ;;  %v2014_v48 = vrot.slane %v2013_v34, 4  ;;  %v1990_v26 = vrot.slane %v1989_v1, 1 }
 0x2f7   : > { %v1996_v23 = vadd.f32 %v1995_v29, %v1994_v25  ;;  %v2008_v54 = vadd.f32 %v2007_v12, %v2006_v24  ;;  %v8202_v37 = vadd.f32 %v10752_v31, %v1927_v36  ;;  %v2021_v22 = vrot.slane %v2020_v57, 4  ;;  %v4104_v24 = vld [vmem:[#allocation11 + $0x410] sm:$0xff] }
 0x2f8   : > { %v2015_v30 = vadd.f32 %v2014_v48, %v2013_v34  ;;  %v2028_v6 = vrot.slane %v2027_v52, 4  ;;  %v1935_v32 = vadd.f32 %v1934_v47, %v1933_v46  ;;  %v1942_v51 = vadd.f32 %v1941_v45, %v1940_v61  ;;  %v10759_v61 = vld [vmem:[#allocation90_spill] sm:$0xff] }
 0x2f9   : > { %10753 = vst [vmem:[#allocation106_spill] sm:$0xff] %v8202_v37  ;;  %v2003_v11 = vadd.f32 %v2002_v55, %v2001_v27  ;;  %v2009_v10 = vrot.slane %v2008_v54, 2  ;;  %v8205_v44 = vadd.f32 %v1948_v18, %v1947_v3  ;;  %v8207_v25 = vadd.f32 %v1955_v56, %v1954_v21  ;;  %v654_v56 = vpop.f32.mrf.mxu1 }
 0x2fa   : > { %v1997_v29 = vrot.slane %v1996_v23, 1  ;;  %v2016_v15 = vrot.slane %v2015_v30, 2  ;;  %v1991_v12 = vadd.f32 %v1990_v26, %v1989_v1  ;;  %v3970_v48 = vrot.slane %v8090_v43, 4 }
 0x2fb   : > { %10754 = vst [vmem:[#allocation88_spill] sm:$0xff] %v8205_v44  ;;  %10755 = vst [vmem:[#allocation58_spill] sm:$0xff] %v8207_v25  ;;  %v2010_v36 = vadd.f32 %v2009_v10, %v2008_v54  ;;  %v8213_v34 = vadd.f32 %v2021_v22, %v2020_v57  ;;  %v8215_v46 = vadd.f32 %v2028_v6, %v2027_v52  ;;  %v2004_v21 = vrot.slane %v2003_v11, 1  ;;  %v4110_v44 = vld [vmem:[#allocation11 + $0x440] sm:$0xff] }
 0x2fc   : > { %v8218_v55 = vmul.f32 %v8176_v41, %v1935_v32  ;;  %v3976_v3 = vadd.f32 %v7933_v16, %v10759_v61  ;;  %v3971_v47 = vadd.f32 %v3970_v48, %v8090_v43  ;;  %v4025_v54 = vadd.f32 %v8044_v38, %v8039_v58  ;;  %v4102_v48 = vld [vmem:[#allocation11 + $0x400] sm:$0xff] }
 0x2fd   : > { %10756 = vst [vmem:[#allocation56_spill] sm:$0xff] %v8213_v34  ;;  %10757 = vst [vmem:[#allocation89_spill] sm:$0xff] %v8215_v46  ;;  %v4032_v45 = vadd.f32 %v8060_v40, %v8055_v59  ;;  %v1998_v1 = vadd.f32 %v1997_v29, %v1996_v23  ;;  %v8227_v27 = vadd.f32 %v2016_v15, %v2015_v30  ;;  %v2011_v52 = vrot.slane %v2010_v36, 1  ;;  %v10768_v34 = vld [vmem:[#allocation92_spill] sm:$0xff] }
 0x2fe   : > { %10758 = vst [vmem:[#allocation25_spill] sm:$0xff] %v8218_v55  ;;  %v8230_v18 = vmul.f32 %v8183_v53, %v1942_v51  ;;  %v3977_v57 = vrot.slane %v3976_v3, 4  ;;  %v3972_v26 = vrot.slane %v3971_v47, 2  ;;  %v4026_v31 = vrot.slane %v4025_v54, 4 }
 0x2ff   : > { %10760 = vst [vmem:[#allocation26_spill] sm:$0xff] %v8227_v27  ;;  %v4033_v22 = vrot.slane %v4032_v45, 4  ;;  %v8234_v6 = vmul.f32 %v8190_v19, %v1991_v12  ;;  %v10763_v10 = vstv %s7873_s24  ;;  %v8240_v30 = vadd.f32 %v2004_v21, %v2003_v11  ;;  %v4108_v12 = vld [vmem:[#allocation11 + $0x430] sm:$0xff]  ;;  %v10770_v27 = vld [vmem:[#allocation68_spill] sm:$0xff]  ;;  %s9729_s24 = sld [smem:[#allocation15 + $0x6]] }
 0x300   : > { %10761 = vst [vmem:[#allocation93_spill] sm:$0xff] %v8230_v18  ;;  %v3978_v32 = vadd.f32 %v3977_v57, %v3976_v3  ;;  %v8238_v23 = vadd.f32 %v10763_v10, %v654_v56  ;;  %v3973_v51 = vadd.f32 %v3972_v26, %v3971_v47  ;;  %v4027_v29 = vadd.f32 %v4026_v31, %v4025_v54  ;;  %v4112_v47 = vld [vmem:[#allocation11 + $0x450] sm:$0xff]  ;;  %v4114_v54 = vld [vmem:[#allocation11 + $0x460] sm:$0xff] }
 0x301   : > { %10762 = vst [vmem:[#allocation95_spill] sm:$0xff] %v8234_v6  ;;  %10764 = vst [vmem:[#allocation24_spill] sm:$0xff] %v8240_v30  ;;  %v4034_v15 = vadd.f32 %v4033_v22, %v4032_v45  ;;  %v8244_v43 = vmul.f32 %v8192_v28, %v1998_v1  ;;  %v8247_v57 = vadd.f32 %v2011_v52, %v2010_v36  ;;  %v4116_v45 = vld [vmem:[#allocation11 + $0x470] sm:$0xff]  ;;  %v4118_v31 = vld [vmem:[#allocation11 + $0x480] sm:$0xff] }
 0x302   : > { %v3979_v25 = vrot.slane %v3978_v32, 2  ;;  %v3974_v56 = vrot.slane %v3973_v51, 1  ;;  %v4028_v11 = vrot.slane %v4027_v29, 2  ;;  %v4120_v22 = vld [vmem:[#allocation11 + $0x490] sm:$0xff]  ;;  %v4134_v10 = vadd.f32 %v4102_v48, %v8238_v23  ;;  %v4122_v3 = vld [vmem:[#allocation11 + $0x4a0] sm:$0xff] }
 0x303   : > { %10765 = vst [vmem:[#allocation63_spill] sm:$0xff] %v8244_v43  ;;  %10766 = vst [vmem:[#allocation64_spill] sm:$0xff] %v8247_v57  ;;  %v4035_v21 = vrot.slane %v4034_v15, 2  ;;  %v4136_v1 = vadd.f32 %v4104_v24, %v8238_v23  ;;  %v4138_v8 = vadd.f32 %v4106_v17, %v8238_v23  ;;  %v4124_v36 = vld [vmem:[#allocation11 + $0x4b0] sm:$0xff]  ;;  %v4140_v52 = vadd.f32 %v4108_v12, %v8238_v23  ;;  %v4126_v18 = vld [vmem:[#allocation11 + $0x4c0] sm:$0xff] }
 0x304   : > { %v3980_v26 = vadd.f32 %v3979_v25, %v3978_v32  ;;  %v4029_v30 = vadd.f32 %v4028_v11, %v4027_v29  ;;  %v4142_v57 = vadd.f32 %v4110_v44, %v8238_v23  ;;  %v4144_v25 = vadd.f32 %v4112_v47, %v8238_v23  ;;  %v4130_v12 = vld [vmem:[#allocation11 + $0x4e0] sm:$0xff]  ;;  %v4132_v47 = vld [vmem:[#allocation11 + $0x4f0] sm:$0xff] }
 0x305   : > { %v4036_v43 = vadd.f32 %v4035_v21, %v4034_v15  ;;  %v4146_v32 = vadd.f32 %v4114_v54, %v8238_v23  ;;  %v4148_v48 = vadd.f32 %v4116_v45, %v8238_v23  ;;  %v3975_v55 = vadd.f32 %v3974_v56, %v3973_v51  ;;  %v4128_v21 = vld [vmem:[#allocation11 + $0x4d0] sm:$0xff]  ;;  %v10767_v56 = vld [vmem:[#allocation91_spill] sm:$0xff] }
 0x306   : > { %v3981_v6 = vrot.slane %v3980_v26, 1  ;;  %v4030_v24 = vrot.slane %v4029_v30, 1  ;;  %v4150_v17 = vadd.f32 %v4118_v31, %v8238_v23  ;;  %v4152_v29 = vadd.f32 %v4120_v22, %v8238_v23 }
 0x307   : > { %v4037_v11 = vrot.slane %v4036_v43, 1  ;;  %v4154_v44 = vadd.f32 %v4122_v3, %v8238_v23  ;;  %v4156_v37 = vadd.f32 %v4124_v36, %v8238_v23  ;;  %v4158_v54 = vadd.f32 %v4126_v18, %v8238_v23 }
 0x308   : > { %v3982_v15 = vadd.f32 %v3981_v6, %v3980_v26  ;;  %v4031_v46 = vadd.f32 %v4030_v24, %v4029_v30  ;;  %v4166_v45 = vmul.f32 %v7926_v33, %v4134_v10  ;;  %v4168_v51 = vmul.f32 %v10759_v61, %v4136_v1  ;;  %v10769_v6 = vld [vmem:[#allocation108_spill] sm:$0xff]  ;;  %v10772_v24 = vld [vmem:[#allocation50_spill] sm:$0xff] }
 0x309   : > { %v4170_v31 = vmul.f32 %v10767_v56, %v4138_v8  ;;  %v4172_v22 = vmul.f32 %v10768_v34, %v4140_v52  ;;  %v4174_v26 = vmul.f32 %v10769_v6, %v4142_v57  ;;  %v4176_v35 = vmul.f32 %v10770_v27, %v4144_v25  ;;  %v10771_v52 = vld [vmem:[#allocation51_spill] sm:$0xff] }
 0x30a   : > { %5845 = vrcp.f32 %v3975_v55  ;;  %v4160_v3 = vadd.f32 %v4128_v21, %v8238_v23  ;;  %v4162_v30 = vadd.f32 %v4130_v12, %v8238_v23  ;;  %v4178_v36 = vmul.f32 %v8014_v14, %v4146_v32  ;;  %v10773_v55 = vld [vmem:[#allocation52_spill] sm:$0xff]  ;;  %v10774_v21 = vld [vmem:[#allocation39_spill] sm:$0xff]  ;;  %v10776_v32 = vld [vmem:[#allocation109_spill] sm:$0xff] }
 0x30b   : > { %v4038_v18 = vadd.f32 %v4037_v11, %v4036_v43  ;;  %5847 = vrcp.f32 %v3982_v15  ;;  %v4164_v10 = vadd.f32 %v4132_v47, %v8238_v23  ;;  %v4180_v1 = vmul.f32 %v8020_v2, %v4148_v48  ;;  %v10775_v12 = vld [vmem:[#allocation31_spill] sm:$0xff]  ;;  %v10783_v2 = vld [vmem:[#allocation76_spill] sm:$0xff] }
 0x30c   : > { %5849 = vrcp.f32 %v4031_v46  ;;  %v4182_v8 = vmul.f32 %v8039_v58, %v4150_v17  ;;  %v4198_v57 = vadd.f32 %v10771_v52, %v4166_v45  ;;  %v4205_v25 = vadd.f32 %v10772_v24, %v4168_v51  ;;  %v10777_v48 = vld [vmem:[#allocation111_spill] sm:$0xff]  ;;  %v10778_v51 = vld [vmem:[#allocation110_spill] sm:$0xff] }
 0x30d   : > { %v4212_v5 = vadd.f32 %v10773_v55, %v4170_v31  ;;  %v4219_v27 = vadd.f32 %v10774_v21, %v4172_v22  ;;  %v4226_v6 = vadd.f32 %v10775_v12, %v4174_v26  ;;  %v4233_v43 = vadd.f32 %v10776_v32, %v4176_v35  ;;  %v10779_v22 = vld [vmem:[#allocation115_spill] sm:$0xff]  ;;  %v10780_v32 = vld [vmem:[#allocation113_spill] sm:$0xff] }
 0x30e   : > { %v4184_v15 = vmul.f32 %v8055_v59, %v4152_v29  ;;  %v4199_v23 = vrot.slane %v4198_v57, 4  ;;  %v4206_v11 = vrot.slane %v4205_v25, 4  ;;  %v4240_v46 = vadd.f32 %v10777_v48, %v4178_v36  ;;  %v10782_v36 = vld [vmem:[#allocation114_spill] sm:$0xff] }
 0x30f   : > { %v4213_v47 = vrot.slane %v4212_v5, 4  ;;  %v4220_v17 = vrot.slane %v4219_v27, 4  ;;  %v4227_v58 = vrot.slane %v4226_v6, 4  ;;  %v4234_v45 = vrot.slane %v4233_v43, 4 }
 0x310   : > { %5851 = vrcp.f32 %v4038_v18  ;;  %v4186_v52 = vmul.f32 %v10778_v51, %v4154_v44  ;;  %v4200_v31 = vadd.f32 %v4199_v23, %v4198_v57  ;;  %v4207_v24 = vadd.f32 %v4206_v11, %v4205_v25  ;;  %v10787_v11 = vld [vmem:[#allocation119_spill] sm:$0xff] }
 0x311   : > { %v4188_v55 = vmul.f32 %v10779_v22, %v4156_v37  ;;  %v4214_v26 = vadd.f32 %v4213_v47, %v4212_v5  ;;  %v4221_v21 = vadd.f32 %v4220_v17, %v4219_v27  ;;  %v4228_v35 = vadd.f32 %v4227_v58, %v4226_v6  ;;  %v10785_v5 = vld [vmem:[#allocation117_spill] sm:$0xff]  ;;  %v10786_v58 = vld [vmem:[#allocation78_spill] sm:$0xff] }
 0x312   : > { %v4190_v29 = vmul.f32 %v8105_v60, %v4158_v54  ;;  %v4201_v12 = vrot.slane %v4200_v31, 2  ;;  %v8286_v59 = vadd.f32 %v10780_v32, %v4180_v1  ;;  %v4254_v48 = vadd.f32 %v10782_v36, %v4182_v8  ;;  %v10794_v32 = vld [vmem:[#allocation77_spill] sm:$0xff]  ;;  %v4408_v60 = vld [vmem:[#allocation11 + $0x5c8] sm:$0xff] }
 0x313   : > { %v4192_v14 = vmul.f32 %v10783_v2, %v4160_v3  ;;  %v4208_v18 = vrot.slane %v4207_v24, 2  ;;  %v8290_v34 = vadd.f32 %v4234_v45, %v4233_v43  ;;  %v4241_v44 = vrot.slane %v4240_v46, 4 }
 0x314   : > { %10781 = vst [vmem:[#allocation67_spill] sm:$0xff] %v8286_v59  ;;  %v4215_v57 = vrot.slane %v4214_v26, 2  ;;  %v4222_v25 = vrot.slane %v4221_v21, 2  ;;  %v4255_v37 = vrot.slane %v4254_v48, 4  ;;  %v4261_v27 = vadd.f32 %v10785_v5, %v4184_v15 }
 0x315   : > { %10784 = vst [vmem:[#allocation65_spill] sm:$0xff] %v8290_v34  ;;  %v4194_v6 = vmul.f32 %v10786_v58, %v4162_v30  ;;  %v4202_v54 = vadd.f32 %v4201_v12, %v4200_v31  ;;  %v4229_v23 = vrot.slane %v4228_v35, 2  ;;  %v4268_v1 = vadd.f32 %v10787_v11, %v4186_v52 }
 0x316   : > { %v4196_v47 = vmul.f32 %v8159_v4, %v4164_v10  ;;  %v4256_v3 = vadd.f32 %v4255_v37, %v4254_v48  ;;  %v4262_v17 = vrot.slane %v4261_v27, 4  ;;  %v4209_v45 = vadd.f32 %v4208_v18, %v4207_v24  ;;  %v10793_v37 = vld [vmem:[#allocation75_spill] sm:$0xff] }
 0x317   : > { %v8297_v43 = vpop.eup %5845  ;;  %v8300_v36 = vadd.f32 %v4241_v44, %v4240_v46  ;;  %v4269_v15 = vrot.slane %v4268_v1, 4  ;;  %v4216_v30 = vadd.f32 %v4215_v57, %v4214_v26  ;;  %v4223_v31 = vadd.f32 %v4222_v25, %v4221_v21  ;;  %v10795_v44 = vld [vmem:[#allocation80_spill] sm:$0xff] }
 0x318   : > { %10788 = vst [vmem:[#allocation51_spill] sm:$0xff] %v8297_v43  ;;  %v8302_v5 = vpop.eup %5847  ;;  %v4257_v12 = vrot.slane %v4256_v3, 2  ;;  %v4263_v52 = vadd.f32 %v4262_v17, %v4261_v27  ;;  %v4203_v10 = vrot.slane %v4202_v54, 1  ;;  %v8306_v8 = vadd.f32 %v4229_v23, %v4228_v35 }
 0x319   : > { %10789 = vst [vmem:[#allocation50_spill] sm:$0xff] %v8300_v36  ;;  %10790 = vst [vmem:[#allocation52_spill] sm:$0xff] %v8302_v5  ;;  %v8304_v11 = vpop.eup %5849  ;;  %v4270_v48 = vadd.f32 %v4269_v15, %v4268_v1  ;;  %v4275_v59 = vadd.f32 %v10793_v37, %v4188_v55  ;;  %v4282_v46 = vadd.f32 %v10794_v32, %v4190_v29  ;;  %v4210_v23 = vrot.slane %v4209_v45, 1 }
 0x31a   : > { %10791 = vst [vmem:[#allocation39_spill] sm:$0xff] %v8304_v11  ;;  %10792 = vst [vmem:[#allocation31_spill] sm:$0xff] %v8306_v8  ;;  %v4258_v24 = vadd.f32 %v4257_v12, %v4256_v3  ;;  %v4264_v18 = vrot.slane %v4263_v52, 2  ;;  %v4289_v36 = vadd.f32 %v10795_v44, %v4192_v14  ;;  %v4296_v26 = vadd.f32 %v8149_v39, %v4194_v6  ;;  %v5522_v44 = vpop.f32.mrf.mxu0  ;;  %v2123_v8 = vld [vmem:[#allocation11 + $0x110] sm:$0xff] }
 0x31b   : > { %v4271_v34 = vrot.slane %v4270_v48, 2  ;;  %v4276_v4 = vrot.slane %v4275_v59, 4  ;;  %v8313_v21 = vadd.f32 %v8155_v50, %v4196_v47  ;;  %v4283_v35 = vrot.slane %v4282_v46, 4 }
 0x31c   : > { %v4259_v57 = vrot.slane %v4258_v24, 1  ;;  %v4265_v25 = vadd.f32 %v4264_v18, %v4263_v52  ;;  %v4290_v27 = vrot.slane %v4289_v36, 4  ;;  %v4217_v1 = vrot.slane %v4216_v30, 1 }
 0x31d   : > { %10796 = vst [vmem:[#allocation109_spill] sm:$0xff] %v8313_v21  ;;  %v8317_v55 = vpop.eup %5851  ;;  %v4272_v29 = vadd.f32 %v4271_v34, %v4270_v48  ;;  %v4277_v3 = vadd.f32 %v4276_v4, %v4275_v59  ;;  %v4224_v14 = vrot.slane %v4223_v31, 1  ;;  %v4284_v6 = vadd.f32 %v4283_v35, %v4282_v46  ;;  %v2122_v48 = vld [vmem:[#allocation11 + $0x108] sm:$0xff] }
 0x31e   : > { %10797 = vst [vmem:[#allocation111_spill] sm:$0xff] %v8317_v55  ;;  %v4266_v39 = vrot.slane %v4265_v25, 1  ;;  %v4204_v50 = vadd.f32 %v4203_v10, %v4202_v54  ;;  %v4260_v47 = vadd.f32 %v4259_v57, %v4258_v24  ;;  %v4297_v15 = vrot.slane %v4296_v26, 4  ;;  %v2126_v46 = vld [vmem:[#allocation11 + $0x128] sm:$0xff] }
 0x31f   : > { %v4278_v32 = vrot.slane %v4277_v3, 2  ;;  %v4273_v52 = vrot.slane %v4272_v29, 1  ;;  %v4285_v37 = vrot.slane %v4284_v6, 2  ;;  %v8320_v18 = vadd.f32 %v4290_v27, %v4289_v36  ;;  %v2124_v36 = vld [vmem:[#allocation11 + $0x118] sm:$0xff] }
 0x320   : > { %v4267_v12 = vadd.f32 %v4266_v39, %v4265_v25  ;;  %v4211_v58 = vadd.f32 %v4210_v23, %v4209_v45  ;;  %v8323_v59 = vmul.f32 %v8304_v11, %v4260_v47  ;;  %v10800_v4 = vstv %s8209_s19  ;;  %v2128_v45 = vld [vmem:[#allocation11 + $0x138] sm:$0xff]  ;;  %v2134_v23 = vld [vmem:[#allocation11 + $0x168] sm:$0xff] }
 0x321   : > { %10798 = vst [vmem:[#allocation113_spill] sm:$0xff] %v8320_v18  ;;  %v4279_v2 = vadd.f32 %v4278_v32, %v4277_v3  ;;  %v2119_v34 = vadd.f32 %v5522_v44, %v10800_v4  ;;  %v8327_v17 = vadd.f32 %v4217_v1, %v4216_v30  ;;  %v8329_v54 = vadd.f32 %v4224_v14, %v4223_v31  ;;  %v2130_v30 = vld [vmem:[#allocation11 + $0x148] sm:$0xff]  ;;  %v2132_v31 = vld [vmem:[#allocation11 + $0x158] sm:$0xff]  ;;  %v584_v32 = vpop.f32.mrf.mxu0 }
 0x322   : > { %10799 = vst [vmem:[#allocation114_spill] sm:$0xff] %v8323_v59  ;;  %v8331_v10 = vadd.f32 %v4285_v37, %v4284_v6  ;;  %v8334_v24 = vmul.f32 %v8317_v55, %v4267_v12  ;;  %v8336_v25 = vadd.f32 %v4297_v15, %v4296_v26  ;;  %v8340_v27 = vmul.f32 %v8297_v43, %v4204_v50  ;;  %v2136_v39 = vld [vmem:[#allocation11 + $0x178] sm:$0xff]  ;;  %v2138_v6 = vld [vmem:[#allocation11 + $0x188] sm:$0xff]  ;;  %v10826_v43 = vld [vmem:[#allocation59_spill] sm:$0xff] }
 0x323   : > { %10801 = vst [vmem:[#allocation117_spill] sm:$0xff] %v8327_v17  ;;  %10802 = vst [vmem:[#allocation119_spill] sm:$0xff] %v8329_v54  ;;  %v4280_v57 = vrot.slane %v4279_v2, 1  ;;  %v8342_v1 = vadd.f32 %v4273_v52, %v4272_v29  ;;  %v8346_v14 = vmul.f32 %v8302_v5, %v4211_v58  ;;  %v2140_v26 = vld [vmem:[#allocation11 + $0x198] sm:$0xff]  ;;  %v2142_v15 = vld [vmem:[#allocation11 + $0x1a8] sm:$0xff]  ;;  %v2154_v37 = vadd.f32 %v2122_v48, %v2119_v34 }
 0x324   : > { %10803 = vst [vmem:[#allocation75_spill] sm:$0xff] %v8331_v10  ;;  %10804 = vst [vmem:[#allocation77_spill] sm:$0xff] %v8334_v24  ;;  %v2144_v12 = vld [vmem:[#allocation11 + $0x1b8] sm:$0xff]  ;;  %v2146_v50 = vld [vmem:[#allocation11 + $0x1c8] sm:$0xff]  ;;  %v2156_v44 = vadd.f32 %v2124_v36, %v2119_v34  ;;  %v2158_v4 = vadd.f32 %v2126_v46, %v2119_v34  ;;  %v10809_v35 = vstv %s8209_s19  ;;  %v2162_v17 = vadd.f32 %v2130_v30, %v2119_v34  ;;  %s9789_s19 = sld [smem:[#allocation15 + $0x7]] }
 0x325   : > { %10805 = vst [vmem:[#allocation80_spill] sm:$0xff] %v8336_v25  ;;  %10806 = vst [vmem:[#allocation121_spill] sm:$0xff] %v8340_v27  ;;  %v8351_v54 = vadd.f32 %v10809_v35, %v584_v32  ;;  %v2148_v52 = vld [vmem:[#allocation11 + $0x1d8] sm:$0xff]  ;;  %v2150_v3 = vld [vmem:[#allocation11 + $0x1e8] sm:$0xff]  ;;  %v2164_v24 = vadd.f32 %v2132_v31, %v2119_v34  ;;  %v8354_v59 = vadd.f32 %v4280_v57, %v4279_v2 }
 0x326   : > { %10807 = vst [vmem:[#allocation122_spill] sm:$0xff] %v8342_v1  ;;  %10808 = vst [vmem:[#allocation123_spill] sm:$0xff] %v8346_v14  ;;  %v2152_v58 = vld [vmem:[#allocation11 + $0x1f8] sm:$0xff]  ;;  %v2160_v1 = vadd.f32 %v2128_v45, %v2119_v34  ;;  %v2166_v47 = vadd.f32 %v2134_v23, %v2119_v34  ;;  %v2168_v14 = vadd.f32 %v2136_v39, %v2119_v34  ;;  %v10812_v18 = vld [vmem:[#allocation96_spill] sm:$0xff] }
 0x327   : > { %10810 = vst [vmem:[#allocation124_spill] sm:$0xff] %v8354_v59  ;;  %v2170_v27 = vadd.f32 %v2138_v6, %v2119_v34  ;;  %v2172_v21 = vadd.f32 %v2140_v26, %v2119_v34  ;;  %v2174_v48 = vadd.f32 %v2142_v15, %v2119_v34  ;;  %v2176_v36 = vadd.f32 %v2144_v12, %v2119_v34  ;;  %v10811_v29 = vld [vmem:[#allocation94_spill] sm:$0xff]  ;;  %v10814_v57 = vld [vmem:[#allocation57_spill] sm:$0xff]  ;;  %v5546_v6 = vpop.f32.mrf.mxu1  ;;  %v4384_v26 = vld [vmem:[#allocation11 + $0x508] sm:$0xff] }
 0x328   : > { %v2178_v46 = vadd.f32 %v2146_v50, %v2119_v34  ;;  %v2180_v25 = vadd.f32 %v2148_v52, %v2119_v34  ;;  %v2182_v35 = vadd.f32 %v2150_v3, %v2119_v34  ;;  %v2184_v32 = vadd.f32 %v2152_v58, %v2119_v34  ;;  %v10813_v30 = vld [vmem:[#allocation98_spill] sm:$0xff]  ;;  %v4388_v15 = vld [vmem:[#allocation11 + $0x528] sm:$0xff]  ;;  %v2121_v12 = vld [vmem:[#allocation11 + $0x100] sm:$0xff] }
 0x329   : > { %v8357_v10 = vmul.f32 %v10811_v29, %v2154_v37  ;;  %v8360_v45 = vmul.f32 %v10812_v18, %v2156_v44  ;;  %v8363_v2 = vmul.f32 %v10813_v30, %v2158_v4  ;;  %v8366_v31 = vmul.f32 %v10814_v57, %v2160_v1  ;;  %v10815_v23 = vld [vmem:[#allocation42_spill] sm:$0xff]  ;;  %v10817_v44 = vld [vmem:[#allocation27_spill] sm:$0xff]  ;;  %v10820_v57 = vld [vmem:[#allocation37_spill] sm:$0xff] }
 0x32a   : > { %v8369_v39 = vmul.f32 %v10815_v23, %v2162_v17  ;;  %v4386_v3 = vld [vmem:[#allocation11 + $0x518] sm:$0xff]  ;;  %v8375_v52 = vmul.f32 %v10817_v44, %v2166_v47  ;;  %v10818_v4 = vld [vmem:[#allocation35_spill] sm:$0xff]  ;;  %v10819_v1 = vstv %s8315_s12  ;;  %v2127_v23 = vld [vmem:[#allocation11 + $0x130] sm:$0xff]  ;;  %v8383_v30 = vmul.f32 %v10820_v57, %v2170_v27 }
 0x32b   : > { %v4390_v34 = vld [vmem:[#allocation11 + $0x538] sm:$0xff]  ;;  %v8378_v58 = vmul.f32 %v10818_v4, %v2168_v14  ;;  %v4381_v59 = vadd.f32 %v5546_v6, %v10819_v1  ;;  %v2125_v17 = vld [vmem:[#allocation11 + $0x120] sm:$0xff]  ;;  %v10821_v18 = vld [vmem:[#allocation101_spill] sm:$0xff]  ;;  %v8395_v6 = vmul.f32 %v10826_v43, %v2178_v46  ;;  %v2153_v22 = vadd.f32 %v2121_v12, %v8351_v54 }
 0x32c   : > { %v10816_v50 = vld [vmem:[#allocation54_spill] sm:$0xff]  ;;  %v8386_v29 = vmul.f32 %v10821_v18, %v2172_v21  ;;  %v10822_v5 = vld [vmem:[#allocation107_spill] sm:$0xff]  ;;  %v4392_v44 = vld [vmem:[#allocation11 + $0x548] sm:$0xff]  ;;  %v2155_v46 = vadd.f32 %v2123_v8, %v8351_v54  ;;  %v2157_v43 = vadd.f32 %v2125_v17, %v8351_v54 }
 0x32d   : > { %v8372_v37 = vmul.f32 %v10816_v50, %v2164_v24  ;;  %v8389_v24 = vmul.f32 %v10822_v5, %v2174_v48  ;;  %v10824_v50 = vld [vmem:[#allocation61_spill] sm:$0xff]  ;;  %v4394_v14 = vld [vmem:[#allocation11 + $0x558] sm:$0xff]  ;;  %v4396_v4 = vld [vmem:[#allocation11 + $0x568] sm:$0xff]  ;;  %10827 = vst [vmem:[#allocation127_spill] sm:$0xff] %v8395_v6  ;;  %v4416_v51 = vadd.f32 %v4384_v26, %v4381_v59  ;;  %v4422_v56 = vadd.f32 %v4390_v34, %v4381_v59 }
 0x32e   : > { %v8392_v47 = vmul.f32 %v10824_v50, %v2176_v36  ;;  %v10828_v1 = vld [vmem:[#allocation62_spill] sm:$0xff]  ;;  %v4400_v5 = vld [vmem:[#allocation11 + $0x588] sm:$0xff]  ;;  %v4424_v61 = vadd.f32 %v4392_v44, %v4381_v59  ;;  %v4426_v33 = vadd.f32 %v4394_v14, %v4381_v59  ;;  %v4428_v28 = vadd.f32 %v4396_v4, %v4381_v59  ;;  %v2131_v6 = vld [vmem:[#allocation11 + $0x150] sm:$0xff] }
 0x32f   : > { %10823 = vst [vmem:[#allocation125_spill] sm:$0xff] %v8389_v24  ;;  %v8398_v55 = vmul.f32 %v10828_v1, %v2180_v25  ;;  %v10830_v27 = vld [vmem:[#allocation66_spill] sm:$0xff]  ;;  %v4404_v36 = vld [vmem:[#allocation11 + $0x5a8] sm:$0xff]  ;;  %v2159_v25 = vadd.f32 %v2127_v23, %v8351_v54  ;;  %v4432_v53 = vadd.f32 %v4400_v5, %v4381_v59  ;;  %v4440_v8 = vadd.f32 %v4408_v60, %v4381_v59  ;;  %v2129_v23 = vld [vmem:[#allocation11 + $0x140] sm:$0xff] }
 0x330   : > { %10825 = vst [vmem:[#allocation126_spill] sm:$0xff] %v8392_v47  ;;  %v8401_v57 = vmul.f32 %v10830_v27, %v2182_v35  ;;  %v10832_v21 = vld [vmem:[#allocation70_spill] sm:$0xff]  ;;  %v4412_v35 = vld [vmem:[#allocation11 + $0x5e8] sm:$0xff]  ;;  %v4436_v12 = vadd.f32 %v4404_v36, %v4381_v59  ;;  %v10834_v47 = vld [vmem:[#allocation41_spill] sm:$0xff] }
 0x331   : > { %10829 = vst [vmem:[#allocation128_spill] sm:$0xff] %v8398_v55  ;;  %v8404_v18 = vmul.f32 %v10832_v21, %v2184_v32  ;;  %v4398_v48 = vld [vmem:[#allocation11 + $0x578] sm:$0xff]  ;;  %v4418_v32 = vadd.f32 %v4386_v3, %v4381_v59  ;;  %v4420_v21 = vadd.f32 %v4388_v15, %v4381_v59  ;;  %v4444_v17 = vadd.f32 %v4412_v35, %v4381_v59  ;;  %v10835_v3 = vld [vmem:[#allocation44_spill] sm:$0xff]  ;;  %v10836_v34 = vld [vmem:[#allocation55_spill] sm:$0xff] }
 0x332   : > { %10831 = vst [vmem:[#allocation129_spill] sm:$0xff] %v8401_v57  ;;  %v4402_v11 = vld [vmem:[#allocation11 + $0x598] sm:$0xff]  ;;  %v4430_v19 = vadd.f32 %v4398_v48, %v4381_v59  ;;  %v8411_v24 = vmul.f32 %v10834_v47, %v4416_v51  ;;  %v8420_v5 = vmul.f32 %v10836_v34, %v4422_v56  ;;  %v10838_v60 = vld [vmem:[#allocation72_spill] sm:$0xff]  ;;  %v10840_v51 = vld [vmem:[#allocation47_spill] sm:$0xff]  ;;  %v2163_v48 = vadd.f32 %v2131_v6, %v8351_v54 }
 0x333   : > { %10833 = vst [vmem:[#allocation130_spill] sm:$0xff] %v8404_v18  ;;  %v4406_v50 = vld [vmem:[#allocation11 + $0x5b8] sm:$0xff]  ;;  %v4434_v41 = vadd.f32 %v4402_v11, %v4381_v59  ;;  %v8414_v26 = vmul.f32 %v7933_v16, %v4418_v32  ;;  %v8417_v15 = vmul.f32 %v10835_v3, %v4420_v21  ;;  %v10837_v11 = vld [vmem:[#allocation71_spill] sm:$0xff]  ;;  %v8426_v44 = vmul.f32 %v10838_v60, %v4426_v33  ;;  %v10841_v33 = vld [vmem:[#allocation112_spill] sm:$0xff] }
 0x334   : > { %v4410_v1 = vld [vmem:[#allocation11 + $0x5d8] sm:$0xff]  ;;  %v4438_v18 = vadd.f32 %v4406_v50, %v4381_v59  ;;  %v8423_v50 = vmul.f32 %v10837_v11, %v4424_v61  ;;  %v8432_v14 = vmul.f32 %v10840_v51, %v4430_v19  ;;  %v8435_v21 = vmul.f32 %v8044_v38, %v4432_v53  ;;  %v2137_v53 = vld [vmem:[#allocation11 + $0x180] sm:$0xff]  ;;  %v2139_v38 = vld [vmem:[#allocation11 + $0x190] sm:$0xff] }
 0x335   : > { %v4414_v27 = vld [vmem:[#allocation11 + $0x5f8] sm:$0xff]  ;;  %v4442_v57 = vadd.f32 %v4410_v1, %v4381_v59  ;;  %v2133_v1 = vld [vmem:[#allocation11 + $0x160] sm:$0xff]  ;;  %v8438_v56 = vmul.f32 %v8060_v40, %v4434_v41  ;;  %v2161_v61 = vadd.f32 %v2129_v23, %v8351_v54  ;;  %v8443_v36 = vmul.f32 %v10841_v33, %v4436_v12  ;;  %v2143_v12 = vld [vmem:[#allocation11 + $0x1b0] sm:$0xff] }
 0x336   : > { %v4446_v55 = vadd.f32 %v4414_v27, %v4381_v59  ;;  %v10839_v59 = vld [vmem:[#allocation45_spill] sm:$0xff]  ;;  %v10843_v19 = vld [vmem:[#allocation118_spill] sm:$0xff]  ;;  %v2141_v41 = vld [vmem:[#allocation11 + $0x1a0] sm:$0xff]  ;;  %v8455_v40 = vmul.f32 %v8130_v13, %v4444_v17  ;;  %v2189_v60 = vmul.f32 %v10728_v7, %v2157_v43  ;;  %v2191_v17 = vmul.f32 %v10729_v63, %v2159_v25 }
 0x337   : > { %v8429_v4 = vmul.f32 %v10839_v59, %v4428_v28  ;;  %v2135_v27 = vld [vmem:[#allocation11 + $0x170] sm:$0xff]  ;;  %v10842_v28 = vld [vmem:[#allocation116_spill] sm:$0xff]  ;;  %v8449_v32 = vmul.f32 %v10843_v19, %v4440_v8  ;;  %v10844_v51 = vld [vmem:[#allocation74_spill] sm:$0xff]  ;;  %v2193_v13 = vmul.f32 %v10730_v42, %v2161_v61  ;;  %v2175_v34 = vadd.f32 %v2143_v12, %v8351_v54 }
 0x338   : > { %v8446_v35 = vmul.f32 %v10842_v28, %v4438_v18  ;;  %v8452_v59 = vmul.f32 %v10844_v51, %v4442_v57  ;;  %v8458_v6 = vmul.f32 %v8138_v49, %v4446_v55  ;;  %v2145_v23 = vld [vmem:[#allocation11 + $0x1c0] sm:$0xff]  ;;  %v2147_v33 = vld [vmem:[#allocation11 + $0x1d0] sm:$0xff]  ;;  %v2165_v18 = vadd.f32 %v2133_v1, %v8351_v54  ;;  %v10846_v63 = vld [vmem:[#allocation40_spill] sm:$0xff] }
 0x339   : > { %v2167_v8 = vadd.f32 %v2135_v27, %v8351_v54  ;;  %v2149_v19 = vld [vmem:[#allocation11 + $0x1e0] sm:$0xff]  ;;  %v2151_v28 = vld [vmem:[#allocation11 + $0x1f0] sm:$0xff]  ;;  %v2185_v57 = vmul.f32 %v10657_v62, %v2153_v22  ;;  %v2187_v51 = vmul.f32 %v10660_v9, %v2155_v46  ;;  %v2169_v55 = vadd.f32 %v2137_v53, %v8351_v54  ;;  %v10847_v7 = vld [vmem:[#allocation28_spill] sm:$0xff] }
 0x33a   : > { %v2171_v49 = vadd.f32 %v2139_v38, %v8351_v54  ;;  %v10845_v11 = vld [vmem:[#allocation53_spill] sm:$0xff]  ;;  %v2173_v27 = vadd.f32 %v2141_v41, %v8351_v54  ;;  %v2177_v22 = vadd.f32 %v2145_v23, %v8351_v54  ;;  %v2179_v46 = vadd.f32 %v2147_v33, %v8351_v54  ;;  %v10849_v42 = vld [vmem:[#allocation100_spill] sm:$0xff] }
 0x33b   : > { %v2195_v1 = vmul.f32 %v10845_v11, %v2163_v48  ;;  %v2181_v43 = vadd.f32 %v2149_v19, %v8351_v54  ;;  %v2183_v25 = vadd.f32 %v2151_v28, %v8351_v54  ;;  %v2197_v53 = vmul.f32 %v10846_v63, %v2165_v18  ;;  %v10848_v11 = vld [vmem:[#allocation36_spill] sm:$0xff] }
 0x33c   : > { %v2199_v38 = vmul.f32 %v10847_v7, %v2167_v8  ;;  %v2217_v61 = vadd.f32 %v8357_v10, %v2185_v57  ;;  %v2224_v48 = vadd.f32 %v8360_v45, %v2187_v51  ;;  %v2231_v41 = vadd.f32 %v8363_v2, %v2189_v60 }
 0x33d   : > { %v2238_v12 = vadd.f32 %v8366_v31, %v2191_v17  ;;  %v2201_v23 = vmul.f32 %v10848_v11, %v2169_v55  ;;  %v2203_v33 = vmul.f32 %v10849_v42, %v2171_v49  ;;  %v2245_v19 = vadd.f32 %v8369_v39, %v2193_v13  ;;  %v10850_v49 = vld [vmem:[#allocation69_spill] sm:$0xff] }
 0x33e   : > { %v2252_v54 = vadd.f32 %v8372_v37, %v2195_v1  ;;  %v2218_v28 = vrot.slane %v2217_v61, 4  ;;  %v2225_v18 = vrot.slane %v2224_v48, 4  ;;  %v2232_v63 = vrot.slane %v2231_v41, 4 }
 0x33f   : > { %v2239_v8 = vrot.slane %v2238_v12, 4  ;;  %v2205_v10 = vmul.f32 %v10735_v0, %v2173_v27  ;;  %v2207_v45 = vmul.f32 %v10736_v20, %v2175_v34  ;;  %v2246_v51 = vrot.slane %v2245_v19, 4  ;;  %v10852_v34 = vld [vmem:[#allocation30_spill] sm:$0xff] }
 0x340   : > { %v2259_v2 = vadd.f32 %v8375_v52, %v2197_v53  ;;  %v2219_v31 = vadd.f32 %v2218_v28, %v2217_v61  ;;  %v2226_v60 = vadd.f32 %v2225_v18, %v2224_v48  ;;  %v2233_v57 = vadd.f32 %v2232_v63, %v2231_v41  ;;  %v10853_v41 = vld [vmem:[#allocation32_spill] sm:$0xff] }
 0x341   : > { %v2240_v17 = vadd.f32 %v2239_v8, %v2238_v12  ;;  %v2209_v55 = vmul.f32 %v10850_v49, %v2177_v22  ;;  %v2247_v13 = vadd.f32 %v2246_v51, %v2245_v19  ;;  %v8491_v39 = vadd.f32 %v8378_v58, %v2199_v38  ;;  %v10854_v19 = vld [vmem:[#allocation125_spill] sm:$0xff] }
 0x342   : > { %v2273_v37 = vadd.f32 %v8383_v30, %v2201_v23  ;;  %v2220_v1 = vrot.slane %v2219_v31, 2  ;;  %v2227_v42 = vrot.slane %v2226_v60, 2  ;;  %v2234_v27 = vrot.slane %v2233_v57, 2  ;;  %v10855_v23 = vld [vmem:[#allocation33_spill] sm:$0xff] }
 0x343   : > { %10851 = vst [vmem:[#allocation131_spill] sm:$0xff] %v8491_v39  ;;  %v2253_v0 = vrot.slane %v2252_v54, 4  ;;  %v2211_v20 = vmul.f32 %v10852_v34, %v2179_v46  ;;  %v2241_v11 = vrot.slane %v2240_v17, 2  ;;  %v2280_v53 = vadd.f32 %v8386_v29, %v2203_v33 }
 0x344   : > { %v2274_v52 = vrot.slane %v2273_v37, 4  ;;  %v2221_v63 = vadd.f32 %v2220_v1, %v2219_v31  ;;  %v2228_v61 = vadd.f32 %v2227_v42, %v2226_v60  ;;  %v2248_v48 = vrot.slane %v2247_v13, 2 }
 0x345   : > { %v2260_v22 = vrot.slane %v2259_v2, 4  ;;  %v2213_v12 = vmul.f32 %v10853_v41, %v2181_v43  ;;  %v2281_v38 = vrot.slane %v2280_v53, 4  ;;  %v2287_v30 = vadd.f32 %v10854_v19, %v2205_v10 }
 0x346   : > { %v2275_v58 = vadd.f32 %v2274_v52, %v2273_v37  ;;  %v2215_v28 = vmul.f32 %v10855_v23, %v2183_v25  ;;  %v2235_v18 = vadd.f32 %v2234_v27, %v2233_v57  ;;  %v8499_v8 = vadd.f32 %v2253_v0, %v2252_v54  ;;  %v10859_v52 = vld [vmem:[#allocation126_spill] sm:$0xff]  ;;  %v10860_v0 = vld [vmem:[#allocation127_spill] sm:$0xff]  ;;  %v10861_v27 = vld [vmem:[#allocation128_spill] sm:$0xff] }
 0x347   : > { %v2242_v51 = vadd.f32 %v2241_v11, %v2240_v17  ;;  %v2282_v29 = vadd.f32 %v2281_v38, %v2280_v53  ;;  %v2288_v33 = vrot.slane %v2287_v30, 4  ;;  %v2222_v42 = vrot.slane %v2221_v63, 1  ;;  %v10862_v11 = vld [vmem:[#allocation129_spill] sm:$0xff] }
 0x348   : > { %10856 = vst [vmem:[#allocation32_spill] sm:$0xff] %v8499_v8  ;;  %v2276_v34 = vrot.slane %v2275_v58, 2  ;;  %v2229_v31 = vrot.slane %v2228_v61, 1  ;;  %v8502_v60 = vadd.f32 %v2248_v48, %v2247_v13  ;;  %v8504_v43 = vadd.f32 %v2260_v22, %v2259_v2  ;;  %v4389_v13 = vld [vmem:[#allocation11 + $0x530] sm:$0xff]  ;;  %v10886_v8 = vld [vmem:[#allocation68_spill] sm:$0xff] }
 0x349   : > { %v2283_v1 = vrot.slane %v2282_v29, 2  ;;  %v2289_v10 = vadd.f32 %v2288_v33, %v2287_v30  ;;  %v2294_v25 = vadd.f32 %v10859_v52, %v2207_v45  ;;  %v2236_v57 = vrot.slane %v2235_v18, 1 }
 0x34a   : > { %10857 = vst [vmem:[#allocation125_spill] sm:$0xff] %v8502_v60  ;;  %10858 = vst [vmem:[#allocation33_spill] sm:$0xff] %v8504_v43  ;;  %v2277_v37 = vadd.f32 %v2276_v34, %v2275_v58  ;;  %v2301_v54 = vadd.f32 %v10860_v0, %v2209_v55  ;;  %v2308_v19 = vadd.f32 %v10861_v27, %v2211_v20  ;;  %v2243_v53 = vrot.slane %v2242_v51, 1  ;;  %v10863_v34 = vld [vmem:[#allocation130_spill] sm:$0xff] }
 0x34b   : > { %v2315_v17 = vadd.f32 %v10862_v11, %v2213_v12  ;;  %v2284_v38 = vadd.f32 %v2283_v1, %v2282_v29  ;;  %v2290_v46 = vrot.slane %v2289_v10, 2  ;;  %v2295_v39 = vrot.slane %v2294_v25, 4  ;;  %v4383_v11 = vld [vmem:[#allocation11 + $0x500] sm:$0xff] }
 0x34c   : > { %v2278_v2 = vrot.slane %v2277_v37, 1  ;;  %v2302_v48 = vrot.slane %v2301_v54, 4  ;;  %v8512_v22 = vadd.f32 %v10863_v34, %v2215_v28  ;;  %v2309_v30 = vrot.slane %v2308_v19, 4  ;;  %v664_v28 = vpop.f32.mrf.mxu1  ;;  %v4387_v34 = vld [vmem:[#allocation11 + $0x520] sm:$0xff] }
 0x34d   : > { %v2291_v58 = vadd.f32 %v2290_v46, %v2289_v10  ;;  %v2296_v45 = vadd.f32 %v2295_v39, %v2294_v25  ;;  %v2316_v55 = vrot.slane %v2315_v17, 4  ;;  %v2223_v33 = vadd.f32 %v2222_v42, %v2221_v63  ;;  %v4385_v42 = vld [vmem:[#allocation11 + $0x510] sm:$0xff]  ;;  %v10873_v10 = vld [vmem:[#allocation103_spill] sm:$0xff] }
 0x34e   : > { %10864 = vst [vmem:[#allocation126_spill] sm:$0xff] %v8512_v22  ;;  %v2285_v12 = vrot.slane %v2284_v38, 1  ;;  %v2303_v52 = vadd.f32 %v2302_v48, %v2301_v54  ;;  %v2230_v29 = vadd.f32 %v2229_v31, %v2228_v61  ;;  %v8517_v1 = vadd.f32 %v2236_v57, %v2235_v18  ;;  %v4391_v18 = vld [vmem:[#allocation11 + $0x540] sm:$0xff] }
 0x34f   : > { %v8519_v0 = vadd.f32 %v2243_v53, %v2242_v51  ;;  %v2297_v27 = vrot.slane %v2296_v45, 2  ;;  %v2279_v46 = vadd.f32 %v2278_v2, %v2277_v37  ;;  %v10867_v25 = vstv %s8315_s12  ;;  %v4393_v51 = vld [vmem:[#allocation11 + $0x550] sm:$0xff]  ;;  %v4395_v31 = vld [vmem:[#allocation11 + $0x560] sm:$0xff]  ;;  %v10871_v37 = vld [vmem:[#allocation84_spill] sm:$0xff]  ;;  %s5422_s12 = sshll.u32 %s6242_s11, 7 }
 0x350   : > { %10865 = vst [vmem:[#allocation127_spill] sm:$0xff] %v8517_v1  ;;  %v2304_v39 = vrot.slane %v2303_v52, 2  ;;  %v4380_v63 = vadd.f32 %v10867_v25, %v664_v28  ;;  %v2292_v54 = vrot.slane %v2291_v58, 1  ;;  %v8524_v20 = vadd.f32 %v2309_v30, %v2308_v19  ;;  %v4397_v25 = vld [vmem:[#allocation11 + $0x570] sm:$0xff] }
 0x351   : > { %10866 = vst [vmem:[#allocation128_spill] sm:$0xff] %v8519_v0  ;;  %v2298_v48 = vadd.f32 %v2297_v27, %v2296_v45  ;;  %v8526_v61 = vadd.f32 %v2316_v55, %v2315_v17  ;;  %v2286_v57 = vadd.f32 %v2285_v12, %v2284_v38  ;;  %v8531_v2 = vmul.f32 %v10871_v37, %v2223_v33  ;;  %v4399_v0 = vld [vmem:[#allocation11 + $0x580] sm:$0xff]  ;;  %v10876_v33 = vld [vmem:[#allocation86_spill] sm:$0xff] }
 0x352   : > { %10868 = vst [vmem:[#allocation129_spill] sm:$0xff] %v8524_v20  ;;  %v8528_v53 = vadd.f32 %v2304_v39, %v2303_v52  ;;  %v8534_v28 = vmul.f32 %v10873_v10, %v2230_v29  ;;  %v4415_v1 = vadd.f32 %v4383_v11, %v4380_v63  ;;  %v4417_v45 = vadd.f32 %v4385_v42, %v4380_v63  ;;  %v10878_v29 = vld [vmem:[#allocation105_spill] sm:$0xff]  ;;  %v4403_v42 = vld [vmem:[#allocation11 + $0x5a0] sm:$0xff]  ;;  %v10885_v11 = vld [vmem:[#allocation108_spill] sm:$0xff] }
 0x353   : > { %10869 = vst [vmem:[#allocation130_spill] sm:$0xff] %v8526_v61  ;;  %10872 = vst [vmem:[#allocation133_spill] sm:$0xff] %v8531_v2  ;;  %v4419_v19 = vadd.f32 %v4387_v34, %v4380_v63  ;;  %v4421_v30 = vadd.f32 %v4389_v13, %v4380_v63  ;;  %v2299_v17 = vrot.slane %v2298_v48, 1  ;;  %v4423_v55 = vadd.f32 %v4391_v18, %v4380_v63  ;;  %v4405_v13 = vld [vmem:[#allocation11 + $0x5b0] sm:$0xff]  ;;  %v4407_v34 = vld [vmem:[#allocation11 + $0x5c0] sm:$0xff] }
 0x354   : > { %10870 = vst [vmem:[#allocation132_spill] sm:$0xff] %v8528_v53  ;;  %10874 = vst [vmem:[#allocation134_spill] sm:$0xff] %v8534_v28  ;;  %v4425_v27 = vadd.f32 %v4393_v51, %v4380_v63  ;;  %v4427_v22 = vadd.f32 %v4395_v31, %v4380_v63  ;;  %v8536_v38 = vadd.f32 %v2292_v54, %v2291_v58  ;;  %v4401_v28 = vld [vmem:[#allocation11 + $0x590] sm:$0xff]  ;;  %v4411_v58 = vld [vmem:[#allocation11 + $0x5e0] sm:$0xff] }
 0x355   : > { %v8540_v52 = vmul.f32 %v10876_v33, %v2279_v46  ;;  %v8543_v39 = vmul.f32 %v10878_v29, %v2286_v57  ;;  %v4429_v2 = vadd.f32 %v4397_v25, %v4380_v63  ;;  %v4431_v18 = vadd.f32 %v4399_v0, %v4380_v63  ;;  %v4409_v31 = vld [vmem:[#allocation11 + $0x5d0] sm:$0xff]  ;;  %v10881_v61 = vld [vmem:[#allocation90_spill] sm:$0xff]  ;;  %v10883_v57 = vld [vmem:[#allocation92_spill] sm:$0xff] }
 0x356   : > { %10875 = vst [vmem:[#allocation135_spill] sm:$0xff] %v8536_v38  ;;  %v4413_v54 = vld [vmem:[#allocation11 + $0x5f0] sm:$0xff]  ;;  %v10880_v38 = vld [vmem:[#allocation34_spill] sm:$0xff]  ;;  %v4449_v46 = vmul.f32 %v10881_v61, %v4417_v45  ;;  %v8551_v43 = vadd.f32 %v2299_v17, %v2298_v48  ;;  %v4455_v53 = vmul.f32 %v10885_v11, %v4423_v55  ;;  %v4457_v60 = vmul.f32 %v10886_v8, %v4425_v27  ;;  %v10889_v55 = vld [vmem:[#allocation48_spill] sm:$0xff] }
 0x357   : > { %10877 = vst [vmem:[#allocation136_spill] sm:$0xff] %v8540_v52  ;;  %10879 = vst [vmem:[#allocation137_spill] sm:$0xff] %v8543_v39  ;;  %v4447_v12 = vmul.f32 %v10880_v38, %v4415_v1  ;;  %v10882_v52 = vld [vmem:[#allocation91_spill] sm:$0xff]  ;;  %v4453_v39 = vmul.f32 %v10883_v57, %v4421_v30  ;;  %v10887_v25 = vld [vmem:[#allocation73_spill] sm:$0xff]  ;;  %v4433_v51 = vadd.f32 %v4401_v28, %v4380_v63 }
 0x358   : > { %v4451_v20 = vmul.f32 %v10882_v52, %v4419_v19  ;;  %10884 = vst [vmem:[#allocation138_spill] sm:$0xff] %v8551_v43  ;;  %v4459_v0 = vmul.f32 %v10887_v25, %v4427_v22  ;;  %v4435_v29 = vadd.f32 %v4403_v42, %v4380_v63  ;;  %v4437_v33 = vadd.f32 %v4405_v13, %v4380_v63  ;;  %v10888_v45 = vld [vmem:[#allocation46_spill] sm:$0xff] }
 0x359   : > { %v4439_v10 = vadd.f32 %v4407_v34, %v4380_v63  ;;  %v4441_v37 = vadd.f32 %v4409_v31, %v4380_v63  ;;  %v4443_v1 = vadd.f32 %v4411_v58, %v4380_v63  ;;  %v4445_v38 = vadd.f32 %v4413_v54, %v4380_v63  ;;  %v10890_v31 = vld [vmem:[#allocation38_spill] sm:$0xff]  ;;  %v10892_v54 = vld [vmem:[#allocation115_spill] sm:$0xff] }
 0x35a   : > { %v4461_v61 = vmul.f32 %v10888_v45, %v4429_v2  ;;  %v4479_v19 = vadd.f32 %v8411_v24, %v4447_v12  ;;  %v4486_v48 = vadd.f32 %v8414_v26, %v4449_v46  ;;  %v4493_v30 = vadd.f32 %v8417_v15, %v4451_v20  ;;  %v10891_v12 = vld [vmem:[#allocation110_spill] sm:$0xff] }
 0x35b   : > { %v4500_v17 = vadd.f32 %v8420_v5, %v4453_v39  ;;  %v4463_v27 = vmul.f32 %v10889_v55, %v4431_v18  ;;  %v4507_v22 = vadd.f32 %v8423_v50, %v4455_v53  ;;  %v4514_v28 = vadd.f32 %v8426_v44, %v4457_v60  ;;  %v10893_v53 = vld [vmem:[#allocation120_spill] sm:$0xff] }
 0x35c   : > { %v4521_v42 = vadd.f32 %v8429_v4, %v4459_v0  ;;  %v4480_v13 = vrot.slane %v4479_v19, 4  ;;  %v4487_v63 = vrot.slane %v4486_v48, 4  ;;  %v4494_v34 = vrot.slane %v4493_v30, 4 }
 0x35d   : > { %v4501_v2 = vrot.slane %v4500_v17, 4  ;;  %v4465_v24 = vmul.f32 %v10890_v31, %v4433_v51  ;;  %v4467_v26 = vmul.f32 %v10891_v12, %v4435_v29  ;;  %v4508_v58 = vrot.slane %v4507_v22, 4  ;;  %v10896_v29 = vld [vmem:[#allocation76_spill] sm:$0xff] }
 0x35e   : > { %v4515_v15 = vrot.slane %v4514_v28, 4  ;;  %v4481_v20 = vadd.f32 %v4480_v13, %v4479_v19  ;;  %v4488_v5 = vadd.f32 %v4487_v63, %v4486_v48  ;;  %v4495_v39 = vadd.f32 %v4494_v34, %v4493_v30  ;;  %v10898_v34 = vld [vmem:[#allocation82_spill] sm:$0xff] }
 0x35f   : > { %v4502_v18 = vadd.f32 %v4501_v2, %v4500_v17  ;;  %v4469_v50 = vmul.f32 %v10892_v54, %v4437_v33  ;;  %v4471_v44 = vmul.f32 %v10893_v53, %v4439_v10  ;;  %v4509_v60 = vadd.f32 %v4508_v58, %v4507_v22  ;;  %v10897_v22 = vld [vmem:[#allocation78_spill] sm:$0xff] }
 0x360   : > { %v4535_v4 = vadd.f32 %v8435_v21, %v4463_v27  ;;  %v4482_v46 = vrot.slane %v4481_v20, 2  ;;  %v8570_v0 = vadd.f32 %v4515_v15, %v4514_v28  ;;  %v4522_v43 = vrot.slane %v4521_v42, 4 }
 0x361   : > { %v8573_v51 = vadd.f32 %v8432_v14, %v4461_v61  ;;  %v4473_v12 = vmul.f32 %v10896_v29, %v4441_v37  ;;  %v4489_v19 = vrot.slane %v4488_v5, 2  ;;  %v4542_v30 = vadd.f32 %v8438_v56, %v4465_v24 }
 0x362   : > { %10894 = vst [vmem:[#allocation139_spill] sm:$0xff] %v8570_v0  ;;  %v4536_v48 = vrot.slane %v4535_v4, 4  ;;  %v4483_v17 = vadd.f32 %v4482_v46, %v4481_v20  ;;  %v4496_v33 = vrot.slane %v4495_v39, 2  ;;  %v4503_v13 = vrot.slane %v4502_v18, 2 }
 0x363   : > { %10895 = vst [vmem:[#allocation140_spill] sm:$0xff] %v8573_v51  ;;  %v4510_v10 = vrot.slane %v4509_v60, 2  ;;  %v4475_v63 = vmul.f32 %v10897_v22, %v4443_v1  ;;  %v4543_v27 = vrot.slane %v4542_v30, 4  ;;  %v4549_v28 = vadd.f32 %v8443_v36, %v4467_v26 }
 0x364   : > { %v4537_v21 = vadd.f32 %v4536_v48, %v4535_v4  ;;  %v4477_v2 = vmul.f32 %v10898_v34, %v4445_v38  ;;  %v8581_v61 = vadd.f32 %v4522_v43, %v4521_v42  ;;  %v4490_v58 = vadd.f32 %v4489_v19, %v4488_v5 }
 0x365   : > { %v4544_v24 = vadd.f32 %v4543_v27, %v4542_v30  ;;  %v4550_v15 = vrot.slane %v4549_v28, 4  ;;  %v4484_v20 = vrot.slane %v4483_v17, 1  ;;  %v4497_v46 = vadd.f32 %v4496_v33, %v4495_v39 }
 0x366   : > { %10899 = vst [vmem:[#allocation141_spill] sm:$0xff] %v8581_v61  ;;  %v4538_v56 = vrot.slane %v4537_v21, 2  ;;  %v4504_v29 = vadd.f32 %v4503_v13, %v4502_v18  ;;  %v8584_v1 = vadd.f32 %v4510_v10, %v4509_v60  ;;  %v4556_v38 = vadd.f32 %v8446_v35, %v4469_v50 }
 0x367   : > { %v4545_v48 = vrot.slane %v4544_v24, 2  ;;  %v4551_v36 = vadd.f32 %v4550_v15, %v4549_v28  ;;  %v4563_v26 = vadd.f32 %v8449_v32, %v4471_v44  ;;  %v4570_v43 = vadd.f32 %v8452_v59, %v4473_v12  ;;  %v10903_v15 = vld [vmem:[#allocation39_spill] sm:$0xff] }
 0x368   : > { %10900 = vst [vmem:[#allocation142_spill] sm:$0xff] %v8584_v1  ;;  %v4539_v4 = vadd.f32 %v4538_v56, %v4537_v21  ;;  %v4577_v42 = vadd.f32 %v8455_v40, %v4475_v63  ;;  %v8591_v5 = vadd.f32 %v8458_v6, %v4477_v2  ;;  %v4557_v18 = vrot.slane %v4556_v38, 4  ;;  %v5525_v2 = vpop.f32.mrf.mxu0  ;;  %v4667_v1 = vld [vmem:[#allocation11 + $0x618] sm:$0xff] }
 0x369   : > { %v4546_v30 = vadd.f32 %v4545_v48, %v4544_v24  ;;  %v4552_v39 = vrot.slane %v4551_v36, 2  ;;  %v4491_v60 = vrot.slane %v4490_v58, 1  ;;  %v4498_v33 = vrot.slane %v4497_v46, 1 }
 0x36a   : > { %10901 = vst [vmem:[#allocation143_spill] sm:$0xff] %v8591_v5  ;;  %v4540_v19 = vrot.slane %v4539_v4, 1  ;;  %v4564_v13 = vrot.slane %v4563_v26, 4  ;;  %v4571_v10 = vrot.slane %v4570_v43, 4  ;;  %v4505_v35 = vrot.slane %v4504_v29, 1 }
 0x36b   : > { %v4547_v32 = vrot.slane %v4546_v30, 1  ;;  %v4553_v50 = vadd.f32 %v4552_v39, %v4551_v36  ;;  %v4558_v59 = vadd.f32 %v4557_v18, %v4556_v38  ;;  %v4578_v44 = vrot.slane %v4577_v42, 4  ;;  %v2403_v36 = vld [vmem:[#allocation11 + $0x208] sm:$0xff]  ;;  %v2405_v38 = vld [vmem:[#allocation11 + $0x218] sm:$0xff] }
 0x36c   : > { %v4541_v12 = vadd.f32 %v4540_v19, %v4539_v4  ;;  %v4565_v6 = vadd.f32 %v4564_v13, %v4563_v26  ;;  %v4485_v63 = vadd.f32 %v4484_v20, %v4483_v17  ;;  %v8596_v28 = vadd.f32 %v4571_v10, %v4570_v43  ;;  %v10907_v26 = vld [vmem:[#allocation111_spill] sm:$0xff]  ;;  %v2407_v20 = vld [vmem:[#allocation11 + $0x228] sm:$0xff]  ;;  %v2409_v43 = vld [vmem:[#allocation11 + $0x238] sm:$0xff] }
 0x36d   : > { %v4548_v21 = vadd.f32 %v4547_v32, %v4546_v30  ;;  %v4559_v27 = vrot.slane %v4558_v59, 2  ;;  %v4554_v56 = vrot.slane %v4553_v50, 1  ;;  %v10905_v37 = vstv %s8515_s21  ;;  %v2411_v19 = vld [vmem:[#allocation11 + $0x248] sm:$0xff]  ;;  %v2413_v32 = vld [vmem:[#allocation11 + $0x258] sm:$0xff] }
 0x36e   : > { %10902 = vst [vmem:[#allocation144_spill] sm:$0xff] %v8596_v28  ;;  %v4566_v24 = vrot.slane %v4565_v6, 2  ;;  %v8599_v48 = vmul.f32 %v10903_v15, %v4541_v12  ;;  %v2400_v14 = vadd.f32 %v5525_v2, %v10905_v37  ;;  %v4492_v39 = vadd.f32 %v4491_v60, %v4490_v58  ;;  %v2415_v12 = vld [vmem:[#allocation11 + $0x268] sm:$0xff]  ;;  %v2417_v58 = vld [vmem:[#allocation11 + $0x278] sm:$0xff] }
 0x36f   : > { %v8603_v18 = vadd.f32 %v4498_v33, %v4497_v46  ;;  %v4560_v4 = vadd.f32 %v4559_v27, %v4558_v59  ;;  %v8606_v17 = vmul.f32 %v10907_v26, %v4548_v21  ;;  %v8608_v30 = vadd.f32 %v4505_v35, %v4504_v29  ;;  %v10912_v33 = vld [vmem:[#allocation51_spill] sm:$0xff]  ;;  %v10914_v21 = vld [vmem:[#allocation52_spill] sm:$0xff]  ;;  %v2421_v35 = vld [vmem:[#allocation11 + $0x298] sm:$0xff] }
 0x370   : > { %10904 = vst [vmem:[#allocation145_spill] sm:$0xff] %v8599_v48  ;;  %v8610_v13 = vadd.f32 %v4566_v24, %v4565_v6  ;;  %v8612_v10 = vadd.f32 %v4578_v44, %v4577_v42  ;;  %v8617_v59 = vmul.f32 %v10912_v33, %v4485_v63  ;;  %v8620_v27 = vmul.f32 %v10914_v21, %v4492_v39  ;;  %v2419_v29 = vld [vmem:[#allocation11 + $0x288] sm:$0xff]  ;;  %v594_v6 = vpop.f32.mrf.mxu0  ;;  %v2425_v2 = vld [vmem:[#allocation11 + $0x2b8] sm:$0xff] }
 0x371   : > { %10906 = vst [vmem:[#allocation146_spill] sm:$0xff] %v8603_v18  ;;  %10908 = vst [vmem:[#allocation147_spill] sm:$0xff] %v8606_v17  ;;  %v4561_v46 = vrot.slane %v4560_v4, 1  ;;  %v8624_v42 = vadd.f32 %v4554_v56, %v4553_v50  ;;  %v2423_v44 = vld [vmem:[#allocation11 + $0x2a8] sm:$0xff]  ;;  %v2435_v37 = vadd.f32 %v2403_v36, %v2400_v14  ;;  %v2437_v40 = vadd.f32 %v2405_v38, %v2400_v14  ;;  %v2429_v60 = vld [vmem:[#allocation11 + $0x2d8] sm:$0xff] }
 0x372   : > { %10909 = vst [vmem:[#allocation148_spill] sm:$0xff] %v8608_v30  ;;  %10910 = vst [vmem:[#allocation149_spill] sm:$0xff] %v8610_v13  ;;  %v2427_v24 = vld [vmem:[#allocation11 + $0x2c8] sm:$0xff]  ;;  %v4660_v17 = vstv %s8593_s13  ;;  %v2433_v63 = vld [vmem:[#allocation11 + $0x2f8] sm:$0xff]  ;;  %v2441_v30 = vadd.f32 %v2409_v43, %v2400_v14  ;;  %v2443_v39 = vadd.f32 %v2411_v19, %v2400_v14  ;;  %v2447_v5 = vadd.f32 %v2415_v12, %v2400_v14  ;;  %v5549_v43 = vpop.f32.mrf.mxu1 }
 0x373   : > { %10911 = vst [vmem:[#allocation150_spill] sm:$0xff] %v8612_v10  ;;  %10913 = vst [vmem:[#allocation151_spill] sm:$0xff] %v8617_v59  ;;  %v2431_v48 = vld [vmem:[#allocation11 + $0x2e8] sm:$0xff]  ;;  %v2439_v59 = vadd.f32 %v2407_v20, %v2400_v14  ;;  %v2449_v10 = vadd.f32 %v2417_v58, %v2400_v14  ;;  %v2451_v28 = vadd.f32 %v2419_v29, %v2400_v14  ;;  %v10918_v19 = vld [vmem:[#allocation94_spill] sm:$0xff]  ;;  %v10934_v26 = vstv %s8515_s21  ;;  %s5234_s21 = sshll.u32 %s9339_s16, 4  ;;  %s9854_s21 = int_to_ptr.vmem [resolvable:$true] %s5234_s21 }
 0x374   : > { %10915 = vst [vmem:[#allocation152_spill] sm:$0xff] %v8620_v27  ;;  %10916 = vst [vmem:[#allocation153_spill] sm:$0xff] %v8624_v42  ;;  %v2445_v27 = vadd.f32 %v2413_v32, %v2400_v14  ;;  %v8630_v50 = vadd.f32 %v4561_v46, %v4560_v4  ;;  %v2453_v56 = vadd.f32 %v2421_v35, %v2400_v14  ;;  %v5528_v42 = vpop.f32.mrf.mxu0  ;;  %v10919_v12 = vld [vmem:[#allocation96_spill] sm:$0xff]  ;;  %v10920_v29 = vld [vmem:[#allocation98_spill] sm:$0xff] }
 0x375   : > { %v2455_v36 = vadd.f32 %v2423_v44, %v2400_v14  ;;  %v2457_v38 = vadd.f32 %v2425_v2, %v2400_v14  ;;  %v2459_v51 = vadd.f32 %v2427_v24, %v2400_v14  ;;  %v2461_v61 = vadd.f32 %v2429_v60, %v2400_v14  ;;  %v10921_v4 = vld [vmem:[#allocation57_spill] sm:$0xff]  ;;  %v10922_v35 = vld [vmem:[#allocation42_spill] sm:$0xff]  ;;  %v4689_v15 = vld [vmem:[#allocation11 + $0x6c8] sm:$0xff] }
 0x376   : > { %10917 = vst [vmem:[#allocation154_spill] sm:$0xff] %v8630_v50  ;;  %v2463_v0 = vadd.f32 %v2431_v48, %v2400_v14  ;;  %v2465_v20 = vadd.f32 %v2433_v63, %v2400_v14  ;;  %v8633_v32 = vmul.f32 %v10918_v19, %v2435_v37  ;;  %v8636_v58 = vmul.f32 %v10919_v12, %v2437_v40  ;;  %v10923_v60 = vld [vmem:[#allocation54_spill] sm:$0xff]  ;;  %v10924_v14 = vld [vmem:[#allocation27_spill] sm:$0xff]  ;;  %v4665_v40 = vld [vmem:[#allocation11 + $0x608] sm:$0xff]  ;;  %v674_v12 = vpop.f32.mrf.mxu1 }
 0x377   : > { %v8639_v18 = vmul.f32 %v10920_v29, %v2439_v59  ;;  %v8642_v46 = vmul.f32 %v10921_v4, %v2441_v30  ;;  %v8645_v44 = vmul.f32 %v10922_v35, %v2443_v39  ;;  %v8648_v48 = vmul.f32 %v10923_v60, %v2445_v27  ;;  %v10925_v37 = vld [vmem:[#allocation35_spill] sm:$0xff]  ;;  %v10926_v63 = vld [vmem:[#allocation37_spill] sm:$0xff]  ;;  %v4669_v39 = vld [vmem:[#allocation11 + $0x628] sm:$0xff]  ;;  %v604_v60 = vpop.f32.mrf.mxu0 }
 0x378   : > { %v8651_v2 = vmul.f32 %v10924_v14, %v2447_v5  ;;  %v8654_v24 = vmul.f32 %v10925_v37, %v2449_v10  ;;  %v8657_v50 = vmul.f32 %v10926_v63, %v2451_v28  ;;  %v10927_v59 = vld [vmem:[#allocation101_spill] sm:$0xff]  ;;  %v4662_v30 = vadd.f32 %v5549_v43, %v4660_v17  ;;  %v4671_v35 = vld [vmem:[#allocation11 + $0x638] sm:$0xff]  ;;  %v10928_v4 = vld [vmem:[#allocation107_spill] sm:$0xff] }
 0x379   : > { %v8660_v13 = vmul.f32 %v10927_v59, %v2453_v56  ;;  %v2679_v27 = vstv %s8622_s25  ;;  %v8664_v5 = vmul.f32 %v10928_v4, %v2455_v36  ;;  %v10929_v14 = vld [vmem:[#allocation61_spill] sm:$0xff]  ;;  %v10930_v37 = vld [vmem:[#allocation59_spill] sm:$0xff]  ;;  %v10931_v28 = vld [vmem:[#allocation62_spill] sm:$0xff]  ;;  %s9850_s25 = scalar_lea.hbm %s9911_s8, %s5422_s12 }
 0x37a   : > { %v8667_v10 = vmul.f32 %v10929_v14, %v2457_v38  ;;  %v8670_v29 = vmul.f32 %v10930_v37, %v2459_v51  ;;  %v8673_v63 = vmul.f32 %v10931_v28, %v2461_v61  ;;  %v4673_v56 = vld [vmem:[#allocation11 + $0x648] sm:$0xff]  ;;  %v4675_v43 = vld [vmem:[#allocation11 + $0x658] sm:$0xff]  ;;  %v8683_v51 = vadd.f32 %v10934_v26, %v594_v6 }
 0x37b   : > { %v4677_v59 = vld [vmem:[#allocation11 + $0x668] sm:$0xff]  ;;  %v10932_v19 = vld [vmem:[#allocation66_spill] sm:$0xff]  ;;  %v8685_v37 = vadd.f32 %v4660_v17, %v674_v12  ;;  %v4697_v34 = vadd.f32 %v4665_v40, %v4662_v30  ;;  %v8687_v22 = vadd.f32 %v5528_v42, %v2679_v27  ;;  %v4699_v54 = vadd.f32 %v4667_v1, %v4662_v30  ;;  %v2402_v42 = vld [vmem:[#allocation11 + $0x200] sm:$0xff] }
 0x37c   : > { %v8676_v21 = vmul.f32 %v10932_v19, %v2463_v0  ;;  %v10933_v33 = vld [vmem:[#allocation70_spill] sm:$0xff]  ;;  %v4681_v38 = vld [vmem:[#allocation11 + $0x688] sm:$0xff]  ;;  %v8690_v0 = vadd.f32 %v2679_v27, %v604_v60  ;;  %v4701_v31 = vadd.f32 %v4669_v39, %v4662_v30  ;;  %v4703_v55 = vadd.f32 %v4671_v35, %v4662_v30  ;;  %v2406_v1 = vld [vmem:[#allocation11 + $0x220] sm:$0xff] }
 0x37d   : > { %v8679_v36 = vmul.f32 %v10933_v33, %v2465_v20  ;;  %v4679_v4 = vld [vmem:[#allocation11 + $0x678] sm:$0xff]  ;;  %v4685_v61 = vld [vmem:[#allocation11 + $0x6a8] sm:$0xff]  ;;  %10935 = vst [vmem:[#allocation155_spill] sm:$0xff] %v8687_v22  ;;  %v4705_v45 = vadd.f32 %v4673_v56, %v4662_v30  ;;  %v4707_v26 = vadd.f32 %v4675_v43, %v4662_v30  ;;  %v4709_v6 = vadd.f32 %v4677_v59, %v4662_v30  ;;  %v2408_v39 = vld [vmem:[#allocation11 + $0x230] sm:$0xff] }
 0x37e   : > { %v4683_v14 = vld [vmem:[#allocation11 + $0x698] sm:$0xff]  ;;  %10936 = vst [vmem:[#allocation156_spill] sm:$0xff] %v8690_v0  ;;  %v4693_v20 = vld [vmem:[#allocation11 + $0x6e8] sm:$0xff]  ;;  %v4711_v17 = vadd.f32 %v4679_v4, %v4662_v30  ;;  %v4713_v12 = vadd.f32 %v4681_v38, %v4662_v30  ;;  %v4717_v8 = vadd.f32 %v4685_v61, %v4662_v30  ;;  %v4721_v40 = vadd.f32 %v4689_v15, %v4662_v30  ;;  %v2404_v0 = vld [vmem:[#allocation11 + $0x210] sm:$0xff] }
 0x37f   : > { %v4687_v28 = vld [vmem:[#allocation11 + $0x6b8] sm:$0xff]  ;;  %v4715_v25 = vadd.f32 %v4683_v14, %v4662_v30  ;;  %v4725_v53 = vadd.f32 %v4693_v20, %v4662_v30  ;;  %v8693_v27 = vmul.f32 %v10834_v47, %v4697_v34  ;;  %v8696_v35 = vmul.f32 %v7933_v16, %v4699_v54  ;;  %v10937_v14 = vld [vmem:[#allocation55_spill] sm:$0xff]  ;;  %v10940_v56 = vld [vmem:[#allocation45_spill] sm:$0xff] }
 0x380   : > { %v4691_v19 = vld [vmem:[#allocation11 + $0x6d8] sm:$0xff]  ;;  %v4719_v11 = vadd.f32 %v4687_v28, %v4662_v30  ;;  %v8699_v4 = vmul.f32 %v10835_v3, %v4701_v31  ;;  %v8702_v59 = vmul.f32 %v10937_v14, %v4703_v55  ;;  %v10938_v15 = vld [vmem:[#allocation71_spill] sm:$0xff]  ;;  %v8711_v43 = vmul.f32 %v10940_v56, %v4709_v6  ;;  %v10942_v61 = vld [vmem:[#allocation49_spill] sm:$0xff] }
 0x381   : > { %v4695_v33 = vld [vmem:[#allocation11 + $0x6f8] sm:$0xff]  ;;  %v4723_v22 = vadd.f32 %v4691_v19, %v4662_v30  ;;  %v8705_v28 = vmul.f32 %v10938_v15, %v4705_v45  ;;  %v2410_v19 = vld [vmem:[#allocation11 + $0x240] sm:$0xff]  ;;  %v8717_v31 = vmul.f32 %v10942_v61, %v4713_v12  ;;  %v2416_v55 = vld [vmem:[#allocation11 + $0x270] sm:$0xff]  ;;  %v2434_v45 = vadd.f32 %v2402_v42, %v8683_v51 }
 0x382   : > { %v4727_v60 = vadd.f32 %v4695_v33, %v4662_v30  ;;  %v2412_v33 = vld [vmem:[#allocation11 + $0x250] sm:$0xff]  ;;  %v10939_v30 = vld [vmem:[#allocation72_spill] sm:$0xff]  ;;  %v10941_v38 = vld [vmem:[#allocation47_spill] sm:$0xff]  ;;  %v2436_v15 = vadd.f32 %v2404_v0, %v8683_v51  ;;  %v2438_v3 = vadd.f32 %v2406_v1, %v8683_v51  ;;  %v2442_v12 = vadd.f32 %v2410_v19, %v8683_v51 }
 0x383   : > { %v8708_v34 = vmul.f32 %v10939_v30, %v4707_v26  ;;  %v8714_v54 = vmul.f32 %v10941_v38, %v4711_v17  ;;  %10943 = vst [vmem:[#allocation157_spill] sm:$0xff] %v8717_v31  ;;  %v2414_v20 = vld [vmem:[#allocation11 + $0x260] sm:$0xff]  ;;  %v2440_v26 = vadd.f32 %v2408_v39, %v8683_v51  ;;  %v10944_v30 = vld [vmem:[#allocation29_spill] sm:$0xff]  ;;  %v10946_v56 = vld [vmem:[#allocation112_spill] sm:$0xff]  ;;  %v2444_v61 = vadd.f32 %v2412_v33, %v8683_v51 }
 0x384   : > { %v2418_v14 = vld [vmem:[#allocation11 + $0x280] sm:$0xff]  ;;  %v8724_v6 = vmul.f32 %v10944_v30, %v4715_v25  ;;  %v8727_v17 = vmul.f32 %v10946_v56, %v4717_v8  ;;  %v10948_v38 = vld [vmem:[#allocation116_spill] sm:$0xff]  ;;  %v10950_v42 = vld [vmem:[#allocation118_spill] sm:$0xff] }
 0x385   : > { %v8732_v16 = vmul.f32 %v10948_v38, %v4719_v11  ;;  %v8735_v47 = vmul.f32 %v10950_v42, %v4721_v40  ;;  %v10952_v0 = vld [vmem:[#allocation74_spill] sm:$0xff]  ;;  %v10954_v39 = vld [vmem:[#allocation79_spill] sm:$0xff]  ;;  %v2420_v25 = vld [vmem:[#allocation11 + $0x290] sm:$0xff]  ;;  %v2446_v11 = vadd.f32 %v2414_v20, %v8683_v51  ;;  %v2448_v40 = vadd.f32 %v2416_v55, %v8683_v51 }
 0x386   : > { %10945 = vst [vmem:[#allocation158_spill] sm:$0xff] %v8724_v6  ;;  %10947 = vst [vmem:[#allocation159_spill] sm:$0xff] %v8727_v17  ;;  %v8738_v1 = vmul.f32 %v10952_v0, %v4723_v22  ;;  %v8741_v31 = vmul.f32 %v10954_v39, %v4725_v53  ;;  %v2422_v30 = vld [vmem:[#allocation11 + $0x2a0] sm:$0xff]  ;;  %v2424_v8 = vld [vmem:[#allocation11 + $0x2b0] sm:$0xff]  ;;  %v2450_v42 = vadd.f32 %v2418_v14, %v8683_v51 }
 0x387   : > { %10949 = vst [vmem:[#allocation160_spill] sm:$0xff] %v8732_v16  ;;  %10951 = vst [vmem:[#allocation161_spill] sm:$0xff] %v8735_v47  ;;  %v10956_v56 = vld [vmem:[#allocation81_spill] sm:$0xff]  ;;  %v2426_v19 = vld [vmem:[#allocation11 + $0x2c0] sm:$0xff]  ;;  %v2466_v0 = vmul.f32 %v10657_v62, %v2434_v45  ;;  %v2468_v53 = vmul.f32 %v10660_v9, %v2436_v15  ;;  %v2456_v55 = vadd.f32 %v2424_v8, %v8683_v51 }
 0x388   : > { %10953 = vst [vmem:[#allocation162_spill] sm:$0xff] %v8738_v1  ;;  %10955 = vst [vmem:[#allocation163_spill] sm:$0xff] %v8741_v31  ;;  %v8744_v17 = vmul.f32 %v10956_v56, %v4727_v60  ;;  %v2428_v33 = vld [vmem:[#allocation11 + $0x2d0] sm:$0xff]  ;;  %v2430_v6 = vld [vmem:[#allocation11 + $0x2e0] sm:$0xff]  ;;  %v2452_v60 = vadd.f32 %v2420_v25, %v8683_v51  ;;  %v2454_v56 = vadd.f32 %v2422_v30, %v8683_v51 }
 0x389   : > { %v2432_v22 = vld [vmem:[#allocation11 + $0x2f0] sm:$0xff]  ;;  %v10959_v31 = vld [vmem:[#allocation99_spill] sm:$0xff]  ;;  %v2458_v14 = vadd.f32 %v2426_v19, %v8683_v51  ;;  %v2460_v45 = vadd.f32 %v2428_v33, %v8683_v51  ;;  %v2462_v15 = vadd.f32 %v2430_v6, %v8683_v51  ;;  %v2480_v25 = vmul.f32 %v10847_v7, %v2448_v40 }
 0x38a   : > { %10957 = vst [vmem:[#allocation164_spill] sm:$0xff] %v8744_v17  ;;  %v10958_v39 = vld [vmem:[#allocation97_spill] sm:$0xff]  ;;  %v2472_v1 = vmul.f32 %v10959_v31, %v2440_v26  ;;  %v10960_v17 = vld [vmem:[#allocation23_spill] sm:$0xff]  ;;  %v10963_v31 = vld [vmem:[#allocation36_spill] sm:$0xff] }
 0x38b   : > { %v2470_v38 = vmul.f32 %v10958_v39, %v2438_v3  ;;  %v2474_v47 = vmul.f32 %v10960_v17, %v2442_v12  ;;  %v10961_v20 = vld [vmem:[#allocation53_spill] sm:$0xff]  ;;  %v2464_v3 = vadd.f32 %v2432_v22, %v8683_v51  ;;  %v10962_v39 = vld [vmem:[#allocation40_spill] sm:$0xff]  ;;  %v2482_v30 = vmul.f32 %v10963_v31, %v2450_v42  ;;  %v10965_v17 = vld [vmem:[#allocation102_spill] sm:$0xff] }
 0x38c   : > { %v2476_v16 = vmul.f32 %v10961_v20, %v2444_v61  ;;  %v2478_v26 = vmul.f32 %v10962_v39, %v2446_v11  ;;  %v2498_v12 = vadd.f32 %v8633_v32, %v2466_v0  ;;  %v2505_v61 = vadd.f32 %v8636_v58, %v2468_v53  ;;  %v10964_v20 = vld [vmem:[#allocation100_spill] sm:$0xff] }
 0x38d   : > { %v2512_v8 = vadd.f32 %v8639_v18, %v2470_v38  ;;  %v2519_v19 = vadd.f32 %v8642_v46, %v2472_v1  ;;  %v2484_v33 = vmul.f32 %v10964_v20, %v2452_v60  ;;  %v2486_v6 = vmul.f32 %v10965_v17, %v2454_v56  ;;  %v10966_v31 = vld [vmem:[#allocation60_spill] sm:$0xff] }
 0x38e   : > { %v2526_v51 = vadd.f32 %v8645_v44, %v2474_v47  ;;  %v2533_v11 = vadd.f32 %v8648_v48, %v2476_v16  ;;  %v2499_v22 = vrot.slane %v2498_v12, 4  ;;  %v2506_v40 = vrot.slane %v2505_v61, 4 }
 0x38f   : > { %v2513_v7 = vrot.slane %v2512_v8, 4  ;;  %v2520_v42 = vrot.slane %v2519_v19, 4  ;;  %v2488_v32 = vmul.f32 %v10966_v31, %v2456_v55  ;;  %v2490_v58 = vmul.f32 %v10850_v49, %v2458_v14  ;;  %v10968_v31 = vld [vmem:[#allocation30_spill] sm:$0xff] }
 0x390   : > { %v2527_v0 = vrot.slane %v2526_v51, 4  ;;  %v2540_v18 = vadd.f32 %v8651_v2, %v2478_v26  ;;  %v2500_v46 = vadd.f32 %v2499_v22, %v2498_v12  ;;  %v2507_v38 = vadd.f32 %v2506_v40, %v2505_v61 }
 0x391   : > { %v2514_v1 = vadd.f32 %v2513_v7, %v2512_v8  ;;  %v2521_v53 = vadd.f32 %v2520_v42, %v2519_v19  ;;  %v2534_v60 = vrot.slane %v2533_v11, 4  ;;  %v8777_v47 = vadd.f32 %v8654_v24, %v2480_v25 }
 0x392   : > { %v2528_v56 = vadd.f32 %v2527_v0, %v2526_v51  ;;  %v2554_v16 = vadd.f32 %v8657_v50, %v2482_v30  ;;  %v2501_v44 = vrot.slane %v2500_v46, 2  ;;  %v2508_v48 = vrot.slane %v2507_v38, 2 }
 0x393   : > { %10967 = vst [vmem:[#allocation165_spill] sm:$0xff] %v8777_v47  ;;  %v2515_v17 = vrot.slane %v2514_v1, 2  ;;  %v2522_v55 = vrot.slane %v2521_v53, 2  ;;  %v2492_v14 = vmul.f32 %v10968_v31, %v2460_v45  ;;  %v2541_v49 = vrot.slane %v2540_v18, 4 }
 0x394   : > { %v2555_v20 = vrot.slane %v2554_v16, 4  ;;  %v2561_v2 = vadd.f32 %v8660_v13, %v2484_v33  ;;  %v2502_v26 = vadd.f32 %v2501_v44, %v2500_v46  ;;  %v2509_v7 = vadd.f32 %v2508_v48, %v2507_v38 }
 0x395   : > { %v2516_v12 = vadd.f32 %v2515_v17, %v2514_v1  ;;  %v2529_v61 = vrot.slane %v2528_v56, 2  ;;  %v2494_v8 = vmul.f32 %v10853_v41, %v2462_v15  ;;  %v2568_v50 = vadd.f32 %v8664_v5, %v2486_v6 }
 0x396   : > { %v2556_v24 = vadd.f32 %v2555_v20, %v2554_v16  ;;  %v2562_v25 = vrot.slane %v2561_v2, 4  ;;  %v2496_v30 = vmul.f32 %v10855_v23, %v2464_v3  ;;  %v2523_v19 = vadd.f32 %v2522_v55, %v2521_v53 }
 0x397   : > { %v8785_v51 = vadd.f32 %v2534_v60, %v2533_v11  ;;  %v8788_v22 = vadd.f32 %v2541_v49, %v2540_v18  ;;  %v2569_v40 = vrot.slane %v2568_v50, 4  ;;  %v2503_v17 = vrot.slane %v2502_v26, 1 }
 0x398   : > { %v2557_v13 = vrot.slane %v2556_v24, 2  ;;  %v2563_v33 = vadd.f32 %v2562_v25, %v2561_v2  ;;  %v2510_v42 = vrot.slane %v2509_v7, 1  ;;  %v2517_v0 = vrot.slane %v2516_v12, 1  ;;  %v4666_v25 = vld [vmem:[#allocation11 + $0x610] sm:$0xff] }
 0x399   : > { %10969 = vst [vmem:[#allocation30_spill] sm:$0xff] %v8785_v51  ;;  %10970 = vst [vmem:[#allocation166_spill] sm:$0xff] %v8788_v22  ;;  %v8790_v15 = vadd.f32 %v2529_v61, %v2528_v56  ;;  %v2570_v5 = vadd.f32 %v2569_v40, %v2568_v50  ;;  %v2575_v3 = vadd.f32 %v8667_v10, %v2488_v32  ;;  %v2524_v6 = vrot.slane %v2523_v19, 1  ;;  %v4668_v50 = vld [vmem:[#allocation11 + $0x620] sm:$0xff] }
 0x39a   : > { %v2558_v20 = vadd.f32 %v2557_v13, %v2556_v24  ;;  %v2564_v46 = vrot.slane %v2563_v33, 2  ;;  %v2582_v11 = vadd.f32 %v8670_v29, %v2490_v58  ;;  %v2589_v38 = vadd.f32 %v8673_v63, %v2492_v14  ;;  %v4664_v24 = vld [vmem:[#allocation11 + $0x600] sm:$0xff]  ;;  %v10989_v63 = vld [vmem:[#allocation108_spill] sm:$0xff] }
 0x39b   : > { %10971 = vst [vmem:[#allocation167_spill] sm:$0xff] %v8790_v15  ;;  %v2596_v49 = vadd.f32 %v8676_v21, %v2494_v8  ;;  %v2571_v1 = vrot.slane %v2570_v5, 2  ;;  %v2576_v53 = vrot.slane %v2575_v3, 4  ;;  %v8797_v60 = vadd.f32 %v8679_v36, %v2496_v30  ;;  %v4692_v8 = vld [vmem:[#allocation11 + $0x6e0] sm:$0xff] }
 0x39c   : > { %v2565_v18 = vadd.f32 %v2564_v46, %v2563_v33  ;;  %v2559_v56 = vrot.slane %v2558_v20, 1  ;;  %v2583_v16 = vrot.slane %v2582_v11, 4  ;;  %v2590_v44 = vrot.slane %v2589_v38, 4 }
 0x39d   : > { %10972 = vst [vmem:[#allocation168_spill] sm:$0xff] %v8797_v60  ;;  %v2597_v48 = vrot.slane %v2596_v49, 4  ;;  %v2572_v32 = vadd.f32 %v2571_v1, %v2570_v5  ;;  %v2577_v2 = vadd.f32 %v2576_v53, %v2575_v3  ;;  %v2504_v29 = vadd.f32 %v2503_v17, %v2502_v26  ;;  %v4670_v26 = vld [vmem:[#allocation11 + $0x630] sm:$0xff]  ;;  %v4676_v5 = vld [vmem:[#allocation11 + $0x660] sm:$0xff] }
 0x39e   : > { %v2566_v10 = vrot.slane %v2565_v18, 1  ;;  %v2511_v58 = vadd.f32 %v2510_v42, %v2509_v7  ;;  %v2584_v21 = vadd.f32 %v2583_v16, %v2582_v11  ;;  %v8801_v14 = vadd.f32 %v2517_v0, %v2516_v12  ;;  %v4672_v7 = vld [vmem:[#allocation11 + $0x640] sm:$0xff]  ;;  %v4674_v17 = vld [vmem:[#allocation11 + $0x650] sm:$0xff] }
 0x39f   : > { %v8803_v61 = vadd.f32 %v2524_v6, %v2523_v19  ;;  %v2578_v36 = vrot.slane %v2577_v2, 2  ;;  %v2560_v30 = vadd.f32 %v2559_v56, %v2558_v20  ;;  %v8806_v33 = vadd.f32 %v2590_v44, %v2589_v38  ;;  %v10977_v19 = vld [vmem:[#allocation84_spill] sm:$0xff]  ;;  %v10980_v6 = vld [vmem:[#allocation103_spill] sm:$0xff]  ;;  %v4678_v20 = vld [vmem:[#allocation11 + $0x670] sm:$0xff] }
 0x3a0   : > { %10973 = vst [vmem:[#allocation169_spill] sm:$0xff] %v8801_v14  ;;  %v2585_v13 = vrot.slane %v2584_v21, 2  ;;  %v8808_v40 = vadd.f32 %v2597_v48, %v2596_v49  ;;  %v2567_v42 = vadd.f32 %v2566_v10, %v2565_v18  ;;  %v2573_v12 = vrot.slane %v2572_v32, 1  ;;  %v4680_v1 = vld [vmem:[#allocation11 + $0x680] sm:$0xff]  ;;  %v4682_v53 = vld [vmem:[#allocation11 + $0x690] sm:$0xff]  ;;  %v10994_v14 = vld [vmem:[#allocation48_spill] sm:$0xff] }
 0x3a1   : > { %10974 = vst [vmem:[#allocation170_spill] sm:$0xff] %v8803_v61  ;;  %10975 = vst [vmem:[#allocation171_spill] sm:$0xff] %v8806_v33  ;;  %v2579_v0 = vadd.f32 %v2578_v36, %v2577_v2  ;;  %v8811_v46 = vmul.f32 %v10977_v19, %v2504_v29  ;;  %v8816_v11 = vmul.f32 %v10980_v6, %v2511_v58  ;;  %v10982_v2 = vld [vmem:[#allocation86_spill] sm:$0xff]  ;;  %v4694_v10 = vld [vmem:[#allocation11 + $0x6f0] sm:$0xff] }
 0x3a2   : > { %10976 = vst [vmem:[#allocation172_spill] sm:$0xff] %v8808_v40  ;;  %v8813_v3 = vadd.f32 %v2585_v13, %v2584_v21  ;;  %v4696_v38 = vadd.f32 %v4664_v24, %v8685_v37  ;;  %v4698_v49 = vadd.f32 %v4666_v25, %v8685_v37  ;;  %v4700_v18 = vadd.f32 %v4668_v50, %v8685_v37  ;;  %v10985_v24 = vld [vmem:[#allocation105_spill] sm:$0xff]  ;;  %v4684_v50 = vld [vmem:[#allocation11 + $0x6a0] sm:$0xff]  ;;  %v10993_v61 = vld [vmem:[#allocation46_spill] sm:$0xff] }
 0x3a3   : > { %10978 = vst [vmem:[#allocation173_spill] sm:$0xff] %v8811_v46  ;;  %10981 = vst [vmem:[#allocation175_spill] sm:$0xff] %v8816_v11  ;;  %v4702_v56 = vadd.f32 %v4670_v26, %v8685_v37  ;;  %v4704_v16 = vadd.f32 %v4672_v7, %v8685_v37  ;;  %v4706_v44 = vadd.f32 %v4674_v17, %v8685_v37  ;;  %v2580_v48 = vrot.slane %v2579_v0, 1  ;;  %v4686_v13 = vld [vmem:[#allocation11 + $0x6b0] sm:$0xff]  ;;  %v4688_v26 = vld [vmem:[#allocation11 + $0x6c0] sm:$0xff] }
 0x3a4   : > { %10979 = vst [vmem:[#allocation174_spill] sm:$0xff] %v8813_v3  ;;  %v8826_v29 = vmul.f32 %v10982_v2, %v2560_v30  ;;  %v4708_v58 = vadd.f32 %v4676_v5, %v8685_v37  ;;  %v8829_v21 = vadd.f32 %v2573_v12, %v2572_v32  ;;  %v8833_v25 = vmul.f32 %v10985_v24, %v2567_v42  ;;  %v4690_v17 = vld [vmem:[#allocation11 + $0x6d0] sm:$0xff]  ;;  %v10987_v5 = vld [vmem:[#allocation34_spill] sm:$0xff]  ;;  %v11001_v3 = vld [vmem:[#allocation76_spill] sm:$0xff] }
 0x3a5   : > { %v4710_v7 = vadd.f32 %v4678_v20, %v8685_v37  ;;  %v4712_v30 = vadd.f32 %v4680_v1, %v8685_v37  ;;  %v4714_v45 = vadd.f32 %v4682_v53, %v8685_v37  ;;  %v4728_v32 = vmul.f32 %v10987_v5, %v4696_v38  ;;  %v10988_v12 = vld [vmem:[#allocation90_spill] sm:$0xff]  ;;  %v11051_v19 = vld [vmem:[#allocation41_spill] sm:$0xff] }
 0x3a6   : > { %10983 = vst [vmem:[#allocation176_spill] sm:$0xff] %v8826_v29  ;;  %10984 = vst [vmem:[#allocation177_spill] sm:$0xff] %v8829_v21  ;;  %v4730_v55 = vmul.f32 %v10988_v12, %v4698_v49  ;;  %v4732_v36 = vmul.f32 %v10882_v52, %v4700_v18  ;;  %v4734_v42 = vmul.f32 %v10883_v57, %v4702_v56  ;;  %v10990_v29 = vld [vmem:[#allocation68_spill] sm:$0xff]  ;;  %v10992_v21 = vld [vmem:[#allocation73_spill] sm:$0xff] }
 0x3a7   : > { %10986 = vst [vmem:[#allocation178_spill] sm:$0xff] %v8833_v25  ;;  %v4736_v25 = vmul.f32 %v10989_v63, %v4704_v16  ;;  %v4738_v11 = vmul.f32 %v10990_v29, %v4706_v44  ;;  %v8844_v20 = vadd.f32 %v2580_v48, %v2579_v0  ;;  %v4716_v46 = vadd.f32 %v4684_v50, %v8685_v37  ;;  %v4972_v63 = vld [vmem:[#allocation11 + $0x7d8] sm:$0xff]  ;;  %v4974_v57 = vld [vmem:[#allocation11 + $0x7e8] sm:$0xff] }
 0x3a8   : > { %v4718_v1 = vadd.f32 %v4686_v13, %v8685_v37  ;;  %v4740_v53 = vmul.f32 %v10992_v21, %v4708_v58  ;;  %v4720_v38 = vadd.f32 %v4688_v26, %v8685_v37  ;;  %v4722_v49 = vadd.f32 %v4690_v17, %v8685_v37  ;;  %v10995_v17 = vld [vmem:[#allocation38_spill] sm:$0xff] }
 0x3a9   : > { %10991 = vst [vmem:[#allocation179_spill] sm:$0xff] %v8844_v20  ;;  %v4724_v18 = vadd.f32 %v4692_v8, %v8685_v37  ;;  %v4726_v56 = vadd.f32 %v4694_v10, %v8685_v37  ;;  %v4742_v16 = vmul.f32 %v10993_v61, %v4710_v7  ;;  %v4744_v44 = vmul.f32 %v10994_v14, %v4712_v30  ;;  %v11050_v14 = vld [vmem:[#allocation156_spill] sm:$0xff]  ;;  %v4976_v52 = vld [vmem:[#allocation11 + $0x7f8] sm:$0xff] }
 0x3aa   : > { %v4760_v0 = vadd.f32 %v8693_v27, %v4728_v32  ;;  %v4767_v48 = vadd.f32 %v8696_v35, %v4730_v55  ;;  %v4774_v50 = vadd.f32 %v8699_v4, %v4732_v36  ;;  %v4781_v58 = vadd.f32 %v8702_v59, %v4734_v42  ;;  %v10996_v32 = vld [vmem:[#allocation110_spill] sm:$0xff]  ;;  %v10997_v55 = vld [vmem:[#allocation115_spill] sm:$0xff]  ;;  %v10998_v42 = vld [vmem:[#allocation120_spill] sm:$0xff] }
 0x3ab   : > { %v4788_v13 = vadd.f32 %v8705_v28, %v4736_v25  ;;  %v4795_v26 = vadd.f32 %v8708_v34, %v4738_v11  ;;  %v4746_v8 = vmul.f32 %v10995_v17, %v4714_v45  ;;  %v4802_v10 = vadd.f32 %v8711_v43, %v4740_v53  ;;  %v11000_v43 = vld [vmem:[#allocation157_spill] sm:$0xff]  ;;  %v4960_v17 = vld [vmem:[#allocation11 + $0x778] sm:$0xff] }
 0x3ac   : > { %v4761_v20 = vrot.slane %v4760_v0, 4  ;;  %v4768_v37 = vrot.slane %v4767_v48, 4  ;;  %v4775_v7 = vrot.slane %v4774_v50, 4  ;;  %v4782_v30 = vrot.slane %v4781_v58, 4 }
 0x3ad   : > { %v4789_v60 = vrot.slane %v4788_v13, 4  ;;  %v4796_v27 = vrot.slane %v4795_v26, 4  ;;  %v4748_v35 = vmul.f32 %v10996_v32, %v4716_v46  ;;  %v4750_v4 = vmul.f32 %v10997_v55, %v4718_v1  ;;  %v11046_v32 = vld [vmem:[#allocation66_spill] sm:$0xff] }
 0x3ae   : > { %v4762_v36 = vadd.f32 %v4761_v20, %v4760_v0  ;;  %v4769_v59 = vadd.f32 %v4768_v37, %v4767_v48  ;;  %v4752_v28 = vmul.f32 %v10998_v42, %v4720_v38  ;;  %v4776_v25 = vadd.f32 %v4775_v7, %v4774_v50  ;;  %v11003_v38 = vld [vmem:[#allocation158_spill] sm:$0xff]  ;;  %v11005_v7 = vld [vmem:[#allocation159_spill] sm:$0xff] }
 0x3af   : > { %v4783_v34 = vadd.f32 %v4782_v30, %v4781_v58  ;;  %v4790_v11 = vadd.f32 %v4789_v60, %v4788_v13  ;;  %v8867_v33 = vadd.f32 %v8714_v54, %v4742_v16  ;;  %v4816_v53 = vadd.f32 %v11000_v43, %v4744_v44  ;;  %v11004_v58 = vld [vmem:[#allocation78_spill] sm:$0xff] }
 0x3b0   : > { %v4763_v45 = vrot.slane %v4762_v36, 2  ;;  %v4770_v40 = vrot.slane %v4769_v59, 2  ;;  %v4754_v47 = vmul.f32 %v11001_v3, %v4722_v49  ;;  %v4777_v22 = vrot.slane %v4776_v25, 2  ;;  %v11006_v16 = vld [vmem:[#allocation82_spill] sm:$0xff] }
 0x3b1   : > { %10999 = vst [vmem:[#allocation180_spill] sm:$0xff] %v8867_v33  ;;  %v8871_v46 = vadd.f32 %v4796_v27, %v4795_v26  ;;  %v4803_v1 = vrot.slane %v4802_v10, 4  ;;  %v4784_v20 = vrot.slane %v4783_v34, 2  ;;  %v4791_v0 = vrot.slane %v4790_v11, 2  ;;  %v11045_v42 = vld [vmem:[#allocation62_spill] sm:$0xff] }
 0x3b2   : > { %v4817_v48 = vrot.slane %v4816_v53, 4  ;;  %v4823_v50 = vadd.f32 %v11003_v38, %v4746_v8  ;;  %v4756_v60 = vmul.f32 %v11004_v58, %v4724_v18  ;;  %v4764_v13 = vadd.f32 %v4763_v45, %v4762_v36  ;;  %v11009_v45 = vld [vmem:[#allocation160_spill] sm:$0xff] }
 0x3b3   : > { %11002 = vst [vmem:[#allocation157_spill] sm:$0xff] %v8871_v46  ;;  %v4771_v37 = vadd.f32 %v4770_v40, %v4769_v59  ;;  %v4830_v54 = vadd.f32 %v11005_v7, %v4748_v35  ;;  %v4758_v30 = vmul.f32 %v11006_v16, %v4726_v56  ;;  %v4778_v26 = vadd.f32 %v4777_v22, %v4776_v25  ;;  %v11011_v22 = vld [vmem:[#allocation162_spill] sm:$0xff]  ;;  %v11044_v16 = vld [vmem:[#allocation59_spill] sm:$0xff] }
 0x3b4   : > { %v4818_v49 = vadd.f32 %v4817_v48, %v4816_v53  ;;  %v4824_v43 = vrot.slane %v4823_v50, 4  ;;  %v8879_v51 = vadd.f32 %v4803_v1, %v4802_v10  ;;  %v4785_v3 = vadd.f32 %v4784_v20, %v4783_v34  ;;  %v11010_v53 = vld [vmem:[#allocation161_spill] sm:$0xff]  ;;  %v11012_v1 = vld [vmem:[#allocation163_spill] sm:$0xff]  ;;  %v11013_v34 = vld [vmem:[#allocation164_spill] sm:$0xff] }
 0x3b5   : > { %v4831_v15 = vrot.slane %v4830_v54, 4  ;;  %v8881_v8 = vadd.f32 %v4791_v0, %v4790_v11  ;;  %v4765_v40 = vrot.slane %v4764_v13, 1  ;;  %v4772_v59 = vrot.slane %v4771_v37, 1 }
 0x3b6   : > { %11007 = vst [vmem:[#allocation158_spill] sm:$0xff] %v8879_v51  ;;  %v4819_v18 = vrot.slane %v4818_v49, 2  ;;  %v4825_v36 = vadd.f32 %v4824_v43, %v4823_v50  ;;  %v4837_v56 = vadd.f32 %v11009_v45, %v4750_v4  ;;  %v4844_v48 = vadd.f32 %v11010_v53, %v4752_v28 }
 0x3b7   : > { %11008 = vst [vmem:[#allocation159_spill] sm:$0xff] %v8881_v8  ;;  %v4832_v35 = vadd.f32 %v4831_v15, %v4830_v54  ;;  %v4851_v25 = vadd.f32 %v11011_v22, %v4754_v47  ;;  %v4858_v27 = vadd.f32 %v11012_v1, %v4756_v60  ;;  %v8888_v11 = vadd.f32 %v11013_v34, %v4758_v30  ;;  %v2689_v8 = vld [vmem:[#allocation11 + $0x330] sm:$0xff] }
 0x3b8   : > { %v4820_v38 = vadd.f32 %v4819_v18, %v4818_v49  ;;  %v4826_v7 = vrot.slane %v4825_v36, 2  ;;  %v4838_v10 = vrot.slane %v4837_v56, 4  ;;  %v4845_v50 = vrot.slane %v4844_v48, 4 }
 0x3b9   : > { %v4833_v44 = vrot.slane %v4832_v35, 2  ;;  %11014 = vst [vmem:[#allocation160_spill] sm:$0xff] %v8888_v11  ;;  %v4852_v43 = vrot.slane %v4851_v25, 4  ;;  %v4779_v15 = vrot.slane %v4778_v26, 1  ;;  %v4786_v54 = vrot.slane %v4785_v3, 1  ;;  %v4948_v11 = vld [vmem:[#allocation11 + $0x718] sm:$0xff] }
 0x3ba   : > { %v4821_v20 = vrot.slane %v4820_v38, 1  ;;  %v4827_v0 = vadd.f32 %v4826_v7, %v4825_v36  ;;  %v4839_v49 = vadd.f32 %v4838_v10, %v4837_v56  ;;  %v4846_v45 = vadd.f32 %v4845_v50, %v4844_v48  ;;  %v2684_v7 = vld [vmem:[#allocation11 + $0x308] sm:$0xff]  ;;  %v2686_v48 = vld [vmem:[#allocation11 + $0x318] sm:$0xff]  ;;  %v11024_v50 = vld [vmem:[#allocation51_spill] sm:$0xff] }
 0x3bb   : > { %v4834_v4 = vadd.f32 %v4833_v44, %v4832_v35  ;;  %v4859_v47 = vrot.slane %v4858_v27, 4  ;;  %v4766_v53 = vadd.f32 %v4765_v40, %v4764_v13  ;;  %v8891_v60 = vadd.f32 %v4852_v43, %v4851_v25  ;;  %v11018_v35 = vld [vmem:[#allocation39_spill] sm:$0xff]  ;;  %v2688_v10 = vld [vmem:[#allocation11 + $0x328] sm:$0xff]  ;;  %v2690_v13 = vld [vmem:[#allocation11 + $0x338] sm:$0xff] }
 0x3bc   : > { %v4828_v28 = vrot.slane %v4827_v0, 1  ;;  %v4822_v22 = vadd.f32 %v4821_v20, %v4820_v38  ;;  %v4840_v33 = vrot.slane %v4839_v49, 2  ;;  %v4773_v30 = vadd.f32 %v4772_v59, %v4771_v37  ;;  %v11022_v59 = vld [vmem:[#allocation111_spill] sm:$0xff]  ;;  %v2694_v20 = vld [vmem:[#allocation11 + $0x358] sm:$0xff] }
 0x3bd   : > { %11015 = vst [vmem:[#allocation161_spill] sm:$0xff] %v8891_v60  ;;  %v4835_v34 = vrot.slane %v4834_v4, 1  ;;  %v4847_v36 = vrot.slane %v4846_v45, 2  ;;  %v8893_v51 = vadd.f32 %v4779_v15, %v4778_v26  ;;  %v8895_v46 = vadd.f32 %v4786_v54, %v4785_v3  ;;  %v2692_v26 = vld [vmem:[#allocation11 + $0x348] sm:$0xff]  ;;  %v2687_v60 = vld [vmem:[#allocation11 + $0x320] sm:$0xff] }
 0x3be   : > { %v4829_v1 = vadd.f32 %v4828_v28, %v4827_v0  ;;  %v4841_v44 = vadd.f32 %v4840_v33, %v4839_v49  ;;  %v8898_v56 = vmul.f32 %v11018_v35, %v4822_v22  ;;  %v8902_v38 = vadd.f32 %v4859_v47, %v4858_v27  ;;  %v2696_v3 = vld [vmem:[#allocation11 + $0x368] sm:$0xff]  ;;  %v2698_v49 = vld [vmem:[#allocation11 + $0x378] sm:$0xff]  ;;  %v2695_v35 = vld [vmem:[#allocation11 + $0x360] sm:$0xff] }
 0x3bf   : > { %11016 = vst [vmem:[#allocation162_spill] sm:$0xff] %v8893_v51  ;;  %11017 = vst [vmem:[#allocation163_spill] sm:$0xff] %v8895_v46  ;;  %v8900_v40 = vadd.f32 %v4847_v36, %v4846_v45  ;;  %v8910_v43 = vmul.f32 %v11024_v50, %v4766_v53  ;;  %v11026_v15 = vld [vmem:[#allocation52_spill] sm:$0xff]  ;;  %v2702_v28 = vld [vmem:[#allocation11 + $0x398] sm:$0xff]  ;;  %v8915_v45 = vadd.f32 %v4835_v34, %v4834_v4 }
 0x3c0   : > { %11019 = vst [vmem:[#allocation164_spill] sm:$0xff] %v8898_v56  ;;  %11021 = vst [vmem:[#allocation182_spill] sm:$0xff] %v8902_v38  ;;  %v8906_v25 = vmul.f32 %v11022_v59, %v4829_v1  ;;  %v4842_v0 = vrot.slane %v4841_v44, 1  ;;  %v8913_v54 = vmul.f32 %v11026_v15, %v4773_v30  ;;  %v2700_v27 = vld [vmem:[#allocation11 + $0x388] sm:$0xff]  ;;  %v2706_v22 = vld [vmem:[#allocation11 + $0x3b8] sm:$0xff]  ;;  %v2727_v29 = vadd.f32 %v2695_v35, %v11050_v14 }
 0x3c1   : > { %11020 = vst [vmem:[#allocation181_spill] sm:$0xff] %v8900_v40  ;;  %11025 = vst [vmem:[#allocation184_spill] sm:$0xff] %v8910_v43  ;;  %v2704_v47 = vld [vmem:[#allocation11 + $0x3a8] sm:$0xff]  ;;  %v11029_v36 = vld [vmem:[#allocation155_spill] sm:$0xff] }
 0x3c2   : > { %11023 = vst [vmem:[#allocation183_spill] sm:$0xff] %v8906_v25  ;;  %11027 = vst [vmem:[#allocation185_spill] sm:$0xff] %v8913_v54  ;;  %v2708_v1 = vld [vmem:[#allocation11 + $0x3c8] sm:$0xff]  ;;  %v2716_v37 = vadd.f32 %v2684_v7, %v11029_v36  ;;  %v2718_v18 = vadd.f32 %v2686_v48, %v11029_v36  ;;  %v2720_v33 = vadd.f32 %v2688_v10, %v11029_v36  ;;  %v2710_v25 = vld [vmem:[#allocation11 + $0x3d8] sm:$0xff] }
 0x3c3   : > { %11028 = vst [vmem:[#allocation186_spill] sm:$0xff] %v8915_v45  ;;  %v2712_v56 = vld [vmem:[#allocation11 + $0x3e8] sm:$0xff]  ;;  %v2714_v30 = vld [vmem:[#allocation11 + $0x3f8] sm:$0xff]  ;;  %v2722_v15 = vadd.f32 %v2690_v13, %v11029_v36  ;;  %v2724_v54 = vadd.f32 %v2692_v26, %v11029_v36  ;;  %v2726_v4 = vadd.f32 %v2694_v20, %v11029_v36  ;;  %v8924_v34 = vadd.f32 %v4842_v0, %v4841_v44  ;;  %v2685_v38 = vld [vmem:[#allocation11 + $0x310] sm:$0xff] }
 0x3c4   : > { %v2728_v43 = vadd.f32 %v2696_v3, %v11029_v36  ;;  %v2730_v7 = vadd.f32 %v2698_v49, %v11029_v36  ;;  %v2732_v48 = vadd.f32 %v2700_v27, %v11029_v36  ;;  %v2734_v10 = vadd.f32 %v2702_v28, %v11029_v36  ;;  %v11031_v0 = vld [vmem:[#allocation94_spill] sm:$0xff]  ;;  %v11032_v49 = vld [vmem:[#allocation96_spill] sm:$0xff]  ;;  %v11040_v59 = vld [vmem:[#allocation101_spill] sm:$0xff] }
 0x3c5   : > { %11030 = vst [vmem:[#allocation155_spill] sm:$0xff] %v8924_v34  ;;  %v2736_v53 = vadd.f32 %v2704_v47, %v11029_v36  ;;  %v2738_v45 = vadd.f32 %v2706_v22, %v11029_v36  ;;  %v2740_v13 = vadd.f32 %v2708_v1, %v11029_v36  ;;  %v2742_v26 = vadd.f32 %v2710_v25, %v11029_v36  ;;  %v11033_v27 = vld [vmem:[#allocation98_spill] sm:$0xff]  ;;  %v11034_v47 = vld [vmem:[#allocation57_spill] sm:$0xff]  ;;  %v4946_v25 = vld [vmem:[#allocation11 + $0x708] sm:$0xff] }
 0x3c6   : > { %v2744_v20 = vadd.f32 %v2712_v56, %v11029_v36  ;;  %v2746_v44 = vadd.f32 %v2714_v30, %v11029_v36  ;;  %v8937_v3 = vmul.f32 %v11031_v0, %v2716_v37  ;;  %v8940_v34 = vmul.f32 %v11032_v49, %v2718_v18  ;;  %v11035_v22 = vld [vmem:[#allocation42_spill] sm:$0xff]  ;;  %v2683_v56 = vld [vmem:[#allocation11 + $0x300] sm:$0xff]  ;;  %v4950_v40 = vld [vmem:[#allocation11 + $0x728] sm:$0xff] }
 0x3c7   : > { %v8943_v28 = vmul.f32 %v11033_v27, %v2720_v33  ;;  %v8946_v46 = vmul.f32 %v11034_v47, %v2722_v15  ;;  %v8949_v1 = vmul.f32 %v11035_v22, %v2724_v54  ;;  %v11036_v51 = vld [vmem:[#allocation54_spill] sm:$0xff]  ;;  %v11037_v37 = vld [vmem:[#allocation27_spill] sm:$0xff]  ;;  %v11039_v33 = vld [vmem:[#allocation37_spill] sm:$0xff]  ;;  %v5552_v15 = vpop.f32.mrf.mxu1  ;;  %v8964_v50 = vmul.f32 %v11040_v59, %v2734_v10 }
 0x3c8   : > { %v8952_v36 = vmul.f32 %v11036_v51, %v2726_v4  ;;  %v8955_v30 = vmul.f32 %v11037_v37, %v2728_v43  ;;  %v11038_v18 = vld [vmem:[#allocation35_spill] sm:$0xff]  ;;  %v8961_v49 = vmul.f32 %v11039_v33, %v2732_v48  ;;  %v4952_v54 = vld [vmem:[#allocation11 + $0x738] sm:$0xff]  ;;  %v11042_v43 = vld [vmem:[#allocation61_spill] sm:$0xff]  ;;  %v8975_v58 = vmul.f32 %v11044_v16, %v2740_v13 }
 0x3c9   : > { %v8958_v0 = vmul.f32 %v11038_v18, %v2730_v7  ;;  %v11041_v4 = vld [vmem:[#allocation107_spill] sm:$0xff]  ;;  %v8970_v37 = vmul.f32 %v11042_v43, %v2738_v45  ;;  %v11043_v7 = vstv %s8628_s9  ;;  %v2693_v33 = vld [vmem:[#allocation11 + $0x350] sm:$0xff]  ;;  %v8978_v55 = vmul.f32 %v11045_v42, %v2742_v26  ;;  %v11048_v10 = vld [vmem:[#allocation70_spill] sm:$0xff] }
 0x3ca   : > { %v8967_v51 = vmul.f32 %v11041_v4, %v2736_v53  ;;  %v4943_v18 = vadd.f32 %v5552_v15, %v11043_v7  ;;  %v2691_v48 = vld [vmem:[#allocation11 + $0x340] sm:$0xff]  ;;  %v8981_v59 = vmul.f32 %v11046_v32, %v2744_v20  ;;  %v8984_v53 = vmul.f32 %v11048_v10, %v2746_v44  ;;  %v4954_v4 = vld [vmem:[#allocation11 + $0x748] sm:$0xff]  ;;  %v4956_v45 = vld [vmem:[#allocation11 + $0x758] sm:$0xff] }
 0x3cb   : > { %v4958_v43 = vld [vmem:[#allocation11 + $0x768] sm:$0xff]  ;;  %v4964_v7 = vld [vmem:[#allocation11 + $0x798] sm:$0xff]  ;;  %v2715_v61 = vadd.f32 %v2683_v56, %v11050_v14  ;;  %v2717_v13 = vadd.f32 %v2685_v38, %v11050_v14  ;;  %v2719_v16 = vadd.f32 %v2687_v60, %v11050_v14  ;;  %v2721_v26 = vadd.f32 %v2689_v8, %v11050_v14 }
 0x3cc   : > { %11047 = vst [vmem:[#allocation94_spill] sm:$0xff] %v8981_v59  ;;  %11049 = vst [vmem:[#allocation96_spill] sm:$0xff] %v8984_v53  ;;  %v4962_v15 = vld [vmem:[#allocation11 + $0x788] sm:$0xff]  ;;  %v4968_v20 = vld [vmem:[#allocation11 + $0x7b8] sm:$0xff]  ;;  %v4978_v21 = vadd.f32 %v4946_v25, %v4943_v18  ;;  %v2723_v44 = vadd.f32 %v2691_v48, %v11050_v14  ;;  %v2725_v10 = vadd.f32 %v2693_v33, %v11050_v14 }
 0x3cd   : > { %v4966_v42 = vld [vmem:[#allocation11 + $0x7a8] sm:$0xff]  ;;  %v4980_v56 = vadd.f32 %v4948_v11, %v4943_v18  ;;  %v4982_v12 = vadd.f32 %v4950_v40, %v4943_v18  ;;  %v4984_v38 = vadd.f32 %v4952_v54, %v4943_v18  ;;  %v4986_v5 = vadd.f32 %v4954_v4, %v4943_v18  ;;  %v11052_v53 = vld [vmem:[#allocation43_spill] sm:$0xff] }
 0x3ce   : > { %v4970_v32 = vld [vmem:[#allocation11 + $0x7c8] sm:$0xff]  ;;  %v4988_v60 = vadd.f32 %v4956_v45, %v4943_v18  ;;  %v4990_v22 = vadd.f32 %v4958_v43, %v4943_v18  ;;  %v4992_v8 = vadd.f32 %v4960_v17, %v4943_v18  ;;  %v4994_v47 = vadd.f32 %v4962_v15, %v4943_v18  ;;  %v11054_v54 = vld [vmem:[#allocation55_spill] sm:$0xff]  ;;  %v11060_v45 = vld [vmem:[#allocation29_spill] sm:$0xff] }
 0x3cf   : > { %v4996_v27 = vadd.f32 %v4964_v7, %v4943_v18  ;;  %v4998_v24 = vadd.f32 %v4966_v42, %v4943_v18  ;;  %v5000_v25 = vadd.f32 %v4968_v20, %v4943_v18  ;;  %v5002_v2 = vadd.f32 %v4970_v32, %v4943_v18  ;;  %v11053_v11 = vld [vmem:[#allocation44_spill] sm:$0xff]  ;;  %v11055_v17 = vld [vmem:[#allocation71_spill] sm:$0xff]  ;;  %v2697_v42 = vld [vmem:[#allocation11 + $0x370] sm:$0xff] }
 0x3d0   : > { %v5004_v48 = vadd.f32 %v4972_v63, %v4943_v18  ;;  %v5006_v6 = vadd.f32 %v4974_v57, %v4943_v18  ;;  %v5008_v33 = vadd.f32 %v4976_v52, %v4943_v18  ;;  %v8994_v35 = vmul.f32 %v11051_v19, %v4978_v21  ;;  %v11056_v32 = vld [vmem:[#allocation72_spill] sm:$0xff]  ;;  %v11057_v52 = vld [vmem:[#allocation45_spill] sm:$0xff]  ;;  %v11058_v19 = vld [vmem:[#allocation47_spill] sm:$0xff] }
 0x3d1   : > { %v8997_v59 = vmul.f32 %v11052_v53, %v4980_v56  ;;  %v9000_v40 = vmul.f32 %v11053_v11, %v4982_v12  ;;  %v9003_v4 = vmul.f32 %v11054_v54, %v4984_v38  ;;  %v9006_v43 = vmul.f32 %v11055_v17, %v4986_v5  ;;  %v11059_v18 = vld [vmem:[#allocation49_spill] sm:$0xff]  ;;  %v2699_v12 = vld [vmem:[#allocation11 + $0x380] sm:$0xff]  ;;  %v11061_v7 = vld [vmem:[#allocation112_spill] sm:$0xff] }
 0x3d2   : > { %v9009_v63 = vmul.f32 %v11056_v32, %v4988_v60  ;;  %v9012_v57 = vmul.f32 %v11057_v52, %v4990_v22  ;;  %v9015_v21 = vmul.f32 %v11058_v19, %v4992_v8  ;;  %v9018_v53 = vmul.f32 %v11059_v18, %v4994_v47  ;;  %v11062_v20 = vld [vmem:[#allocation116_spill] sm:$0xff]  ;;  %v11063_v38 = vld [vmem:[#allocation118_spill] sm:$0xff]  ;;  %v2701_v22 = vld [vmem:[#allocation11 + $0x390] sm:$0xff] }
 0x3d3   : > { %v9021_v15 = vmul.f32 %v11060_v45, %v4996_v27  ;;  %v9024_v5 = vmul.f32 %v11061_v7, %v4998_v24  ;;  %v9027_v56 = vmul.f32 %v11062_v20, %v5000_v25  ;;  %v9030_v60 = vmul.f32 %v11063_v38, %v5002_v2  ;;  %v2703_v52 = vld [vmem:[#allocation11 + $0x3a0] sm:$0xff]  ;;  %v11064_v8 = vld [vmem:[#allocation74_spill] sm:$0xff]  ;;  %v11068_v32 = vld [vmem:[#allocation81_spill] sm:$0xff] }
 0x3d4   : > { %v9033_v19 = vmul.f32 %v11064_v8, %v5004_v48  ;;  %v11066_v47 = vld [vmem:[#allocation79_spill] sm:$0xff]  ;;  %v9039_v27 = vmul.f32 %v11068_v32, %v5008_v33  ;;  %v2705_v45 = vld [vmem:[#allocation11 + $0x3b0] sm:$0xff]  ;;  %v2729_v25 = vadd.f32 %v2697_v42, %v11050_v14  ;;  %v2731_v2 = vadd.f32 %v2699_v12, %v11050_v14 }
 0x3d5   : > { %v9036_v18 = vmul.f32 %v11066_v47, %v5006_v6  ;;  %v2707_v24 = vld [vmem:[#allocation11 + $0x3c0] sm:$0xff]  ;;  %v2709_v7 = vld [vmem:[#allocation11 + $0x3d0] sm:$0xff]  ;;  %v2747_v38 = vmul.f32 %v10657_v62, %v2715_v61  ;;  %v2749_v48 = vmul.f32 %v10660_v9, %v2717_v13  ;;  %v2733_v6 = vadd.f32 %v2701_v22, %v11050_v14  ;;  %v11074_v13 = vld [vmem:[#allocation28_spill] sm:$0xff] }
 0x3d6   : > { %11065 = vst [vmem:[#allocation37_spill] sm:$0xff] %v9033_v19  ;;  %11069 = vst [vmem:[#allocation156_spill] sm:$0xff] %v9039_v27  ;;  %v2711_v20 = vld [vmem:[#allocation11 + $0x3e0] sm:$0xff]  ;;  %v2713_v17 = vld [vmem:[#allocation11 + $0x3f0] sm:$0xff]  ;;  %v2735_v42 = vadd.f32 %v2703_v52, %v11050_v14  ;;  %v2737_v19 = vadd.f32 %v2705_v45, %v11050_v14  ;;  %v2739_v12 = vadd.f32 %v2707_v24, %v11050_v14 }
 0x3d7   : > { %11067 = vst [vmem:[#allocation101_spill] sm:$0xff] %v9036_v18  ;;  %v11070_v8 = vld [vmem:[#allocation97_spill] sm:$0xff]  ;;  %v11071_v47 = vld [vmem:[#allocation99_spill] sm:$0xff]  ;;  %v2741_v62 = vadd.f32 %v2709_v7, %v11050_v14  ;;  %v2743_v9 = vadd.f32 %v2711_v20, %v11050_v14  ;;  %v2745_v61 = vadd.f32 %v2713_v17, %v11050_v14  ;;  %v11075_v22 = vld [vmem:[#allocation36_spill] sm:$0xff]  ;;  %v2786_v52 = vadd.f32 %v8940_v34, %v2749_v48 }
 0x3d8   : > { %v2751_v54 = vmul.f32 %v11070_v8, %v2719_v16  ;;  %v2753_v33 = vmul.f32 %v11071_v47, %v2721_v26  ;;  %v11072_v32 = vld [vmem:[#allocation23_spill] sm:$0xff]  ;;  %v11073_v27 = vld [vmem:[#allocation53_spill] sm:$0xff]  ;;  %v2759_v16 = vmul.f32 %v10962_v39, %v2727_v29  ;;  %v2761_v26 = vmul.f32 %v11074_v13, %v2729_v25  ;;  %v11077_v17 = vld [vmem:[#allocation102_spill] sm:$0xff] }
 0x3d9   : > { %v2755_v11 = vmul.f32 %v11072_v32, %v2723_v44  ;;  %v2757_v18 = vmul.f32 %v11073_v27, %v2725_v10  ;;  %v2763_v44 = vmul.f32 %v11075_v22, %v2731_v2  ;;  %v2779_v10 = vadd.f32 %v8937_v3, %v2747_v38  ;;  %v11076_v27 = vld [vmem:[#allocation100_spill] sm:$0xff] }
 0x3da   : > { %v2793_v45 = vadd.f32 %v8943_v28, %v2751_v54  ;;  %v2765_v24 = vmul.f32 %v11076_v27, %v2733_v6  ;;  %v2800_v7 = vadd.f32 %v8946_v46, %v2753_v33  ;;  %v2767_v29 = vmul.f32 %v11077_v17, %v2735_v42  ;;  %v11078_v2 = vld [vmem:[#allocation60_spill] sm:$0xff]  ;;  %v11079_v28 = vld [vmem:[#allocation69_spill] sm:$0xff] }
 0x3db   : > { %v2807_v20 = vadd.f32 %v8949_v1, %v2755_v11  ;;  %v2814_v14 = vadd.f32 %v8952_v36, %v2757_v18  ;;  %v2780_v39 = vrot.slane %v2779_v10, 4  ;;  %v2787_v25 = vrot.slane %v2786_v52, 4 }
 0x3dc   : > { %v2794_v13 = vrot.slane %v2793_v45, 4  ;;  %v2769_v22 = vmul.f32 %v11078_v2, %v2737_v19  ;;  %v2801_v3 = vrot.slane %v2800_v7, 4  ;;  %v2821_v34 = vadd.f32 %v8955_v30, %v2759_v16 }
 0x3dd   : > { %v2808_v38 = vrot.slane %v2807_v20, 4  ;;  %v2771_v54 = vmul.f32 %v11079_v28, %v2739_v12  ;;  %v2781_v27 = vadd.f32 %v2780_v39, %v2779_v10  ;;  %v2788_v48 = vadd.f32 %v2787_v25, %v2786_v52 }
 0x3de   : > { %v2795_v46 = vadd.f32 %v2794_v13, %v2793_v45  ;;  %v2802_v6 = vadd.f32 %v2801_v3, %v2800_v7  ;;  %v2815_v11 = vrot.slane %v2814_v14, 4  ;;  %v9071_v36 = vadd.f32 %v8958_v0, %v2761_v26 }
 0x3df   : > { %v2809_v1 = vadd.f32 %v2808_v38, %v2807_v20  ;;  %v2782_v18 = vrot.slane %v2781_v27, 2  ;;  %v2789_v33 = vrot.slane %v2788_v48, 2  ;;  %v2835_v19 = vadd.f32 %v8961_v49, %v2763_v44 }
 0x3e0   : > { %v2796_v42 = vrot.slane %v2795_v46, 2  ;;  %v2773_v2 = vmul.f32 %v10968_v31, %v2741_v62  ;;  %v2803_v17 = vrot.slane %v2802_v6, 2  ;;  %v2822_v30 = vrot.slane %v2821_v34, 4 }
 0x3e1   : > { %v2842_v12 = vadd.f32 %v8964_v50, %v2765_v24  ;;  %v2783_v39 = vadd.f32 %v2782_v18, %v2781_v27  ;;  %v2790_v16 = vadd.f32 %v2789_v33, %v2788_v48  ;;  %v2810_v13 = vrot.slane %v2809_v1, 2 }
 0x3e2   : > { %v2836_v10 = vrot.slane %v2835_v19, 4  ;;  %v2775_v52 = vmul.f32 %v10853_v41, %v2743_v9  ;;  %v2797_v45 = vadd.f32 %v2796_v42, %v2795_v46  ;;  %v2849_v26 = vadd.f32 %v8967_v51, %v2767_v29  ;;  %v11081_v42 = vld [vmem:[#allocation96_spill] sm:$0xff] }
 0x3e3   : > { %v2843_v0 = vrot.slane %v2842_v12, 4  ;;  %v2777_v7 = vmul.f32 %v10855_v23, %v2745_v61  ;;  %v9079_v20 = vadd.f32 %v2815_v11, %v2814_v14  ;;  %v2804_v44 = vadd.f32 %v2803_v17, %v2802_v6  ;;  %v11080_v17 = vld [vmem:[#allocation94_spill] sm:$0xff] }
 0x3e4   : > { %v2837_v62 = vadd.f32 %v2836_v10, %v2835_v19  ;;  %v9082_v25 = vadd.f32 %v2822_v30, %v2821_v34  ;;  %v2850_v24 = vrot.slane %v2849_v26, 4  ;;  %v2784_v3 = vrot.slane %v2783_v39, 1 }
 0x3e5   : > { %v2844_v50 = vadd.f32 %v2843_v0, %v2842_v12  ;;  %v2791_v38 = vrot.slane %v2790_v16, 1  ;;  %v9084_v27 = vadd.f32 %v2810_v13, %v2809_v1  ;;  %v2798_v48 = vrot.slane %v2797_v45, 1 }
 0x3e6   : > { %v2838_v9 = vrot.slane %v2837_v62, 2  ;;  %v2851_v51 = vadd.f32 %v2850_v24, %v2849_v26  ;;  %v2856_v61 = vadd.f32 %v8970_v37, %v2769_v22  ;;  %v2863_v29 = vadd.f32 %v8975_v58, %v2771_v54 }
 0x3e7   : > { %v2845_v46 = vrot.slane %v2844_v50, 2  ;;  %v2870_v11 = vadd.f32 %v8978_v55, %v2773_v2  ;;  %v2877_v34 = vadd.f32 %v11080_v17, %v2775_v52  ;;  %v9091_v19 = vadd.f32 %v11081_v42, %v2777_v7  ;;  %v684_v52 = vpop.f32.mrf.mxu1  ;;  %v4947_v17 = vld [vmem:[#allocation11 + $0x710] sm:$0xff] }
 0x3e8   : > { %v2839_v14 = vadd.f32 %v2838_v9, %v2837_v62  ;;  %v2852_v18 = vrot.slane %v2851_v51, 2  ;;  %v2857_v33 = vrot.slane %v2856_v61, 4  ;;  %v2805_v1 = vrot.slane %v2804_v44, 1 }
 0x3e9   : > { %v2846_v6 = vadd.f32 %v2845_v46, %v2844_v50  ;;  %11082 = vst [vmem:[#allocation41_spill] sm:$0xff] %v9091_v19  ;;  %v2864_v12 = vrot.slane %v2863_v29, 4  ;;  %v2871_v13 = vrot.slane %v2870_v11, 4  ;;  %v2878_v0 = vrot.slane %v2877_v34, 4 }
 0x3ea   : > { %v2840_v30 = vrot.slane %v2839_v14, 1  ;;  %v2853_v37 = vadd.f32 %v2852_v18, %v2851_v51  ;;  %v2858_v22 = vadd.f32 %v2857_v33, %v2856_v61  ;;  %v2785_v26 = vadd.f32 %v2784_v3, %v2783_v39  ;;  %v4945_v61 = vld [vmem:[#allocation11 + $0x700] sm:$0xff]  ;;  %v4951_v39 = vld [vmem:[#allocation11 + $0x730] sm:$0xff] }
 0x3eb   : > { %v2847_v55 = vrot.slane %v2846_v6, 1  ;;  %v2865_v2 = vadd.f32 %v2864_v12, %v2863_v29  ;;  %v9095_v54 = vadd.f32 %v2871_v13, %v2870_v11  ;;  %v2792_v7 = vadd.f32 %v2791_v38, %v2790_v16  ;;  %v4949_v12 = vld [vmem:[#allocation11 + $0x720] sm:$0xff]  ;;  %v11087_v38 = vld [vmem:[#allocation84_spill] sm:$0xff] }
 0x3ec   : > { %v9097_v62 = vadd.f32 %v2798_v48, %v2797_v45  ;;  %v2859_v50 = vrot.slane %v2858_v22, 2  ;;  %v9099_v24 = vadd.f32 %v2805_v1, %v2804_v44  ;;  %v2841_v9 = vadd.f32 %v2840_v30, %v2839_v14  ;;  %v4953_v16 = vld [vmem:[#allocation11 + $0x740] sm:$0xff]  ;;  %v4955_v14 = vld [vmem:[#allocation11 + $0x750] sm:$0xff] }
 0x3ed   : > { %v2866_v46 = vrot.slane %v2865_v2, 2  ;;  %v2854_v18 = vrot.slane %v2853_v37, 1  ;;  %v9102_v29 = vadd.f32 %v2878_v0, %v2877_v34  ;;  %v11086_v11 = vstv %s8628_s9  ;;  %v11089_v30 = vld [vmem:[#allocation103_spill] sm:$0xff]  ;;  %v11091_v34 = vld [vmem:[#allocation86_spill] sm:$0xff]  ;;  %v4963_v44 = vld [vmem:[#allocation11 + $0x790] sm:$0xff]  ;;  %s5222_s9 = scalar_lea.sflag [#allocation4], %s6404_s1 }
 0x3ee   : > { %11083 = vst [vmem:[#allocation43_spill] sm:$0xff] %v9097_v62  ;;  %11084 = vst [vmem:[#allocation49_spill] sm:$0xff] %v9099_v24  ;;  %v2860_v33 = vadd.f32 %v2859_v50, %v2858_v22  ;;  %v4942_v42 = vadd.f32 %v11086_v11, %v684_v52  ;;  %v2848_v45 = vadd.f32 %v2847_v55, %v2846_v6  ;;  %v4957_v52 = vld [vmem:[#allocation11 + $0x760] sm:$0xff]  ;;  %v4959_v50 = vld [vmem:[#allocation11 + $0x770] sm:$0xff] }
 0x3ef   : > { %11085 = vst [vmem:[#allocation29_spill] sm:$0xff] %v9102_v29  ;;  %v9106_v3 = vadd.f32 %v2866_v46, %v2865_v2  ;;  %v9110_v48 = vmul.f32 %v11087_v38, %v2785_v26  ;;  %v9113_v13 = vmul.f32 %v11089_v30, %v2792_v7  ;;  %v9116_v22 = vmul.f32 %v11091_v34, %v2841_v9  ;;  %v4961_v11 = vld [vmem:[#allocation11 + $0x780] sm:$0xff]  ;;  %v11094_v26 = vld [vmem:[#allocation105_spill] sm:$0xff]  ;;  %v11096_v7 = vld [vmem:[#allocation98_spill] sm:$0xff] }
 0x3f0   : > { %v2861_v1 = vrot.slane %v2860_v33, 1  ;;  %v4977_v0 = vadd.f32 %v4945_v61, %v4942_v42  ;;  %v4979_v6 = vadd.f32 %v4947_v17, %v4942_v42  ;;  %v4981_v55 = vadd.f32 %v4949_v12, %v4942_v42  ;;  %v4965_v34 = vld [vmem:[#allocation11 + $0x7a0] sm:$0xff]  ;;  %v4967_v17 = vld [vmem:[#allocation11 + $0x7b0] sm:$0xff]  ;;  %v11101_v61 = vld [vmem:[#allocation90_spill] sm:$0xff] }
 0x3f1   : > { %11088 = vst [vmem:[#allocation97_spill] sm:$0xff] %v9110_v48  ;;  %11090 = vst [vmem:[#allocation99_spill] sm:$0xff] %v9113_v13  ;;  %v4983_v2 = vadd.f32 %v4951_v39, %v4942_v42  ;;  %v4985_v46 = vadd.f32 %v4953_v16, %v4942_v42  ;;  %v9118_v51 = vadd.f32 %v2854_v18, %v2853_v37  ;;  %v4969_v12 = vld [vmem:[#allocation11 + $0x7c0] sm:$0xff]  ;;  %v11098_v39 = vld [vmem:[#allocation57_spill] sm:$0xff] }
 0x3f2   : > { %11092 = vst [vmem:[#allocation23_spill] sm:$0xff] %v9116_v22  ;;  %v9121_v38 = vmul.f32 %v11094_v26, %v2848_v45  ;;  %v4987_v49 = vadd.f32 %v4955_v14, %v4942_v42  ;;  %v9125_v30 = vadd.f32 %v11096_v7, %v11070_v8  ;;  %v9127_v9 = vadd.f32 %v2861_v1, %v2860_v33  ;;  %v11099_v18 = vld [vmem:[#allocation42_spill] sm:$0xff]  ;;  %v4971_v45 = vld [vmem:[#allocation11 + $0x7d0] sm:$0xff]  ;;  %v4973_v14 = vld [vmem:[#allocation11 + $0x7e0] sm:$0xff] }
 0x3f3   : > { %11093 = vst [vmem:[#allocation36_spill] sm:$0xff] %v9118_v51  ;;  %v9132_v37 = vadd.f32 %v11098_v39, %v11071_v47  ;;  %v9136_v16 = vadd.f32 %v11099_v18, %v11072_v32  ;;  %v4975_v26 = vld [vmem:[#allocation11 + $0x7f0] sm:$0xff]  ;;  %v4989_v8 = vadd.f32 %v4957_v52, %v4942_v42  ;;  %v4991_v7 = vadd.f32 %v4959_v50, %v4942_v42  ;;  %v11100_v1 = vld [vmem:[#allocation34_spill] sm:$0xff]  ;;  %v11103_v13 = vld [vmem:[#allocation92_spill] sm:$0xff] }
 0x3f4   : > { %11095 = vst [vmem:[#allocation100_spill] sm:$0xff] %v9121_v38  ;;  %11097 = vst [vmem:[#allocation69_spill] sm:$0xff] %v9127_v9  ;;  %v4993_v33 = vadd.f32 %v4961_v11, %v4942_v42  ;;  %v5009_v10 = vmul.f32 %v11100_v1, %v4977_v0  ;;  %v5011_v58 = vmul.f32 %v11101_v61, %v4979_v6  ;;  %v11102_v38 = vld [vmem:[#allocation91_spill] sm:$0xff]  ;;  %v11104_v47 = vld [vmem:[#allocation108_spill] sm:$0xff] }
 0x3f5   : > { %v5013_v22 = vmul.f32 %v11102_v38, %v4981_v55  ;;  %v5015_v48 = vmul.f32 %v11103_v13, %v4983_v2  ;;  %v5017_v39 = vmul.f32 %v11104_v47, %v4985_v46  ;;  %v4995_v9 = vadd.f32 %v4963_v44, %v4942_v42  ;;  %v11105_v18 = vld [vmem:[#allocation68_spill] sm:$0xff]  ;;  %v11106_v11 = vld [vmem:[#allocation73_spill] sm:$0xff]  ;;  %v11107_v0 = vld [vmem:[#allocation46_spill] sm:$0xff] }
 0x3f6   : > { %v4997_v51 = vadd.f32 %v4965_v34, %v4942_v42  ;;  %v4999_v32 = vadd.f32 %v4967_v17, %v4942_v42  ;;  %v5019_v24 = vmul.f32 %v11105_v18, %v4987_v49  ;;  %v5001_v62 = vadd.f32 %v4969_v12, %v4942_v42  ;;  %v11108_v6 = vld [vmem:[#allocation48_spill] sm:$0xff]  ;;  %v11109_v34 = vld [vmem:[#allocation38_spill] sm:$0xff] }
 0x3f7   : > { %v5003_v19 = vadd.f32 %v4971_v45, %v4942_v42  ;;  %v5005_v52 = vadd.f32 %v4973_v14, %v4942_v42  ;;  %v5007_v50 = vadd.f32 %v4975_v26, %v4942_v42  ;;  %v5021_v29 = vmul.f32 %v11106_v11, %v4989_v8  ;;  %v11110_v12 = vld [vmem:[#allocation110_spill] sm:$0xff] }
 0x3f8   : > { %v5023_v1 = vmul.f32 %v11107_v0, %v4991_v7  ;;  %v5025_v61 = vmul.f32 %v11108_v6, %v4993_v33  ;;  %v5041_v55 = vadd.f32 %v8994_v35, %v5009_v10  ;;  %v5048_v2 = vadd.f32 %v8997_v59, %v5011_v58  ;;  %v11111_v35 = vld [vmem:[#allocation115_spill] sm:$0xff]  ;;  %v11112_v59 = vld [vmem:[#allocation120_spill] sm:$0xff] }
 0x3f9   : > { %v5055_v44 = vadd.f32 %v9000_v40, %v5013_v22  ;;  %v5062_v46 = vadd.f32 %v9003_v4, %v5015_v48  ;;  %v5069_v49 = vadd.f32 %v9006_v43, %v5017_v39  ;;  %v5027_v17 = vmul.f32 %v11109_v34, %v4995_v9 }
 0x3fa   : > { %v5029_v42 = vmul.f32 %v11110_v12, %v4997_v51  ;;  %v5042_v45 = vrot.slane %v5041_v55, 4  ;;  %v5076_v14 = vadd.f32 %v9009_v63, %v5019_v24  ;;  %v5049_v26 = vrot.slane %v5048_v2, 4 }
 0x3fb   : > { %v5056_v8 = vrot.slane %v5055_v44, 4  ;;  %v5063_v7 = vrot.slane %v5062_v46, 4  ;;  %v5070_v33 = vrot.slane %v5069_v49, 4  ;;  %v5031_v10 = vmul.f32 %v11111_v35, %v4999_v32  ;;  %v11114_v35 = vld [vmem:[#allocation76_spill] sm:$0xff] }
 0x3fc   : > { %v5033_v58 = vmul.f32 %v11112_v59, %v5001_v62  ;;  %v5043_v40 = vadd.f32 %v5042_v45, %v5041_v55  ;;  %v5083_v4 = vadd.f32 %v9012_v57, %v5021_v29  ;;  %v5050_v48 = vadd.f32 %v5049_v26, %v5048_v2  ;;  %v11115_v29 = vld [vmem:[#allocation78_spill] sm:$0xff] }
 0x3fd   : > { %v5057_v43 = vadd.f32 %v5056_v8, %v5055_v44  ;;  %v5064_v22 = vadd.f32 %v5063_v7, %v5062_v46  ;;  %v5071_v9 = vadd.f32 %v5070_v33, %v5069_v49  ;;  %v5077_v51 = vrot.slane %v5076_v14, 4  ;;  %v11116_v26 = vld [vmem:[#allocation82_spill] sm:$0xff] }
 0x3fe   : > { %v5044_v39 = vrot.slane %v5043_v40, 2  ;;  %v9159_v6 = vadd.f32 %v9015_v21, %v5023_v1  ;;  %v5097_v63 = vadd.f32 %v9018_v53, %v5025_v61  ;;  %v5051_v24 = vrot.slane %v5050_v48, 2 }
 0x3ff   : > { %v5058_v34 = vrot.slane %v5057_v43, 2  ;;  %v5065_v12 = vrot.slane %v5064_v22, 2  ;;  %v5072_v32 = vrot.slane %v5071_v9, 2  ;;  %v5035_v62 = vmul.f32 %v11114_v35, %v5003_v19 }
 0x400   : > { %11113 = vst [vmem:[#allocation94_spill] sm:$0xff] %v9159_v6  ;;  %v5045_v55 = vadd.f32 %v5044_v39, %v5043_v40  ;;  %v5098_v45 = vrot.slane %v5097_v63, 4  ;;  %v5104_v57 = vadd.f32 %v9021_v15, %v5027_v17  ;;  %v5037_v2 = vmul.f32 %v11115_v29, %v5005_v52 }
 0x401   : > { %v5052_v44 = vadd.f32 %v5051_v24, %v5050_v48  ;;  %v5059_v46 = vadd.f32 %v5058_v34, %v5057_v43  ;;  %v5066_v49 = vadd.f32 %v5065_v12, %v5064_v22  ;;  %v5039_v21 = vmul.f32 %v11116_v26, %v5007_v50  ;;  %v11121_v34 = vld [vmem:[#allocation156_spill] sm:$0xff] }
 0x402   : > { %v5099_v1 = vadd.f32 %v5098_v45, %v5097_v63  ;;  %v5105_v8 = vrot.slane %v5104_v57, 4  ;;  %v5111_v53 = vadd.f32 %v9024_v5, %v5029_v42  ;;  %v9167_v61 = vadd.f32 %v5072_v32, %v5071_v9 }
 0x403   : > { %v9169_v7 = vadd.f32 %v5077_v51, %v5076_v14  ;;  %v5084_v19 = vrot.slane %v5083_v4, 4  ;;  %v5046_v40 = vrot.slane %v5045_v55, 1  ;;  %v5053_v48 = vrot.slane %v5052_v44, 1  ;;  %v11119_v14 = vld [vmem:[#allocation37_spill] sm:$0xff] }
 0x404   : > { %11117 = vst [vmem:[#allocation96_spill] sm:$0xff] %v9167_v61  ;;  %v5100_v15 = vrot.slane %v5099_v1, 2  ;;  %v5106_v17 = vadd.f32 %v5105_v8, %v5104_v57  ;;  %v5112_v52 = vrot.slane %v5111_v53, 4  ;;  %v5060_v43 = vrot.slane %v5059_v46, 1  ;;  %v11120_v51 = vld [vmem:[#allocation101_spill] sm:$0xff] }
 0x405   : > { %11118 = vst [vmem:[#allocation84_spill] sm:$0xff] %v9169_v7  ;;  %v5067_v12 = vrot.slane %v5066_v49, 1  ;;  %v5118_v50 = vadd.f32 %v9027_v56, %v5031_v10  ;;  %v5125_v5 = vadd.f32 %v9030_v60, %v5033_v58  ;;  %v5132_v9 = vadd.f32 %v11119_v14, %v5035_v62 }
 0x406   : > { %v5101_v22 = vadd.f32 %v5100_v15, %v5099_v1  ;;  %v5107_v39 = vrot.slane %v5106_v17, 2  ;;  %v5113_v63 = vadd.f32 %v5112_v52, %v5111_v53  ;;  %v5139_v24 = vadd.f32 %v11120_v51, %v5037_v2 }
 0x407   : > { %v5119_v42 = vrot.slane %v5118_v50, 4  ;;  %v9177_v32 = vadd.f32 %v11121_v34, %v5039_v21  ;;  %v5126_v33 = vrot.slane %v5125_v5, 4  ;;  %v9180_v56 = vadd.f32 %v5084_v19, %v5083_v4  ;;  %v11145_v4 = vld [vmem:[#allocation60_spill] sm:$0xff] }
 0x408   : > { %v5102_v45 = vrot.slane %v5101_v22, 1  ;;  %v5108_v57 = vadd.f32 %v5107_v39, %v5106_v17  ;;  %v5114_v8 = vrot.slane %v5113_v63, 2  ;;  %v5133_v1 = vrot.slane %v5132_v9, 4 }
 0x409   : > { %11122 = vst [vmem:[#allocation103_spill] sm:$0xff] %v9177_v32  ;;  %11123 = vst [vmem:[#allocation86_spill] sm:$0xff] %v9180_v56  ;;  %v5120_v10 = vadd.f32 %v5119_v42, %v5118_v50  ;;  %v5047_v53 = vadd.f32 %v5046_v40, %v5045_v55  ;;  %v5140_v62 = vrot.slane %v5139_v24, 4  ;;  %v9183_v15 = vadd.f32 %v5053_v48, %v5052_v44  ;;  %v11129_v40 = vld [vmem:[#allocation39_spill] sm:$0xff]  ;;  %v11136_v42 = vld [vmem:[#allocation53_spill] sm:$0xff] }
 0x40a   : > { %v5109_v58 = vrot.slane %v5108_v57, 1  ;;  %v9185_v2 = vadd.f32 %v5060_v43, %v5059_v46  ;;  %v5103_v21 = vadd.f32 %v5102_v45, %v5101_v22  ;;  %v9187_v52 = vadd.f32 %v5114_v8, %v5113_v63  ;;  %v11132_v48 = vld [vmem:[#allocation51_spill] sm:$0xff]  ;;  %v11138_v45 = vld [vmem:[#allocation40_spill] sm:$0xff] }
 0x40b   : > { %11124 = vst [vmem:[#allocation105_spill] sm:$0xff] %v9183_v15  ;;  %v9189_v17 = vadd.f32 %v5067_v12, %v5066_v49  ;;  %v9191_v14 = vadd.f32 %v5126_v33, %v5125_v5  ;;  %v5121_v19 = vrot.slane %v5120_v10, 2  ;;  %v9194_v55 = vadd.f32 %v5133_v1, %v5132_v9  ;;  %v11134_v49 = vld [vmem:[#allocation111_spill] sm:$0xff]  ;;  %v11137_v9 = vld [vmem:[#allocation54_spill] sm:$0xff]  ;;  %v11140_v1 = vld [vmem:[#allocation28_spill] sm:$0xff] }
 0x40c   : > { %11125 = vst [vmem:[#allocation98_spill] sm:$0xff] %v9185_v2  ;;  %11126 = vst [vmem:[#allocation57_spill] sm:$0xff] %v9187_v52  ;;  %v5110_v39 = vadd.f32 %v5109_v58, %v5108_v57  ;;  %v9197_v50 = vmul.f32 %v11129_v40, %v5103_v21  ;;  %v1716_v44 = vrot.slane %v9125_v30, 4  ;;  %v9200_v46 = vadd.f32 %v5140_v62, %v5139_v24  ;;  %v11139_v57 = vld [vmem:[#allocation27_spill] sm:$0xff]  ;;  %v11195_v56 = vld [vmem:[#allocation136_spill] sm:$0xff] }
 0x40d   : > { %11127 = vst [vmem:[#allocation42_spill] sm:$0xff] %v9189_v17  ;;  %11128 = vst [vmem:[#allocation34_spill] sm:$0xff] %v9191_v14  ;;  %v9203_v43 = vmul.f32 %v11132_v48, %v5047_v53  ;;  %v1723_v33 = vrot.slane %v9132_v37, 4  ;;  %v1730_v5 = vrot.slane %v9136_v16, 4  ;;  %v1736_v51 = vadd.f32 %v11137_v9, %v11136_v42  ;;  %v11141_v53 = vld [vmem:[#allocation35_spill] sm:$0xff] }
 0x40e   : > { %11130 = vst [vmem:[#allocation90_spill] sm:$0xff] %v9197_v50  ;;  %11131 = vst [vmem:[#allocation91_spill] sm:$0xff] %v9200_v46  ;;  %v9206_v12 = vmul.f32 %v11134_v49, %v5110_v39  ;;  %v1717_v63 = vadd.f32 %v1716_v44, %v9125_v30  ;;  %v1743_v8 = vadd.f32 %v11139_v57, %v11138_v45  ;;  %v11143_v49 = vld [vmem:[#allocation102_spill] sm:$0xff]  ;;  %v11144_v42 = vld [vmem:[#allocation107_spill] sm:$0xff] }
 0x40f   : > { %11133 = vst [vmem:[#allocation92_spill] sm:$0xff] %v9203_v43  ;;  %v1724_v34 = vadd.f32 %v1723_v33, %v9132_v37  ;;  %v1750_v58 = vadd.f32 %v11141_v53, %v11140_v1  ;;  %v9220_v62 = vadd.f32 %v5121_v19, %v5120_v10  ;;  %v1731_v30 = vadd.f32 %v1730_v5, %v9136_v16  ;;  %v11146_v45 = vld [vmem:[#allocation61_spill] sm:$0xff] }
 0x410   : > { %11135 = vst [vmem:[#allocation108_spill] sm:$0xff] %v9206_v12  ;;  %v1718_v21 = vrot.slane %v1717_v63, 2  ;;  %v1737_v39 = vrot.slane %v1736_v51, 4  ;;  %v1744_v44 = vrot.slane %v1743_v8, 4  ;;  %v1771_v9 = vadd.f32 %v11144_v42, %v11143_v49 }
 0x411   : > { %11142 = vst [vmem:[#allocation68_spill] sm:$0xff] %v9220_v62  ;;  %v1725_v40 = vrot.slane %v1724_v34, 2  ;;  %v1751_v48 = vrot.slane %v1750_v58, 4  ;;  %v1732_v37 = vrot.slane %v1731_v30, 2  ;;  %v1778_v57 = vadd.f32 %v11146_v45, %v11145_v4  ;;  %v11148_v45 = vld [vmem:[#allocation62_spill] sm:$0xff] }
 0x412   : > { %v1719_v60 = vadd.f32 %v1718_v21, %v1717_v63  ;;  %v1738_v33 = vadd.f32 %v1737_v39, %v1736_v51  ;;  %v1745_v1 = vadd.f32 %v1744_v44, %v1743_v8  ;;  %v1772_v19 = vrot.slane %v1771_v9, 4 }
 0x413   : > { %v1726_v22 = vadd.f32 %v1725_v40, %v1724_v34  ;;  %v1752_v10 = vadd.f32 %v1751_v48, %v1750_v58  ;;  %v1733_v6 = vadd.f32 %v1732_v37, %v1731_v30  ;;  %v1779_v5 = vrot.slane %v1778_v57, 4  ;;  %v11147_v40 = vld [vmem:[#allocation59_spill] sm:$0xff] }
 0x414   : > { %v1720_v53 = vrot.slane %v1719_v60, 1  ;;  %v1739_v16 = vrot.slane %v1738_v33, 2  ;;  %v1746_v12 = vrot.slane %v1745_v1, 2  ;;  %v1773_v43 = vadd.f32 %v1772_v19, %v1771_v9 }
 0x415   : > { %v1727_v24 = vrot.slane %v1726_v22, 1  ;;  %v1753_v50 = vrot.slane %v1752_v10, 2  ;;  %v1734_v49 = vrot.slane %v1733_v6, 1  ;;  %v1780_v21 = vadd.f32 %v1779_v5, %v1778_v57 }
 0x416   : > { %v1721_v17 = vadd.f32 %v1720_v53, %v1719_v60  ;;  %v1740_v63 = vadd.f32 %v1739_v16, %v1738_v33  ;;  %v1747_v39 = vadd.f32 %v1746_v12, %v1745_v1  ;;  %v1774_v4 = vrot.slane %v1773_v43, 2 }
 0x417   : > { %v1728_v51 = vadd.f32 %v1727_v24, %v1726_v22  ;;  %v1754_v42 = vadd.f32 %v1753_v50, %v1752_v10  ;;  %v1735_v34 = vadd.f32 %v1734_v49, %v1733_v6  ;;  %v1781_v58 = vrot.slane %v1780_v21, 2  ;;  %v11149_v22 = vld [vmem:[#allocation66_spill] sm:$0xff] }
 0x418   : > { %v1741_v8 = vrot.slane %v1740_v63, 1  ;;  %v1785_v30 = vadd.f32 %v11147_v40, %v11079_v28  ;;  %v1748_v44 = vrot.slane %v1747_v39, 1  ;;  %v1775_v37 = vadd.f32 %v1774_v4, %v1773_v43  ;;  %v11150_v28 = vld [vmem:[#allocation70_spill] sm:$0xff] }
 0x419   : > { %v1755_v48 = vrot.slane %v1754_v42, 1  ;;  %v1792_v9 = vadd.f32 %v11148_v45, %v10968_v31  ;;  %v1782_v19 = vadd.f32 %v1781_v58, %v1780_v21  ;;  %v1799_v12 = vadd.f32 %v11149_v22, %v10853_v41  ;;  %v11151_v31 = vld [vmem:[#allocation87_spill] sm:$0xff] }
 0x41a   : > { %v1742_v60 = vadd.f32 %v1741_v8, %v1740_v63  ;;  %v1786_v33 = vrot.slane %v1785_v30, 4  ;;  %v1749_v50 = vadd.f32 %v1748_v44, %v1747_v39  ;;  %v1776_v6 = vrot.slane %v1775_v37, 1  ;;  %v11153_v8 = vld [vmem:[#allocation85_spill] sm:$0xff] }
 0x41b   : > { %v1756_v24 = vadd.f32 %v1755_v48, %v1754_v42  ;;  %v1793_v57 = vrot.slane %v1792_v9, 4  ;;  %v1783_v1 = vrot.slane %v1782_v19, 1  ;;  %v1800_v53 = vrot.slane %v1799_v12, 4 }
 0x41c   : > { %v1787_v10 = vadd.f32 %v1786_v33, %v1785_v30  ;;  %v1806_v16 = vadd.f32 %v11150_v28, %v10855_v23  ;;  %v1777_v43 = vadd.f32 %v1776_v6, %v1775_v37  ;;  %5853 = vrcp.f32 %v1721_v17  ;;  %v11155_v30 = vld [vmem:[#allocation104_spill] sm:$0xff] }
 0x41d   : > { %v1794_v5 = vadd.f32 %v1793_v57, %v1792_v9  ;;  %v11152_v49 = vrot.slane %v11151_v31, 1  ;;  %v1784_v21 = vadd.f32 %v1783_v1, %v1782_v19  ;;  %v1801_v39 = vadd.f32 %v1800_v53, %v1799_v12 }
 0x41e   : > { %v1788_v41 = vrot.slane %v1787_v10, 2  ;;  %v1807_v42 = vrot.slane %v1806_v16, 4  ;;  %5855 = vrcp.f32 %v1728_v51  ;;  %v11154_v58 = vrot.slane %v11153_v8, 2 }
 0x41f   : > { %v9238_v63 = vadd.f32 %v11152_v49, %v11151_v31  ;;  %v1795_v4 = vrot.slane %v1794_v5, 2  ;;  %v1974_v23 = vrot.slane %v11155_v30, 2  ;;  %v1802_v48 = vrot.slane %v1801_v39, 2 }
 0x420   : > { %v1968_v40 = vadd.f32 %v11154_v58, %v11153_v8  ;;  %v1789_v44 = vadd.f32 %v1788_v41, %v1787_v10  ;;  %v1808_v17 = vadd.f32 %v1807_v42, %v1806_v16  ;;  %5857 = vrcp.f32 %v1735_v34  ;;  %v11163_v58 = vld [vmem:[#allocation106_spill] sm:$0xff] }
 0x421   : > { %v1796_v37 = vadd.f32 %v1795_v4, %v1794_v5  ;;  %5859 = vrcp.f32 %v1742_v60  ;;  %v1975_v9 = vadd.f32 %v1974_v23, %v11155_v30  ;;  %v1803_v33 = vadd.f32 %v1802_v48, %v1801_v39  ;;  %v11156_v60 = vld [vmem:[#allocation83_spill] sm:$0xff]  ;;  %v11160_v39 = vld [vmem:[#allocation56_spill] sm:$0xff] }
 0x422   : > { %v1969_v45 = vrot.slane %v1968_v40, 1  ;;  %v1790_v19 = vrot.slane %v1789_v44, 1  ;;  %v1809_v51 = vrot.slane %v1808_v17, 2  ;;  %5861 = vrcp.f32 %v1749_v50  ;;  %v11158_v50 = vld [vmem:[#allocation26_spill] sm:$0xff] }
 0x423   : > { %v1797_v22 = vrot.slane %v1796_v37, 1  ;;  %5863 = vrcp.f32 %v1756_v24  ;;  %v1976_v6 = vrot.slane %v1975_v9, 1  ;;  %v1804_v1 = vrot.slane %v1803_v33, 1 }
 0x424   : > { %v1970_v12 = vadd.f32 %v1969_v45, %v1968_v40  ;;  %v1791_v57 = vadd.f32 %v1790_v19, %v1789_v44  ;;  %v1810_v10 = vadd.f32 %v1809_v51, %v1808_v17  ;;  %5865 = vrcp.f32 %v1777_v43 }
 0x425   : > { %v1798_v34 = vadd.f32 %v1797_v22, %v1796_v37  ;;  %5867 = vrcp.f32 %v1784_v21  ;;  %v1977_v53 = vadd.f32 %v1976_v6, %v1975_v9  ;;  %v11157_v28 = vrot.slane %v11156_v60, 4  ;;  %v11162_v21 = vld [vmem:[#allocation89_spill] sm:$0xff]  ;;  %v11167_v22 = vld [vmem:[#allocation95_spill] sm:$0xff] }
 0x426   : > { %v1805_v5 = vadd.f32 %v1804_v1, %v1803_v33  ;;  %v1811_v31 = vrot.slane %v1810_v10, 1  ;;  %5869 = vrcp.f32 %v1791_v57  ;;  %v11159_v24 = vrot.slane %v11158_v50, 1  ;;  %v11165_v37 = vld [vmem:[#allocation25_spill] sm:$0xff] }
 0x427   : > { %v1980_v16 = vadd.f32 %v11157_v28, %v11156_v60  ;;  %5871 = vrcp.f32 %v1798_v34  ;;  %v11161_v43 = vrot.slane %v11160_v39, 2  ;;  %v2030_v4 = vrot.slane %v11162_v21, 2  ;;  %v11166_v33 = vld [vmem:[#allocation93_spill] sm:$0xff]  ;;  %v11168_v34 = vld [vmem:[#allocation88_spill] sm:$0xff] }
 0x428   : > { %v9253_v49 = vadd.f32 %v11159_v24, %v11158_v50  ;;  %v1812_v8 = vadd.f32 %v1811_v31, %v1810_v10  ;;  %5873 = vrcp.f32 %v1805_v5  ;;  %v11164_v40 = vrot.slane %v11163_v58, 4  ;;  %v11169_v5 = vld [vmem:[#allocation63_spill] sm:$0xff] }
 0x429   : > { %v1981_v41 = vrot.slane %v1980_v16, 2  ;;  %v2024_v42 = vadd.f32 %v11161_v43, %v11160_v39  ;;  %v9263_v23 = vstv %s9244_s18  ;;  %v2031_v17 = vadd.f32 %v2030_v4, %v11162_v21  ;;  %v9268_v9 = vpop.eup %5853  ;;  %v11170_v39 = vld [vmem:[#allocation58_spill] sm:$0xff]  ;;  %s6078_s18 = scalar_lea.vmem %s9854_s21, 2048 }
 0x42a   : > { %v2036_v30 = vadd.f32 %v11164_v40, %v11163_v58  ;;  %v2059_v45 = vadd.f32 %v9263_v23, %v11165_v37  ;;  %5875 = vrcp.f32 %v1812_v8  ;;  %v2060_v51 = vadd.f32 %v9263_v23, %v11166_v33  ;;  %p6079_p2 = scmp.ne.s32.totalorder %s9854_s21, %s6078_s18 }
 0x42b   : > { %v1982_v44 = vadd.f32 %v1981_v41, %v1980_v16  ;;  %v2025_v48 = vrot.slane %v2024_v42, 1  ;;  %v2067_v6 = vadd.f32 %v9263_v23, %v11167_v22  ;;  %v2032_v10 = vrot.slane %v2031_v17, 1  ;;  %v9276_v28 = vpop.eup %5855 }
 0x42c   : > { %v2037_v19 = vrot.slane %v2036_v30, 2  ;;  %v2043_v60 = vmul.f32 %v9268_v9, %v11168_v34  ;;  %v2068_v31 = vadd.f32 %v9263_v23, %v11169_v5  ;;  %v2044_v43 = vmul.f32 %v9276_v28, %v11170_v39  ;;  %p6080_p4 = pnand %p6079_p2, %p11335_p8 }
 0x42d   : > { %v1983_v57 = vrot.slane %v1982_v44, 1  ;;  %v2026_v1 = vadd.f32 %v2025_v48, %v2024_v42  ;;  %v9280_v50 = vpop.eup %5857  ;;  %v2033_v41 = vadd.f32 %v2032_v10, %v2031_v17  ;;  %v2092_v58 = vsel %vm2091_vm0, %v2060_v51, %v2059_v45 }
 0x42e   : > { %v2038_v16 = vadd.f32 %v2037_v19, %v2036_v30  ;;  %v2061_v42 = vadd.f32 %v9263_v23, %v2043_v60  ;;  %v9285_v21 = vpop.eup %5859  ;;  %v2045_v8 = vmul.f32 %v9280_v50, %v9238_v63  ;;  %p6081_p12 = pneg %p6080_p4 }
 0x42f   : > { %v1984_v24 = vadd.f32 %v1983_v57, %v1982_v44  ;;  %v9290_v40 = vpop.eup %5861  ;;  %v2046_v30 = vmul.f32 %v9285_v21, %v1970_v12  ;;  %v2062_v44 = vadd.f32 %v9263_v23, %v2044_v43  ;;  %v11171_v57 = vld [vmem:[#allocation24_spill] sm:$0xff]  ;;  %v2105_v43 = vsel %vm2091_vm0, %v2068_v31, %v2067_v6 }
 0x430   : > { %v2039_v4 = vrot.slane %v2038_v16, 1  ;;  %v2094_v48 = vsel %vm2093_vm1, %v2061_v42, %v2092_v58  ;;  %v9295_v17 = vpop.eup %5863  ;;  %v2047_v19 = vmul.f32 %v9290_v40, %v1977_v53  ;;  %v2063_v33 = vadd.f32 %v9263_v23, %v2045_v8  ;;  %v11175_v31 = vld [vmem:[#allocation32_spill] sm:$0xff] }
 0x431   : > { %v9299_v63 = vpop.eup %5865  ;;  %v2048_v45 = vmul.f32 %v9295_v17, %v1984_v24  ;;  %v2064_v51 = vadd.f32 %v9263_v23, %v2046_v30  ;;  %v2096_v12 = vsel %vm2095_vm2, %v2062_v44, %v2094_v48  ;;  %v11173_v30 = vld [vmem:[#allocation125_spill] sm:$0xff] }
 0x432   : > { %v2040_v37 = vadd.f32 %v2039_v4, %v2038_v16  ;;  %v9304_v22 = vpop.eup %5867  ;;  %v2051_v10 = vmul.f32 %v9299_v63, %v11171_v57  ;;  %v2065_v34 = vadd.f32 %v9263_v23, %v2047_v19  ;;  %v2098_v53 = vsel %vm2097_vm3, %v2063_v33, %v2096_v12  ;;  %v11172_v16 = vld [vmem:[#allocation64_spill] sm:$0xff] }
 0x433   : > { %v9310_v60 = vpop.eup %5869  ;;  %v2052_v5 = vmul.f32 %v9304_v22, %v11172_v16  ;;  %v2066_v24 = vadd.f32 %v9263_v23, %v2048_v45  ;;  %v2100_v39 = vsel %vm2099_vm4, %v2064_v51, %v2098_v53  ;;  %v11174_v44 = vrot.slane %v11173_v30, 1 }
 0x434   : > { %v9317_v42 = vpop.eup %5871  ;;  %v2053_v4 = vmul.f32 %v9310_v60, %v9253_v49  ;;  %v2069_v8 = vadd.f32 %v9263_v23, %v2051_v10  ;;  %v2102_v58 = vsel %vm2101_vm5, %v2065_v34, %v2100_v39  ;;  %v11176_v51 = vrot.slane %v11175_v31, 2  ;;  %v11178_v39 = vld [vmem:[#allocation131_spill] sm:$0xff] }
 0x435   : > { %v2251_v48 = vadd.f32 %v11174_v44, %v11173_v30  ;;  %v9326_v19 = vpop.eup %5873  ;;  %v2054_v33 = vmul.f32 %v9317_v42, %v2026_v1  ;;  %v2070_v45 = vadd.f32 %v9263_v23, %v2052_v5  ;;  %v2104_v6 = vsel %vm2103_vm6, %v2066_v24, %v2102_v58  ;;  %v11177_v1 = vld [vmem:[#allocation33_spill] sm:$0xff] }
 0x436   : > { %v2256_v49 = vadd.f32 %v11176_v51, %v11175_v31  ;;  %v2055_v12 = vmul.f32 %v9326_v19, %v2033_v41  ;;  %v2071_v57 = vadd.f32 %v9263_v23, %v2053_v4  ;;  %v2106_v10 = vsel %vm2093_vm1, %v2069_v8, %v2105_v43  ;;  %2114 = vst [vmem:[%s9339_s16] sm:$0xff] %v2104_v6  ;;  %v11180_v6 = vld [vmem:[#allocation132_spill] sm:$0xff] }
 0x437   : > { %v2262_v34 = vrot.slane %v11177_v1, 2  ;;  %v9343_v53 = vpop.eup %5875  ;;  %v2072_v16 = vadd.f32 %v9263_v23, %v2054_v33  ;;  %v2107_v5 = vsel %vm2095_vm2, %v2070_v45, %v2106_v10  ;;  %v11179_v41 = vrot.slane %v11178_v39, 4 }
 0x438   : > { %v2257_v24 = vrot.slane %v2256_v49, 1  ;;  %v2056_v43 = vmul.f32 %v9343_v53, %v2040_v37  ;;  %v2073_v8 = vadd.f32 %v9263_v23, %v2055_v12  ;;  %v2108_v58 = vsel %vm2097_vm3, %v2071_v57, %v2107_v5  ;;  %v11184_v5 = vld [vmem:[#allocation130_spill] sm:$0xff] }
 0x439   : > { %v2268_v4 = vadd.f32 %v11179_v41, %v11178_v39  ;;  %v2263_v30 = vadd.f32 %v2262_v34, %v11177_v1  ;;  %v2109_v44 = vsel %vm2099_vm4, %v2072_v16, %v2108_v58  ;;  %v11181_v31 = vrot.slane %v11180_v6, 1  ;;  %v11182_v39 = vld [vmem:[#allocation129_spill] sm:$0xff]  ;;  %v11185_v16 = vld [vmem:[#allocation126_spill] sm:$0xff]  ;;  %v11187_v58 = vld [vmem:[#allocation127_spill] sm:$0xff] }
 0x43a   : > { %v2258_v33 = vadd.f32 %v2257_v24, %v2256_v49  ;;  %v2074_v10 = vadd.f32 %v9263_v23, %v2056_v43  ;;  %v2110_v37 = vsel %vm2101_vm5, %v2073_v8, %v2109_v44  ;;  %v11183_v57 = vrot.slane %v11182_v39, 2  ;;  %v11188_v8 = vld [vmem:[#allocation128_spill] sm:$0xff] }
 0x43b   : > { %v2269_v45 = vrot.slane %v2268_v4, 2  ;;  %v2307_v51 = vadd.f32 %v11181_v31, %v11180_v6  ;;  %v2264_v12 = vrot.slane %v2263_v30, 1  ;;  %v2318_v41 = vrot.slane %v11184_v5, 2 }
 0x43c   : > { %v2312_v1 = vadd.f32 %v11183_v57, %v11182_v39  ;;  %v11186_v49 = vrot.slane %v11185_v16, 4  ;;  %v2331_v2 = vmul.f32 %v9268_v9, %v11187_v58  ;;  %v2111_v6 = vsel %vm2103_vm6, %v2074_v10, %v2110_v37  ;;  %v11189_v58 = vld [vmem:[#allocation135_spill] sm:$0xff] }
 0x43d   : > { %v2270_v34 = vadd.f32 %v2269_v45, %v2268_v4  ;;  %v2265_v23 = vadd.f32 %v2264_v12, %v2263_v30  ;;  %v2332_v44 = vmul.f32 %v9276_v28, %v11188_v8  ;;  %2115 = vst [vmem:[%s9339_s16 + $0x8] sm:$0xff] %v2111_v6  ;;  %v2319_v4 = vadd.f32 %v2318_v41, %v11184_v5  ;;  %v11190_v8 = vld [vmem:[#allocation138_spill] sm:$0xff] }
 0x43e   : > { %v2324_v24 = vadd.f32 %v11186_v49, %v11185_v16  ;;  %v2313_v43 = vrot.slane %v2312_v1, 1  ;;  %v2333_v39 = vmul.f32 %v9280_v50, %v2251_v48  ;;  %v2334_v16 = vmul.f32 %v9285_v21, %v2258_v33  ;;  %v11191_v48 = vld [vmem:[#allocation167_spill] sm:$0xff] }
 0x43f   : > { %v2271_v31 = vrot.slane %v2270_v34, 1  ;;  %v2335_v49 = vmul.f32 %v9290_v40, %v2265_v23  ;;  %v2339_v30 = vmul.f32 %v9299_v63, %v11189_v58  ;;  %v2320_v37 = vrot.slane %v2319_v4, 1  ;;  %v11193_v58 = vld [vmem:[#allocation133_spill] sm:$0xff] }
 0x440   : > { %v2325_v45 = vrot.slane %v2324_v24, 2  ;;  %v2314_v57 = vadd.f32 %v2313_v43, %v2312_v1  ;;  %v2340_v6 = vmul.f32 %v9304_v22, %v11190_v8  ;;  %v2341_v61 = vmul.f32 %v9310_v60, %v2307_v51 }
 0x441   : > { %v2272_v10 = vadd.f32 %v2271_v31, %v2270_v34  ;;  %v2346_v41 = vstv %s9354_s2  ;;  %v11192_v1 = vrot.slane %v11191_v48, 1  ;;  %v2321_v43 = vadd.f32 %v2320_v37, %v2319_v4  ;;  %v11194_v31 = vld [vmem:[#allocation134_spill] sm:$0xff]  ;;  %s6172_s2 = smov [#allocation16]  }
 0x442   : > { %v2326_v12 = vadd.f32 %v2325_v45, %v2324_v24  ;;  %v2342_v5 = vmul.f32 %v9317_v42, %v2314_v57  ;;  %v2347_v34 = vadd.f32 %v2346_v41, %v11193_v58  ;;  %v2348_v24 = vadd.f32 %v2346_v41, %v11194_v31 }
 0x443   : > { %v2532_v33 = vadd.f32 %v11192_v1, %v11191_v48  ;;  %v2336_v32 = vmul.f32 %v9295_v17, %v2272_v10  ;;  %v2349_v45 = vadd.f32 %v2346_v41, %v2331_v2  ;;  %v2350_v46 = vadd.f32 %v2346_v41, %v2332_v44  ;;  %v11196_v48 = vld [vmem:[#allocation137_spill] sm:$0xff] }
 0x444   : > { %v2327_v23 = vrot.slane %v2326_v12, 1  ;;  %v2351_v8 = vadd.f32 %v2346_v41, %v2333_v39  ;;  %v2343_v51 = vmul.f32 %v9326_v19, %v2321_v43  ;;  %v2352_v57 = vadd.f32 %v2346_v41, %v2334_v16  ;;  %v11197_v39 = vld [vmem:[#allocation30_spill] sm:$0xff] }
 0x445   : > { %v2353_v15 = vadd.f32 %v2346_v41, %v2335_v49  ;;  %v2354_v7 = vadd.f32 %v2346_v41, %v2336_v32  ;;  %v2355_v62 = vadd.f32 %v2346_v41, %v11195_v56  ;;  %v2356_v4 = vadd.f32 %v2346_v41, %v11196_v48 }
 0x446   : > { %v2328_v52 = vadd.f32 %v2327_v23, %v2326_v12  ;;  %v2357_v37 = vadd.f32 %v2346_v41, %v2339_v30  ;;  %v2358_v1 = vadd.f32 %v2346_v41, %v2340_v6  ;;  %v2359_v58 = vadd.f32 %v2346_v41, %v2341_v61  ;;  %v11199_v30 = vld [vmem:[#allocation166_spill] sm:$0xff] }
 0x447   : > { %v2360_v14 = vadd.f32 %v2346_v41, %v2342_v5  ;;  %v2361_v31 = vadd.f32 %v2346_v41, %v2343_v51  ;;  %v2379_v2 = vsel %vm2091_vm0, %v2348_v24, %v2347_v34  ;;  %v2386_v44 = vsel %vm2091_vm0, %v2356_v4, %v2355_v62  ;;  %v11200_v5 = vld [vmem:[#allocation165_spill] sm:$0xff] }
 0x448   : > { %v2344_v10 = vmul.f32 %v9343_v53, %v2328_v52  ;;  %v11198_v16 = vrot.slane %v11197_v39, 2  ;;  %v2380_v56 = vsel %vm2093_vm1, %v2349_v45, %v2379_v2  ;;  %v2387_v12 = vsel %vm2093_vm1, %v2357_v37, %v2386_v44  ;;  %v11202_v45 = vld [vmem:[#allocation174_spill] sm:$0xff]  ;;  %v11204_v2 = vld [vmem:[#allocation171_spill] sm:$0xff] }
 0x449   : > { %v2543_v43 = vrot.slane %v11199_v30, 2  ;;  %v2381_v52 = vsel %vm2095_vm2, %v2350_v46, %v2380_v56  ;;  %v2388_v61 = vsel %vm2095_vm2, %v2358_v1, %v2387_v12  ;;  %v11201_v23 = vrot.slane %v11200_v5, 4 }
 0x44a   : > { %v2537_v49 = vadd.f32 %v11198_v16, %v11197_v39  ;;  %v2362_v32 = vadd.f32 %v2346_v41, %v2344_v10  ;;  %v2382_v34 = vsel %vm2097_vm3, %v2351_v8, %v2381_v52  ;;  %v2389_v24 = vsel %vm2097_vm3, %v2359_v58, %v2388_v61  ;;  %v11209_v52 = vld [vmem:[#allocation169_spill] sm:$0xff] }
 0x44b   : > { %v2549_v62 = vadd.f32 %v11201_v23, %v11200_v5  ;;  %v2544_v41 = vadd.f32 %v2543_v43, %v11199_v30  ;;  %v11203_v51 = vrot.slane %v11202_v45, 1  ;;  %v2383_v46 = vsel %vm2099_vm4, %v2352_v57, %v2382_v34  ;;  %v11206_v30 = vld [vmem:[#allocation172_spill] sm:$0xff]  ;;  %v11210_v5 = vld [vmem:[#allocation170_spill] sm:$0xff] }
 0x44c   : > { %v2538_v6 = vrot.slane %v2537_v49, 1  ;;  %v2390_v4 = vsel %vm2099_vm4, %v2360_v14, %v2389_v24  ;;  %v2384_v8 = vsel %vm2101_vm5, %v2353_v15, %v2383_v46  ;;  %v11205_v44 = vrot.slane %v11204_v2, 2  ;;  %v11207_v43 = vld [vmem:[#allocation168_spill] sm:$0xff]  ;;  %v11211_v46 = vld [vmem:[#allocation177_spill] sm:$0xff] }
 0x44d   : > { %v2588_v48 = vadd.f32 %v11203_v51, %v11202_v45  ;;  %v2550_v10 = vrot.slane %v2549_v62, 2  ;;  %v2391_v1 = vsel %vm2101_vm5, %v2361_v31, %v2390_v4  ;;  %v2545_v58 = vrot.slane %v2544_v41, 1 }
 0x44e   : > { %v2539_v37 = vadd.f32 %v2538_v6, %v2537_v49  ;;  %v2593_v39 = vadd.f32 %v11205_v44, %v11204_v2  ;;  %v2385_v16 = vsel %vm2103_vm6, %v2354_v7, %v2384_v8  ;;  %v2392_v56 = vsel %vm2103_vm6, %v2362_v32, %v2391_v1 }
 0x44f   : > { %v2551_v12 = vadd.f32 %v2550_v10, %v2549_v62  ;;  %v2599_v57 = vrot.slane %v11206_v30, 2  ;;  %2395 = vst [vmem:[%s9339_s16 + $0x10] sm:$0xff] %v2385_v16  ;;  %2396 = vst [vmem:[%s9339_s16 + $0x18] sm:$0xff] %v2392_v56  ;;  %v2546_v14 = vadd.f32 %v2545_v58, %v2544_v41  ;;  %v11208_v15 = vrot.slane %v11207_v43, 4  ;;  %v11212_v10 = vld [vmem:[#allocation179_spill] sm:$0xff] }
 0x450   : > { %v2594_v49 = vrot.slane %v2593_v39, 1  ;;  %v2612_v61 = vmul.f32 %v9268_v9, %v11209_v52  ;;  %v2613_v32 = vmul.f32 %v9276_v28, %v11210_v5  ;;  %v2614_v23 = vmul.f32 %v9280_v50, %v2532_v33  ;;  %v11214_v56 = vld [vmem:[#allocation175_spill] sm:$0xff] }
 0x451   : > { %v2605_v31 = vadd.f32 %v11208_v15, %v11207_v43  ;;  %v2552_v6 = vrot.slane %v2551_v12, 1  ;;  %v2600_v7 = vadd.f32 %v2599_v57, %v11206_v30  ;;  %v2615_v24 = vmul.f32 %v9285_v21, %v2539_v37  ;;  %v11213_v37 = vld [vmem:[#allocation173_spill] sm:$0xff] }
 0x452   : > { %v2595_v62 = vadd.f32 %v2594_v49, %v2593_v39  ;;  %v2616_v41 = vmul.f32 %v9290_v40, %v2546_v14  ;;  %v2620_v4 = vmul.f32 %v9299_v63, %v11211_v46  ;;  %v2621_v8 = vmul.f32 %v9304_v22, %v11212_v10 }
 0x453   : > { %v2606_v34 = vrot.slane %v2605_v31, 2  ;;  %v2553_v45 = vadd.f32 %v2552_v6, %v2551_v12  ;;  %v2601_v51 = vrot.slane %v2600_v7, 1  ;;  %v2622_v58 = vmul.f32 %v9310_v60, %v2588_v48  ;;  %v11215_v6 = vld [vmem:[#allocation176_spill] sm:$0xff] }
 0x454   : > { %v2623_v2 = vmul.f32 %v9317_v42, %v2595_v62  ;;  %v2627_v33 = vstv %s9415_s17  ;;  %v11216_v62 = vld [vmem:[#allocation178_spill] sm:$0xff]  ;;  %s6082_s17 = sshll.u32 %s6172_s2, 4  ;;  %s6083_s17 = int_to_ptr.vmem [resolvable:$false] %s6082_s17 }
 0x455   : > { %v2607_v1 = vadd.f32 %v2606_v34, %v2605_v31  ;;  %v2602_v44 = vadd.f32 %v2601_v51, %v2600_v7  ;;  %v2617_v39 = vmul.f32 %v9295_v17, %v2553_v45  ;;  %v2628_v16 = vadd.f32 %v2627_v33, %v11213_v37  ;;  %p6085_p1 = scmp.lt.s32.totalorder %s9854_s21, %s6083_s17 }
 0x456   : > { %v2629_v12 = vadd.f32 %v2627_v33, %v11214_v56  ;;  %v2630_v57 = vadd.f32 %v2627_v33, %v2612_v61  ;;  %v2631_v14 = vadd.f32 %v2627_v33, %v2613_v32  ;;  %v2632_v49 = vadd.f32 %v2627_v33, %v2614_v23 }
 0x457   : > { %v2608_v30 = vrot.slane %v2607_v1, 1  ;;  %v2624_v43 = vmul.f32 %v9326_v19, %v2602_v44  ;;  %v2633_v15 = vadd.f32 %v2627_v33, %v2615_v24  ;;  %v2634_v31 = vadd.f32 %v2627_v33, %v2616_v41 }
 0x458   : > { %v2635_v52 = vadd.f32 %v2627_v33, %v2617_v39  ;;  %v2636_v5 = vadd.f32 %v2627_v33, %v11215_v6  ;;  %v2637_v7 = vadd.f32 %v2627_v33, %v11216_v62  ;;  %v2638_v34 = vadd.f32 %v2627_v33, %v2620_v4 }
 0x459   : > { %v2609_v48 = vadd.f32 %v2608_v30, %v2607_v1  ;;  %v2639_v45 = vadd.f32 %v2627_v33, %v2621_v8  ;;  %v2640_v51 = vadd.f32 %v2627_v33, %v2622_v58  ;;  %v2641_v46 = vadd.f32 %v2627_v33, %v2623_v2 }
 0x45a   : > { %v2642_v10 = vadd.f32 %v2627_v33, %v2624_v43  ;;  %v2660_v61 = vsel %vm2091_vm0, %v2629_v12, %v2628_v16  ;;  %v2667_v32 = vsel %vm2091_vm0, %v2637_v7, %v2636_v5  ;;  %v11217_v23 = vrot.slane %v9084_v27, 1 }
 0x45b   : > { %v2625_v37 = vmul.f32 %v9343_v53, %v2609_v48  ;;  %v2661_v41 = vsel %vm2093_vm1, %v2630_v57, %v2660_v61  ;;  %v2668_v1 = vsel %vm2093_vm1, %v2638_v34, %v2667_v32  ;;  %v11218_v4 = vrot.slane %v9079_v20, 2 }
 0x45c   : > { %v2813_v24 = vadd.f32 %v11217_v23, %v9084_v27  ;;  %v2824_v58 = vrot.slane %v9082_v25, 2  ;;  %v2662_v44 = vsel %vm2095_vm2, %v2631_v14, %v2661_v41  ;;  %v2669_v39 = vsel %vm2095_vm2, %v2639_v45, %v2668_v1  ;;  %v11226_v23 = vld [vmem:[#allocation49_spill] sm:$0xff] }
 0x45d   : > { %v2818_v8 = vadd.f32 %v11218_v4, %v9079_v20  ;;  %v2643_v2 = vadd.f32 %v2627_v33, %v2625_v37  ;;  %v11219_v16 = vrot.slane %v9071_v36, 4  ;;  %v2663_v27 = vsel %vm2097_vm3, %v2632_v49, %v2662_v44  ;;  %v11225_v37 = vld [vmem:[#allocation43_spill] sm:$0xff] }
 0x45e   : > { %v2670_v12 = vsel %vm2097_vm3, %v2640_v51, %v2669_v39  ;;  %v2825_v20 = vadd.f32 %v2824_v58, %v9082_v25  ;;  %v2664_v33 = vsel %vm2099_vm4, %v2633_v15, %v2663_v27  ;;  %v11220_v43 = vrot.slane %v9106_v3, 1  ;;  %v11222_v51 = vld [vmem:[#allocation29_spill] sm:$0xff]  ;;  %v11227_v39 = vld [vmem:[#allocation36_spill] sm:$0xff] }
 0x45f   : > { %v2830_v56 = vadd.f32 %v11219_v16, %v9071_v36  ;;  %v2819_v30 = vrot.slane %v2818_v8, 1  ;;  %v2671_v57 = vsel %vm2099_vm4, %v2641_v46, %v2670_v12  ;;  %v2665_v49 = vsel %vm2101_vm5, %v2634_v31, %v2664_v33  ;;  %v11223_v46 = vld [vmem:[#allocation41_spill] sm:$0xff] }
 0x460   : > { %v2869_v36 = vadd.f32 %v11220_v43, %v9106_v3  ;;  %v2672_v48 = vsel %vm2101_vm5, %v2642_v10, %v2671_v57  ;;  %v2826_v5 = vrot.slane %v2825_v20, 1  ;;  %v2666_v62 = vsel %vm2103_vm6, %v2635_v52, %v2665_v49  ;;  %v11228_v16 = vld [vmem:[#allocation69_spill] sm:$0xff] }
 0x461   : > { %v2831_v14 = vrot.slane %v2830_v56, 2  ;;  %v2820_v6 = vadd.f32 %v2819_v30, %v2818_v8  ;;  %v2673_v25 = vsel %vm2103_vm6, %v2643_v2, %v2672_v48  ;;  %v11221_v15 = vrot.slane %v9095_v54, 2  ;;  %2676 = vst [vmem:[%s9339_s16 + $0x20] sm:$0xff] %v2666_v62 }
 0x462   : > { %2677 = vst [vmem:[%s9339_s16 + $0x28] sm:$0xff] %v2673_v25  ;;  %v2827_v45 = vadd.f32 %v2826_v5, %v2825_v20  ;;  %v2880_v3 = vrot.slane %v11222_v51, 2  ;;  %v11224_v31 = vrot.slane %v11223_v46, 4  ;;  %v2893_v61 = vmul.f32 %v9268_v9, %v11225_v37 }
 0x463   : > { %v2832_v7 = vadd.f32 %v2831_v14, %v2830_v56  ;;  %v2874_v34 = vadd.f32 %v11221_v15, %v9095_v54  ;;  %v2894_v41 = vmul.f32 %v9276_v28, %v11226_v23  ;;  %v2895_v54 = vmul.f32 %v9280_v50, %v2813_v24 }
 0x464   : > { %v2886_v10 = vadd.f32 %v11224_v31, %v11223_v46  ;;  %v2881_v1 = vadd.f32 %v2880_v3, %v11222_v51  ;;  %v2896_v8 = vmul.f32 %v9285_v21, %v2820_v6  ;;  %v2897_v58 = vmul.f32 %v9290_v40, %v2827_v45  ;;  %v11229_v21 = vld [vmem:[#allocation97_spill] sm:$0xff]  ;;  %v11230_v40 = vld [vmem:[#allocation99_spill] sm:$0xff] }
 0x465   : > { %v2833_v52 = vrot.slane %v2832_v7, 1  ;;  %v2875_v32 = vrot.slane %v2874_v34, 1  ;;  %v2901_v9 = vmul.f32 %v9299_v63, %v11227_v39  ;;  %v2902_v56 = vmul.f32 %v9304_v22, %v11228_v16 }
 0x466   : > { %v2887_v4 = vrot.slane %v2886_v10, 2  ;;  %v2882_v27 = vrot.slane %v2881_v1, 1  ;;  %v2903_v28 = vmul.f32 %v9310_v60, %v2869_v36  ;;  %v2908_v50 = vstv %s9473_s22  ;;  %v11231_v36 = vld [vmem:[#allocation23_spill] sm:$0xff]  ;;  %s6084_s22 = scalar_lea.vmem %s6083_s17, 4096 }
 0x467   : > { %v2834_v2 = vadd.f32 %v2833_v52, %v2832_v7  ;;  %v2876_v44 = vadd.f32 %v2875_v32, %v2874_v34  ;;  %v2909_v20 = vadd.f32 %v2908_v50, %v11229_v21  ;;  %v2910_v33 = vadd.f32 %v2908_v50, %v11230_v40  ;;  %v11237_v21 = vld [vmem:[#allocation45_spill] sm:$0xff]  ;;  %p6086_p3 = scmp.lt.s32.totalorder %s6084_s22, %s6078_s18 }
 0x468   : > { %v2888_v12 = vadd.f32 %v2887_v4, %v2886_v10  ;;  %v2883_v57 = vadd.f32 %v2882_v27, %v2881_v1  ;;  %v2911_v43 = vadd.f32 %v2908_v50, %v2893_v61  ;;  %v2912_v63 = vadd.f32 %v2908_v50, %v2894_v41  ;;  %v11234_v61 = vld [vmem:[#allocation55_spill] sm:$0xff] }
 0x469   : > { %v2898_v24 = vmul.f32 %v9295_v17, %v2834_v2  ;;  %v2904_v30 = vmul.f32 %v9317_v42, %v2876_v44  ;;  %v2913_v49 = vadd.f32 %v2908_v50, %v2895_v54  ;;  %v2914_v48 = vadd.f32 %v2908_v50, %v2896_v8  ;;  %v11232_v17 = vld [vmem:[#allocation100_spill] sm:$0xff]  ;;  %v11235_v41 = vld [vmem:[#allocation71_spill] sm:$0xff]  ;;  %p6087_p5 = por %p6086_p3, %p6085_p1 }
 0x46a   : > { %v2889_v14 = vrot.slane %v2888_v12, 1  ;;  %v2915_v22 = vadd.f32 %v2908_v50, %v2897_v58  ;;  %v2905_v60 = vmul.f32 %v9326_v19, %v2883_v57  ;;  %v2917_v62 = vadd.f32 %v2908_v50, %v11231_v36  ;;  %v11233_v19 = vld [vmem:[#allocation44_spill] sm:$0xff] }
 0x46b   : > { %v2916_v6 = vadd.f32 %v2908_v50, %v2898_v24  ;;  %v2918_v25 = vadd.f32 %v2908_v50, %v11232_v17  ;;  %v2919_v42 = vadd.f32 %v2908_v50, %v2901_v9  ;;  %v2920_v7 = vadd.f32 %v2908_v50, %v2902_v56  ;;  %v11236_v44 = vld [vmem:[#allocation72_spill] sm:$0xff]  ;;  %p6088_p6 = pnand %p6087_p5, %p6081_p12 }
 0x46c   : > { %v2890_v5 = vadd.f32 %v2889_v14, %v2888_v12  ;;  %v2921_v15 = vadd.f32 %v2908_v50, %v2903_v28  ;;  %v2922_v34 = vadd.f32 %v2908_v50, %v2904_v30  ;;  %v2923_v51 = vadd.f32 %v2908_v50, %v2905_v60  ;;  %v11239_v14 = vld [vmem:[#allocation110_spill] sm:$0xff] }
 0x46d   : > { %v2941_v3 = vsel %vm2091_vm0, %v2910_v33, %v2909_v20  ;;  %v2948_v46 = vsel %vm2091_vm0, %v2918_v25, %v2917_v62  ;;  %v3983_v37 = vadd.f32 %v11233_v19, %v11102_v38  ;;  %v3990_v52 = vadd.f32 %v11234_v61, %v11103_v13 }
 0x46e   : > { %v2906_v45 = vmul.f32 %v9343_v53, %v2890_v5  ;;  %v2942_v31 = vsel %vm2093_vm1, %v2911_v43, %v2941_v3  ;;  %v2949_v10 = vsel %vm2093_vm1, %v2919_v42, %v2948_v46  ;;  %v3997_v54 = vadd.f32 %v11235_v41, %v11104_v47  ;;  %v11240_v43 = vld [vmem:[#allocation112_spill] sm:$0xff]  ;;  %v11243_v41 = vld [vmem:[#allocation118_spill] sm:$0xff] }
 0x46f   : > { %v2943_v23 = vsel %vm2095_vm2, %v2912_v63, %v2942_v31  ;;  %v2950_v53 = vsel %vm2095_vm2, %v2920_v7, %v2949_v10  ;;  %v3984_v8 = vrot.slane %v3983_v37, 4  ;;  %v3991_v58 = vrot.slane %v3990_v52, 4 }
 0x470   : > { %v2924_v32 = vadd.f32 %v2908_v50, %v2906_v45  ;;  %v2944_v1 = vsel %vm2097_vm3, %v2913_v49, %v2943_v23  ;;  %v2951_v4 = vsel %vm2097_vm3, %v2921_v15, %v2950_v53  ;;  %v3998_v2 = vrot.slane %v3997_v54, 4  ;;  %v11241_v49 = vld [vmem:[#allocation115_spill] sm:$0xff] }
 0x471   : > { %v2945_v38 = vsel %vm2099_vm4, %v2914_v48, %v2944_v1  ;;  %v2952_v13 = vsel %vm2099_vm4, %v2922_v34, %v2951_v4  ;;  %v4004_v39 = vadd.f32 %v11236_v44, %v11105_v18  ;;  %v3985_v16 = vadd.f32 %v3984_v8, %v3983_v37  ;;  %v11238_v18 = vld [vmem:[#allocation47_spill] sm:$0xff]  ;;  %v11242_v48 = vld [vmem:[#allocation116_spill] sm:$0xff]  ;;  %v11244_v1 = vld [vmem:[#allocation74_spill] sm:$0xff] }
 0x472   : > { %v2946_v9 = vsel %vm2101_vm5, %v2915_v22, %v2945_v38  ;;  %v2953_v47 = vsel %vm2101_vm5, %v2923_v51, %v2952_v13  ;;  %v3992_v56 = vadd.f32 %v3991_v58, %v3990_v52  ;;  %v3999_v28 = vadd.f32 %v3998_v2, %v3997_v54  ;;  %v11245_v13 = vld [vmem:[#allocation79_spill] sm:$0xff] }
 0x473   : > { %v2947_v27 = vsel %vm2103_vm6, %v2916_v6, %v2946_v9  ;;  %v2954_v12 = vsel %vm2103_vm6, %v2924_v32, %v2953_v47  ;;  %v4005_v50 = vrot.slane %v4004_v39, 4  ;;  %v3986_v24 = vrot.slane %v3985_v16, 2 }
 0x474   : > { %2957 = vst [vmem:[%s9339_s16 + $0x30] sm:$0xff] %v2947_v27  ;;  %2958 = vst [vmem:[%s9339_s16 + $0x38] sm:$0xff] %v2954_v12  ;;  %v3993_v30 = vrot.slane %v3992_v56, 2  ;;  %v4011_v20 = vadd.f32 %v11237_v21, %v11106_v11  ;;  %v4018_v40 = vadd.f32 %v11238_v18, %v11107_v0  ;;  %v4000_v33 = vrot.slane %v3999_v28, 2  ;;  %v11246_v12 = vld [vmem:[#allocation81_spill] sm:$0xff] }
 0x475   : > { %v4006_v57 = vadd.f32 %v4005_v50, %v4004_v39  ;;  %v4039_v63 = vadd.f32 %v11240_v43, %v11239_v14  ;;  %v4046_v22 = vadd.f32 %v11242_v48, %v11241_v49  ;;  %v3987_v6 = vadd.f32 %v3986_v24, %v3985_v16  ;;  %v11247_v43 = vld [vmem:[#allocation65_spill] sm:$0xff] }
 0x476   : > { %v3994_v5 = vadd.f32 %v3993_v30, %v3992_v56  ;;  %v4012_v60 = vrot.slane %v4011_v20, 4  ;;  %v4019_v36 = vrot.slane %v4018_v40, 4  ;;  %v4001_v62 = vadd.f32 %v4000_v33, %v3999_v28 }
 0x477   : > { %v4007_v17 = vrot.slane %v4006_v57, 2  ;;  %v4040_v25 = vrot.slane %v4039_v63, 4  ;;  %v4047_v42 = vrot.slane %v4046_v22, 4  ;;  %v3988_v11 = vrot.slane %v3987_v6, 1 }
 0x478   : > { %v3995_v7 = vrot.slane %v3994_v5, 1  ;;  %v4013_v15 = vadd.f32 %v4012_v60, %v4011_v20  ;;  %v4020_v0 = vadd.f32 %v4019_v36, %v4018_v40  ;;  %v4002_v34 = vrot.slane %v4001_v62, 1 }
 0x479   : > { %v4008_v45 = vadd.f32 %v4007_v17, %v4006_v57  ;;  %v4041_v51 = vadd.f32 %v4040_v25, %v4039_v63  ;;  %v4048_v3 = vadd.f32 %v4047_v42, %v4046_v22  ;;  %v5135_v46 = vrot.slane %v9194_v55, 2  ;;  %v11249_v22 = vld [vmem:[#allocation50_spill] sm:$0xff] }
 0x47a   : > { %v3989_v31 = vadd.f32 %v3988_v11, %v3987_v6  ;;  %v4014_v10 = vrot.slane %v4013_v15, 2  ;;  %v4021_v19 = vrot.slane %v4020_v0, 2  ;;  %v3996_v37 = vadd.f32 %v3995_v7, %v3994_v5  ;;  %v11250_v7 = vld [vmem:[#allocation31_spill] sm:$0xff] }
 0x47b   : > { %v4009_v61 = vrot.slane %v4008_v45, 1  ;;  %v4042_v52 = vrot.slane %v4041_v51, 2  ;;  %v4049_v32 = vrot.slane %v4048_v3, 2  ;;  %v4053_v54 = vadd.f32 %v11112_v59, %v11243_v41 }
 0x47c   : > { %v4015_v23 = vadd.f32 %v4014_v10, %v4013_v15  ;;  %v4022_v53 = vadd.f32 %v4021_v19, %v4020_v0  ;;  %v4060_v4 = vadd.f32 %v11114_v35, %v11244_v1  ;;  %v4003_v8 = vadd.f32 %v4002_v34, %v4001_v62  ;;  %v11252_v10 = vld [vmem:[#allocation67_spill] sm:$0xff]  ;;  %v11256_v1 = vld [vmem:[#allocation80_spill] sm:$0xff] }
 0x47d   : > { %v4043_v58 = vadd.f32 %v4042_v52, %v4041_v51  ;;  %v4050_v38 = vadd.f32 %v4049_v32, %v4048_v3  ;;  %v4067_v2 = vadd.f32 %v11245_v13, %v11115_v29  ;;  %v4054_v9 = vrot.slane %v4053_v54, 4  ;;  %v11254_v32 = vld [vmem:[#allocation113_spill] sm:$0xff] }
 0x47e   : > { %v4016_v44 = vrot.slane %v4015_v23, 1  ;;  %v4023_v39 = vrot.slane %v4022_v53, 1  ;;  %v4061_v47 = vrot.slane %v4060_v4, 4  ;;  %v4074_v28 = vadd.f32 %v11116_v26, %v11246_v12 }
 0x47f   : > { %v4044_v16 = vrot.slane %v4043_v58, 1  ;;  %v4051_v56 = vrot.slane %v4050_v38, 1  ;;  %v4068_v27 = vrot.slane %v4067_v2, 4  ;;  %v4010_v59 = vadd.f32 %v4009_v61, %v4008_v45 }
 0x480   : > { %v4017_v50 = vadd.f32 %v4016_v44, %v4015_v23  ;;  %v4055_v24 = vadd.f32 %v4054_v9, %v4053_v54  ;;  %v4062_v35 = vadd.f32 %v4061_v47, %v4060_v4  ;;  %v4024_v30 = vadd.f32 %v4023_v39, %v4022_v53  ;;  %v11259_v9 = vld [vmem:[#allocation121_spill] sm:$0xff] }
 0x481   : > { %v4045_v21 = vadd.f32 %v4044_v16, %v4043_v58  ;;  %v4069_v20 = vadd.f32 %v4068_v27, %v4067_v2  ;;  %v4075_v18 = vrot.slane %v4074_v28, 4  ;;  %v4052_v40 = vadd.f32 %v4051_v56, %v4050_v38  ;;  %v11257_v58 = vld [vmem:[#allocation109_spill] sm:$0xff]  ;;  %v11260_v16 = vld [vmem:[#allocation75_spill] sm:$0xff] }
 0x482   : > { %v4056_v29 = vrot.slane %v4055_v24, 2  ;;  %v4063_v33 = vrot.slane %v4062_v35, 2  ;;  %5877 = vrcp.f32 %v3989_v31  ;;  %v11248_v63 = vrot.slane %v11247_v43, 2 }
 0x483   : > { %v4070_v57 = vrot.slane %v4069_v20, 2  ;;  %v4076_v14 = vadd.f32 %v4075_v18, %v4074_v28  ;;  %5879 = vrcp.f32 %v3996_v37  ;;  %v4243_v6 = vrot.slane %v11249_v22, 2  ;;  %v11262_v28 = vld [vmem:[#allocation123_spill] sm:$0xff]  ;;  %v11264_v18 = vld [vmem:[#allocation77_spill] sm:$0xff] }
 0x484   : > { %v4237_v49 = vadd.f32 %v11248_v63, %v11247_v43  ;;  %v4057_v26 = vadd.f32 %v4056_v29, %v4055_v24  ;;  %v4064_v48 = vadd.f32 %v4063_v33, %v4062_v35  ;;  %5881 = vrcp.f32 %v4003_v8  ;;  %v11266_v43 = vld [vmem:[#allocation142_spill] sm:$0xff] }
 0x485   : > { %v4071_v5 = vadd.f32 %v4070_v57, %v4069_v20  ;;  %v4077_v60 = vrot.slane %v4076_v14, 2  ;;  %5883 = vrcp.f32 %v4010_v59  ;;  %v4244_v25 = vadd.f32 %v4243_v6, %v11249_v22  ;;  %v11265_v57 = vld [vmem:[#allocation117_spill] sm:$0xff] }
 0x486   : > { %v4238_v36 = vrot.slane %v4237_v49, 1  ;;  %v4058_v62 = vrot.slane %v4057_v26, 1  ;;  %v4065_v17 = vrot.slane %v4064_v48, 1  ;;  %5885 = vrcp.f32 %v4017_v50  ;;  %v11263_v50 = vld [vmem:[#allocation114_spill] sm:$0xff] }
 0x487   : > { %v4072_v42 = vrot.slane %v4071_v5, 1  ;;  %v4078_v11 = vadd.f32 %v4077_v60, %v4076_v14  ;;  %5887 = vrcp.f32 %v4024_v30  ;;  %v11251_v15 = vrot.slane %v11250_v7, 1  ;;  %v11270_v60 = vld [vmem:[#allocation119_spill] sm:$0xff] }
 0x488   : > { %v4059_v34 = vadd.f32 %v4058_v62, %v4057_v26  ;;  %v4066_v45 = vadd.f32 %v4065_v17, %v4064_v48  ;;  %5889 = vrcp.f32 %v4045_v21  ;;  %v4245_v51 = vrot.slane %v4244_v25, 1  ;;  %v11268_v26 = vld [vmem:[#allocation139_spill] sm:$0xff] }
 0x489   : > { %v4232_v0 = vadd.f32 %v11251_v15, %v11250_v7  ;;  %v4073_v3 = vadd.f32 %v4072_v42, %v4071_v5  ;;  %v4079_v31 = vrot.slane %v4078_v11, 1  ;;  %5891 = vrcp.f32 %v4052_v40 }
 0x48a   : > { %v11253_v19 = vrot.slane %v11252_v10, 4  ;;  %5893 = vrcp.f32 %v4059_v34  ;;  %v4239_v61 = vadd.f32 %v4238_v36, %v4237_v49  ;;  %v4246_v52 = vadd.f32 %v4245_v51, %v4244_v25 }
 0x48b   : > { %v11255_v23 = vrot.slane %v11254_v32, 2  ;;  %v4080_v41 = vadd.f32 %v4079_v31, %v4078_v11  ;;  %5895 = vrcp.f32 %v4066_v45  ;;  %v4299_v4 = vrot.slane %v11256_v1, 2 }
 0x48c   : > { %v4249_v37 = vadd.f32 %v11253_v19, %v11252_v10  ;;  %5897 = vrcp.f32 %v4073_v3  ;;  %v11258_v38 = vrot.slane %v11257_v58, 4  ;;  %v9577_v2 = vstv %s9560_s20  ;;  %v11271_v3 = vld [vmem:[#allocation141_spill] sm:$0xff]  ;;  %v11272_v10 = vld [vmem:[#allocation140_spill] sm:$0xff] }
 0x48d   : > { %v4293_v53 = vadd.f32 %v11255_v23, %v11254_v32  ;;  %5899 = vrcp.f32 %v4080_v41  ;;  %v4300_v39 = vadd.f32 %v4299_v4, %v11256_v1  ;;  %v4328_v47 = vadd.f32 %v9577_v2, %v11259_v9 }
 0x48e   : > { %v4250_v54 = vrot.slane %v4249_v37, 2  ;;  %v4305_v13 = vadd.f32 %v11258_v38, %v11257_v58  ;;  %v11261_v56 = vrot.slane %v11260_v16, 1  ;;  %v4329_v59 = vadd.f32 %v9577_v2, %v11262_v28  ;;  %v11274_v38 = vld [vmem:[#allocation122_spill] sm:$0xff] }
 0x48f   : > { %v4294_v8 = vrot.slane %v4293_v53, 1  ;;  %v4336_v24 = vadd.f32 %v9577_v2, %v11263_v50  ;;  %v9589_v35 = vpop.eup %5877  ;;  %v4301_v20 = vrot.slane %v4300_v39, 1  ;;  %v4337_v40 = vadd.f32 %v9577_v2, %v11264_v18 }
 0x490   : > { %v4251_v44 = vadd.f32 %v4250_v54, %v4249_v37  ;;  %v4288_v27 = vadd.f32 %v11261_v56, %v11260_v16  ;;  %v4306_v12 = vrot.slane %v4305_v13, 2  ;;  %v9593_v29 = vpop.eup %5879  ;;  %v4312_v14 = vmul.f32 %v9589_v35, %v11265_v57 }
 0x491   : > { %v4295_v21 = vadd.f32 %v4294_v8, %v4293_v53  ;;  %v11267_v63 = vrot.slane %v11266_v43, 1  ;;  %v11269_v48 = vrot.slane %v11268_v26, 2  ;;  %v9605_v6 = vpop.eup %5881  ;;  %v4313_v36 = vmul.f32 %v9593_v29, %v11270_v60 }
 0x492   : > { %v4252_v30 = vrot.slane %v4251_v44, 1  ;;  %v4307_v33 = vadd.f32 %v4306_v12, %v4305_v13  ;;  %v4360_v62 = vsel %vm2091_vm0, %v4329_v59, %v4328_v47  ;;  %v4367_v17 = vsel %vm2091_vm0, %v4337_v40, %v4336_v24  ;;  %v9611_v25 = vpop.eup %5883  ;;  %v11275_v47 = vld [vmem:[#allocation124_spill] sm:$0xff] }
 0x493   : > { %v9600_v49 = vadd.f32 %v11267_v63, %v11266_v43  ;;  %v4518_v22 = vadd.f32 %v11269_v48, %v11268_v26  ;;  %v4302_v42 = vadd.f32 %v4301_v20, %v4300_v39  ;;  %v4314_v7 = vmul.f32 %v9605_v6, %v4232_v0  ;;  %v9615_v34 = vpop.eup %5885 }
 0x494   : > { %v4253_v5 = vadd.f32 %v4252_v30, %v4251_v44  ;;  %v4308_v11 = vrot.slane %v4307_v33, 1  ;;  %v4330_v15 = vadd.f32 %v9577_v2, %v4312_v14  ;;  %v4315_v45 = vmul.f32 %v9611_v25, %v4239_v61  ;;  %v9623_v32 = vpop.eup %5887 }
 0x495   : > { %v4331_v51 = vadd.f32 %v9577_v2, %v4313_v36  ;;  %v4524_v31 = vrot.slane %v11271_v3, 2  ;;  %v11273_v19 = vrot.slane %v11272_v10, 4  ;;  %v4316_v23 = vmul.f32 %v9615_v34, %v4246_v52  ;;  %v9628_v54 = vpop.eup %5889 }
 0x496   : > { %v4332_v0 = vadd.f32 %v9577_v2, %v4314_v7  ;;  %v4361_v53 = vsel %vm2093_vm1, %v4330_v15, %v4360_v62  ;;  %v4519_v41 = vrot.slane %v4518_v22, 1  ;;  %v4309_v61 = vadd.f32 %v4308_v11, %v4307_v33  ;;  %v9633_v58 = vpop.eup %5891  ;;  %v11276_v7 = vld [vmem:[#allocation144_spill] sm:$0xff] }
 0x497   : > { %v4530_v37 = vadd.f32 %v11273_v19, %v11272_v10  ;;  %v4317_v1 = vmul.f32 %v9623_v32, %v4253_v5  ;;  %v4333_v4 = vadd.f32 %v9577_v2, %v4315_v45  ;;  %v4362_v8 = vsel %vm2095_vm2, %v4331_v51, %v4361_v53  ;;  %v9640_v9 = vpop.eup %5893  ;;  %v11278_v51 = vld [vmem:[#allocation149_spill] sm:$0xff]  ;;  %v11280_v10 = vld [vmem:[#allocation150_spill] sm:$0xff]  ;;  %v11281_v53 = vld [vmem:[#allocation143_spill] sm:$0xff] }
 0x498   : > { %v4320_v13 = vmul.f32 %v9628_v54, %v11274_v38  ;;  %v4334_v52 = vadd.f32 %v9577_v2, %v4316_v23  ;;  %v4363_v44 = vsel %vm2097_vm3, %v4332_v0, %v4362_v8  ;;  %v4525_v39 = vadd.f32 %v4524_v31, %v11271_v3  ;;  %v9646_v59 = vpop.eup %5895  ;;  %v11284_v38 = vld [vmem:[#allocation148_spill] sm:$0xff] }
 0x499   : > { %v4321_v16 = vmul.f32 %v9633_v58, %v11275_v47  ;;  %v4335_v56 = vadd.f32 %v9577_v2, %v4317_v1  ;;  %v4364_v12 = vsel %vm2099_vm4, %v4333_v4, %v4363_v44  ;;  %v4531_v28 = vrot.slane %v4530_v37, 2  ;;  %v9651_v18 = vpop.eup %5897  ;;  %v11283_v4 = vld [vmem:[#allocation146_spill] sm:$0xff] }
 0x49a   : > { %v4322_v50 = vmul.f32 %v9640_v9, %v4288_v27  ;;  %v4338_v24 = vadd.f32 %v9577_v2, %v4320_v13  ;;  %v4365_v30 = vsel %vm2101_vm5, %v4334_v52, %v4364_v12  ;;  %v4526_v20 = vrot.slane %v4525_v39, 1  ;;  %v9656_v43 = vpop.eup %5899  ;;  %v11285_v12 = vld [vmem:[#allocation153_spill] sm:$0xff] }
 0x49b   : > { %v4323_v40 = vmul.f32 %v9646_v59, %v4295_v21  ;;  %v4339_v33 = vadd.f32 %v9577_v2, %v4321_v16  ;;  %v4366_v57 = vsel %vm2103_vm6, %v4335_v56, %v4365_v30  ;;  %v4532_v14 = vadd.f32 %v4531_v28, %v4530_v37 }
 0x49c   : > { %v4324_v63 = vmul.f32 %v9651_v18, %v4302_v42  ;;  %v4340_v27 = vadd.f32 %v9577_v2, %v4322_v50  ;;  %v4368_v26 = vsel %vm2093_vm1, %v4338_v24, %v4367_v17  ;;  %4376 = vst [vmem:[%s9339_s16 + $0x40] sm:$0xff] %v4366_v57  ;;  %v4520_v48 = vadd.f32 %v4519_v41, %v4518_v22  ;;  %v11286_v50 = vld [vmem:[#allocation154_spill] sm:$0xff] }
 0x49d   : > { %v4325_v5 = vmul.f32 %v9656_v43, %v4309_v61  ;;  %v4341_v21 = vadd.f32 %v9577_v2, %v4323_v40  ;;  %v4369_v60 = vsel %vm2095_vm2, %v4339_v33, %v4368_v26  ;;  %v4533_v36 = vrot.slane %v4532_v14, 1 }
 0x49e   : > { %v4342_v62 = vadd.f32 %v9577_v2, %v4324_v63  ;;  %v4370_v42 = vsel %vm2097_vm3, %v4340_v27, %v4369_v60  ;;  %v4527_v11 = vadd.f32 %v4526_v20, %v4525_v39  ;;  %v11277_v17 = vrot.slane %v11276_v7, 2  ;;  %v11288_v27 = vld [vmem:[#allocation152_spill] sm:$0xff] }
 0x49f   : > { %v4343_v22 = vadd.f32 %v9577_v2, %v4325_v5  ;;  %v4371_v45 = vsel %vm2099_vm4, %v4341_v21, %v4370_v42  ;;  %v11279_v3 = vrot.slane %v11278_v51, 1  ;;  %v4580_v19 = vrot.slane %v11280_v10, 2 }
 0x4a0   : > { %v4574_v15 = vadd.f32 %v11277_v17, %v11276_v7  ;;  %v4372_v37 = vsel %vm2101_vm5, %v4342_v62, %v4371_v45  ;;  %v4534_v23 = vadd.f32 %v4533_v36, %v4532_v14  ;;  %v11282_v41 = vrot.slane %v11281_v53, 4  ;;  %v11287_v14 = vld [vmem:[#allocation151_spill] sm:$0xff]  ;;  %v11291_v17 = vld [vmem:[#allocation145_spill] sm:$0xff] }
 0x4a1   : > { %v4569_v31 = vadd.f32 %v11279_v3, %v11278_v51  ;;  %v4373_v1 = vsel %vm2103_vm6, %v4343_v22, %v4372_v37  ;;  %v4581_v2 = vadd.f32 %v4580_v19, %v11280_v10  ;;  %v4593_v8 = vmul.f32 %v9589_v35, %v11283_v4  ;;  %v11292_v51 = vld [vmem:[#allocation147_spill] sm:$0xff]  ;;  %v11293_v4 = vld [vmem:[#allocation157_spill] sm:$0xff] }
 0x4a2   : > { %v4575_v0 = vrot.slane %v4574_v15, 1  ;;  %v4586_v61 = vadd.f32 %v11282_v41, %v11281_v53  ;;  %v4594_v13 = vmul.f32 %v9593_v29, %v11284_v38  ;;  %4377 = vst [vmem:[%s9339_s16 + $0x48] sm:$0xff] %v4373_v1  ;;  %v4595_v39 = vmul.f32 %v9605_v6, %v9600_v49 }
 0x4a3   : > { %v4596_v47 = vmul.f32 %v9611_v25, %v4520_v48  ;;  %v4582_v16 = vrot.slane %v4581_v2, 1  ;;  %v4597_v56 = vmul.f32 %v9615_v34, %v4527_v11  ;;  %v4601_v28 = vmul.f32 %v9628_v54, %v11285_v12  ;;  %v11289_v48 = vld [vmem:[#allocation34_spill] sm:$0xff] }
 0x4a4   : > { %v4576_v52 = vadd.f32 %v4575_v0, %v4574_v15  ;;  %v4587_v44 = vrot.slane %v4586_v61, 2  ;;  %v4602_v24 = vmul.f32 %v9633_v58, %v11286_v50  ;;  %v4603_v20 = vmul.f32 %v9640_v9, %v4569_v31 }
 0x4a5   : > { %v4608_v33 = vstv %s9662_s23  ;;  %v4583_v57 = vadd.f32 %v4582_v16, %v4581_v2  ;;  %v4598_v49 = vmul.f32 %v9623_v32, %v4534_v23  ;;  %v11290_v5 = vrot.slane %v11289_v48, 2  ;;  %v11296_v16 = vld [vmem:[#allocation180_spill] sm:$0xff] }
 0x4a6   : > { %v4588_v30 = vadd.f32 %v4587_v44, %v4586_v61  ;;  %v4604_v40 = vmul.f32 %v9646_v59, %v4576_v52  ;;  %v4609_v63 = vadd.f32 %v4608_v33, %v11287_v14  ;;  %v4610_v26 = vadd.f32 %v4608_v33, %v11288_v27  ;;  %v11298_v27 = vld [vmem:[#allocation159_spill] sm:$0xff] }
 0x4a7   : > { %v9706_v21 = vadd.f32 %v11290_v5, %v11289_v48  ;;  %v4611_v36 = vadd.f32 %v4608_v33, %v4593_v8  ;;  %v4612_v62 = vadd.f32 %v4608_v33, %v4594_v13  ;;  %v4605_v42 = vmul.f32 %v9651_v18, %v4583_v57  ;;  %v11295_v13 = vld [vmem:[#allocation158_spill] sm:$0xff] }
 0x4a8   : > { %v4589_v60 = vrot.slane %v4588_v30, 1  ;;  %v4613_v11 = vadd.f32 %v4608_v33, %v4595_v39  ;;  %v4614_v7 = vadd.f32 %v4608_v33, %v4596_v47  ;;  %v4617_v15 = vadd.f32 %v4608_v33, %v11291_v17 }
 0x4a9   : > { %v4615_v45 = vadd.f32 %v4608_v33, %v4597_v56  ;;  %v4618_v3 = vadd.f32 %v4608_v33, %v11292_v51  ;;  %v4619_v31 = vadd.f32 %v4608_v33, %v4601_v28  ;;  %v4616_v10 = vadd.f32 %v4608_v33, %v4598_v49 }
 0x4aa   : > { %v4590_v22 = vadd.f32 %v4589_v60, %v4588_v30  ;;  %v4620_v19 = vadd.f32 %v4608_v33, %v4602_v24  ;;  %v4621_v37 = vadd.f32 %v4608_v33, %v4603_v20  ;;  %v4641_v23 = vsel %vm2091_vm0, %v4610_v26, %v4609_v63 }
 0x4ab   : > { %v4622_v53 = vadd.f32 %v4608_v33, %v4604_v40  ;;  %v4642_v41 = vsel %vm2093_vm1, %v4611_v36, %v4641_v23  ;;  %v4648_v61 = vsel %vm2091_vm0, %v4618_v3, %v4617_v15  ;;  %v11294_v8 = vrot.slane %v11293_v4, 2  ;;  %v11305_v3 = vld [vmem:[#allocation160_spill] sm:$0xff] }
 0x4ac   : > { %v4606_v0 = vmul.f32 %v9656_v43, %v4590_v22  ;;  %v4643_v1 = vsel %vm2095_vm2, %v4612_v62, %v4642_v41  ;;  %v4649_v2 = vsel %vm2093_vm1, %v4619_v31, %v4648_v61  ;;  %v4805_v52 = vrot.slane %v11295_v13, 2  ;;  %v11300_v62 = vld [vmem:[#allocation161_spill] sm:$0xff]  ;;  %v11308_v61 = vld [vmem:[#allocation163_spill] sm:$0xff] }
 0x4ad   : > { %v4799_v38 = vadd.f32 %v11294_v8, %v11293_v4  ;;  %v4623_v44 = vadd.f32 %v4608_v33, %v4605_v42  ;;  %v4644_v39 = vsel %vm2097_vm3, %v4613_v11, %v4643_v1  ;;  %v4650_v47 = vsel %vm2095_vm2, %v4620_v19, %v4649_v2  ;;  %v11302_v11 = vld [vmem:[#allocation182_spill] sm:$0xff]  ;;  %v11303_v22 = vld [vmem:[#allocation181_spill] sm:$0xff] }
 0x4ae   : > { %v11297_v56 = vrot.slane %v11296_v16, 4  ;;  %v4645_v28 = vsel %vm2099_vm4, %v4614_v7, %v4644_v39  ;;  %v4651_v50 = vsel %vm2097_vm3, %v4621_v37, %v4650_v47  ;;  %v4806_v30 = vadd.f32 %v4805_v52, %v11295_v13  ;;  %v11309_v4 = vld [vmem:[#allocation186_spill] sm:$0xff] }
 0x4af   : > { %v4800_v24 = vrot.slane %v4799_v38, 1  ;;  %v4624_v20 = vadd.f32 %v4608_v33, %v4606_v0  ;;  %v4646_v40 = vsel %vm2101_vm5, %v4615_v45, %v4645_v28  ;;  %v4652_v57 = vsel %vm2099_vm4, %v4622_v53, %v4651_v50  ;;  %v11307_v0 = vld [vmem:[#allocation162_spill] sm:$0xff] }
 0x4b0   : > { %v4811_v12 = vadd.f32 %v11297_v56, %v11296_v16  ;;  %v4647_v14 = vsel %vm2103_vm6, %v4616_v10, %v4646_v40  ;;  %v4653_v63 = vsel %vm2101_vm5, %v4623_v44, %v4652_v57  ;;  %v11299_v26 = vrot.slane %v11298_v27, 1  ;;  %v11310_v44 = vld [vmem:[#allocation155_spill] sm:$0xff] }
 0x4b1   : > { %v4807_v5 = vrot.slane %v4806_v30, 1  ;;  %v4654_v60 = vsel %vm2103_vm6, %v4624_v20, %v4653_v63  ;;  %4657 = vst [vmem:[%s9339_s16 + $0x50] sm:$0xff] %v4647_v14  ;;  %v11301_v33 = vrot.slane %v11300_v62, 2  ;;  %v4861_v7 = vrot.slane %v11302_v11, 2  ;;  %v11311_v20 = vld [vmem:[#allocation68_spill] sm:$0xff]  ;;  %v11313_v63 = vld [vmem:[#allocation185_spill] sm:$0xff] }
 0x4b2   : > { %v4812_v49 = vrot.slane %v4811_v12, 2  ;;  %v4794_v48 = vadd.f32 %v11299_v26, %v11298_v27  ;;  %4658 = vst [vmem:[%s9339_s16 + $0x58] sm:$0xff] %v4654_v60  ;;  %v4801_v17 = vadd.f32 %v4800_v24, %v4799_v38  ;;  %v11304_v45 = vrot.slane %v11303_v22, 1 }
 0x4b3   : > { %v4855_v42 = vadd.f32 %v11301_v33, %v11300_v62  ;;  %v4808_v15 = vadd.f32 %v4807_v5, %v4806_v30  ;;  %v11306_v31 = vrot.slane %v11305_v3, 4  ;;  %v4862_v23 = vadd.f32 %v4861_v7, %v11302_v11  ;;  %v11314_v33 = vld [vmem:[#allocation164_spill] sm:$0xff]  ;;  %v11315_v11 = vld [vmem:[#allocation183_spill] sm:$0xff] }
 0x4b4   : > { %v4813_v36 = vadd.f32 %v4812_v49, %v4811_v12  ;;  %v4850_v51 = vadd.f32 %v11304_v45, %v11303_v22  ;;  %v4874_v53 = vmul.f32 %v9589_v35, %v11307_v0  ;;  %v4875_v1 = vmul.f32 %v9593_v29, %v11308_v61  ;;  %v11312_v49 = vld [vmem:[#allocation184_spill] sm:$0xff]  ;;  %v11316_v0 = vld [vmem:[#allocation86_spill] sm:$0xff] }
 0x4b5   : > { %v4867_v10 = vadd.f32 %v11306_v31, %v11305_v3  ;;  %v4856_v37 = vrot.slane %v4855_v42, 1  ;;  %v4876_v2 = vmul.f32 %v9605_v6, %v4794_v48  ;;  %v4882_v8 = vmul.f32 %v9628_v54, %v11309_v4 }
 0x4b6   : > { %v4814_v19 = vrot.slane %v4813_v36, 1  ;;  %v4863_v52 = vrot.slane %v4862_v23, 1  ;;  %v4883_v39 = vmul.f32 %v9633_v58, %v11310_v44  ;;  %v4877_v16 = vmul.f32 %v9611_v25, %v4801_v17  ;;  %v11319_v44 = vld [vmem:[#allocation84_spill] sm:$0xff] }
 0x4b7   : > { %v4868_v41 = vrot.slane %v4867_v10, 2  ;;  %v4857_v13 = vadd.f32 %v4856_v37, %v4855_v42  ;;  %v4884_v56 = vmul.f32 %v9640_v9, %v4850_v51  ;;  %v4889_v12 = vstv %s9729_s24 }
 0x4b8   : > { %v4815_v38 = vadd.f32 %v4814_v19, %v4813_v36  ;;  %v4864_v28 = vadd.f32 %v4863_v52, %v4862_v23  ;;  %v4878_v50 = vmul.f32 %v9615_v34, %v4808_v15  ;;  %v5123_v40 = vrot.slane %v11311_v20, 1 }
 0x4b9   : > { %v4869_v47 = vadd.f32 %v4868_v41, %v4867_v10  ;;  %v4885_v30 = vmul.f32 %v9646_v59, %v4857_v13  ;;  %v4890_v14 = vadd.f32 %v4889_v12, %v11312_v49  ;;  %v4891_v27 = vadd.f32 %v4889_v12, %v11313_v63 }
 0x4ba   : > { %v4879_v24 = vmul.f32 %v9623_v32, %v4815_v38  ;;  %v4886_v26 = vmul.f32 %v9651_v18, %v4864_v28  ;;  %v4892_v48 = vadd.f32 %v4889_v12, %v4874_v53  ;;  %v4893_v5 = vadd.f32 %v4889_v12, %v4875_v1 }
 0x4bb   : > { %v4870_v57 = vrot.slane %v4869_v47, 1  ;;  %v4894_v60 = vadd.f32 %v4889_v12, %v4876_v2  ;;  %v4895_v62 = vadd.f32 %v4889_v12, %v4877_v16  ;;  %v4898_v42 = vadd.f32 %v4889_v12, %v11314_v33  ;;  %v11317_v2 = vld [vmem:[#allocation94_spill] sm:$0xff]  ;;  %v11325_v33 = vld [vmem:[#allocation91_spill] sm:$0xff] }
 0x4bc   : > { %v4899_v7 = vadd.f32 %v4889_v12, %v11315_v11  ;;  %v4896_v17 = vadd.f32 %v4889_v12, %v4878_v50  ;;  %v4897_v15 = vadd.f32 %v4889_v12, %v4879_v24  ;;  %v4900_v22 = vadd.f32 %v4889_v12, %v4882_v8  ;;  %v11321_v24 = vld [vmem:[#allocation105_spill] sm:$0xff]  ;;  %v11326_v11 = vld [vmem:[#allocation103_spill] sm:$0xff] }
 0x4bd   : > { %v4871_v36 = vadd.f32 %v4870_v57, %v4869_v47  ;;  %v4901_v45 = vadd.f32 %v4889_v12, %v4883_v39  ;;  %v4902_v3 = vadd.f32 %v4889_v12, %v4884_v56  ;;  %v4922_v31 = vsel %vm2091_vm0, %v4891_v27, %v4890_v14 }
 0x4be   : > { %v4929_v10 = vsel %vm2091_vm0, %v4899_v7, %v4898_v42  ;;  %v4903_v19 = vadd.f32 %v4889_v12, %v4885_v30  ;;  %v4923_v37 = vsel %vm2093_vm1, %v4892_v48, %v4922_v31  ;;  %v5086_v53 = vrot.slane %v11316_v0, 2  ;;  %v11322_v30 = vld [vmem:[#allocation52_spill] sm:$0xff]  ;;  %v11330_v31 = vld [vmem:[#allocation98_spill] sm:$0xff] }
 0x4bf   : > { %v4887_v51 = vmul.f32 %v9656_v43, %v4871_v36  ;;  %v4930_v23 = vsel %vm2093_vm1, %v4900_v22, %v4929_v10  ;;  %v4904_v41 = vadd.f32 %v4889_v12, %v4886_v26  ;;  %v4924_v61 = vsel %vm2095_vm2, %v4893_v5, %v4923_v37  ;;  %v11323_v5 = vld [vmem:[#allocation57_spill] sm:$0xff] }
 0x4c0   : > { %v4931_v1 = vsel %vm2095_vm2, %v4901_v45, %v4930_v23  ;;  %v11318_v4 = vrot.slane %v11317_v2, 4  ;;  %v4925_v13 = vsel %vm2097_vm3, %v4894_v60, %v4924_v61  ;;  %v11320_v39 = vrot.slane %v11319_v44, 2 }
 0x4c1   : > { %v4905_v38 = vadd.f32 %v4889_v12, %v4887_v51  ;;  %v4932_v52 = vsel %vm2097_vm3, %v4902_v3, %v4931_v1  ;;  %v4926_v16 = vsel %vm2099_vm4, %v4895_v62, %v4925_v13  ;;  %v5087_v28 = vadd.f32 %v5086_v53, %v11316_v0 }
 0x4c2   : > { %v5092_v8 = vadd.f32 %v11318_v4, %v11317_v2  ;;  %v5080_v47 = vadd.f32 %v11320_v39, %v11319_v44  ;;  %v4933_v56 = vsel %vm2099_vm4, %v4903_v19, %v4932_v52  ;;  %v5130_v12 = vrot.slane %v9706_v21, 1  ;;  %v11332_v52 = vld [vmem:[#allocation92_spill] sm:$0xff] }
 0x4c3   : > { %v5154_v57 = vmul.f32 %v11322_v30, %v11321_v24  ;;  %v4927_v49 = vsel %vm2101_vm5, %v4896_v17, %v4926_v16  ;;  %v4934_v14 = vsel %vm2101_vm5, %v4904_v41, %v4933_v56  ;;  %v5136_v48 = vadd.f32 %v5135_v46, %v9194_v55 }
 0x4c4   : > { %v5093_v50 = vrot.slane %v5092_v8, 2  ;;  %v4928_v63 = vsel %vm2103_vm6, %v4897_v15, %v4927_v49  ;;  %v4935_v27 = vsel %vm2103_vm6, %v4905_v38, %v4934_v14  ;;  %v11324_v60 = vrot.slane %v11323_v5, 1  ;;  %v11328_v15 = vld [vmem:[#allocation96_spill] sm:$0xff] }
 0x4c5   : > { %v5124_v62 = vadd.f32 %v5123_v40, %v11311_v20  ;;  %4938 = vst [vmem:[%s9339_s16 + $0x60] sm:$0xff] %v4928_v63  ;;  %4939 = vst [vmem:[%s9339_s16 + $0x68] sm:$0xff] %v4935_v27  ;;  %v5142_v42 = vrot.slane %v11325_v33, 2  ;;  %v11327_v7 = vrot.slane %v11326_v11, 4  ;;  %v11329_v22 = vrot.slane %v11328_v15, 1 }
 0x4c6   : > { %v5094_v26 = vadd.f32 %v5093_v50, %v5092_v8  ;;  %v5117_v36 = vadd.f32 %v11324_v60, %v11323_v5  ;;  %v5081_v55 = vrot.slane %v5080_v47, 1  ;;  %v5088_v46 = vrot.slane %v5087_v28, 1  ;;  %v11334_v50 = vld [vmem:[#allocation108_spill] sm:$0xff] }
 0x4c7   : > { %v5148_v17 = vadd.f32 %v11327_v7, %v11326_v11  ;;  %v5075_v45 = vadd.f32 %v11329_v22, %v11328_v15  ;;  %v5137_v51 = vrot.slane %v5136_v48, 1  ;;  %v5131_v3 = vadd.f32 %v5130_v12, %v9706_v21  ;;  %v11331_v21 = vld [vmem:[#allocation42_spill] sm:$0xff] }
 0x4c8   : > { %v5143_v20 = vadd.f32 %v5142_v42, %v11325_v33  ;;  %v5155_v10 = vmul.f32 %v9589_v35, %v11330_v31  ;;  %v5095_v19 = vrot.slane %v5094_v26, 1  ;;  %v5163_v23 = vmul.f32 %v9628_v54, %v5117_v36 }
 0x4c9   : > { %v5149_v40 = vrot.slane %v5148_v17, 2  ;;  %v5138_v37 = vadd.f32 %v5137_v51, %v5136_v48  ;;  %v5164_v0 = vmul.f32 %v9633_v58, %v5124_v62  ;;  %v5165_v61 = vmul.f32 %v9640_v9, %v5131_v3 }
 0x4ca   : > { %v5144_v53 = vrot.slane %v5143_v20, 1  ;;  %v5170_v1 = vstv %s9789_s19  ;;  %v5082_v2 = vadd.f32 %v5081_v55, %v5080_v47  ;;  %v5089_v4 = vadd.f32 %v5088_v46, %v5087_v28  ;;  %v11333_v28 = vld [vmem:[#allocation90_spill] sm:$0xff] }
 0x4cb   : > { %v5150_v41 = vadd.f32 %v5149_v40, %v5148_v17  ;;  %v5156_v8 = vmul.f32 %v9593_v29, %v11331_v21  ;;  %v5166_v38 = vmul.f32 %v9646_v59, %v5138_v37  ;;  %v5171_v44 = vadd.f32 %v5170_v1, %v11332_v52 }
 0x4cc   : > { %v5145_v13 = vadd.f32 %v5144_v53, %v5143_v20  ;;  %v5172_v39 = vadd.f32 %v5170_v1, %v5154_v57  ;;  %v5096_v54 = vadd.f32 %v5095_v19, %v5094_v26  ;;  %v5157_v58 = vmul.f32 %v9605_v6, %v5075_v45 }
 0x4cd   : > { %v5151_v35 = vrot.slane %v5150_v41, 1  ;;  %v5158_v16 = vmul.f32 %v9611_v25, %v5082_v2  ;;  %v5173_v9 = vadd.f32 %v5170_v1, %v5155_v10  ;;  %v5179_v29 = vadd.f32 %v5170_v1, %v11333_v28 }
 0x4ce   : > { %v5167_v47 = vmul.f32 %v9651_v18, %v5145_v13  ;;  %v5180_v59 = vadd.f32 %v5170_v1, %v11334_v50  ;;  %v5159_v12 = vmul.f32 %v9615_v34, %v5089_v4  ;;  %v5160_v24 = vmul.f32 %v9623_v32, %v5096_v54 }
 0x4cf   : > { %v5152_v56 = vadd.f32 %v5151_v35, %v5150_v41  ;;  %v5174_v30 = vadd.f32 %v5170_v1, %v5156_v8  ;;  %v5181_v57 = vadd.f32 %v5170_v1, %v5163_v23  ;;  %v5182_v6 = vadd.f32 %v5170_v1, %v5164_v0 }
 0x4d0   : > { %v5203_v25 = vsel %vm2091_vm0, %v5172_v39, %v5171_v44  ;;  %v5210_v14 = vsel %vm2091_vm0, %v5180_v59, %v5179_v29  ;;  %v5175_v18 = vadd.f32 %v5170_v1, %v5157_v58  ;;  %v5183_v63 = vadd.f32 %v5170_v1, %v5165_v61 }
 0x4d1   : > { %v5168_v49 = vmul.f32 %v9656_v43, %v5152_v56  ;;  %v5204_v27 = vsel %vm2093_vm1, %v5173_v9, %v5203_v25  ;;  %v5211_v26 = vsel %vm2093_vm1, %v5181_v57, %v5210_v14  ;;  %v5176_v34 = vadd.f32 %v5170_v1, %v5158_v16 }
 0x4d2   : > { %v5184_v48 = vadd.f32 %v5170_v1, %v5166_v38  ;;  %v5205_v32 = vsel %vm2095_vm2, %v5174_v30, %v5204_v27  ;;  %v5212_v43 = vsel %vm2095_vm2, %v5182_v6, %v5211_v26  ;;  %v5177_v5 = vadd.f32 %v5170_v1, %v5159_v12 }
 0x4d3   : > { %v5185_v60 = vadd.f32 %v5170_v1, %v5167_v47  ;;  %v5206_v36 = vsel %vm2097_vm3, %v5175_v18, %v5205_v32  ;;  %v5213_v62 = vsel %vm2097_vm3, %v5183_v63, %v5212_v43  ;;  %v5178_v33 = vadd.f32 %v5170_v1, %v5160_v24 }
 0x4d4   : > { %v5186_v42 = vadd.f32 %v5170_v1, %v5168_v49  ;;  %v5207_v11 = vsel %vm2099_vm4, %v5176_v34, %v5206_v36  ;;  %v5214_v7 = vsel %vm2099_vm4, %v5184_v48, %v5213_v62 }
 0x4d5   : > { %v5208_v17 = vsel %vm2101_vm5, %v5177_v5, %v5207_v11  ;;  %v5215_v15 = vsel %vm2101_vm5, %v5185_v60, %v5214_v7 }
 0x4d6   : > { %v5209_v22 = vsel %vm2103_vm6, %v5178_v33, %v5208_v17  ;;  %v5216_v45 = vsel %vm2103_vm6, %v5186_v42, %v5215_v15 }
 0x4d7   : > { %5219 = vst [vmem:[%s9339_s16 + $0x70] sm:$0xff] %v5209_v22  ;;  %5220 = vst [vmem:[%s9339_s16 + $0x78] sm:$0xff] %v5216_v45 }
 0x4d8   : > { %6091 = shalt.err (!%p6088_p6)
}
 0x4d9   : > { %s6092_s16 = scalar_lea.hbm %s9850_s25, 2048  ;;  %s6096_s24 = scalar_lea.hbm %s9911_s8, 4096 }
 0x4da   : > { %p6093_p10 = scmp.ne.s32.totalorder %s9850_s25, %s6092_s16  ;;  %p6097_p11 = scmp.lt.s32.totalorder %s9850_s25, %s9911_s8 }
 0x4db   : > { %p6098_p13 = scmp.lt.s32.totalorder %s6096_s24, %s6092_s16 }
 0x4dc   : > { %p6094_p9 = pnand %p6093_p10, %p11335_p8 }
 0x4dd   : > { %p6099_p0 = por %p6098_p13, %p6097_p11 }
 0x4de   : > { %p6095_p7 = pneg %p6094_p9 }
 0x4e0   : > { %p6100_p2 = pnand %p6099_p0, %p6095_p7 }
 0x4e2   : > { %6103 = shalt.err (!%p6100_p2)
}
 0x4e3   : > { %s6173_s11 = smov 128   ;;  %s6174_s13 = smov 256  }
 0x4e4   : > { %s6175_s18 = smov 8  }
 0x4e5   : > { %5615 = dma.vmem_to_hbm [thread:$0]  (%p11335_p8), %s9854_s21, 2048, %s9850_s25, %s5222_s9, %s6173_s11, %s6174_s13, %s6175_s18  }
 0x4e6 PF: > { %s5249_s2 = sand.u32 1, %s6146_s27   ;;  %p11336_p4 = scmp.ne.s32.totalorder %s10251_s14, 0 }
 0x4e7   : > { %p11337_p12 = scmp.ge.s32.totalorder %s6158_s30, 2  ;;  %s5250_s17 = scalar_lea.sflag [#allocation4], %s5249_s2 }
 0x4e9   : > { %p5644_p1 = pnand %p11337_p12, %p11336_p4 }
 0x4eb   : > { %p5645_p3 = pneg %p5644_p1 }
 0x4ed   : > { %6141 = dma.done.wait (%p5645_p3), %s5250_s17, 2048  }
 0x4ee   : > { %6143 = vsyncadd (%p5645_p3), %s5250_s17, 4294965248  ;;  %p25_p5 = scmp.ge.s32.totalorder %s6336_s26, 4   ;;  %s11338_s27 = smov %s6150_s28 }
 0x4ef   : > { %s11339_s28 = smov %s6154_s29  ;;  %s11340_s29 = smov %s6348_s10 }
 0x4f0   : > { %s11341_s30 = smov %s6336_s26  ;;  %27 = sbr.rel (!%p25_p5) target bundleno = 12 (0xc), region = 139 }
 0x4f5   :  { %5255 = vsyncpa [#allocation3], 1 }
 0x4f6   :  { %5257 = vsyncpa [#allocation3 + $0x1], 1 }
 0x4f7   :  { %5258 = vsyncpa [#allocation7], 1 }
 0x4f8   :  { %5259 = vsyncpa [#allocation10], 1 }
 0x4f9   :  { %5260 = vsyncpa [#allocation4], 1 }
 0x4fa   :  { %5262 = vsyncpa [#allocation4 + $0x1], 1 }
 0x4fb   :  { %5263 = vsyncpa [#allocation5], 1 }
 0x4fc   :  { %5265 = vsyncpa [#allocation5 + $0x1], 1 }
 0x4fd   :  { %5266 = vsyncpa [#allocation14], 1 }

</bundles_post_ra>
